<compile_context>
chip_gen: v5e
topology: v5e:2x2
jax: 0.10.0
libtpu: 0.0.40
codegen_flags: <defaults>
</compile_context>

<pallas_src>
import math
import functools

import jax
import jax.numpy as jnp
from jax.experimental import pallas as pl
from jax.experimental.pallas import tpu as pltpu

NEG = -1e30  # additive mask value (exp underflows to 0 exactly like -inf, but NaN-safe)

_STEP_KEYS = ("gold", "mem", "pe_b", "tkey", "ekey")
_CONST_KEYS = ("qbid", "t_stack", "t_stack_t", "head_mask", "shiftm", "sel_first", "rep")
_WEIGHT_KEYS = ("in_wg", "in_wh", "in_b",
                "sa_wq", "sa_wk", "sa_wv", "sa_bq", "sa_bk", "sa_bv", "sa_wo", "sa_bo",
                "ca_wq", "ca_wk", "ca_wv", "ca_bq", "ca_bk", "ca_bv", "ca_wo", "ca_bo",
                "ln_g", "ln_b", "ff_w1", "ff_b1", "ff_w2", "ff_b2",
                "mlp_w1", "mlp_b1", "mlp_w2", "mlp_b2")


# ------------------------------------------------------------------ fused Pallas kernel

def _fused_forward_kernel(*refs, num_layers, nhead):
    f32 = jnp.float32
    names = _STEP_KEYS + _CONST_KEYS + _WEIGHT_KEYS
    n = len(names)
    r = dict(zip(names, refs[:n]))
    logits_ref, ids_ref = refs[n], refs[n + 1]

    gold = r["gold"][0]        # (Ms, Ed)   gold label embeddings (un-shifted) of this step
    mem = r["mem"][0]          # (Bs*Se, D) encoder memory rows of this step
    pe_b = r["pe_b"][0]        # (Bs, D)    positional-encoding rows (quirky pe[:B] broadcast)
    tkey = r["tkey"][0]        # (1, Ms)    target-key batch id where valid else -1
    ekey = r["ekey"][0]        # (1, BsSe)  encoder-key batch id where valid else -1
    qbid = r["qbid"][...]      # (Ms, 1)    query-row batch id
    T = r["t_stack"][...]      # (H*Ms, Ms) head-stacking matrix (constant)
    Tt = r["t_stack_t"][...]   # (Ms, H*Ms) its transpose (constant)
    hm = r["head_mask"][...]   # (H*Ms, D)  0/1 mask selecting head h's columns on row block h

    Ms = gold.shape[0]
    D = r["in_wg"].shape[1]
    C = r["mlp_w2"].shape[1]
    scale = 1.0 / math.sqrt(D // nhead)

    # ---- additive attention masks, built once and head-stacked via a single MXU matmul each
    row = jax.lax.broadcasted_iota(jnp.int32, (Ms, Ms), 0)
    col = jax.lax.broadcasted_iota(jnp.int32, (Ms, Ms), 1)
    self_ok = (tkey == qbid) & (col <= row)       # same batch & valid key & causal
    self_mask = jnp.dot(T, jnp.where(self_ok, 0.0, NEG), preferred_element_type=f32)   # (H*Ms, Ms)
    cross_mask = jnp.dot(T, jnp.where(ekey == qbid, 0.0, NEG), preferred_element_type=f32)  # (H*Ms, BsSe)

    def layer_norm(y, g, b):  # PyTorch LayerNorm: biased variance, eps=1e-5; one fused reduction
        both = jnp.concatenate([y, y * y], axis=0)                    # (2*Ms, D)
        s = jnp.sum(both, axis=-1, keepdims=True) * (1.0 / D)         # one cross-lane reduce
        mu = s[:Ms]
        var = s[Ms:] - mu * mu
        return (y - mu) * jax.lax.rsqrt(var + 1e-5) * g + b

    def mha(q, k, v, add_mask):
        # stack heads on the sublane axis: row h*Ms+i holds query i restricted to head h's columns
        qs = jnp.dot(T, q, preferred_element_type=f32) * hm           # (H*Ms, D)
        s = jax.lax.dot_general(qs, k, (((1,), (1,)), ((), ())),
                                preferred_element_type=f32)           # (H*Ms, Sk)
        s = s * scale + add_mask
        s = s - jnp.max(s, axis=-1, keepdims=True)                    # single softmax for all heads
        p = jnp.exp(s)
        p = p * pl.reciprocal(jnp.sum(p, axis=-1, keepdims=True), approx=True)
        om = jnp.dot(p, v, preferred_element_type=f32) * hm           # (H*Ms, D), head h's cols only
        return jnp.dot(Tt, om, preferred_element_type=f32)            # (Ms, D) == per-head concat

    # ---- teacher-forcing input rows + input projection + positional-encoding quirk (all in-kernel)
    g_proj = jnp.dot(gold, r["in_wg"][...], preferred_element_type=f32)       # (Ms, D)
    g_shift = jnp.dot(r["shiftm"][...], g_proj, preferred_element_type=f32)   # shift right, zero row 0/batch
    h_first = jnp.dot(r["sel_first"][...], mem, preferred_element_type=f32)   # (Bs, D) first encoder state
    base_b = jnp.dot(h_first, r["in_wh"][...], preferred_element_type=f32) + r["in_b"][...] + pe_b
    x = g_shift + jnp.dot(r["rep"][...], base_b, preferred_element_type=f32)  # broadcast to all rows

    # ---- nn.TransformerDecoder: post-norm layers, ReLU FFN, dropout = identity
    for l in range(num_layers):
        lg = r["ln_g"][l]   # (3, D)
        lb = r["ln_b"][l]   # (3, D)

        # self attention (separate q/k/v weights -> no lane-offset unpacking)
        q = jnp.dot(x, r["sa_wq"][l], preferred_element_type=f32) + r["sa_bq"][l]
        k = jnp.dot(x, r["sa_wk"][l], preferred_element_type=f32) + r["sa_bk"][l]
        v = jnp.dot(x, r["sa_wv"][l], preferred_element_type=f32) + r["sa_bv"][l]
        sa = mha(q, k, v, self_mask)
        sa = jnp.dot(sa, r["sa_wo"][l], preferred_element_type=f32) + r["sa_bo"][l]
        x = layer_norm(x + sa, lg[0:1, :], lb[0:1, :])

        # cross attention over the encoder memory
        q = jnp.dot(x, r["ca_wq"][l], preferred_element_type=f32) + r["ca_bq"][l]
        k = jnp.dot(mem, r["ca_wk"][l], preferred_element_type=f32) + r["ca_bk"][l]
        v = jnp.dot(mem, r["ca_wv"][l], preferred_element_type=f32) + r["ca_bv"][l]
        ca = mha(q, k, v, cross_mask)
        ca = jnp.dot(ca, r["ca_wo"][l], preferred_element_type=f32) + r["ca_bo"][l]
        x = layer_norm(x + ca, lg[1:2, :], lb[1:2, :])

        # feed-forward; the (Ms, dim_feedforward) intermediate never leaves VMEM
        hid = jnp.maximum(jnp.dot(x, r["ff_w1"][l], preferred_element_type=f32) + r["ff_b1"][l], 0.0)
        ff = jnp.dot(hid, r["ff_w2"][l], preferred_element_type=f32) + r["ff_b2"][l]
        x = layer_norm(x + ff, lg[2:3, :], lb[2:3, :])

    # ---- output MLP head (Linear -> ReLU -> (Dropout=identity) -> Linear) + fused argmax
    hid = jnp.maximum(jnp.dot(x, r["mlp_w1"][...], preferred_element_type=f32) + r["mlp_b1"][...], 0.0)
    logits = jnp.dot(hid, r["mlp_w2"][...], preferred_element_type=f32) + r["mlp_b2"][...]   # (Ms, C)
    logits_ref[0] = logits
    cidx = jax.lax.broadcasted_iota(jnp.int32, (Ms, C), 1).astype(f32)
    mx = jnp.max(logits, axis=-1, keepdims=True)
    am = jnp.min(jnp.where(logits == mx, cidx, float(C)), axis=-1, keepdims=True)  # first-max index
    ids_ref[0] = am.astype(jnp.int32)


# ------------------------------------------------------------------ forward wrapper

def seq2seq_decoder_forward(params, encoded_hidden_embeddings, hidden, cell,
                            text_lengths, encoder_mask, gold_label_ids,
                            gold_label_embeddings, seq_label_mask,
                            *, nhead, output_size, grid_blocks=1):
    """Training (teacher-forcing) branch of Seq2SeqTransformerDecoder2.forward.
    hidden / cell / text_lengths are accepted for signature parity but unused (as in the reference).
    grid_blocks=1 is best on single-TensorCore chips (v5e/v6e); use 2 on v7x to engage both cores."""
    del hidden, cell, text_lengths
    f32 = jnp.float32
    B, Se, He = encoded_hidden_embeddings.shape
    Sd = gold_label_ids.shape[1]
    Ed = gold_label_embeddings.shape[-1]
    L = params["sa_wq"].shape[0]
    D = params["in_wg"].shape[1]
    C = params["mlp_w2"].shape[1]
    F = params["ff_w1"].shape[2]
    G = grid_blocks
    assert B % G == 0, "grid_blocks must divide the batch size"
    assert C == output_size
    Bs = B // G
    Ms = Bs * Sd
    BsSe = Bs * Se
    Dh = D // nhead
    HMs = nhead * Ms

    # ---- per-grid-step inputs (reshapes only; shift/broadcast/concat happen inside the kernel)
    bid = jnp.arange(Bs, dtype=f32)
    step = {
        "gold": gold_label_embeddings.astype(f32).reshape(G, Ms, Ed),
        "mem": encoded_hidden_embeddings.astype(f32).reshape(G, BsSe, He),
        # reference quirk: PositionalEncoding applied batch-first -> pe[:B] broadcasts along Sd
        "pe_b": params["pe"][:B].reshape(G, Bs, D),
        "tkey": jnp.where(seq_label_mask.reshape(G, Bs, Sd), bid[None, :, None], -1.0).reshape(G, 1, Ms),
        "ekey": jnp.where(encoder_mask.reshape(G, Bs, Se), bid[None, :, None], -1.0).reshape(G, 1, BsSe),
    }

    # ---- compile-time-constant helper matrices (constant-folded by XLA under jit)
    rr = jnp.arange(Ms)
    hh = jnp.arange(HMs)
    consts = {
        "qbid": (rr // Sd).astype(f32)[:, None],                                          # (Ms, 1)
        "t_stack": (rr[None, :] == (hh % Ms)[:, None]).astype(f32),                       # (H*Ms, Ms)
        "head_mask": ((jnp.arange(D)[None, :] // Dh) == (hh // Ms)[:, None]).astype(f32), # (H*Ms, D)
        "shiftm": ((rr[None, :] == rr[:, None] - 1) & ((rr % Sd) != 0)[:, None]).astype(f32),
        "sel_first": (jnp.arange(BsSe)[None, :] == (jnp.arange(Bs) * Se)[:, None]).astype(f32),
        "rep": (jnp.arange(Bs)[None, :] == (rr // Sd)[:, None]).astype(f32),              # (Ms, Bs)
    }
    consts["t_stack_t"] = consts["t_stack"].T

    def step_spec(a):
        nd = a.ndim
        return pl.BlockSpec((1,) + a.shape[1:], lambda g, _n=nd: (g,) + (0,) * (_n - 1))

    def const_spec(a):
        nd = a.ndim
        return pl.BlockSpec(a.shape, lambda g, _n=nd: (0,) * _n)

    operands = ([step[k] for k in _STEP_KEYS]
                + [consts[k] for k in _CONST_KEYS]
                + [params[k] for k in _WEIGHT_KEYS])
    in_specs = ([step_spec(step[k]) for k in _STEP_KEYS]
                + [const_spec(consts[k]) for k in _CONST_KEYS]
                + [const_spec(params[k]) for k in _WEIGHT_KEYS])

    # advisory cost hint so XLA schedules the tiny surrounding reshape/slice ops around the call
    flops = G * (2 * Ms * (Ed + He) * D
                 + L * (8 * Ms * D * D + 4 * BsSe * D * D
                        + 4 * HMs * D * (Ms + BsSe) + 4 * HMs * Ms * D
                        + 4 * Ms * D * F)
                 + 2 * Ms * D * (D + C))
    transc = G * L * HMs * (Ms + BsSe)
    bytes_accessed = (sum(int(a.size) * a.dtype.itemsize for a in operands)
                      + G * Ms * (C + 1) * 4)

    kernel = functools.partial(_fused_forward_kernel, num_layers=int(L), nhead=nhead)
    logits_g, ids_g = pl.pallas_call(
        kernel,
        grid=(G,),
        in_specs=in_specs,
        out_specs=(pl.BlockSpec((1, Ms, C), lambda g: (g, 0, 0)),
                   pl.BlockSpec((1, Ms, 1), lambda g: (g, 0, 0))),
        out_shape=(jax.ShapeDtypeStruct((G, Ms, C), f32),
                   jax.ShapeDtypeStruct((G, Ms, 1), jnp.int32)),
        compiler_params=pltpu.CompilerParams(dimension_semantics=("parallel",)),
        cost_estimate=pl.CostEstimate(flops=int(flops), transcendentals=int(transc),
                                      bytes_accessed=int(bytes_accessed)),
    )(*operands)

    logits = logits_g.reshape(B, Sd, C)
    next_input_ids = ids_g.reshape(B, Sd)
    return logits, next_input_ids


# ------------------------------------------------------------------ deterministic parameters

def make_positional_encoding(max_len, d_model):
    position = jnp.arange(max_len, dtype=jnp.float32)[:, None]
    div_term = jnp.exp(jnp.arange(0, d_model, 2, dtype=jnp.float32) * (-math.log(10000.0) / d_model))
    pe = jnp.zeros((max_len, d_model), jnp.float32)
    pe = pe.at[:, 0::2].set(jnp.sin(position * div_term))
    pe = pe.at[:, 1::2].set(jnp.cos(position * div_term))
    return pe  # (max_len, d_model)


def init_params(key, *, label_embedding_dim, encoder_hidden_dim, decoder_hidden_size,
                output_size, nhead=8, num_layers=2, dim_feedforward=2048, max_len=64):
    assert encoder_hidden_dim == decoder_hidden_size, \
        "the module's MLP requires decoder d_model == decoder_hidden_size"
    D = encoder_hidden_dim
    F = dim_feedforward
    L = num_layers
    keys = iter(jax.random.split(key, 1024))

    def w(shape, scale=0.05):
        return (scale * jax.random.normal(next(keys), shape)).astype(jnp.float32)

    def stack(shape, scale=0.05):
        return jnp.stack([w(shape, scale) for _ in range(L)], axis=0)

    params = dict(
        pe=make_positional_encoding(max_len, D),
        # input projection, split by input block (label part | repeated-hidden part)
        in_wg=w((label_embedding_dim, D)),
        in_wh=w((encoder_hidden_dim, D)),
        in_b=w((1, D), 0.02),
        # self-attention: separate q/k/v projections + out-projection (per layer, stacked on dim 0)
        sa_wq=stack((D, D)), sa_wk=stack((D, D)), sa_wv=stack((D, D)),
        sa_bq=stack((1, D), 0.02), sa_bk=stack((1, D), 0.02), sa_bv=stack((1, D), 0.02),
        sa_wo=stack((D, D)), sa_bo=stack((1, D), 0.02),
        # cross-attention
        ca_wq=stack((D, D)), ca_wk=stack((D, D)), ca_wv=stack((D, D)),
        ca_bq=stack((1, D), 0.02), ca_bk=stack((1, D), 0.02), ca_bv=stack((1, D), 0.02),
        ca_wo=stack((D, D)), ca_bo=stack((1, D), 0.02),
        # three LayerNorms per layer, stacked as (L, 3, D)
        ln_g=jnp.ones((L, 3, D), jnp.float32), ln_b=jnp.zeros((L, 3, D), jnp.float32),
        # feed-forward
        ff_w1=stack((D, F)), ff_b1=stack((1, F), 0.02),
        ff_w2=stack((F, D)), ff_b2=stack((1, D), 0.02),
        # output MLP head
        mlp_w1=w((decoder_hidden_size, decoder_hidden_size)),
        mlp_b1=w((1, decoder_hidden_size), 0.02),
        mlp_w2=w((decoder_hidden_size, output_size)),
        mlp_b2=w((1, output_size), 0.02),
    )
    return params


# ------------------------------------------------------------------ main

if __name__ == "__main__":
    B, Se, Sd = 2, 16, 8
    He = 32            # encoder_hidden_dim == decoder_hidden_size (required by the module's MLP)
    Ed = 16            # label_embedding_dim
    C = 10             # output_size
    nhead = 8          # nn.TransformerDecoderLayer(d_model=He, nhead=8)

    key = jax.random.PRNGKey(0)
    kp, k1, k2, k3, k4, k5 = jax.random.split(key, 6)

    params = init_params(kp, label_embedding_dim=Ed, encoder_hidden_dim=He,
                         decoder_hidden_size=He, output_size=C, nhead=nhead)

    encoded_hidden_embeddings = jax.random.normal(k1, (B, Se, He), jnp.float32)  # (B, Se, He)
    hidden = jax.random.normal(k2, (2, B, He), jnp.float32)                      # unused by forward
    cell = jax.random.normal(k3, (2, B, He), jnp.float32)                        # unused by forward
    text_lengths = jnp.array([Se, Se - 4], jnp.int32)
    encoder_mask = jnp.arange(Se)[None, :] < text_lengths[:, None]               # (B, Se) bool
    gold_label_ids = jax.random.randint(k4, (B, Sd, 1), 0, C)                    # (B, Sd, 1)
    gold_label_embeddings = jax.random.normal(k5, (B, Sd, Ed), jnp.float32)      # (B, Sd, Ed)
    seq_label_mask = jnp.arange(Sd)[None, :] < jnp.array([Sd, Sd - 2])[:, None]  # (B, Sd) bool

    # TODO(synk): only the training (teacher-forcing) branch is implemented; the eval-time greedy
    # decode loop depends on an external AllenNLP label_field_embedder / Vocabulary and is out of scope.
    fwd = jax.jit(functools.partial(seq2seq_decoder_forward, nhead=nhead, output_size=C,
                                    grid_blocks=1))
    logits, next_ids = fwd(params, encoded_hidden_embeddings, hidden, cell, text_lengths,
                           encoder_mask, gold_label_ids, gold_label_embeddings, seq_label_mask)

    jax.block_until_ready((logits, next_ids))
    assert logits.shape == (B, Sd, C) and logits.dtype == jnp.float32
    assert next_ids.shape == (B, Sd) and next_ids.dtype == jnp.int32
    print("KERNEL_OK")
</pallas_src>

<mosaic_0001>
module attributes {stable_mosaic.version = 11 : i64} {
  func.func @_fused_forward_kernel(%arg0: i32, %arg1: memref<1x16x16xf32, #tpu.memory_space<vmem>>, %arg2: memref<1x32x32xf32, #tpu.memory_space<vmem>>, %arg3: memref<1x2x32xf32, #tpu.memory_space<vmem>>, %arg4: memref<1x1x16xf32, #tpu.memory_space<vmem>>, %arg5: memref<1x1x32xf32, #tpu.memory_space<vmem>>, %arg6: memref<16x1xf32, #tpu.memory_space<vmem>>, %arg7: memref<128x16xf32, #tpu.memory_space<vmem>>, %arg8: memref<16x128xf32, #tpu.memory_space<vmem>>, %arg9: memref<128x32xf32, #tpu.memory_space<vmem>>, %arg10: memref<16x16xf32, #tpu.memory_space<vmem>>, %arg11: memref<2x32xf32, #tpu.memory_space<vmem>>, %arg12: memref<16x2xf32, #tpu.memory_space<vmem>>, %arg13: memref<16x32xf32, #tpu.memory_space<vmem>>, %arg14: memref<32x32xf32, #tpu.memory_space<vmem>>, %arg15: memref<1x32xf32, #tpu.memory_space<vmem>>, %arg16: memref<2x32x32xf32, #tpu.memory_space<vmem>>, %arg17: memref<2x32x32xf32, #tpu.memory_space<vmem>>, %arg18: memref<2x32x32xf32, #tpu.memory_space<vmem>>, %arg19: memref<2x1x32xf32, #tpu.memory_space<vmem>>, %arg20: memref<2x1x32xf32, #tpu.memory_space<vmem>>, %arg21: memref<2x1x32xf32, #tpu.memory_space<vmem>>, %arg22: memref<2x32x32xf32, #tpu.memory_space<vmem>>, %arg23: memref<2x1x32xf32, #tpu.memory_space<vmem>>, %arg24: memref<2x32x32xf32, #tpu.memory_space<vmem>>, %arg25: memref<2x32x32xf32, #tpu.memory_space<vmem>>, %arg26: memref<2x32x32xf32, #tpu.memory_space<vmem>>, %arg27: memref<2x1x32xf32, #tpu.memory_space<vmem>>, %arg28: memref<2x1x32xf32, #tpu.memory_space<vmem>>, %arg29: memref<2x1x32xf32, #tpu.memory_space<vmem>>, %arg30: memref<2x32x32xf32, #tpu.memory_space<vmem>>, %arg31: memref<2x1x32xf32, #tpu.memory_space<vmem>>, %arg32: memref<2x3x32xf32, #tpu.memory_space<vmem>>, %arg33: memref<2x3x32xf32, #tpu.memory_space<vmem>>, %arg34: memref<2x32x2048xf32, #tpu.memory_space<vmem>>, %arg35: memref<2x1x2048xf32, #tpu.memory_space<vmem>>, %arg36: memref<2x2048x32xf32, #tpu.memory_space<vmem>>, %arg37: memref<2x1x32xf32, #tpu.memory_space<vmem>>, %arg38: memref<32x32xf32, #tpu.memory_space<vmem>>, %arg39: memref<1x32xf32, #tpu.memory_space<vmem>>, %arg40: memref<32x10xf32, #tpu.memory_space<vmem>>, %arg41: memref<1x10xf32, #tpu.memory_space<vmem>>, %arg42: memref<1x16x10xf32, #tpu.memory_space<vmem>>, %arg43: memref<1x16x1xi32, #tpu.memory_space<vmem>>) attributes {dimension_semantics = [#tpu.dimension_semantics<parallel>], iteration_bounds = array<i64: 1>, scalar_prefetch = 0 : i64, scratch_operands = 0 : i64, tpu.core_type = #tpu.core_type<tc>, window_params = [{transform_indices = @transform_0, window_bounds = array<i64: 1, 16, 16>}, {transform_indices = @transform_1, window_bounds = array<i64: 1, 32, 32>}, {transform_indices = @transform_2, window_bounds = array<i64: 1, 2, 32>}, {transform_indices = @transform_3, window_bounds = array<i64: 1, 1, 16>}, {transform_indices = @transform_4, window_bounds = array<i64: 1, 1, 32>}, {pipeline_mode = #tpu.pipeline_mode<synchronous>, transform_indices = @transform_5, window_bounds = array<i64: 16, 1>}, {pipeline_mode = #tpu.pipeline_mode<synchronous>, transform_indices = @transform_6, window_bounds = array<i64: 128, 16>}, {pipeline_mode = #tpu.pipeline_mode<synchronous>, transform_indices = @transform_7, window_bounds = array<i64: 16, 128>}, {pipeline_mode = #tpu.pipeline_mode<synchronous>, transform_indices = @transform_8, window_bounds = array<i64: 128, 32>}, {pipeline_mode = #tpu.pipeline_mode<synchronous>, transform_indices = @transform_9, window_bounds = array<i64: 16, 16>}, {pipeline_mode = #tpu.pipeline_mode<synchronous>, transform_indices = @transform_10, window_bounds = array<i64: 2, 32>}, {pipeline_mode = #tpu.pipeline_mode<synchronous>, transform_indices = @transform_11, window_bounds = array<i64: 16, 2>}, {pipeline_mode = #tpu.pipeline_mode<synchronous>, transform_indices = @transform_12, window_bounds = array<i64: 16, 32>}, {pipeline_mode = #tpu.pipeline_mode<synchronous>, transform_indices = @transform_13, window_bounds = array<i64: 32, 32>}, {pipeline_mode = #tpu.pipeline_mode<synchronous>, transform_indices = @transform_14, window_bounds = array<i64: 1, 32>}, {pipeline_mode = #tpu.pipeline_mode<synchronous>, transform_indices = @transform_15, window_bounds = array<i64: 2, 32, 32>}, {pipeline_mode = #tpu.pipeline_mode<synchronous>, transform_indices = @transform_16, window_bounds = array<i64: 2, 32, 32>}, {pipeline_mode = #tpu.pipeline_mode<synchronous>, transform_indices = @transform_17, window_bounds = array<i64: 2, 32, 32>}, {pipeline_mode = #tpu.pipeline_mode<synchronous>, transform_indices = @transform_18, window_bounds = array<i64: 2, 1, 32>}, {pipeline_mode = #tpu.pipeline_mode<synchronous>, transform_indices = @transform_19, window_bounds = array<i64: 2, 1, 32>}, {pipeline_mode = #tpu.pipeline_mode<synchronous>, transform_indices = @transform_20, window_bounds = array<i64: 2, 1, 32>}, {pipeline_mode = #tpu.pipeline_mode<synchronous>, transform_indices = @transform_21, window_bounds = array<i64: 2, 32, 32>}, {pipeline_mode = #tpu.pipeline_mode<synchronous>, transform_indices = @transform_22, window_bounds = array<i64: 2, 1, 32>}, {pipeline_mode = #tpu.pipeline_mode<synchronous>, transform_indices = @transform_23, window_bounds = array<i64: 2, 32, 32>}, {pipeline_mode = #tpu.pipeline_mode<synchronous>, transform_indices = @transform_24, window_bounds = array<i64: 2, 32, 32>}, {pipeline_mode = #tpu.pipeline_mode<synchronous>, transform_indices = @transform_25, window_bounds = array<i64: 2, 32, 32>}, {pipeline_mode = #tpu.pipeline_mode<synchronous>, transform_indices = @transform_26, window_bounds = array<i64: 2, 1, 32>}, {pipeline_mode = #tpu.pipeline_mode<synchronous>, transform_indices = @transform_27, window_bounds = array<i64: 2, 1, 32>}, {pipeline_mode = #tpu.pipeline_mode<synchronous>, transform_indices = @transform_28, window_bounds = array<i64: 2, 1, 32>}, {pipeline_mode = #tpu.pipeline_mode<synchronous>, transform_indices = @transform_29, window_bounds = array<i64: 2, 32, 32>}, {pipeline_mode = #tpu.pipeline_mode<synchronous>, transform_indices = @transform_30, window_bounds = array<i64: 2, 1, 32>}, {pipeline_mode = #tpu.pipeline_mode<synchronous>, transform_indices = @transform_31, window_bounds = array<i64: 2, 3, 32>}, {pipeline_mode = #tpu.pipeline_mode<synchronous>, transform_indices = @transform_32, window_bounds = array<i64: 2, 3, 32>}, {pipeline_mode = #tpu.pipeline_mode<synchronous>, transform_indices = @transform_33, window_bounds = array<i64: 2, 32, 2048>}, {pipeline_mode = #tpu.pipeline_mode<synchronous>, transform_indices = @transform_34, window_bounds = array<i64: 2, 1, 2048>}, {pipeline_mode = #tpu.pipeline_mode<synchronous>, transform_indices = @transform_35, window_bounds = array<i64: 2, 2048, 32>}, {pipeline_mode = #tpu.pipeline_mode<synchronous>, transform_indices = @transform_36, window_bounds = array<i64: 2, 1, 32>}, {pipeline_mode = #tpu.pipeline_mode<synchronous>, transform_indices = @transform_37, window_bounds = array<i64: 32, 32>}, {pipeline_mode = #tpu.pipeline_mode<synchronous>, transform_indices = @transform_38, window_bounds = array<i64: 1, 32>}, {pipeline_mode = #tpu.pipeline_mode<synchronous>, transform_indices = @transform_39, window_bounds = array<i64: 32, 10>}, {pipeline_mode = #tpu.pipeline_mode<synchronous>, transform_indices = @transform_40, window_bounds = array<i64: 1, 10>}, {transform_indices = @transform_41, window_bounds = array<i64: 1, 16, 10>}, {transform_indices = @transform_42, window_bounds = array<i64: 1, 16, 1>}]} {
    %c0 = arith.constant 0 : index
    %c0_0 = arith.constant 0 : index
    %c0_1 = arith.constant 0 : index
    %0 = vector.load %arg1[%c0, %c0_0, %c0_1] : memref<1x16x16xf32, #tpu.memory_space<vmem>>, vector<1x16x16xf32>
    %1 = vector.shape_cast %0 : vector<1x16x16xf32> to vector<16x16xf32>
    %c0_2 = arith.constant 0 : index
    %c0_3 = arith.constant 0 : index
    %c0_4 = arith.constant 0 : index
    %2 = vector.load %arg2[%c0_2, %c0_3, %c0_4] : memref<1x32x32xf32, #tpu.memory_space<vmem>>, vector<1x32x32xf32>
    %3 = vector.shape_cast %2 : vector<1x32x32xf32> to vector<32x32xf32>
    %c0_5 = arith.constant 0 : index
    %c0_6 = arith.constant 0 : index
    %c0_7 = arith.constant 0 : index
    %4 = vector.load %arg3[%c0_5, %c0_6, %c0_7] : memref<1x2x32xf32, #tpu.memory_space<vmem>>, vector<1x2x32xf32>
    %5 = vector.shape_cast %4 : vector<1x2x32xf32> to vector<2x32xf32>
    %c0_8 = arith.constant 0 : index
    %c0_9 = arith.constant 0 : index
    %c0_10 = arith.constant 0 : index
    %6 = vector.load %arg4[%c0_8, %c0_9, %c0_10] : memref<1x1x16xf32, #tpu.memory_space<vmem>>, vector<1x1x16xf32>
    %7 = vector.shape_cast %6 : vector<1x1x16xf32> to vector<1x16xf32>
    %c0_11 = arith.constant 0 : index
    %c0_12 = arith.constant 0 : index
    %c0_13 = arith.constant 0 : index
    %8 = vector.load %arg5[%c0_11, %c0_12, %c0_13] : memref<1x1x32xf32, #tpu.memory_space<vmem>>, vector<1x1x32xf32>
    %9 = vector.shape_cast %8 : vector<1x1x32xf32> to vector<1x32xf32>
    %c0_14 = arith.constant 0 : index
    %c0_15 = arith.constant 0 : index
    %10 = vector.load %arg6[%c0_14, %c0_15] : memref<16x1xf32, #tpu.memory_space<vmem>>, vector<16x1xf32>
    %c0_16 = arith.constant 0 : index
    %c0_17 = arith.constant 0 : index
    %11 = vector.load %arg7[%c0_16, %c0_17] : memref<128x16xf32, #tpu.memory_space<vmem>>, vector<128x16xf32>
    %c0_18 = arith.constant 0 : index
    %c0_19 = arith.constant 0 : index
    %12 = vector.load %arg8[%c0_18, %c0_19] : memref<16x128xf32, #tpu.memory_space<vmem>>, vector<16x128xf32>
    %c0_20 = arith.constant 0 : index
    %c0_21 = arith.constant 0 : index
    %13 = vector.load %arg9[%c0_20, %c0_21] : memref<128x32xf32, #tpu.memory_space<vmem>>, vector<128x32xf32>
    %14 = tpu.iota {dimensions = array<i32: 0>} : vector<16x16xi32>
    %15 = tpu.iota {dimensions = array<i32: 1>} : vector<16x16xi32>
    %16 = vector.broadcast %7 : vector<1x16xf32> to vector<16x16xf32>
    %17 = vector.broadcast %10 : vector<16x1xf32> to vector<16x16xf32>
    %18 = arith.cmpf oeq, %16, %17 : vector<16x16xf32>
    %19 = arith.cmpi sle, %15, %14 : vector<16x16xi32>
    %20 = arith.andi %18, %19 : vector<16x16xi1>
    %cst = arith.constant 0.000000e+00 : f32
    %cst_22 = arith.constant -1.000000e+30 : f32
    %21 = vector.broadcast %cst : f32 to vector<16x16xf32>
    %22 = vector.broadcast %cst_22 : f32 to vector<16x16xf32>
    %23 = arith.select %20, %21, %22 : vector<16x16xi1>, vector<16x16xf32>
    %cst_23 = arith.constant dense<0.000000e+00> : vector<128x16xf32>
    %24 = tpu.matmul %11, %23, %cst_23 {dimension_numbers = #tpu.dot_dimension_numbers<[1], [0], [0], [1], [0, 0, 1, 1], [], []>} : vector<128x16xf32>, vector<16x16xf32>, vector<128x16xf32> -> vector<128x16xf32>
    %25 = vector.broadcast %9 : vector<1x32xf32> to vector<16x32xf32>
    %26 = vector.broadcast %10 : vector<16x1xf32> to vector<16x32xf32>
    %27 = arith.cmpf oeq, %25, %26 : vector<16x32xf32>
    %cst_24 = arith.constant 0.000000e+00 : f32
    %cst_25 = arith.constant -1.000000e+30 : f32
    %28 = vector.broadcast %cst_24 : f32 to vector<16x32xf32>
    %29 = vector.broadcast %cst_25 : f32 to vector<16x32xf32>
    %30 = arith.select %27, %28, %29 : vector<16x32xi1>, vector<16x32xf32>
    %cst_26 = arith.constant dense<0.000000e+00> : vector<128x32xf32>
    %31 = tpu.matmul %11, %30, %cst_26 {dimension_numbers = #tpu.dot_dimension_numbers<[1], [0], [0], [1], [0, 0, 1, 1], [], []>} : vector<128x16xf32>, vector<16x32xf32>, vector<128x32xf32> -> vector<128x32xf32>
    %c0_27 = arith.constant 0 : index
    %c0_28 = arith.constant 0 : index
    %32 = vector.load %arg13[%c0_27, %c0_28] : memref<16x32xf32, #tpu.memory_space<vmem>>, vector<16x32xf32>
    %cst_29 = arith.constant dense<0.000000e+00> : vector<16x32xf32>
    %33 = tpu.matmul %1, %32, %cst_29 {dimension_numbers = #tpu.dot_dimension_numbers<[1], [0], [0], [1], [0, 0, 1, 1], [], []>} : vector<16x16xf32>, vector<16x32xf32>, vector<16x32xf32> -> vector<16x32xf32>
    %c0_30 = arith.constant 0 : index
    %c0_31 = arith.constant 0 : index
    %34 = vector.load %arg10[%c0_30, %c0_31] : memref<16x16xf32, #tpu.memory_space<vmem>>, vector<16x16xf32>
    %cst_32 = arith.constant dense<0.000000e+00> : vector<16x32xf32>
    %35 = tpu.matmul %34, %33, %cst_32 {dimension_numbers = #tpu.dot_dimension_numbers<[1], [0], [0], [1], [0, 0, 1, 1], [], []>} : vector<16x16xf32>, vector<16x32xf32>, vector<16x32xf32> -> vector<16x32xf32>
    %c0_33 = arith.constant 0 : index
    %c0_34 = arith.constant 0 : index
    %36 = vector.load %arg11[%c0_33, %c0_34] : memref<2x32xf32, #tpu.memory_space<vmem>>, vector<2x32xf32>
    %cst_35 = arith.constant dense<0.000000e+00> : vector<2x32xf32>
    %37 = tpu.matmul %36, %3, %cst_35 {dimension_numbers = #tpu.dot_dimension_numbers<[1], [0], [0], [1], [0, 0, 1, 1], [], []>} : vector<2x32xf32>, vector<32x32xf32>, vector<2x32xf32> -> vector<2x32xf32>
    %c0_36 = arith.constant 0 : index
    %c0_37 = arith.constant 0 : index
    %38 = vector.load %arg14[%c0_36, %c0_37] : memref<32x32xf32, #tpu.memory_space<vmem>>, vector<32x32xf32>
    %cst_38 = arith.constant dense<0.000000e+00> : vector<2x32xf32>
    %39 = tpu.matmul %37, %38, %cst_38 {dimension_numbers = #tpu.dot_dimension_numbers<[1], [0], [0], [1], [0, 0, 1, 1], [], []>} : vector<2x32xf32>, vector<32x32xf32>, vector<2x32xf32> -> vector<2x32xf32>
    %c0_39 = arith.constant 0 : index
    %c0_40 = arith.constant 0 : index
    %40 = vector.load %arg15[%c0_39, %c0_40] : memref<1x32xf32, #tpu.memory_space<vmem>>, vector<1x32xf32>
    %41 = vector.broadcast %40 : vector<1x32xf32> to vector<2x32xf32>
    %42 = arith.addf %39, %41 : vector<2x32xf32>
    %43 = arith.addf %42, %5 : vector<2x32xf32>
    %c0_41 = arith.constant 0 : index
    %c0_42 = arith.constant 0 : index
    %44 = vector.load %arg12[%c0_41, %c0_42] : memref<16x2xf32, #tpu.memory_space<vmem>>, vector<16x2xf32>
    %cst_43 = arith.constant dense<0.000000e+00> : vector<16x32xf32>
    %45 = tpu.matmul %44, %43, %cst_43 {dimension_numbers = #tpu.dot_dimension_numbers<[1], [0], [0], [1], [0, 0, 1, 1], [], []>} : vector<16x2xf32>, vector<2x32xf32>, vector<16x32xf32> -> vector<16x32xf32>
    %46 = arith.addf %35, %45 : vector<16x32xf32>
    %c0_44 = arith.constant 0 : index
    %c0_45 = arith.constant 0 : index
    %c0_46 = arith.constant 0 : index
    %47 = vector.load %arg32[%c0_44, %c0_45, %c0_46] : memref<2x3x32xf32, #tpu.memory_space<vmem>>, vector<1x3x32xf32>
    %48 = vector.shape_cast %47 : vector<1x3x32xf32> to vector<3x32xf32>
    %c0_47 = arith.constant 0 : index
    %c0_48 = arith.constant 0 : index
    %c0_49 = arith.constant 0 : index
    %49 = vector.load %arg33[%c0_47, %c0_48, %c0_49] : memref<2x3x32xf32, #tpu.memory_space<vmem>>, vector<1x3x32xf32>
    %50 = vector.shape_cast %49 : vector<1x3x32xf32> to vector<3x32xf32>
    %c0_50 = arith.constant 0 : index
    %c0_51 = arith.constant 0 : index
    %c0_52 = arith.constant 0 : index
    %51 = vector.load %arg16[%c0_50, %c0_51, %c0_52] : memref<2x32x32xf32, #tpu.memory_space<vmem>>, vector<1x32x32xf32>
    %52 = vector.shape_cast %51 : vector<1x32x32xf32> to vector<32x32xf32>
    %cst_53 = arith.constant dense<0.000000e+00> : vector<16x32xf32>
    %53 = tpu.matmul %46, %52, %cst_53 {dimension_numbers = #tpu.dot_dimension_numbers<[1], [0], [0], [1], [0, 0, 1, 1], [], []>} : vector<16x32xf32>, vector<32x32xf32>, vector<16x32xf32> -> vector<16x32xf32>
    %c0_54 = arith.constant 0 : index
    %c0_55 = arith.constant 0 : index
    %c0_56 = arith.constant 0 : index
    %54 = vector.load %arg19[%c0_54, %c0_55, %c0_56] : memref<2x1x32xf32, #tpu.memory_space<vmem>>, vector<1x1x32xf32>
    %55 = vector.shape_cast %54 : vector<1x1x32xf32> to vector<1x32xf32>
    %56 = vector.broadcast %55 : vector<1x32xf32> to vector<16x32xf32>
    %57 = arith.addf %53, %56 : vector<16x32xf32>
    %c0_57 = arith.constant 0 : index
    %c0_58 = arith.constant 0 : index
    %c0_59 = arith.constant 0 : index
    %58 = vector.load %arg17[%c0_57, %c0_58, %c0_59] : memref<2x32x32xf32, #tpu.memory_space<vmem>>, vector<1x32x32xf32>
    %59 = vector.shape_cast %58 : vector<1x32x32xf32> to vector<32x32xf32>
    %cst_60 = arith.constant dense<0.000000e+00> : vector<16x32xf32>
    %60 = tpu.matmul %46, %59, %cst_60 {dimension_numbers = #tpu.dot_dimension_numbers<[1], [0], [0], [1], [0, 0, 1, 1], [], []>} : vector<16x32xf32>, vector<32x32xf32>, vector<16x32xf32> -> vector<16x32xf32>
    %c0_61 = arith.constant 0 : index
    %c0_62 = arith.constant 0 : index
    %c0_63 = arith.constant 0 : index
    %61 = vector.load %arg20[%c0_61, %c0_62, %c0_63] : memref<2x1x32xf32, #tpu.memory_space<vmem>>, vector<1x1x32xf32>
    %62 = vector.shape_cast %61 : vector<1x1x32xf32> to vector<1x32xf32>
    %63 = vector.broadcast %62 : vector<1x32xf32> to vector<16x32xf32>
    %64 = arith.addf %60, %63 : vector<16x32xf32>
    %c0_64 = arith.constant 0 : index
    %c0_65 = arith.constant 0 : index
    %c0_66 = arith.constant 0 : index
    %65 = vector.load %arg18[%c0_64, %c0_65, %c0_66] : memref<2x32x32xf32, #tpu.memory_space<vmem>>, vector<1x32x32xf32>
    %66 = vector.shape_cast %65 : vector<1x32x32xf32> to vector<32x32xf32>
    %cst_67 = arith.constant dense<0.000000e+00> : vector<16x32xf32>
    %67 = tpu.matmul %46, %66, %cst_67 {dimension_numbers = #tpu.dot_dimension_numbers<[1], [0], [0], [1], [0, 0, 1, 1], [], []>} : vector<16x32xf32>, vector<32x32xf32>, vector<16x32xf32> -> vector<16x32xf32>
    %c0_68 = arith.constant 0 : index
    %c0_69 = arith.constant 0 : index
    %c0_70 = arith.constant 0 : index
    %68 = vector.load %arg21[%c0_68, %c0_69, %c0_70] : memref<2x1x32xf32, #tpu.memory_space<vmem>>, vector<1x1x32xf32>
    %69 = vector.shape_cast %68 : vector<1x1x32xf32> to vector<1x32xf32>
    %70 = vector.broadcast %69 : vector<1x32xf32> to vector<16x32xf32>
    %71 = arith.addf %67, %70 : vector<16x32xf32>
    %cst_71 = arith.constant dense<0.000000e+00> : vector<128x32xf32>
    %72 = tpu.matmul %11, %57, %cst_71 {dimension_numbers = #tpu.dot_dimension_numbers<[1], [0], [0], [1], [0, 0, 1, 1], [], []>} : vector<128x16xf32>, vector<16x32xf32>, vector<128x32xf32> -> vector<128x32xf32>
    %73 = arith.mulf %72, %13 : vector<128x32xf32>
    %cst_72 = arith.constant dense<0.000000e+00> : vector<128x16xf32>
    %74 = tpu.matmul %73, %64, %cst_72 {dimension_numbers = #tpu.dot_dimension_numbers<[1], [1], [0], [0], [0, 0, 1, 0], [], []>} : vector<128x32xf32>, vector<16x32xf32>, vector<128x16xf32> -> vector<128x16xf32>
    %cst_73 = arith.constant 5.000000e-01 : f32
    %75 = vector.broadcast %cst_73 : f32 to vector<128x16xf32>
    %76 = arith.mulf %74, %75 : vector<128x16xf32>
    %77 = arith.addf %76, %24 : vector<128x16xf32>
    %cst_74 = arith.constant dense<0xFF800000> : vector<128xf32>
    %78 = vector.multi_reduction <maximumf>, %77, %cst_74 [1] : vector<128x16xf32> to vector<128xf32>
    %79 = vector.shape_cast %78 : vector<128xf32> to vector<128x1xf32>
    %80 = vector.broadcast %79 : vector<128x1xf32> to vector<128x16xf32>
    %81 = arith.subf %77, %80 : vector<128x16xf32>
    %82 = math.exp %81 : vector<128x16xf32>
    %cst_75 = arith.constant dense<0.000000e+00> : vector<128xf32>
    %83 = vector.multi_reduction <add>, %82, %cst_75 [1] : vector<128x16xf32> to vector<128xf32>
    %84 = vector.shape_cast %83 : vector<128xf32> to vector<128x1xf32>
    %85 = tpu.reciprocal %84 {approx = true} : vector<128x1xf32> -> vector<128x1xf32>
    %86 = vector.broadcast %85 : vector<128x1xf32> to vector<128x16xf32>
    %87 = arith.mulf %82, %86 : vector<128x16xf32>
    %cst_76 = arith.constant dense<0.000000e+00> : vector<128x32xf32>
    %88 = tpu.matmul %87, %71, %cst_76 {dimension_numbers = #tpu.dot_dimension_numbers<[1], [0], [0], [1], [0, 0, 1, 1], [], []>} : vector<128x16xf32>, vector<16x32xf32>, vector<128x32xf32> -> vector<128x32xf32>
    %89 = arith.mulf %88, %13 : vector<128x32xf32>
    %cst_77 = arith.constant dense<0.000000e+00> : vector<16x32xf32>
    %90 = tpu.matmul %12, %89, %cst_77 {dimension_numbers = #tpu.dot_dimension_numbers<[1], [0], [0], [1], [0, 0, 1, 1], [], []>} : vector<16x128xf32>, vector<128x32xf32>, vector<16x32xf32> -> vector<16x32xf32>
    %c0_78 = arith.constant 0 : index
    %c0_79 = arith.constant 0 : index
    %c0_80 = arith.constant 0 : index
    %91 = vector.load %arg22[%c0_78, %c0_79, %c0_80] : memref<2x32x32xf32, #tpu.memory_space<vmem>>, vector<1x32x32xf32>
    %92 = vector.shape_cast %91 : vector<1x32x32xf32> to vector<32x32xf32>
    %cst_81 = arith.constant dense<0.000000e+00> : vector<16x32xf32>
    %93 = tpu.matmul %90, %92, %cst_81 {dimension_numbers = #tpu.dot_dimension_numbers<[1], [0], [0], [1], [0, 0, 1, 1], [], []>} : vector<16x32xf32>, vector<32x32xf32>, vector<16x32xf32> -> vector<16x32xf32>
    %c0_82 = arith.constant 0 : index
    %c0_83 = arith.constant 0 : index
    %c0_84 = arith.constant 0 : index
    %94 = vector.load %arg23[%c0_82, %c0_83, %c0_84] : memref<2x1x32xf32, #tpu.memory_space<vmem>>, vector<1x1x32xf32>
    %95 = vector.shape_cast %94 : vector<1x1x32xf32> to vector<1x32xf32>
    %96 = vector.broadcast %95 : vector<1x32xf32> to vector<16x32xf32>
    %97 = arith.addf %93, %96 : vector<16x32xf32>
    %98 = arith.addf %46, %97 : vector<16x32xf32>
    %99 = vector.extract_strided_slice %48 {offsets = [0, 0], sizes = [1, 32], strides = [1, 1]} : vector<3x32xf32> to vector<1x32xf32>
    %100 = vector.extract_strided_slice %50 {offsets = [0, 0], sizes = [1, 32], strides = [1, 1]} : vector<3x32xf32> to vector<1x32xf32>
    %101 = arith.mulf %98, %98 : vector<16x32xf32>
    %102 = tpu.concatenate %98, %101 in 0 : vector<16x32xf32>, vector<16x32xf32> -> vector<32x32xf32>
    %cst_85 = arith.constant dense<0.000000e+00> : vector<32xf32>
    %103 = vector.multi_reduction <add>, %102, %cst_85 [1] : vector<32x32xf32> to vector<32xf32>
    %104 = vector.shape_cast %103 : vector<32xf32> to vector<32x1xf32>
    %cst_86 = arith.constant 3.125000e-02 : f32
    %105 = vector.broadcast %cst_86 : f32 to vector<32x1xf32>
    %106 = arith.mulf %104, %105 : vector<32x1xf32>
    %107 = vector.extract_strided_slice %106 {offsets = [0, 0], sizes = [16, 1], strides = [1, 1]} : vector<32x1xf32> to vector<16x1xf32>
    %108 = vector.extract_strided_slice %106 {offsets = [16, 0], sizes = [16, 1], strides = [1, 1]} : vector<32x1xf32> to vector<16x1xf32>
    %109 = arith.mulf %107, %107 : vector<16x1xf32>
    %110 = arith.subf %108, %109 : vector<16x1xf32>
    %111 = vector.broadcast %107 : vector<16x1xf32> to vector<16x32xf32>
    %112 = arith.subf %98, %111 : vector<16x32xf32>
    %cst_87 = arith.constant 9.99999974E-6 : f32
    %113 = vector.broadcast %cst_87 : f32 to vector<16x1xf32>
    %114 = arith.addf %110, %113 : vector<16x1xf32>
    %115 = math.rsqrt %114 : vector<16x1xf32>
    %116 = vector.broadcast %115 : vector<16x1xf32> to vector<16x32xf32>
    %117 = arith.mulf %112, %116 : vector<16x32xf32>
    %118 = vector.broadcast %99 : vector<1x32xf32> to vector<16x32xf32>
    %119 = arith.mulf %117, %118 : vector<16x32xf32>
    %120 = vector.broadcast %100 : vector<1x32xf32> to vector<16x32xf32>
    %121 = arith.addf %119, %120 : vector<16x32xf32>
    %c0_88 = arith.constant 0 : index
    %c0_89 = arith.constant 0 : index
    %c0_90 = arith.constant 0 : index
    %122 = vector.load %arg24[%c0_88, %c0_89, %c0_90] : memref<2x32x32xf32, #tpu.memory_space<vmem>>, vector<1x32x32xf32>
    %123 = vector.shape_cast %122 : vector<1x32x32xf32> to vector<32x32xf32>
    %cst_91 = arith.constant dense<0.000000e+00> : vector<16x32xf32>
    %124 = tpu.matmul %121, %123, %cst_91 {dimension_numbers = #tpu.dot_dimension_numbers<[1], [0], [0], [1], [0, 0, 1, 1], [], []>} : vector<16x32xf32>, vector<32x32xf32>, vector<16x32xf32> -> vector<16x32xf32>
    %c0_92 = arith.constant 0 : index
    %c0_93 = arith.constant 0 : index
    %c0_94 = arith.constant 0 : index
    %125 = vector.load %arg27[%c0_92, %c0_93, %c0_94] : memref<2x1x32xf32, #tpu.memory_space<vmem>>, vector<1x1x32xf32>
    %126 = vector.shape_cast %125 : vector<1x1x32xf32> to vector<1x32xf32>
    %127 = vector.broadcast %126 : vector<1x32xf32> to vector<16x32xf32>
    %128 = arith.addf %124, %127 : vector<16x32xf32>
    %c0_95 = arith.constant 0 : index
    %c0_96 = arith.constant 0 : index
    %c0_97 = arith.constant 0 : index
    %129 = vector.load %arg25[%c0_95, %c0_96, %c0_97] : memref<2x32x32xf32, #tpu.memory_space<vmem>>, vector<1x32x32xf32>
    %130 = vector.shape_cast %129 : vector<1x32x32xf32> to vector<32x32xf32>
    %cst_98 = arith.constant dense<0.000000e+00> : vector<32x32xf32>
    %131 = tpu.matmul %3, %130, %cst_98 {dimension_numbers = #tpu.dot_dimension_numbers<[1], [0], [0], [1], [0, 0, 1, 1], [], []>} : vector<32x32xf32>, vector<32x32xf32>, vector<32x32xf32> -> vector<32x32xf32>
    %c0_99 = arith.constant 0 : index
    %c0_100 = arith.constant 0 : index
    %c0_101 = arith.constant 0 : index
    %132 = vector.load %arg28[%c0_99, %c0_100, %c0_101] : memref<2x1x32xf32, #tpu.memory_space<vmem>>, vector<1x1x32xf32>
    %133 = vector.shape_cast %132 : vector<1x1x32xf32> to vector<1x32xf32>
    %134 = vector.broadcast %133 : vector<1x32xf32> to vector<32x32xf32>
    %135 = arith.addf %131, %134 : vector<32x32xf32>
    %c0_102 = arith.constant 0 : index
    %c0_103 = arith.constant 0 : index
    %c0_104 = arith.constant 0 : index
    %136 = vector.load %arg26[%c0_102, %c0_103, %c0_104] : memref<2x32x32xf32, #tpu.memory_space<vmem>>, vector<1x32x32xf32>
    %137 = vector.shape_cast %136 : vector<1x32x32xf32> to vector<32x32xf32>
    %cst_105 = arith.constant dense<0.000000e+00> : vector<32x32xf32>
    %138 = tpu.matmul %3, %137, %cst_105 {dimension_numbers = #tpu.dot_dimension_numbers<[1], [0], [0], [1], [0, 0, 1, 1], [], []>} : vector<32x32xf32>, vector<32x32xf32>, vector<32x32xf32> -> vector<32x32xf32>
    %c0_106 = arith.constant 0 : index
    %c0_107 = arith.constant 0 : index
    %c0_108 = arith.constant 0 : index
    %139 = vector.load %arg29[%c0_106, %c0_107, %c0_108] : memref<2x1x32xf32, #tpu.memory_space<vmem>>, vector<1x1x32xf32>
    %140 = vector.shape_cast %139 : vector<1x1x32xf32> to vector<1x32xf32>
    %141 = vector.broadcast %140 : vector<1x32xf32> to vector<32x32xf32>
    %142 = arith.addf %138, %141 : vector<32x32xf32>
    %cst_109 = arith.constant dense<0.000000e+00> : vector<128x32xf32>
    %143 = tpu.matmul %11, %128, %cst_109 {dimension_numbers = #tpu.dot_dimension_numbers<[1], [0], [0], [1], [0, 0, 1, 1], [], []>} : vector<128x16xf32>, vector<16x32xf32>, vector<128x32xf32> -> vector<128x32xf32>
    %144 = arith.mulf %143, %13 : vector<128x32xf32>
    %cst_110 = arith.constant dense<0.000000e+00> : vector<128x32xf32>
    %145 = tpu.matmul %144, %135, %cst_110 {dimension_numbers = #tpu.dot_dimension_numbers<[1], [1], [0], [0], [0, 0, 1, 0], [], []>} : vector<128x32xf32>, vector<32x32xf32>, vector<128x32xf32> -> vector<128x32xf32>
    %cst_111 = arith.constant 5.000000e-01 : f32
    %146 = vector.broadcast %cst_111 : f32 to vector<128x32xf32>
    %147 = arith.mulf %145, %146 : vector<128x32xf32>
    %148 = arith.addf %147, %31 : vector<128x32xf32>
    %cst_112 = arith.constant dense<0xFF800000> : vector<128xf32>
    %149 = vector.multi_reduction <maximumf>, %148, %cst_112 [1] : vector<128x32xf32> to vector<128xf32>
    %150 = vector.shape_cast %149 : vector<128xf32> to vector<128x1xf32>
    %151 = vector.broadcast %150 : vector<128x1xf32> to vector<128x32xf32>
    %152 = arith.subf %148, %151 : vector<128x32xf32>
    %153 = math.exp %152 : vector<128x32xf32>
    %cst_113 = arith.constant dense<0.000000e+00> : vector<128xf32>
    %154 = vector.multi_reduction <add>, %153, %cst_113 [1] : vector<128x32xf32> to vector<128xf32>
    %155 = vector.shape_cast %154 : vector<128xf32> to vector<128x1xf32>
    %156 = tpu.reciprocal %155 {approx = true} : vector<128x1xf32> -> vector<128x1xf32>
    %157 = vector.broadcast %156 : vector<128x1xf32> to vector<128x32xf32>
    %158 = arith.mulf %153, %157 : vector<128x32xf32>
    %cst_114 = arith.constant dense<0.000000e+00> : vector<128x32xf32>
    %159 = tpu.matmul %158, %142, %cst_114 {dimension_numbers = #tpu.dot_dimension_numbers<[1], [0], [0], [1], [0, 0, 1, 1], [], []>} : vector<128x32xf32>, vector<32x32xf32>, vector<128x32xf32> -> vector<128x32xf32>
    %160 = arith.mulf %159, %13 : vector<128x32xf32>
    %cst_115 = arith.constant dense<0.000000e+00> : vector<16x32xf32>
    %161 = tpu.matmul %12, %160, %cst_115 {dimension_numbers = #tpu.dot_dimension_numbers<[1], [0], [0], [1], [0, 0, 1, 1], [], []>} : vector<16x128xf32>, vector<128x32xf32>, vector<16x32xf32> -> vector<16x32xf32>
    %c0_116 = arith.constant 0 : index
    %c0_117 = arith.constant 0 : index
    %c0_118 = arith.constant 0 : index
    %162 = vector.load %arg30[%c0_116, %c0_117, %c0_118] : memref<2x32x32xf32, #tpu.memory_space<vmem>>, vector<1x32x32xf32>
    %163 = vector.shape_cast %162 : vector<1x32x32xf32> to vector<32x32xf32>
    %cst_119 = arith.constant dense<0.000000e+00> : vector<16x32xf32>
    %164 = tpu.matmul %161, %163, %cst_119 {dimension_numbers = #tpu.dot_dimension_numbers<[1], [0], [0], [1], [0, 0, 1, 1], [], []>} : vector<16x32xf32>, vector<32x32xf32>, vector<16x32xf32> -> vector<16x32xf32>
    %c0_120 = arith.constant 0 : index
    %c0_121 = arith.constant 0 : index
    %c0_122 = arith.constant 0 : index
    %165 = vector.load %arg31[%c0_120, %c0_121, %c0_122] : memref<2x1x32xf32, #tpu.memory_space<vmem>>, vector<1x1x32xf32>
    %166 = vector.shape_cast %165 : vector<1x1x32xf32> to vector<1x32xf32>
    %167 = vector.broadcast %166 : vector<1x32xf32> to vector<16x32xf32>
    %168 = arith.addf %164, %167 : vector<16x32xf32>
    %169 = arith.addf %121, %168 : vector<16x32xf32>
    %170 = vector.extract_strided_slice %48 {offsets = [1, 0], sizes = [1, 32], strides = [1, 1]} : vector<3x32xf32> to vector<1x32xf32>
    %171 = vector.extract_strided_slice %50 {offsets = [1, 0], sizes = [1, 32], strides = [1, 1]} : vector<3x32xf32> to vector<1x32xf32>
    %172 = arith.mulf %169, %169 : vector<16x32xf32>
    %173 = tpu.concatenate %169, %172 in 0 : vector<16x32xf32>, vector<16x32xf32> -> vector<32x32xf32>
    %cst_123 = arith.constant dense<0.000000e+00> : vector<32xf32>
    %174 = vector.multi_reduction <add>, %173, %cst_123 [1] : vector<32x32xf32> to vector<32xf32>
    %175 = vector.shape_cast %174 : vector<32xf32> to vector<32x1xf32>
    %cst_124 = arith.constant 3.125000e-02 : f32
    %176 = vector.broadcast %cst_124 : f32 to vector<32x1xf32>
    %177 = arith.mulf %175, %176 : vector<32x1xf32>
    %178 = vector.extract_strided_slice %177 {offsets = [0, 0], sizes = [16, 1], strides = [1, 1]} : vector<32x1xf32> to vector<16x1xf32>
    %179 = vector.extract_strided_slice %177 {offsets = [16, 0], sizes = [16, 1], strides = [1, 1]} : vector<32x1xf32> to vector<16x1xf32>
    %180 = arith.mulf %178, %178 : vector<16x1xf32>
    %181 = arith.subf %179, %180 : vector<16x1xf32>
    %182 = vector.broadcast %178 : vector<16x1xf32> to vector<16x32xf32>
    %183 = arith.subf %169, %182 : vector<16x32xf32>
    %cst_125 = arith.constant 9.99999974E-6 : f32
    %184 = vector.broadcast %cst_125 : f32 to vector<16x1xf32>
    %185 = arith.addf %181, %184 : vector<16x1xf32>
    %186 = math.rsqrt %185 : vector<16x1xf32>
    %187 = vector.broadcast %186 : vector<16x1xf32> to vector<16x32xf32>
    %188 = arith.mulf %183, %187 : vector<16x32xf32>
    %189 = vector.broadcast %170 : vector<1x32xf32> to vector<16x32xf32>
    %190 = arith.mulf %188, %189 : vector<16x32xf32>
    %191 = vector.broadcast %171 : vector<1x32xf32> to vector<16x32xf32>
    %192 = arith.addf %190, %191 : vector<16x32xf32>
    %c0_126 = arith.constant 0 : index
    %c0_127 = arith.constant 0 : index
    %c0_128 = arith.constant 0 : index
    %193 = vector.load %arg34[%c0_126, %c0_127, %c0_128] : memref<2x32x2048xf32, #tpu.memory_space<vmem>>, vector<1x32x2048xf32>
    %194 = vector.shape_cast %193 : vector<1x32x2048xf32> to vector<32x2048xf32>
    %cst_129 = arith.constant dense<0.000000e+00> : vector<16x2048xf32>
    %195 = tpu.matmul %192, %194, %cst_129 {dimension_numbers = #tpu.dot_dimension_numbers<[1], [0], [0], [1], [0, 0, 1, 1], [], []>} : vector<16x32xf32>, vector<32x2048xf32>, vector<16x2048xf32> -> vector<16x2048xf32>
    %c0_130 = arith.constant 0 : index
    %c0_131 = arith.constant 0 : index
    %c0_132 = arith.constant 0 : index
    %196 = vector.load %arg35[%c0_130, %c0_131, %c0_132] : memref<2x1x2048xf32, #tpu.memory_space<vmem>>, vector<1x1x2048xf32>
    %197 = vector.shape_cast %196 : vector<1x1x2048xf32> to vector<1x2048xf32>
    %198 = vector.broadcast %197 : vector<1x2048xf32> to vector<16x2048xf32>
    %199 = arith.addf %195, %198 : vector<16x2048xf32>
    %cst_133 = arith.constant 0.000000e+00 : f32
    %200 = vector.broadcast %cst_133 : f32 to vector<16x2048xf32>
    %201 = arith.maximumf %199, %200 : vector<16x2048xf32>
    %c0_134 = arith.constant 0 : index
    %c0_135 = arith.constant 0 : index
    %c0_136 = arith.constant 0 : index
    %202 = vector.load %arg36[%c0_134, %c0_135, %c0_136] : memref<2x2048x32xf32, #tpu.memory_space<vmem>>, vector<1x2048x32xf32>
    %203 = vector.shape_cast %202 : vector<1x2048x32xf32> to vector<2048x32xf32>
    %cst_137 = arith.constant dense<0.000000e+00> : vector<16x32xf32>
    %204 = tpu.matmul %201, %203, %cst_137 {dimension_numbers = #tpu.dot_dimension_numbers<[1], [0], [0], [1], [0, 0, 1, 1], [], []>} : vector<16x2048xf32>, vector<2048x32xf32>, vector<16x32xf32> -> vector<16x32xf32>
    %c0_138 = arith.constant 0 : index
    %c0_139 = arith.constant 0 : index
    %c0_140 = arith.constant 0 : index
    %205 = vector.load %arg37[%c0_138, %c0_139, %c0_140] : memref<2x1x32xf32, #tpu.memory_space<vmem>>, vector<1x1x32xf32>
    %206 = vector.shape_cast %205 : vector<1x1x32xf32> to vector<1x32xf32>
    %207 = vector.broadcast %206 : vector<1x32xf32> to vector<16x32xf32>
    %208 = arith.addf %204, %207 : vector<16x32xf32>
    %209 = arith.addf %192, %208 : vector<16x32xf32>
    %210 = vector.extract_strided_slice %48 {offsets = [2, 0], sizes = [1, 32], strides = [1, 1]} : vector<3x32xf32> to vector<1x32xf32>
    %211 = vector.extract_strided_slice %50 {offsets = [2, 0], sizes = [1, 32], strides = [1, 1]} : vector<3x32xf32> to vector<1x32xf32>
    %212 = arith.mulf %209, %209 : vector<16x32xf32>
    %213 = tpu.concatenate %209, %212 in 0 : vector<16x32xf32>, vector<16x32xf32> -> vector<32x32xf32>
    %cst_141 = arith.constant dense<0.000000e+00> : vector<32xf32>
    %214 = vector.multi_reduction <add>, %213, %cst_141 [1] : vector<32x32xf32> to vector<32xf32>
    %215 = vector.shape_cast %214 : vector<32xf32> to vector<32x1xf32>
    %cst_142 = arith.constant 3.125000e-02 : f32
    %216 = vector.broadcast %cst_142 : f32 to vector<32x1xf32>
    %217 = arith.mulf %215, %216 : vector<32x1xf32>
    %218 = vector.extract_strided_slice %217 {offsets = [0, 0], sizes = [16, 1], strides = [1, 1]} : vector<32x1xf32> to vector<16x1xf32>
    %219 = vector.extract_strided_slice %217 {offsets = [16, 0], sizes = [16, 1], strides = [1, 1]} : vector<32x1xf32> to vector<16x1xf32>
    %220 = arith.mulf %218, %218 : vector<16x1xf32>
    %221 = arith.subf %219, %220 : vector<16x1xf32>
    %222 = vector.broadcast %218 : vector<16x1xf32> to vector<16x32xf32>
    %223 = arith.subf %209, %222 : vector<16x32xf32>
    %cst_143 = arith.constant 9.99999974E-6 : f32
    %224 = vector.broadcast %cst_143 : f32 to vector<16x1xf32>
    %225 = arith.addf %221, %224 : vector<16x1xf32>
    %226 = math.rsqrt %225 : vector<16x1xf32>
    %227 = vector.broadcast %226 : vector<16x1xf32> to vector<16x32xf32>
    %228 = arith.mulf %223, %227 : vector<16x32xf32>
    %229 = vector.broadcast %210 : vector<1x32xf32> to vector<16x32xf32>
    %230 = arith.mulf %228, %229 : vector<16x32xf32>
    %231 = vector.broadcast %211 : vector<1x32xf32> to vector<16x32xf32>
    %232 = arith.addf %230, %231 : vector<16x32xf32>
    %c1 = arith.constant 1 : index
    %c0_144 = arith.constant 0 : index
    %c0_145 = arith.constant 0 : index
    %233 = vector.load %arg32[%c1, %c0_144, %c0_145] : memref<2x3x32xf32, #tpu.memory_space<vmem>>, vector<1x3x32xf32>
    %234 = vector.shape_cast %233 : vector<1x3x32xf32> to vector<3x32xf32>
    %c1_146 = arith.constant 1 : index
    %c0_147 = arith.constant 0 : index
    %c0_148 = arith.constant 0 : index
    %235 = vector.load %arg33[%c1_146, %c0_147, %c0_148] : memref<2x3x32xf32, #tpu.memory_space<vmem>>, vector<1x3x32xf32>
    %236 = vector.shape_cast %235 : vector<1x3x32xf32> to vector<3x32xf32>
    %c1_149 = arith.constant 1 : index
    %c0_150 = arith.constant 0 : index
    %c0_151 = arith.constant 0 : index
    %237 = vector.load %arg16[%c1_149, %c0_150, %c0_151] : memref<2x32x32xf32, #tpu.memory_space<vmem>>, vector<1x32x32xf32>
    %238 = vector.shape_cast %237 : vector<1x32x32xf32> to vector<32x32xf32>
    %cst_152 = arith.constant dense<0.000000e+00> : vector<16x32xf32>
    %239 = tpu.matmul %232, %238, %cst_152 {dimension_numbers = #tpu.dot_dimension_numbers<[1], [0], [0], [1], [0, 0, 1, 1], [], []>} : vector<16x32xf32>, vector<32x32xf32>, vector<16x32xf32> -> vector<16x32xf32>
    %c1_153 = arith.constant 1 : index
    %c0_154 = arith.constant 0 : index
    %c0_155 = arith.constant 0 : index
    %240 = vector.load %arg19[%c1_153, %c0_154, %c0_155] : memref<2x1x32xf32, #tpu.memory_space<vmem>>, vector<1x1x32xf32>
    %241 = vector.shape_cast %240 : vector<1x1x32xf32> to vector<1x32xf32>
    %242 = vector.broadcast %241 : vector<1x32xf32> to vector<16x32xf32>
    %243 = arith.addf %239, %242 : vector<16x32xf32>
    %c1_156 = arith.constant 1 : index
    %c0_157 = arith.constant 0 : index
    %c0_158 = arith.constant 0 : index
    %244 = vector.load %arg17[%c1_156, %c0_157, %c0_158] : memref<2x32x32xf32, #tpu.memory_space<vmem>>, vector<1x32x32xf32>
    %245 = vector.shape_cast %244 : vector<1x32x32xf32> to vector<32x32xf32>
    %cst_159 = arith.constant dense<0.000000e+00> : vector<16x32xf32>
    %246 = tpu.matmul %232, %245, %cst_159 {dimension_numbers = #tpu.dot_dimension_numbers<[1], [0], [0], [1], [0, 0, 1, 1], [], []>} : vector<16x32xf32>, vector<32x32xf32>, vector<16x32xf32> -> vector<16x32xf32>
    %c1_160 = arith.constant 1 : index
    %c0_161 = arith.constant 0 : index
    %c0_162 = arith.constant 0 : index
    %247 = vector.load %arg20[%c1_160, %c0_161, %c0_162] : memref<2x1x32xf32, #tpu.memory_space<vmem>>, vector<1x1x32xf32>
    %248 = vector.shape_cast %247 : vector<1x1x32xf32> to vector<1x32xf32>
    %249 = vector.broadcast %248 : vector<1x32xf32> to vector<16x32xf32>
    %250 = arith.addf %246, %249 : vector<16x32xf32>
    %c1_163 = arith.constant 1 : index
    %c0_164 = arith.constant 0 : index
    %c0_165 = arith.constant 0 : index
    %251 = vector.load %arg18[%c1_163, %c0_164, %c0_165] : memref<2x32x32xf32, #tpu.memory_space<vmem>>, vector<1x32x32xf32>
    %252 = vector.shape_cast %251 : vector<1x32x32xf32> to vector<32x32xf32>
    %cst_166 = arith.constant dense<0.000000e+00> : vector<16x32xf32>
    %253 = tpu.matmul %232, %252, %cst_166 {dimension_numbers = #tpu.dot_dimension_numbers<[1], [0], [0], [1], [0, 0, 1, 1], [], []>} : vector<16x32xf32>, vector<32x32xf32>, vector<16x32xf32> -> vector<16x32xf32>
    %c1_167 = arith.constant 1 : index
    %c0_168 = arith.constant 0 : index
    %c0_169 = arith.constant 0 : index
    %254 = vector.load %arg21[%c1_167, %c0_168, %c0_169] : memref<2x1x32xf32, #tpu.memory_space<vmem>>, vector<1x1x32xf32>
    %255 = vector.shape_cast %254 : vector<1x1x32xf32> to vector<1x32xf32>
    %256 = vector.broadcast %255 : vector<1x32xf32> to vector<16x32xf32>
    %257 = arith.addf %253, %256 : vector<16x32xf32>
    %cst_170 = arith.constant dense<0.000000e+00> : vector<128x32xf32>
    %258 = tpu.matmul %11, %243, %cst_170 {dimension_numbers = #tpu.dot_dimension_numbers<[1], [0], [0], [1], [0, 0, 1, 1], [], []>} : vector<128x16xf32>, vector<16x32xf32>, vector<128x32xf32> -> vector<128x32xf32>
    %259 = arith.mulf %258, %13 : vector<128x32xf32>
    %cst_171 = arith.constant dense<0.000000e+00> : vector<128x16xf32>
    %260 = tpu.matmul %259, %250, %cst_171 {dimension_numbers = #tpu.dot_dimension_numbers<[1], [1], [0], [0], [0, 0, 1, 0], [], []>} : vector<128x32xf32>, vector<16x32xf32>, vector<128x16xf32> -> vector<128x16xf32>
    %cst_172 = arith.constant 5.000000e-01 : f32
    %261 = vector.broadcast %cst_172 : f32 to vector<128x16xf32>
    %262 = arith.mulf %260, %261 : vector<128x16xf32>
    %263 = arith.addf %262, %24 : vector<128x16xf32>
    %cst_173 = arith.constant dense<0xFF800000> : vector<128xf32>
    %264 = vector.multi_reduction <maximumf>, %263, %cst_173 [1] : vector<128x16xf32> to vector<128xf32>
    %265 = vector.shape_cast %264 : vector<128xf32> to vector<128x1xf32>
    %266 = vector.broadcast %265 : vector<128x1xf32> to vector<128x16xf32>
    %267 = arith.subf %263, %266 : vector<128x16xf32>
    %268 = math.exp %267 : vector<128x16xf32>
    %cst_174 = arith.constant dense<0.000000e+00> : vector<128xf32>
    %269 = vector.multi_reduction <add>, %268, %cst_174 [1] : vector<128x16xf32> to vector<128xf32>
    %270 = vector.shape_cast %269 : vector<128xf32> to vector<128x1xf32>
    %271 = tpu.reciprocal %270 {approx = true} : vector<128x1xf32> -> vector<128x1xf32>
    %272 = vector.broadcast %271 : vector<128x1xf32> to vector<128x16xf32>
    %273 = arith.mulf %268, %272 : vector<128x16xf32>
    %cst_175 = arith.constant dense<0.000000e+00> : vector<128x32xf32>
    %274 = tpu.matmul %273, %257, %cst_175 {dimension_numbers = #tpu.dot_dimension_numbers<[1], [0], [0], [1], [0, 0, 1, 1], [], []>} : vector<128x16xf32>, vector<16x32xf32>, vector<128x32xf32> -> vector<128x32xf32>
    %275 = arith.mulf %274, %13 : vector<128x32xf32>
    %cst_176 = arith.constant dense<0.000000e+00> : vector<16x32xf32>
    %276 = tpu.matmul %12, %275, %cst_176 {dimension_numbers = #tpu.dot_dimension_numbers<[1], [0], [0], [1], [0, 0, 1, 1], [], []>} : vector<16x128xf32>, vector<128x32xf32>, vector<16x32xf32> -> vector<16x32xf32>
    %c1_177 = arith.constant 1 : index
    %c0_178 = arith.constant 0 : index
    %c0_179 = arith.constant 0 : index
    %277 = vector.load %arg22[%c1_177, %c0_178, %c0_179] : memref<2x32x32xf32, #tpu.memory_space<vmem>>, vector<1x32x32xf32>
    %278 = vector.shape_cast %277 : vector<1x32x32xf32> to vector<32x32xf32>
    %cst_180 = arith.constant dense<0.000000e+00> : vector<16x32xf32>
    %279 = tpu.matmul %276, %278, %cst_180 {dimension_numbers = #tpu.dot_dimension_numbers<[1], [0], [0], [1], [0, 0, 1, 1], [], []>} : vector<16x32xf32>, vector<32x32xf32>, vector<16x32xf32> -> vector<16x32xf32>
    %c1_181 = arith.constant 1 : index
    %c0_182 = arith.constant 0 : index
    %c0_183 = arith.constant 0 : index
    %280 = vector.load %arg23[%c1_181, %c0_182, %c0_183] : memref<2x1x32xf32, #tpu.memory_space<vmem>>, vector<1x1x32xf32>
    %281 = vector.shape_cast %280 : vector<1x1x32xf32> to vector<1x32xf32>
    %282 = vector.broadcast %281 : vector<1x32xf32> to vector<16x32xf32>
    %283 = arith.addf %279, %282 : vector<16x32xf32>
    %284 = arith.addf %232, %283 : vector<16x32xf32>
    %285 = vector.extract_strided_slice %234 {offsets = [0, 0], sizes = [1, 32], strides = [1, 1]} : vector<3x32xf32> to vector<1x32xf32>
    %286 = vector.extract_strided_slice %236 {offsets = [0, 0], sizes = [1, 32], strides = [1, 1]} : vector<3x32xf32> to vector<1x32xf32>
    %287 = arith.mulf %284, %284 : vector<16x32xf32>
    %288 = tpu.concatenate %284, %287 in 0 : vector<16x32xf32>, vector<16x32xf32> -> vector<32x32xf32>
    %cst_184 = arith.constant dense<0.000000e+00> : vector<32xf32>
    %289 = vector.multi_reduction <add>, %288, %cst_184 [1] : vector<32x32xf32> to vector<32xf32>
    %290 = vector.shape_cast %289 : vector<32xf32> to vector<32x1xf32>
    %cst_185 = arith.constant 3.125000e-02 : f32
    %291 = vector.broadcast %cst_185 : f32 to vector<32x1xf32>
    %292 = arith.mulf %290, %291 : vector<32x1xf32>
    %293 = vector.extract_strided_slice %292 {offsets = [0, 0], sizes = [16, 1], strides = [1, 1]} : vector<32x1xf32> to vector<16x1xf32>
    %294 = vector.extract_strided_slice %292 {offsets = [16, 0], sizes = [16, 1], strides = [1, 1]} : vector<32x1xf32> to vector<16x1xf32>
    %295 = arith.mulf %293, %293 : vector<16x1xf32>
    %296 = arith.subf %294, %295 : vector<16x1xf32>
    %297 = vector.broadcast %293 : vector<16x1xf32> to vector<16x32xf32>
    %298 = arith.subf %284, %297 : vector<16x32xf32>
    %cst_186 = arith.constant 9.99999974E-6 : f32
    %299 = vector.broadcast %cst_186 : f32 to vector<16x1xf32>
    %300 = arith.addf %296, %299 : vector<16x1xf32>
    %301 = math.rsqrt %300 : vector<16x1xf32>
    %302 = vector.broadcast %301 : vector<16x1xf32> to vector<16x32xf32>
    %303 = arith.mulf %298, %302 : vector<16x32xf32>
    %304 = vector.broadcast %285 : vector<1x32xf32> to vector<16x32xf32>
    %305 = arith.mulf %303, %304 : vector<16x32xf32>
    %306 = vector.broadcast %286 : vector<1x32xf32> to vector<16x32xf32>
    %307 = arith.addf %305, %306 : vector<16x32xf32>
    %c1_187 = arith.constant 1 : index
    %c0_188 = arith.constant 0 : index
    %c0_189 = arith.constant 0 : index
    %308 = vector.load %arg24[%c1_187, %c0_188, %c0_189] : memref<2x32x32xf32, #tpu.memory_space<vmem>>, vector<1x32x32xf32>
    %309 = vector.shape_cast %308 : vector<1x32x32xf32> to vector<32x32xf32>
    %cst_190 = arith.constant dense<0.000000e+00> : vector<16x32xf32>
    %310 = tpu.matmul %307, %309, %cst_190 {dimension_numbers = #tpu.dot_dimension_numbers<[1], [0], [0], [1], [0, 0, 1, 1], [], []>} : vector<16x32xf32>, vector<32x32xf32>, vector<16x32xf32> -> vector<16x32xf32>
    %c1_191 = arith.constant 1 : index
    %c0_192 = arith.constant 0 : index
    %c0_193 = arith.constant 0 : index
    %311 = vector.load %arg27[%c1_191, %c0_192, %c0_193] : memref<2x1x32xf32, #tpu.memory_space<vmem>>, vector<1x1x32xf32>
    %312 = vector.shape_cast %311 : vector<1x1x32xf32> to vector<1x32xf32>
    %313 = vector.broadcast %312 : vector<1x32xf32> to vector<16x32xf32>
    %314 = arith.addf %310, %313 : vector<16x32xf32>
    %c1_194 = arith.constant 1 : index
    %c0_195 = arith.constant 0 : index
    %c0_196 = arith.constant 0 : index
    %315 = vector.load %arg25[%c1_194, %c0_195, %c0_196] : memref<2x32x32xf32, #tpu.memory_space<vmem>>, vector<1x32x32xf32>
    %316 = vector.shape_cast %315 : vector<1x32x32xf32> to vector<32x32xf32>
    %cst_197 = arith.constant dense<0.000000e+00> : vector<32x32xf32>
    %317 = tpu.matmul %3, %316, %cst_197 {dimension_numbers = #tpu.dot_dimension_numbers<[1], [0], [0], [1], [0, 0, 1, 1], [], []>} : vector<32x32xf32>, vector<32x32xf32>, vector<32x32xf32> -> vector<32x32xf32>
    %c1_198 = arith.constant 1 : index
    %c0_199 = arith.constant 0 : index
    %c0_200 = arith.constant 0 : index
    %318 = vector.load %arg28[%c1_198, %c0_199, %c0_200] : memref<2x1x32xf32, #tpu.memory_space<vmem>>, vector<1x1x32xf32>
    %319 = vector.shape_cast %318 : vector<1x1x32xf32> to vector<1x32xf32>
    %320 = vector.broadcast %319 : vector<1x32xf32> to vector<32x32xf32>
    %321 = arith.addf %317, %320 : vector<32x32xf32>
    %c1_201 = arith.constant 1 : index
    %c0_202 = arith.constant 0 : index
    %c0_203 = arith.constant 0 : index
    %322 = vector.load %arg26[%c1_201, %c0_202, %c0_203] : memref<2x32x32xf32, #tpu.memory_space<vmem>>, vector<1x32x32xf32>
    %323 = vector.shape_cast %322 : vector<1x32x32xf32> to vector<32x32xf32>
    %cst_204 = arith.constant dense<0.000000e+00> : vector<32x32xf32>
    %324 = tpu.matmul %3, %323, %cst_204 {dimension_numbers = #tpu.dot_dimension_numbers<[1], [0], [0], [1], [0, 0, 1, 1], [], []>} : vector<32x32xf32>, vector<32x32xf32>, vector<32x32xf32> -> vector<32x32xf32>
    %c1_205 = arith.constant 1 : index
    %c0_206 = arith.constant 0 : index
    %c0_207 = arith.constant 0 : index
    %325 = vector.load %arg29[%c1_205, %c0_206, %c0_207] : memref<2x1x32xf32, #tpu.memory_space<vmem>>, vector<1x1x32xf32>
    %326 = vector.shape_cast %325 : vector<1x1x32xf32> to vector<1x32xf32>
    %327 = vector.broadcast %326 : vector<1x32xf32> to vector<32x32xf32>
    %328 = arith.addf %324, %327 : vector<32x32xf32>
    %cst_208 = arith.constant dense<0.000000e+00> : vector<128x32xf32>
    %329 = tpu.matmul %11, %314, %cst_208 {dimension_numbers = #tpu.dot_dimension_numbers<[1], [0], [0], [1], [0, 0, 1, 1], [], []>} : vector<128x16xf32>, vector<16x32xf32>, vector<128x32xf32> -> vector<128x32xf32>
    %330 = arith.mulf %329, %13 : vector<128x32xf32>
    %cst_209 = arith.constant dense<0.000000e+00> : vector<128x32xf32>
    %331 = tpu.matmul %330, %321, %cst_209 {dimension_numbers = #tpu.dot_dimension_numbers<[1], [1], [0], [0], [0, 0, 1, 0], [], []>} : vector<128x32xf32>, vector<32x32xf32>, vector<128x32xf32> -> vector<128x32xf32>
    %cst_210 = arith.constant 5.000000e-01 : f32
    %332 = vector.broadcast %cst_210 : f32 to vector<128x32xf32>
    %333 = arith.mulf %331, %332 : vector<128x32xf32>
    %334 = arith.addf %333, %31 : vector<128x32xf32>
    %cst_211 = arith.constant dense<0xFF800000> : vector<128xf32>
    %335 = vector.multi_reduction <maximumf>, %334, %cst_211 [1] : vector<128x32xf32> to vector<128xf32>
    %336 = vector.shape_cast %335 : vector<128xf32> to vector<128x1xf32>
    %337 = vector.broadcast %336 : vector<128x1xf32> to vector<128x32xf32>
    %338 = arith.subf %334, %337 : vector<128x32xf32>
    %339 = math.exp %338 : vector<128x32xf32>
    %cst_212 = arith.constant dense<0.000000e+00> : vector<128xf32>
    %340 = vector.multi_reduction <add>, %339, %cst_212 [1] : vector<128x32xf32> to vector<128xf32>
    %341 = vector.shape_cast %340 : vector<128xf32> to vector<128x1xf32>
    %342 = tpu.reciprocal %341 {approx = true} : vector<128x1xf32> -> vector<128x1xf32>
    %343 = vector.broadcast %342 : vector<128x1xf32> to vector<128x32xf32>
    %344 = arith.mulf %339, %343 : vector<128x32xf32>
    %cst_213 = arith.constant dense<0.000000e+00> : vector<128x32xf32>
    %345 = tpu.matmul %344, %328, %cst_213 {dimension_numbers = #tpu.dot_dimension_numbers<[1], [0], [0], [1], [0, 0, 1, 1], [], []>} : vector<128x32xf32>, vector<32x32xf32>, vector<128x32xf32> -> vector<128x32xf32>
    %346 = arith.mulf %345, %13 : vector<128x32xf32>
    %cst_214 = arith.constant dense<0.000000e+00> : vector<16x32xf32>
    %347 = tpu.matmul %12, %346, %cst_214 {dimension_numbers = #tpu.dot_dimension_numbers<[1], [0], [0], [1], [0, 0, 1, 1], [], []>} : vector<16x128xf32>, vector<128x32xf32>, vector<16x32xf32> -> vector<16x32xf32>
    %c1_215 = arith.constant 1 : index
    %c0_216 = arith.constant 0 : index
    %c0_217 = arith.constant 0 : index
    %348 = vector.load %arg30[%c1_215, %c0_216, %c0_217] : memref<2x32x32xf32, #tpu.memory_space<vmem>>, vector<1x32x32xf32>
    %349 = vector.shape_cast %348 : vector<1x32x32xf32> to vector<32x32xf32>
    %cst_218 = arith.constant dense<0.000000e+00> : vector<16x32xf32>
    %350 = tpu.matmul %347, %349, %cst_218 {dimension_numbers = #tpu.dot_dimension_numbers<[1], [0], [0], [1], [0, 0, 1, 1], [], []>} : vector<16x32xf32>, vector<32x32xf32>, vector<16x32xf32> -> vector<16x32xf32>
    %c1_219 = arith.constant 1 : index
    %c0_220 = arith.constant 0 : index
    %c0_221 = arith.constant 0 : index
    %351 = vector.load %arg31[%c1_219, %c0_220, %c0_221] : memref<2x1x32xf32, #tpu.memory_space<vmem>>, vector<1x1x32xf32>
    %352 = vector.shape_cast %351 : vector<1x1x32xf32> to vector<1x32xf32>
    %353 = vector.broadcast %352 : vector<1x32xf32> to vector<16x32xf32>
    %354 = arith.addf %350, %353 : vector<16x32xf32>
    %355 = arith.addf %307, %354 : vector<16x32xf32>
    %356 = vector.extract_strided_slice %234 {offsets = [1, 0], sizes = [1, 32], strides = [1, 1]} : vector<3x32xf32> to vector<1x32xf32>
    %357 = vector.extract_strided_slice %236 {offsets = [1, 0], sizes = [1, 32], strides = [1, 1]} : vector<3x32xf32> to vector<1x32xf32>
    %358 = arith.mulf %355, %355 : vector<16x32xf32>
    %359 = tpu.concatenate %355, %358 in 0 : vector<16x32xf32>, vector<16x32xf32> -> vector<32x32xf32>
    %cst_222 = arith.constant dense<0.000000e+00> : vector<32xf32>
    %360 = vector.multi_reduction <add>, %359, %cst_222 [1] : vector<32x32xf32> to vector<32xf32>
    %361 = vector.shape_cast %360 : vector<32xf32> to vector<32x1xf32>
    %cst_223 = arith.constant 3.125000e-02 : f32
    %362 = vector.broadcast %cst_223 : f32 to vector<32x1xf32>
    %363 = arith.mulf %361, %362 : vector<32x1xf32>
    %364 = vector.extract_strided_slice %363 {offsets = [0, 0], sizes = [16, 1], strides = [1, 1]} : vector<32x1xf32> to vector<16x1xf32>
    %365 = vector.extract_strided_slice %363 {offsets = [16, 0], sizes = [16, 1], strides = [1, 1]} : vector<32x1xf32> to vector<16x1xf32>
    %366 = arith.mulf %364, %364 : vector<16x1xf32>
    %367 = arith.subf %365, %366 : vector<16x1xf32>
    %368 = vector.broadcast %364 : vector<16x1xf32> to vector<16x32xf32>
    %369 = arith.subf %355, %368 : vector<16x32xf32>
    %cst_224 = arith.constant 9.99999974E-6 : f32
    %370 = vector.broadcast %cst_224 : f32 to vector<16x1xf32>
    %371 = arith.addf %367, %370 : vector<16x1xf32>
    %372 = math.rsqrt %371 : vector<16x1xf32>
    %373 = vector.broadcast %372 : vector<16x1xf32> to vector<16x32xf32>
    %374 = arith.mulf %369, %373 : vector<16x32xf32>
    %375 = vector.broadcast %356 : vector<1x32xf32> to vector<16x32xf32>
    %376 = arith.mulf %374, %375 : vector<16x32xf32>
    %377 = vector.broadcast %357 : vector<1x32xf32> to vector<16x32xf32>
    %378 = arith.addf %376, %377 : vector<16x32xf32>
    %c1_225 = arith.constant 1 : index
    %c0_226 = arith.constant 0 : index
    %c0_227 = arith.constant 0 : index
    %379 = vector.load %arg34[%c1_225, %c0_226, %c0_227] : memref<2x32x2048xf32, #tpu.memory_space<vmem>>, vector<1x32x2048xf32>
    %380 = vector.shape_cast %379 : vector<1x32x2048xf32> to vector<32x2048xf32>
    %cst_228 = arith.constant dense<0.000000e+00> : vector<16x2048xf32>
    %381 = tpu.matmul %378, %380, %cst_228 {dimension_numbers = #tpu.dot_dimension_numbers<[1], [0], [0], [1], [0, 0, 1, 1], [], []>} : vector<16x32xf32>, vector<32x2048xf32>, vector<16x2048xf32> -> vector<16x2048xf32>
    %c1_229 = arith.constant 1 : index
    %c0_230 = arith.constant 0 : index
    %c0_231 = arith.constant 0 : index
    %382 = vector.load %arg35[%c1_229, %c0_230, %c0_231] : memref<2x1x2048xf32, #tpu.memory_space<vmem>>, vector<1x1x2048xf32>
    %383 = vector.shape_cast %382 : vector<1x1x2048xf32> to vector<1x2048xf32>
    %384 = vector.broadcast %383 : vector<1x2048xf32> to vector<16x2048xf32>
    %385 = arith.addf %381, %384 : vector<16x2048xf32>
    %cst_232 = arith.constant 0.000000e+00 : f32
    %386 = vector.broadcast %cst_232 : f32 to vector<16x2048xf32>
    %387 = arith.maximumf %385, %386 : vector<16x2048xf32>
    %c1_233 = arith.constant 1 : index
    %c0_234 = arith.constant 0 : index
    %c0_235 = arith.constant 0 : index
    %388 = vector.load %arg36[%c1_233, %c0_234, %c0_235] : memref<2x2048x32xf32, #tpu.memory_space<vmem>>, vector<1x2048x32xf32>
    %389 = vector.shape_cast %388 : vector<1x2048x32xf32> to vector<2048x32xf32>
    %cst_236 = arith.constant dense<0.000000e+00> : vector<16x32xf32>
    %390 = tpu.matmul %387, %389, %cst_236 {dimension_numbers = #tpu.dot_dimension_numbers<[1], [0], [0], [1], [0, 0, 1, 1], [], []>} : vector<16x2048xf32>, vector<2048x32xf32>, vector<16x32xf32> -> vector<16x32xf32>
    %c1_237 = arith.constant 1 : index
    %c0_238 = arith.constant 0 : index
    %c0_239 = arith.constant 0 : index
    %391 = vector.load %arg37[%c1_237, %c0_238, %c0_239] : memref<2x1x32xf32, #tpu.memory_space<vmem>>, vector<1x1x32xf32>
    %392 = vector.shape_cast %391 : vector<1x1x32xf32> to vector<1x32xf32>
    %393 = vector.broadcast %392 : vector<1x32xf32> to vector<16x32xf32>
    %394 = arith.addf %390, %393 : vector<16x32xf32>
    %395 = arith.addf %378, %394 : vector<16x32xf32>
    %396 = vector.extract_strided_slice %234 {offsets = [2, 0], sizes = [1, 32], strides = [1, 1]} : vector<3x32xf32> to vector<1x32xf32>
    %397 = vector.extract_strided_slice %236 {offsets = [2, 0], sizes = [1, 32], strides = [1, 1]} : vector<3x32xf32> to vector<1x32xf32>
    %398 = arith.mulf %395, %395 : vector<16x32xf32>
    %399 = tpu.concatenate %395, %398 in 0 : vector<16x32xf32>, vector<16x32xf32> -> vector<32x32xf32>
    %cst_240 = arith.constant dense<0.000000e+00> : vector<32xf32>
    %400 = vector.multi_reduction <add>, %399, %cst_240 [1] : vector<32x32xf32> to vector<32xf32>
    %401 = vector.shape_cast %400 : vector<32xf32> to vector<32x1xf32>
    %cst_241 = arith.constant 3.125000e-02 : f32
    %402 = vector.broadcast %cst_241 : f32 to vector<32x1xf32>
    %403 = arith.mulf %401, %402 : vector<32x1xf32>
    %404 = vector.extract_strided_slice %403 {offsets = [0, 0], sizes = [16, 1], strides = [1, 1]} : vector<32x1xf32> to vector<16x1xf32>
    %405 = vector.extract_strided_slice %403 {offsets = [16, 0], sizes = [16, 1], strides = [1, 1]} : vector<32x1xf32> to vector<16x1xf32>
    %406 = arith.mulf %404, %404 : vector<16x1xf32>
    %407 = arith.subf %405, %406 : vector<16x1xf32>
    %408 = vector.broadcast %404 : vector<16x1xf32> to vector<16x32xf32>
    %409 = arith.subf %395, %408 : vector<16x32xf32>
    %cst_242 = arith.constant 9.99999974E-6 : f32
    %410 = vector.broadcast %cst_242 : f32 to vector<16x1xf32>
    %411 = arith.addf %407, %410 : vector<16x1xf32>
    %412 = math.rsqrt %411 : vector<16x1xf32>
    %413 = vector.broadcast %412 : vector<16x1xf32> to vector<16x32xf32>
    %414 = arith.mulf %409, %413 : vector<16x32xf32>
    %415 = vector.broadcast %396 : vector<1x32xf32> to vector<16x32xf32>
    %416 = arith.mulf %414, %415 : vector<16x32xf32>
    %417 = vector.broadcast %397 : vector<1x32xf32> to vector<16x32xf32>
    %418 = arith.addf %416, %417 : vector<16x32xf32>
    %c0_243 = arith.constant 0 : index
    %c0_244 = arith.constant 0 : index
    %419 = vector.load %arg38[%c0_243, %c0_244] : memref<32x32xf32, #tpu.memory_space<vmem>>, vector<32x32xf32>
    %cst_245 = arith.constant dense<0.000000e+00> : vector<16x32xf32>
    %420 = tpu.matmul %418, %419, %cst_245 {dimension_numbers = #tpu.dot_dimension_numbers<[1], [0], [0], [1], [0, 0, 1, 1], [], []>} : vector<16x32xf32>, vector<32x32xf32>, vector<16x32xf32> -> vector<16x32xf32>
    %c0_246 = arith.constant 0 : index
    %c0_247 = arith.constant 0 : index
    %421 = vector.load %arg39[%c0_246, %c0_247] : memref<1x32xf32, #tpu.memory_space<vmem>>, vector<1x32xf32>
    %422 = vector.broadcast %421 : vector<1x32xf32> to vector<16x32xf32>
    %423 = arith.addf %420, %422 : vector<16x32xf32>
    %cst_248 = arith.constant 0.000000e+00 : f32
    %424 = vector.broadcast %cst_248 : f32 to vector<16x32xf32>
    %425 = arith.maximumf %423, %424 : vector<16x32xf32>
    %c0_249 = arith.constant 0 : index
    %c0_250 = arith.constant 0 : index
    %426 = vector.load %arg40[%c0_249, %c0_250] : memref<32x10xf32, #tpu.memory_space<vmem>>, vector<32x10xf32>
    %cst_251 = arith.constant dense<0.000000e+00> : vector<16x10xf32>
    %427 = tpu.matmul %425, %426, %cst_251 {dimension_numbers = #tpu.dot_dimension_numbers<[1], [0], [0], [1], [0, 0, 1, 1], [], []>} : vector<16x32xf32>, vector<32x10xf32>, vector<16x10xf32> -> vector<16x10xf32>
    %c0_252 = arith.constant 0 : index
    %c0_253 = arith.constant 0 : index
    %428 = vector.load %arg41[%c0_252, %c0_253] : memref<1x10xf32, #tpu.memory_space<vmem>>, vector<1x10xf32>
    %429 = vector.broadcast %428 : vector<1x10xf32> to vector<16x10xf32>
    %430 = arith.addf %427, %429 : vector<16x10xf32>
    %c0_254 = arith.constant 0 : index
    %c0_255 = arith.constant 0 : index
    %c0_256 = arith.constant 0 : index
    %431 = vector.load %arg42[%c0_254, %c0_255, %c0_256] : memref<1x16x10xf32, #tpu.memory_space<vmem>>, vector<1x16x10xf32>
    %432 = vector.shape_cast %431 : vector<1x16x10xf32> to vector<16x10xf32>
    %433 = vector.shape_cast %430 : vector<16x10xf32> to vector<1x16x10xf32>
    tpu.vector_store %arg42[%c0_254, %c0_255, %c0_256], %433 {strides = array<i32>} : memref<1x16x10xf32, #tpu.memory_space<vmem>>, vector<1x16x10xf32>,
    %434 = tpu.iota {dimensions = array<i32: 1>} : vector<16x10xi32>
    %435 = arith.sitofp %434 : vector<16x10xi32> to vector<16x10xf32>
    %cst_257 = arith.constant dense<0xFF800000> : vector<16xf32>
    %436 = vector.multi_reduction <maximumf>, %430, %cst_257 [1] : vector<16x10xf32> to vector<16xf32>
    %437 = vector.shape_cast %436 : vector<16xf32> to vector<16x1xf32>
    %438 = vector.broadcast %437 : vector<16x1xf32> to vector<16x10xf32>
    %439 = arith.cmpf oeq, %430, %438 : vector<16x10xf32>
    %cst_258 = arith.constant 1.000000e+01 : f32
    %440 = vector.broadcast %cst_258 : f32 to vector<16x10xf32>
    %441 = arith.select %439, %435, %440 : vector<16x10xi1>, vector<16x10xf32>
    %cst_259 = arith.constant dense<0x7F800000> : vector<16xf32>
    %442 = vector.multi_reduction <minimumf>, %441, %cst_259 [1] : vector<16x10xf32> to vector<16xf32>
    %443 = vector.shape_cast %442 : vector<16xf32> to vector<16x1xf32>
    %444 = arith.fptosi %443 : vector<16x1xf32> to vector<16x1xi32>
    %c0_260 = arith.constant 0 : index
    %c0_261 = arith.constant 0 : index
    %c0_262 = arith.constant 0 : index
    %445 = vector.load %arg43[%c0_260, %c0_261, %c0_262] : memref<1x16x1xi32, #tpu.memory_space<vmem>>, vector<1x16x1xi32>
    %446 = vector.shape_cast %445 : vector<1x16x1xi32> to vector<16x1xi32>
    %447 = vector.shape_cast %444 : vector<16x1xi32> to vector<1x16x1xi32>
    tpu.vector_store %arg43[%c0_260, %c0_261, %c0_262], %447 {strides = array<i32>} : memref<1x16x1xi32, #tpu.memory_space<vmem>>, vector<1x16x1xi32>,
    return
  }
  func.func @transform_0(%arg0: i32) -> (i32, i32, i32) {
    %c0_i32 = arith.constant 0 : i32
    %c0_i32_0 = arith.constant 0 : i32
    %c0_i32_1 = arith.constant 0 : i32
    return %arg0, %c0_i32, %c0_i32_0 : i32, i32, i32
  }
  func.func @transform_1(%arg0: i32) -> (i32, i32, i32) {
    %c0_i32 = arith.constant 0 : i32
    %c0_i32_0 = arith.constant 0 : i32
    %c0_i32_1 = arith.constant 0 : i32
    return %arg0, %c0_i32, %c0_i32_0 : i32, i32, i32
  }
  func.func @transform_2(%arg0: i32) -> (i32, i32, i32) {
    %c0_i32 = arith.constant 0 : i32
    %c0_i32_0 = arith.constant 0 : i32
    %c0_i32_1 = arith.constant 0 : i32
    return %arg0, %c0_i32, %c0_i32_0 : i32, i32, i32
  }
  func.func @transform_3(%arg0: i32) -> (i32, i32, i32) {
    %c0_i32 = arith.constant 0 : i32
    %c0_i32_0 = arith.constant 0 : i32
    %c0_i32_1 = arith.constant 0 : i32
    return %arg0, %c0_i32, %c0_i32_0 : i32, i32, i32
  }
  func.func @transform_4(%arg0: i32) -> (i32, i32, i32) {
    %c0_i32 = arith.constant 0 : i32
    %c0_i32_0 = arith.constant 0 : i32
    %c0_i32_1 = arith.constant 0 : i32
    return %arg0, %c0_i32, %c0_i32_0 : i32, i32, i32
  }
  func.func @transform_5(%arg0: i32) -> (i32, i32) {
    %c0_i32 = arith.constant 0 : i32
    %c0_i32_0 = arith.constant 0 : i32
    %c0_i32_1 = arith.constant 0 : i32
    return %c0_i32, %c0_i32_0 : i32, i32
  }
  func.func @transform_6(%arg0: i32) -> (i32, i32) {
    %c0_i32 = arith.constant 0 : i32
    %c0_i32_0 = arith.constant 0 : i32
    %c0_i32_1 = arith.constant 0 : i32
    return %c0_i32, %c0_i32_0 : i32, i32
  }
  func.func @transform_7(%arg0: i32) -> (i32, i32) {
    %c0_i32 = arith.constant 0 : i32
    %c0_i32_0 = arith.constant 0 : i32
    %c0_i32_1 = arith.constant 0 : i32
    return %c0_i32, %c0_i32_0 : i32, i32
  }
  func.func @transform_8(%arg0: i32) -> (i32, i32) {
    %c0_i32 = arith.constant 0 : i32
    %c0_i32_0 = arith.constant 0 : i32
    %c0_i32_1 = arith.constant 0 : i32
    return %c0_i32, %c0_i32_0 : i32, i32
  }
  func.func @transform_9(%arg0: i32) -> (i32, i32) {
    %c0_i32 = arith.constant 0 : i32
    %c0_i32_0 = arith.constant 0 : i32
    %c0_i32_1 = arith.constant 0 : i32
    return %c0_i32, %c0_i32_0 : i32, i32
  }
  func.func @transform_10(%arg0: i32) -> (i32, i32) {
    %c0_i32 = arith.constant 0 : i32
    %c0_i32_0 = arith.constant 0 : i32
    %c0_i32_1 = arith.constant 0 : i32
    return %c0_i32, %c0_i32_0 : i32, i32
  }
  func.func @transform_11(%arg0: i32) -> (i32, i32) {
    %c0_i32 = arith.constant 0 : i32
    %c0_i32_0 = arith.constant 0 : i32
    %c0_i32_1 = arith.constant 0 : i32
    return %c0_i32, %c0_i32_0 : i32, i32
  }
  func.func @transform_12(%arg0: i32) -> (i32, i32) {
    %c0_i32 = arith.constant 0 : i32
    %c0_i32_0 = arith.constant 0 : i32
    %c0_i32_1 = arith.constant 0 : i32
    return %c0_i32, %c0_i32_0 : i32, i32
  }
  func.func @transform_13(%arg0: i32) -> (i32, i32) {
    %c0_i32 = arith.constant 0 : i32
    %c0_i32_0 = arith.constant 0 : i32
    %c0_i32_1 = arith.constant 0 : i32
    return %c0_i32, %c0_i32_0 : i32, i32
  }
  func.func @transform_14(%arg0: i32) -> (i32, i32) {
    %c0_i32 = arith.constant 0 : i32
    %c0_i32_0 = arith.constant 0 : i32
    %c0_i32_1 = arith.constant 0 : i32
    return %c0_i32, %c0_i32_0 : i32, i32
  }
  func.func @transform_15(%arg0: i32) -> (i32, i32, i32) {
    %c0_i32 = arith.constant 0 : i32
    %c0_i32_0 = arith.constant 0 : i32
    %c0_i32_1 = arith.constant 0 : i32
    %c0_i32_2 = arith.constant 0 : i32
    return %c0_i32, %c0_i32_0, %c0_i32_1 : i32, i32, i32
  }
  func.func @transform_16(%arg0: i32) -> (i32, i32, i32) {
    %c0_i32 = arith.constant 0 : i32
    %c0_i32_0 = arith.constant 0 : i32
    %c0_i32_1 = arith.constant 0 : i32
    %c0_i32_2 = arith.constant 0 : i32
    return %c0_i32, %c0_i32_0, %c0_i32_1 : i32, i32, i32
  }
  func.func @transform_17(%arg0: i32) -> (i32, i32, i32) {
    %c0_i32 = arith.constant 0 : i32
    %c0_i32_0 = arith.constant 0 : i32
    %c0_i32_1 = arith.constant 0 : i32
    %c0_i32_2 = arith.constant 0 : i32
    return %c0_i32, %c0_i32_0, %c0_i32_1 : i32, i32, i32
  }
  func.func @transform_18(%arg0: i32) -> (i32, i32, i32) {
    %c0_i32 = arith.constant 0 : i32
    %c0_i32_0 = arith.constant 0 : i32
    %c0_i32_1 = arith.constant 0 : i32
    %c0_i32_2 = arith.constant 0 : i32
    return %c0_i32, %c0_i32_0, %c0_i32_1 : i32, i32, i32
  }
  func.func @transform_19(%arg0: i32) -> (i32, i32, i32) {
    %c0_i32 = arith.constant 0 : i32
    %c0_i32_0 = arith.constant 0 : i32
    %c0_i32_1 = arith.constant 0 : i32
    %c0_i32_2 = arith.constant 0 : i32
    return %c0_i32, %c0_i32_0, %c0_i32_1 : i32, i32, i32
  }
  func.func @transform_20(%arg0: i32) -> (i32, i32, i32) {
    %c0_i32 = arith.constant 0 : i32
    %c0_i32_0 = arith.constant 0 : i32
    %c0_i32_1 = arith.constant 0 : i32
    %c0_i32_2 = arith.constant 0 : i32
    return %c0_i32, %c0_i32_0, %c0_i32_1 : i32, i32, i32
  }
  func.func @transform_21(%arg0: i32) -> (i32, i32, i32) {
    %c0_i32 = arith.constant 0 : i32
    %c0_i32_0 = arith.constant 0 : i32
    %c0_i32_1 = arith.constant 0 : i32
    %c0_i32_2 = arith.constant 0 : i32
    return %c0_i32, %c0_i32_0, %c0_i32_1 : i32, i32, i32
  }
  func.func @transform_22(%arg0: i32) -> (i32, i32, i32) {
    %c0_i32 = arith.constant 0 : i32
    %c0_i32_0 = arith.constant 0 : i32
    %c0_i32_1 = arith.constant 0 : i32
    %c0_i32_2 = arith.constant 0 : i32
    return %c0_i32, %c0_i32_0, %c0_i32_1 : i32, i32, i32
  }
  func.func @transform_23(%arg0: i32) -> (i32, i32, i32) {
    %c0_i32 = arith.constant 0 : i32
    %c0_i32_0 = arith.constant 0 : i32
    %c0_i32_1 = arith.constant 0 : i32
    %c0_i32_2 = arith.constant 0 : i32
    return %c0_i32, %c0_i32_0, %c0_i32_1 : i32, i32, i32
  }
  func.func @transform_24(%arg0: i32) -> (i32, i32, i32) {
    %c0_i32 = arith.constant 0 : i32
    %c0_i32_0 = arith.constant 0 : i32
    %c0_i32_1 = arith.constant 0 : i32
    %c0_i32_2 = arith.constant 0 : i32
    return %c0_i32, %c0_i32_0, %c0_i32_1 : i32, i32, i32
  }
  func.func @transform_25(%arg0: i32) -> (i32, i32, i32) {
    %c0_i32 = arith.constant 0 : i32
    %c0_i32_0 = arith.constant 0 : i32
    %c0_i32_1 = arith.constant 0 : i32
    %c0_i32_2 = arith.constant 0 : i32
    return %c0_i32, %c0_i32_0, %c0_i32_1 : i32, i32, i32
  }
  func.func @transform_26(%arg0: i32) -> (i32, i32, i32) {
    %c0_i32 = arith.constant 0 : i32
    %c0_i32_0 = arith.constant 0 : i32
    %c0_i32_1 = arith.constant 0 : i32
    %c0_i32_2 = arith.constant 0 : i32
    return %c0_i32, %c0_i32_0, %c0_i32_1 : i32, i32, i32
  }
  func.func @transform_27(%arg0: i32) -> (i32, i32, i32) {
    %c0_i32 = arith.constant 0 : i32
    %c0_i32_0 = arith.constant 0 : i32
    %c0_i32_1 = arith.constant 0 : i32
    %c0_i32_2 = arith.constant 0 : i32
    return %c0_i32, %c0_i32_0, %c0_i32_1 : i32, i32, i32
  }
  func.func @transform_28(%arg0: i32) -> (i32, i32, i32) {
    %c0_i32 = arith.constant 0 : i32
    %c0_i32_0 = arith.constant 0 : i32
    %c0_i32_1 = arith.constant 0 : i32
    %c0_i32_2 = arith.constant 0 : i32
    return %c0_i32, %c0_i32_0, %c0_i32_1 : i32, i32, i32
  }
  func.func @transform_29(%arg0: i32) -> (i32, i32, i32) {
    %c0_i32 = arith.constant 0 : i32
    %c0_i32_0 = arith.constant 0 : i32
    %c0_i32_1 = arith.constant 0 : i32
    %c0_i32_2 = arith.constant 0 : i32
    return %c0_i32, %c0_i32_0, %c0_i32_1 : i32, i32, i32
  }
  func.func @transform_30(%arg0: i32) -> (i32, i32, i32) {
    %c0_i32 = arith.constant 0 : i32
    %c0_i32_0 = arith.constant 0 : i32
    %c0_i32_1 = arith.constant 0 : i32
    %c0_i32_2 = arith.constant 0 : i32
    return %c0_i32, %c0_i32_0, %c0_i32_1 : i32, i32, i32
  }
  func.func @transform_31(%arg0: i32) -> (i32, i32, i32) {
    %c0_i32 = arith.constant 0 : i32
    %c0_i32_0 = arith.constant 0 : i32
    %c0_i32_1 = arith.constant 0 : i32
    %c0_i32_2 = arith.constant 0 : i32
    return %c0_i32, %c0_i32_0, %c0_i32_1 : i32, i32, i32
  }
  func.func @transform_32(%arg0: i32) -> (i32, i32, i32) {
    %c0_i32 = arith.constant 0 : i32
    %c0_i32_0 = arith.constant 0 : i32
    %c0_i32_1 = arith.constant 0 : i32
    %c0_i32_2 = arith.constant 0 : i32
    return %c0_i32, %c0_i32_0, %c0_i32_1 : i32, i32, i32
  }
  func.func @transform_33(%arg0: i32) -> (i32, i32, i32) {
    %c0_i32 = arith.constant 0 : i32
    %c0_i32_0 = arith.constant 0 : i32
    %c0_i32_1 = arith.constant 0 : i32
    %c0_i32_2 = arith.constant 0 : i32
    return %c0_i32, %c0_i32_0, %c0_i32_1 : i32, i32, i32
  }
  func.func @transform_34(%arg0: i32) -> (i32, i32, i32) {
    %c0_i32 = arith.constant 0 : i32
    %c0_i32_0 = arith.constant 0 : i32
    %c0_i32_1 = arith.constant 0 : i32
    %c0_i32_2 = arith.constant 0 : i32
    return %c0_i32, %c0_i32_0, %c0_i32_1 : i32, i32, i32
  }
  func.func @transform_35(%arg0: i32) -> (i32, i32, i32) {
    %c0_i32 = arith.constant 0 : i32
    %c0_i32_0 = arith.constant 0 : i32
    %c0_i32_1 = arith.constant 0 : i32
    %c0_i32_2 = arith.constant 0 : i32
    return %c0_i32, %c0_i32_0, %c0_i32_1 : i32, i32, i32
  }
  func.func @transform_36(%arg0: i32) -> (i32, i32, i32) {
    %c0_i32 = arith.constant 0 : i32
    %c0_i32_0 = arith.constant 0 : i32
    %c0_i32_1 = arith.constant 0 : i32
    %c0_i32_2 = arith.constant 0 : i32
    return %c0_i32, %c0_i32_0, %c0_i32_1 : i32, i32, i32
  }
  func.func @transform_37(%arg0: i32) -> (i32, i32) {
    %c0_i32 = arith.constant 0 : i32
    %c0_i32_0 = arith.constant 0 : i32
    %c0_i32_1 = arith.constant 0 : i32
    return %c0_i32, %c0_i32_0 : i32, i32
  }
  func.func @transform_38(%arg0: i32) -> (i32, i32) {
    %c0_i32 = arith.constant 0 : i32
    %c0_i32_0 = arith.constant 0 : i32
    %c0_i32_1 = arith.constant 0 : i32
    return %c0_i32, %c0_i32_0 : i32, i32
  }
  func.func @transform_39(%arg0: i32) -> (i32, i32) {
    %c0_i32 = arith.constant 0 : i32
    %c0_i32_0 = arith.constant 0 : i32
    %c0_i32_1 = arith.constant 0 : i32
    return %c0_i32, %c0_i32_0 : i32, i32
  }
  func.func @transform_40(%arg0: i32) -> (i32, i32) {
    %c0_i32 = arith.constant 0 : i32
    %c0_i32_0 = arith.constant 0 : i32
    %c0_i32_1 = arith.constant 0 : i32
    return %c0_i32, %c0_i32_0 : i32, i32
  }
  func.func @transform_41(%arg0: i32) -> (i32, i32, i32) {
    %c0_i32 = arith.constant 0 : i32
    %c0_i32_0 = arith.constant 0 : i32
    %c0_i32_1 = arith.constant 0 : i32
    return %arg0, %c0_i32, %c0_i32_0 : i32, i32, i32
  }
  func.func @transform_42(%arg0: i32) -> (i32, i32, i32) {
    %c0_i32 = arith.constant 0 : i32
    %c0_i32_0 = arith.constant 0 : i32
    %c0_i32_1 = arith.constant 0 : i32
    return %arg0, %c0_i32, %c0_i32_0 : i32, i32, i32
  }
}

</mosaic_0001>

<bundles_post_ra>
// kernel: seq2seq_decoder_forward.1
= control target key start
LH: loop header
LB: loop body
LE: loop exit
PB: predicated region body
PF: predicated region fallthrough
CT: control target
= control target key end

     0   :  { %s7444_s6 = smov 1   ;;  %s7445_s10 = smov 2   ;;  %s10232_s0 = inlined_call_operand.smem [shape: u32[43], index: -1, kind: input, shape index: {}] }
   0x1   :  { %s7499_s5 = sld [smem:[%s10232_s0]]   ;;  %s7446_s14 = smov 3  }
   0x2   :  { %s7504_s9 = sld [smem:[%s10232_s0 + %s7444_s6]]   ;;  %s7447_s18 = smov 4  }
   0x3   :  { %s7509_s13 = sld [smem:[%s10232_s0 + %s7445_s10]]   ;;  %s7448_s22 = smov 5  }
   0x4   :  { %s7514_s17 = sld [smem:[%s10232_s0 + %s7446_s14]]   ;;  %s7449_s26 = smov 6  }
   0x5   :  { %s7519_s21 = sld [smem:[%s10232_s0 + %s7447_s18]]   ;;  %s7450_s30 = smov 7  }
   0x6   :  { %s7524_s25 = sld [smem:[%s10232_s0 + %s7448_s22]]   ;;  %s7451_s4 = smov 8  }
   0x7   :  { %s7529_s29 = sld [smem:[%s10232_s0 + %s7449_s26]]   ;;  %s7452_s10 = smov 9  }
   0x8   :  { %s7534_s3 = sld [smem:[%s10232_s0 + %s7450_s30]]   ;;  %s7453_s15 = smov 10  }
   0x9   :  { %s7539_s8 = sld [smem:[%s10232_s0 + %s7451_s4]]   ;;  %s7454_s20 = smov 11  }
   0xa   :  { %s7544_s14 = sld [smem:[%s10232_s0 + %s7452_s10]]   ;;  %s7455_s26 = smov 12  }
   0xb   :  { %10274 = sst [smem:[#allocation5_spill]] %s7519_s21  ;;  %s7456_s1 = smov 13  }
   0xc   :  { %s7549_s19 = sld [smem:[%s10232_s0 + %s7453_s15]]   ;;  %s7457_s7 = smov 14  }
   0xd   :  { %10275 = sst [smem:[#allocation6_spill]] %s7529_s29  ;;  %s7458_s15 = smov 15  }
   0xe   :  { %10276 = sst [smem:[#allocation7_spill]] %s7534_s3  ;;  %s7459_s22 = smov 16  }
   0xf   :  { %10277 = sst [smem:[#allocation8_spill]] %s7539_s8  ;;  %s7460_s28 = smov 17  }
  0x10   :  { %s7554_s24 = sld [smem:[%s10232_s0 + %s7454_s20]]  }
  0x11   :  { %s7559_s30 = sld [smem:[%s10232_s0 + %s7455_s26]]  }
  0x12   :  { %s7564_s6 = sld [smem:[%s10232_s0 + %s7456_s1]]  }
  0x13   :  { %s7569_s12 = sld [smem:[%s10232_s0 + %s7457_s7]]   ;;  %s7461_s7 = smov 18  }
  0x14   :  { %s7574_s20 = sld [smem:[%s10232_s0 + %s7458_s15]]   ;;  %s7462_s15 = smov 19  }
  0x15   :  { %s7579_s27 = sld [smem:[%s10232_s0 + %s7459_s22]]   ;;  %s7463_s22 = smov 20  }
  0x16   :  { %s7584_s4 = sld [smem:[%s10232_s0 + %s7460_s28]]   ;;  %s7464_s28 = smov 21  }
  0x17   :  { %s7589_s3 = sld [smem:[%s10232_s0 + %s7461_s7]]   ;;  %s7465_s7 = smov 22  }
  0x18   :  { %s7594_s8 = sld [smem:[%s10232_s0 + %s7462_s15]]   ;;  %s7466_s15 = smov 23  }
  0x19   :  { %s7599_s21 = sld [smem:[%s10232_s0 + %s7463_s22]]   ;;  %s7467_s22 = smov 24  }
  0x1a   :  { %s7604_s29 = sld [smem:[%s10232_s0 + %s7464_s28]]   ;;  %s7468_s28 = smov 25  }
  0x1d   :  { %10278 = sst [smem:[#allocation9_spill]] %s7589_s3 }
  0x1e   :  { %10279 = sst [smem:[#allocation10_spill]] %s7594_s8 }
  0x1f   :  { %10280 = sst [smem:[#allocation11_spill]] %s7599_s21 }
  0x20   :  { %10281 = sst [smem:[#allocation12_spill]] %s7604_s29 }
  0x21   :  { %s7609_s3 = sld [smem:[%s10232_s0 + %s7465_s7]]   ;;  %s7469_s7 = smov 26  }
  0x22   :  { %s7614_s8 = sld [smem:[%s10232_s0 + %s7466_s15]]   ;;  %s7470_s15 = smov 27  }
  0x23   :  { %s7619_s21 = sld [smem:[%s10232_s0 + %s7467_s22]]   ;;  %s7471_s22 = smov 28  }
  0x24   :  { %s7624_s29 = sld [smem:[%s10232_s0 + %s7468_s28]]   ;;  %s7472_s28 = smov 29  }
  0x27   :  { %10282 = sst [smem:[#allocation13_spill]] %s7609_s3 }
  0x28   :  { %10283 = sst [smem:[#allocation14_spill]] %s7614_s8 }
  0x29   :  { %10284 = sst [smem:[#allocation15_spill]] %s7619_s21 }
  0x2a   :  { %10285 = sst [smem:[#allocation16_spill]] %s7624_s29 }
  0x2b   :  { %s7629_s3 = sld [smem:[%s10232_s0 + %s7469_s7]]   ;;  %s7473_s7 = smov 30  }
  0x2c   :  { %s7634_s8 = sld [smem:[%s10232_s0 + %s7470_s15]]   ;;  %s7474_s15 = smov 31  }
  0x2d   :  { %s7639_s21 = sld [smem:[%s10232_s0 + %s7471_s22]]   ;;  %s7475_s22 = smov 32  }
  0x2e   :  { %s7644_s29 = sld [smem:[%s10232_s0 + %s7472_s28]]   ;;  %s7476_s28 = smov 33  }
  0x31   :  { %10286 = sst [smem:[#allocation17_spill]] %s7629_s3 }
  0x32   :  { %10287 = sst [smem:[#allocation18_spill]] %s7634_s8 }
  0x33   :  { %10288 = sst [smem:[#allocation19_spill]] %s7639_s21 }
  0x34   :  { %10289 = sst [smem:[#allocation20_spill]] %s7644_s29 }
  0x35   :  { %s7649_s3 = sld [smem:[%s10232_s0 + %s7473_s7]]   ;;  %s7477_s7 = smov 34  }
  0x36   :  { %s7654_s8 = sld [smem:[%s10232_s0 + %s7474_s15]]   ;;  %s7478_s15 = smov 35  }
  0x37   :  { %s7659_s21 = sld [smem:[%s10232_s0 + %s7475_s22]]   ;;  %s7479_s22 = smov 36  }
  0x38   :  { %s7664_s29 = sld [smem:[%s10232_s0 + %s7476_s28]]   ;;  %s7480_s28 = smov 37  }
  0x3b   :  { %10290 = sst [smem:[#allocation21_spill]] %s7649_s3 }
  0x3c   :  { %10291 = sst [smem:[#allocation22_spill]] %s7654_s8 }
  0x3d   :  { %10292 = sst [smem:[#allocation23_spill]] %s7659_s21 }
  0x3e   :  { %10293 = sst [smem:[#allocation24_spill]] %s7664_s29 }
  0x3f   :  { %s7669_s3 = sld [smem:[%s10232_s0 + %s7477_s7]]   ;;  %s7481_s7 = smov 38  }
  0x40   :  { %s7674_s8 = sld [smem:[%s10232_s0 + %s7478_s15]]   ;;  %s7482_s15 = smov 39  }
  0x41   :  { %s7679_s21 = sld [smem:[%s10232_s0 + %s7479_s22]]   ;;  %s7483_s22 = smov 40  }
  0x42   :  { %s7684_s29 = sld [smem:[%s10232_s0 + %s7480_s28]]   ;;  %s7484_s28 = smov 41  }
  0x45   :  { %10294 = sst [smem:[#allocation25_spill]] %s7669_s3 }
  0x46   :  { %10295 = sst [smem:[#allocation26_spill]] %s7674_s8 }
  0x47   :  { %10296 = sst [smem:[#allocation27_spill]] %s7679_s21 }
  0x48   :  { %10297 = sst [smem:[#allocation28_spill]] %s7684_s29 }
  0x49   :  { %s7689_s3 = sld [smem:[%s10232_s0 + %s7481_s7]]   ;;  %s7485_s7 = smov 42  }
  0x4a   :  { %s7694_s8 = sld [smem:[%s10232_s0 + %s7482_s15]]  }
  0x4b   :  { %s7699_s21 = sld [smem:[%s10232_s0 + %s7483_s22]]  }
  0x4c   :  { %s7704_s29 = sld [smem:[%s10232_s0 + %s7484_s28]]  }
  0x4f   :  { %10298 = sst [smem:[#allocation29_spill]] %s7689_s3 }
  0x50   :  { %s7709_s3 = sld [smem:[%s10232_s0 + %s7485_s7]]  }
  0x51   :  { %v179_v0 = vld [vmem:[%s7504_s9 + $0x18] sm:$0xff]  ;;  %v178_v1 = vld [vmem:[%s7504_s9 + $0x10] sm:$0xff]  ;;  %v432_v2 = vld [vmem:[%s7559_s30 + $0x8] sm:$0xff]  ;;  %vm245_vm0 = vcmask 130048   ;;  %vm465_vm1 = vcmask 261120  }
  0x52   :  { %481 = vmatpush.msra.mxu3 %v179_v0  ;;  %v177_v3 = vld [vmem:[%s7504_s9 + $0x8] sm:$0xff]  ;;  %453 = vmatpush.msra.mxu2 %v432_v2  ;;  %v431_v4 = vld [vmem:[%s7559_s30] sm:$0xff]  ;;  %v492_v8 = vld [vmem:[%s7564_s6 + $0x18] sm:$0xff] }
  0x53   :  { %v174_v5 = vld [vmem:[%s7499_s5] sm:$0xff]  ;;  %v491_v9 = vld [vmem:[%s7564_s6 + $0x10] sm:$0xff]  ;;  %v175_v10 = vld [vmem:[%s7499_s5 + $0x8] sm:$0xff] }
  0x54   :  { %482 = vmatpush.msra.mxu3 %v178_v1  ;;  %v176_v6 = vld [vmem:[%s7504_s9] sm:$0xff]  ;;  %454 = vmatpush.msra.mxu2 %v431_v4  ;;  %v490_v11 = vld [vmem:[%s7564_s6 + $0x8] sm:$0xff] }
  0x55   :  { %v464_v7 = vld [vmem:[%s7549_s19] sm:$0x3]  ;;  %6253 = vmatmul.msk.f32.vlgmr.msra.gmra.mxu2 %vm245_vm0, %v174_v5 }
  0x56   :  { %483 = vmatpush.msra.mxu3 %v177_v3 }
  0x58   :  { %484 = vmatpush.msra.mxu3 %v176_v6 }
  0x59   :  { %6255 = vmatmul.msk.f32.vlgmr.msra.gmra.mxu3 %vm465_vm1, %v464_v7 }
  0x5a   :  { %512 = vmatpush.msrb.mxu3 %v492_v8 }
  0x5c   :  { %513 = vmatpush.msrb.mxu3 %v491_v9 }
  0x5d   :  { %91 = vsyncpa [#allocation3], 0  ;;  %6254 = vmatmul.msk.f32.gmra.mxu2 %vm245_vm0, %v175_v10  ;;  %v489_v12 = vld [vmem:[%s7564_s6] sm:$0xff]  ;;  %v463_v17 = vld [vmem:[%s7544_s14 + $0x8] sm:$0xff]  ;;  %vm530_vm2 = vcmask 1041408   ;;  %vm523_vm3 = vcmask 15360   ;;  %v219_v47 = vlaneseq }
  0x5e   :  { %514 = vmatpush.msrb.mxu3 %v490_v11  ;;  %v462_v16 = vld [vmem:[%s7544_s14] sm:$0xff]  ;;  %v628_v18 = vld [vmem:[%s7579_s27 + $0x18] sm:$0xff]  ;;  %v627_v19 = vld [vmem:[%s7579_s27 + $0x10] sm:$0xff]  ;;  %v7486_v39 = vmov 0   ;;  %s10299_s0 = sld [smem:[#allocation6_spill]] }
  0x5f   :  { %v7013_v20 = vld [vmem:[%s7569_s12] ss:$0 sm:$0xff]  ;;  %v591_v26 = vld [vmem:[%s7574_s20 + $0x18] sm:$0xff]  ;;  %v590_v27 = vld [vmem:[%s7574_s20 + $0x10] sm:$0xff]  ;;  %7012 = vset.pattern.permute.xlu0 %v7486_v39  ;;  %v220_v49 = vshrl.u32 %v219_v47, 7  ;;  %v7769_v51 = vand.u32 127, %v219_v47 }
  0x60   :  { %515 = vmatpush.msrb.mxu3 %v489_v12  ;;  %v180_v21 = vld [vmem:[%s7509_s13] sm:$0x3]  ;;  %v522_v28 = vld [vmem:[%s7554_s24 + $0x8] sm:$0xff]  ;;  %v659_v33 = vld [vmem:[%s7584_s4 + $0x18] sm:$0xff]  ;;  %s10301_s5 = sld [smem:[#allocation9_spill]] }
  0x61   :  { %v521_v25 = vld [vmem:[%s7554_s24] sm:$0xff]  ;;  %v589_v29 = vld [vmem:[%s7574_s20 + $0x8] sm:$0xff]  ;;  %v658_v34 = vld [vmem:[%s7584_s4 + $0x10] sm:$0xff]  ;;  %v221_v50 = vadd.s32 8, %v220_v49  ;;  %10300 = vst [vmem:[#allocation30_spill] sm:$0xff] %v7769_v51  ;;  %s10302_s13 = sld [smem:[#allocation10_spill]]  ;;  %vm239_vm9 = vcmp.le.s32.totalorder %v7769_v51, %v220_v49 }
  0x62   :  { %v626_v30 = vld [vmem:[%s7579_s27 + $0x8] sm:$0xff]  ;;  %v588_v31 = vld [vmem:[%s7574_s20] sm:$0xff]  ;;  %v7487_v53 = vmov -1e+30   ;;  %s10305_s14 = sld [smem:[#allocation8_spill]] }
  0x63   :  { %v625_v32 = vld [vmem:[%s7579_s27] sm:$0xff]  ;;  %v657_v35 = vld [vmem:[%s7584_s4 + $0x8] sm:$0xff]  ;;  %vm240_vm5 = vcmp.le.s32.totalorder %v7769_v51, %v221_v50  ;;  %s10310_s19 = sld [smem:[#allocation7_spill]] }
  0x64   :  { %v656_v36 = vld [vmem:[%s7584_s4] sm:$0xff]  ;;  %v184_v37 = vld [vmem:[%s7524_s25 + $0x8] sm:$0xff]  ;;  %v187_v1 = vld [vmem:[%s10299_s0 + $0x10] sm:$0xff]  ;;  %s10312_s24 = sld [smem:[#allocation12_spill]] }
  0x65   :  { %234 = vperm.xlu0 %7012, %v184_v37   ;;  %v183_v42 = vld [vmem:[%s7524_s25] sm:$0xff]  ;;  %v186_v57 = vld [vmem:[%s10299_s0 + $0x8] sm:$0xff]  ;;  %v188_v4 = vld [vmem:[%s10299_s0 + $0x18] sm:$0xff]  ;;  %s10304_s25 = sld [smem:[#allocation5_spill]] }
  0x66   :  { %v7016_v48 = vld [vmem:[%s7514_s17] ss:$0 sm:$0xff]  ;;  %s10303_s17 = sld [smem:[#allocation11_spill]]  ;;  %v190_v10 = vld [vmem:[%s10299_s0 + $0x28] sm:$0xff]  ;;  %v191_v11 = vld [vmem:[%s10299_s0 + $0x30] sm:$0xff] }
  0x67   :  { %v7779_v54 = vld [vmem:[%s10299_s0] sm:$0xff]  ;;  %v192_v12 = vld [vmem:[%s10299_s0 + $0x38] sm:$0xff]  ;;  %s10318_s30 = sld [smem:[#allocation13_spill]] }
  0x68   :  { %v7014_v58 = vld [vmem:[%s10301_s5] ss:$0 sm:$0xff]  ;;  %v7877_v37 = vld [vmem:[%s10305_s14 + $0x28] sm:$0xff]  ;;  %s10326_s6 = sld [smem:[#allocation14_spill]] }
  0x69   :  { %v7015_v59 = vld [vmem:[%s10302_s13] ss:$0 sm:$0xff]  ;;  %s10327_s12 = sld [smem:[#allocation15_spill]] }
  0x6a   :  { %v189_v9 = vld [vmem:[%s10299_s0 + $0x20] sm:$0xff]  ;;  %s10328_s15 = sld [smem:[#allocation22_spill]] }
  0x6b   :  { %s10329_s16 = sld [smem:[#allocation23_spill]] }
  0x6c   :  { %v7018_v5 = vld [vmem:[%s10303_s17] ss:$0 sm:$0xff]  ;;  %s10330_s18 = sld [smem:[#allocation17_spill]] }
  0x6d   :  { %229 = vperm.xlu0 %7012, %v183_v42   ;;  %s10331_s22 = sld [smem:[#allocation18_spill]] }
  0x6e   :  { %s10332_s23 = sld [smem:[#allocation16_spill]] }
  0x6f   :  { %s10333_s26 = sld [smem:[#allocation19_spill]] }
  0x70   :  { %s10334_s28 = sld [smem:[#allocation20_spill]] }
  0x71   :  { %s10335_s1 = sld [smem:[#allocation21_spill]] }
  0x72   :  { %s10336_s2 = sld [smem:[#allocation24_spill]] }
  0x73   :  { %s10337_s7 = sld [smem:[#allocation26_spill]] }
  0x74   :  { %s10338_s10 = sld [smem:[#allocation25_spill]] }
  0x75   :  { %s10339_s11 = sld [smem:[#allocation27_spill]] }
  0xd7   :  { %v7766_v46 = vpop.permute.xlu0 %234 }
  0xd8   :  { %v456_v13 = vpop.f32.mrf.mxu2  ;;  %vm238_vm4 = vcmp.eq.f32.partialorder %v7016_v48, %v7766_v46 }
  0xd9   :  { %vm242_vm7 = vmand %vm238_vm4, %vm240_vm5 }
  0xda   :  { %vm6213_vm8 = vmneg %vm242_vm7 }
  0xdb   :  { %6214 = vmatpush.msk.msra.mxu0 %vm6213_vm8, %v7487_v53 }
  0xdc   :  { %v486_v14 = vpop.f32.mrf.mxu3 }
  0xdd   :  { %6256 = vmatmul.msk.f32.vlgmr.msrb.gmra.mxu3 %vm465_vm1, %v486_v14  ;;  %v7017_v14 = vld [vmem:[%s10304_s25] ss:$0 sm:$0xff] }
  0xde   :  { %vm363_vm12 = vcmp.eq.f32.partialorder %v7017_v14, %v7766_v46 }
  0xdf   :  { %v7771_v52 = vpop.permute.xlu0 %229  ;;  %vm6233_vm13 = vmneg %vm363_vm12 }
  0xe0   :  { %v459_v15 = vpop.f32.mrf.mxu2  ;;  %vm237_vm6 = vcmp.eq.f32.partialorder %v7016_v48, %v7771_v52  ;;  %6234 = vmatpush.msk.msra.mxu1 %vm6233_vm13, %v7487_v53  ;;  %vm362_vm14 = vcmp.eq.f32.partialorder %v7017_v14, %v7771_v52  ;;  %v7895_v48 = vld [vmem:[%s10305_s14 + $0x40] sm:$0xff]  ;;  %v7901_v52 = vld [vmem:[%s10305_s14 + $0x48] sm:$0xff] }
  0xe1   :  { %577 = vmatpush.msra.mxu3 %v459_v15  ;;  %vm241_vm10 = vmand %vm237_vm6, %vm239_vm9  ;;  %v194_v15 = vld [vmem:[%s10299_s0 + $0x48] sm:$0xff] }
  0xe2   :  { %vm6215_vm11 = vmneg %vm241_vm10 }
  0xe3   :  { %578 = vmatpush.msra.mxu3 %v456_v13  ;;  %6216 = vmatpush.msk.msra.mxu0 %vm6215_vm11, %v7487_v53  ;;  %v193_v13 = vld [vmem:[%s10299_s0 + $0x40] sm:$0xff]  ;;  %vm6235_vm15 = vmneg %vm362_vm14 }
  0xe4   :  { %6217 = vmatmul.msk.f32.vlgmr.msra.gmra.mxu0 %vm245_vm0, %v7779_v54  ;;  %6236 = vmatpush.msk.msra.mxu1 %vm6235_vm15, %v7487_v53 }
  0xe5   :  { %6260 = vmatmul.msk.f32.vlgmr.msra.gmra.mxu3 %vm245_vm0, %v462_v16  ;;  %v195_v16 = vld [vmem:[%s10299_s0 + $0x50] sm:$0xff]  ;;  %6237 = vmatmul.msk.f32.vlgmr.msra.gmra.mxu1 %vm245_vm0, %v7779_v54 }
  0xe6   :  { %645 = vmatpush.msrb.mxu3 %v628_v18  ;;  %v7835_v18 = vld [vmem:[%s10305_s14] sm:$0xff] }
  0xe8   :  { %646 = vmatpush.msrb.mxu3 %v627_v19 }
  0xea   :  { %647 = vmatpush.msrb.mxu3 %v626_v30  ;;  %v7862_v30 = vld [vmem:[%s10305_s14 + $0x18] sm:$0xff] }
  0xec   :  { %648 = vmatpush.msrb.mxu3 %v625_v32  ;;  %6218 = vmatmul.msk.f32.gmra.mxu0 %vm245_vm0, %v186_v57 }
  0xed   :  { %6261 = vmatmul.msk.f32.gmra.mxu3 %vm245_vm0, %v463_v17  ;;  %v196_v17 = vld [vmem:[%s10299_s0 + $0x58] sm:$0xff]  ;;  %6238 = vmatmul.msk.f32.gmra.mxu1 %vm245_vm0, %v186_v57 }
  0xf4   :  { %6219 = vmatmul.msk.f32.gmra.mxu0 %vm245_vm0, %v187_v1 }
  0xf5   :  { %6239 = vmatmul.msk.f32.gmra.mxu1 %vm245_vm0, %v187_v1 }
  0xfc   :  { %6220 = vmatmul.msk.f32.gmra.mxu0 %vm245_vm0, %v188_v4 }
  0xfd   :  { %6240 = vmatmul.msk.f32.gmra.mxu1 %vm245_vm0, %v188_v4 }
 0x104   :  { %6221 = vmatmul.msk.f32.gmra.mxu0 %vm245_vm0, %v189_v9 }
 0x105   :  { %6241 = vmatmul.msk.f32.gmra.mxu1 %vm245_vm0, %v189_v9 }
 0x10c   :  { %6222 = vmatmul.msk.f32.gmra.mxu0 %vm245_vm0, %v190_v10 }
 0x10d   :  { %6242 = vmatmul.msk.f32.gmra.mxu1 %vm245_vm0, %v190_v10 }
 0x114   :  { %6223 = vmatmul.msk.f32.gmra.mxu0 %vm245_vm0, %v191_v11 }
 0x115   :  { %6243 = vmatmul.msk.f32.gmra.mxu1 %vm245_vm0, %v191_v11 }
 0x11c   :  { %6224 = vmatmul.msk.f32.gmra.mxu0 %vm245_vm0, %v192_v12 }
 0x11d   :  { %6244 = vmatmul.msk.f32.gmra.mxu1 %vm245_vm0, %v192_v12 }
 0x124   :  { %6225 = vmatmul.msk.f32.gmra.mxu0 %vm245_vm0, %v193_v13 }
 0x125   :  { %6245 = vmatmul.msk.f32.gmra.mxu1 %vm245_vm0, %v193_v13 }
 0x12c   :  { %6226 = vmatmul.msk.f32.gmra.mxu0 %vm245_vm0, %v194_v15 }
 0x12d   :  { %6246 = vmatmul.msk.f32.gmra.mxu1 %vm245_vm0, %v194_v15 }
 0x134   :  { %6227 = vmatmul.msk.f32.gmra.mxu0 %vm245_vm0, %v195_v16 }
 0x135   :  { %6247 = vmatmul.msk.f32.gmra.mxu1 %vm245_vm0, %v195_v16 }
 0x13c   :  { %6228 = vmatmul.msk.f32.gmra.mxu0 %vm245_vm0, %v196_v17 }
 0x13d   :  { %6248 = vmatmul.msk.f32.gmra.mxu1 %vm245_vm0, %v196_v17 }
 0x160   :  { %v517_v22 = vpop.f32.mrf.mxu3 }
 0x161   :  { %v518_v23 = vadd.f32 %v7013_v20, %v517_v22  ;;  %v7844_v22 = vld [vmem:[%s10305_s14 + $0x8] sm:$0xff] }
 0x163   :  { %v520_v24 = vadd.f32 %v518_v23, %v180_v21  ;;  %v197_v21 = vld [vmem:[%s10299_s0 + $0x60] sm:$0xff] }
 0x164   :  { %6229 = vmatmul.msk.f32.gmra.mxu0 %vm245_vm0, %v197_v21  ;;  %6249 = vmatmul.msk.f32.gmra.mxu1 %vm245_vm0, %v197_v21 }
 0x165   :  { %6257 = vmatpush.msk.msrb.mxu2 %vm530_vm2, %v520_v24 }
 0x166   :  { %6258 = vmatmul.msk.f32.vlgmr.msrb.gmra.mxu2 %vm523_vm3, %v521_v25  ;;  %v198_v25 = vld [vmem:[%s10299_s0 + $0x68] sm:$0xff] }
 0x167   :  { %614 = vmatpush.msra.mxu2 %v591_v26  ;;  %v7853_v26 = vld [vmem:[%s10305_s14 + $0x10] sm:$0xff] }
 0x168   :  { %v580_v38 = vpop.f32.mrf.mxu3 }
 0x169   :  { %615 = vmatpush.msra.mxu2 %v590_v27 }
 0x16b   :  { %616 = vmatpush.msra.mxu2 %v589_v29  ;;  %v199_v29 = vld [vmem:[%s10299_s0 + $0x70] sm:$0xff] }
 0x16c   :  { %6230 = vmatmul.msk.f32.gmra.mxu0 %vm245_vm0, %v198_v25  ;;  %6250 = vmatmul.msk.f32.gmra.mxu1 %vm245_vm0, %v198_v25 }
 0x16d   :  { %617 = vmatpush.msra.mxu2 %v588_v31 }
 0x16e   :  { %6259 = vmatmul.msk.f32.gmra.mxu2 %vm523_vm3, %v522_v28 }
 0x16f   :  { %676 = vmatpush.msrb.mxu2 %v659_v33  ;;  %v200_v33 = vld [vmem:[%s10299_s0 + $0x78] sm:$0xff] }
 0x170   :  { %v583_v43 = vpop.f32.mrf.mxu3 }
 0x171   :  { %677 = vmatpush.msrb.mxu2 %v658_v34  ;;  %v7871_v34 = vld [vmem:[%s10305_s14 + $0x20] sm:$0xff] }
 0x173   :  { %678 = vmatpush.msrb.mxu2 %v657_v35 }
 0x174   :  { %6231 = vmatmul.msk.f32.gmra.mxu0 %vm245_vm0, %v199_v29  ;;  %6251 = vmatmul.msk.f32.gmra.mxu1 %vm245_vm0, %v199_v29 }
 0x175   :  { %679 = vmatpush.msrb.mxu2 %v656_v36 }
 0x17c   :  { %6232 = vmatmul.msk.f32.gmra.mxu0 %vm245_vm0, %v200_v33  ;;  %6252 = vmatmul.msk.f32.gmra.mxu1 %vm245_vm0, %v200_v33 }
 0x1e9   :  { %v551_v40 = vpop.f32.mrf.mxu2 }
 0x1ea   :  { %v7749_v41 = vadd.f32 %v580_v38, %v551_v40  ;;  %v7883_v40 = vld [vmem:[%s10305_s14 + $0x30] sm:$0xff] }
 0x1ec   :  { %6262 = vmatmul.msk.f32.vlgmr.msra.gmra.mxu2 %vm465_vm1, %v7749_v41  ;;  %6264 = vmatmul.msk.f32.vlgmr.msrb.gmra.mxu3 %vm465_vm1, %v7749_v41 }
 0x1f1   :  { %v554_v44 = vpop.f32.mrf.mxu2 }
 0x1f2   :  { %v7756_v45 = vadd.f32 %v583_v43, %v554_v44  ;;  %v7889_v44 = vld [vmem:[%s10305_s14 + $0x38] sm:$0xff] }
 0x1f4   :  { %6263 = vmatmul.msk.f32.gmra.mxu2 %vm465_vm1, %v7756_v45  ;;  %6265 = vmatmul.msk.f32.gmra.mxu3 %vm465_vm1, %v7756_v45 }
 0x1fc   :  { %6266 = vmatmul.msk.f32.vlgmr.msrb.gmra.mxu2 %vm465_vm1, %v7749_v41 }
 0x204   :  { %6267 = vmatmul.msk.f32.gmra.mxu2 %vm465_vm1, %v7756_v45 }
 0x26f   :  { %v619_v55 = vpop.f32.mrf.mxu2  ;;  %v650_v56 = vpop.f32.mrf.mxu3 }
 0x270   :  { %v620_v0 = vadd.f32 %v7014_v58, %v619_v55  ;;  %v651_v2 = vadd.f32 %v7015_v59, %v650_v56  ;;  %v7907_v55 = vld [vmem:[%s10305_s14 + $0x50] sm:$0xff] }
 0x277   :  { %v622_v60 = vpop.f32.mrf.mxu2  ;;  %v653_v61 = vpop.f32.mrf.mxu3 }
 0x278   :  { %v623_v62 = vadd.f32 %v7014_v58, %v622_v60  ;;  %v654_v63 = vadd.f32 %v7015_v59, %v653_v61  ;;  %v7913_v58 = vld [vmem:[%s10305_s14 + $0x58] sm:$0xff]  ;;  %v7918_v61 = vpop.f32.mrf.mxu0 }
 0x27a   :  { %701 = vmatpush.msra.mxu3 %v623_v62  ;;  %6284 = vmatpush.xpose.msk.msra.mxu2 %vm465_vm1, %v654_v63 }
 0x27c   :  { %702 = vmatpush.msra.mxu3 %v620_v0 }
 0x27d   :  { %6268 = vmatmul.msk.f32.vlgmr.msra.gmra.mxu3 %vm245_vm0, %v7779_v54 }
 0x27e   :  { %6285 = vmatpush.xpose.msk.msra.mxu2 %vm465_vm1, %v651_v2  ;;  %v7925_v2 = vld [vmem:[%s10305_s14 + $0x60] sm:$0xff] }
 0x27f   :  { %v681_v3 = vpop.f32.mrf.mxu2 }
 0x280   :  { %v682_v8 = vadd.f32 %v7018_v5, %v681_v3  ;;  %v7920_v62 = vpop.f32.mrf.mxu0 }
 0x285   :  { %6269 = vmatmul.msk.f32.gmra.mxu3 %vm245_vm0, %v186_v57 }
 0x287   :  { %v684_v6 = vpop.f32.mrf.mxu2 }
 0x288   :  { %v685_v7 = vadd.f32 %v7018_v5, %v684_v6  ;;  %v7922_v63 = vpop.f32.mrf.mxu0 }
 0x28a   :  { %1157 = vmatpush.msrb.mxu0 %v685_v7 }
 0x28c   :  { %1158 = vmatpush.msrb.mxu0 %v682_v8 }
 0x28d   :  { %6270 = vmatmul.msk.f32.gmra.mxu3 %vm245_vm0, %v187_v1 }
 0x290   :  { %v7934_v8 = vpop.f32.mrf.mxu0 }
 0x295   :  { %6271 = vmatmul.msk.f32.gmra.mxu3 %vm245_vm0, %v188_v4 }
 0x29d   :  { %6272 = vmatmul.msk.f32.gmra.mxu3 %vm245_vm0, %v189_v9 }
 0x2a5   :  { %6273 = vmatmul.msk.f32.gmra.mxu3 %vm245_vm0, %v190_v10  ;;  %v7937_v10 = vld [vmem:[%s10305_s14 + $0x68] sm:$0xff] }
 0x2ad   :  { %6274 = vmatmul.msk.f32.gmra.mxu3 %vm245_vm0, %v191_v11 }
 0x2b5   :  { %6275 = vmatmul.msk.f32.gmra.mxu3 %vm245_vm0, %v192_v12 }
 0x2bd   :  { %6276 = vmatmul.msk.f32.gmra.mxu3 %vm245_vm0, %v193_v13 }
 0x2c5   :  { %6277 = vmatmul.msk.f32.gmra.mxu3 %vm245_vm0, %v194_v15 }
 0x2cd   :  { %6278 = vmatmul.msk.f32.gmra.mxu3 %vm245_vm0, %v195_v16 }
 0x2d5   :  { %6279 = vmatmul.msk.f32.gmra.mxu3 %vm245_vm0, %v196_v17  ;;  %v7947_v17 = vld [vmem:[%s10305_s14 + $0x70] sm:$0xff] }
 0x2dd   :  { %6280 = vmatmul.msk.f32.gmra.mxu3 %vm245_vm0, %v197_v21 }
 0x2e5   :  { %6281 = vmatmul.msk.f32.gmra.mxu3 %vm245_vm0, %v198_v25 }
 0x2ed   :  { %6282 = vmatmul.msk.f32.gmra.mxu3 %vm245_vm0, %v199_v29 }
 0x2f5   :  { %6283 = vmatmul.msk.f32.gmra.mxu3 %vm245_vm0, %v200_v33 }
 0x300   :  { %v704_v19 = vpop.f32.mrf.mxu3 }
 0x301   :  { %v752_v20 = vmul.f32 %v704_v19, %v7835_v18 }
 0x303   :  { %6286 = vmatmul.msk.f32.vlgmr.msra.gmra.mxu2 %vm465_vm1, %v752_v20  ;;  %v7949_v20 = vpop.f32.mrf.mxu0 }
 0x308   :  { %v707_v23 = vpop.f32.mrf.mxu3 }
 0x309   :  { %v753_v24 = vmul.f32 %v707_v23, %v7844_v22 }
 0x30b   :  { %6287 = vmatmul.msk.f32.gmra.mxu2 %vm465_vm1, %v753_v24  ;;  %v7965_v33 = vpop.f32.mrf.mxu0 }
 0x310   :  { %v710_v27 = vpop.f32.mrf.mxu3 }
 0x311   :  { %v754_v28 = vmul.f32 %v710_v27, %v7853_v26 }
 0x313   :  { %6288 = vmatmul.msk.f32.gmra.mxu2 %vm465_vm1, %v754_v28  ;;  %v7959_v28 = vld [vmem:[%s10305_s14 + $0x78] sm:$0xff] }
 0x318   :  { %v713_v31 = vpop.f32.mrf.mxu3 }
 0x319   :  { %v755_v32 = vmul.f32 %v713_v31, %v7862_v30 }
 0x31b   :  { %6289 = vmatmul.msk.f32.gmra.mxu2 %vm465_vm1, %v755_v32 }
 0x320   :  { %v716_v35 = vpop.f32.mrf.mxu3 }
 0x321   :  { %v756_v36 = vmul.f32 %v716_v35, %v7871_v34 }
 0x323   :  { %6290 = vmatmul.msk.f32.gmra.mxu2 %vm465_vm1, %v756_v36 }
 0x328   :  { %v719_v38 = vpop.f32.mrf.mxu3 }
 0x329   :  { %v757_v39 = vmul.f32 %v719_v38, %v7877_v37 }
 0x32b   :  { %6291 = vmatmul.msk.f32.gmra.mxu2 %vm465_vm1, %v757_v39 }
 0x330   :  { %v722_v42 = vpop.f32.mrf.mxu3 }
 0x331   :  { %v758_v43 = vmul.f32 %v722_v42, %v7883_v40 }
 0x333   :  { %6292 = vmatmul.msk.f32.gmra.mxu2 %vm465_vm1, %v758_v43  ;;  %v7975_v43 = vpop.f32.mrf.mxu0 }
 0x338   :  { %v725_v46 = vpop.f32.mrf.mxu3 }
 0x339   :  { %v759_v47 = vmul.f32 %v725_v46, %v7889_v44 }
 0x33b   :  { %6293 = vmatmul.msk.f32.gmra.mxu2 %vm465_vm1, %v759_v47 }
 0x340   :  { %v728_v49 = vpop.f32.mrf.mxu3 }
 0x341   :  { %v760_v50 = vmul.f32 %v728_v49, %v7895_v48 }
 0x343   :  { %6294 = vmatmul.msk.f32.gmra.mxu2 %vm465_vm1, %v760_v50 }
 0x348   :  { %v731_v53 = vpop.f32.mrf.mxu3 }
 0x349   :  { %v761_v54 = vmul.f32 %v731_v53, %v7901_v52 }
 0x34b   :  { %6295 = vmatmul.msk.f32.gmra.mxu2 %vm465_vm1, %v761_v54  ;;  %v7982_v54 = vpop.f32.mrf.mxu0 }
 0x350   :  { %v734_v56 = vpop.f32.mrf.mxu3 }
 0x351   :  { %v762_v57 = vmul.f32 %v734_v56, %v7907_v55 }
 0x353   :  { %6296 = vmatmul.msk.f32.gmra.mxu2 %vm465_vm1, %v762_v57 }
 0x358   :  { %v737_v59 = vpop.f32.mrf.mxu3 }
 0x359   :  { %v763_v60 = vmul.f32 %v737_v59, %v7913_v58 }
 0x35b   :  { %6297 = vmatmul.msk.f32.gmra.mxu2 %vm465_vm1, %v763_v60 }
 0x360   :  { %v740_v3 = vpop.f32.mrf.mxu3 }
 0x361   :  { %v764_v4 = vmul.f32 %v740_v3, %v7925_v2 }
 0x363   :  { %6298 = vmatmul.msk.f32.gmra.mxu2 %vm465_vm1, %v764_v4 }
 0x368   :  { %v743_v11 = vpop.f32.mrf.mxu3 }
 0x369   :  { %v765_v12 = vmul.f32 %v743_v11, %v7937_v10 }
 0x36b   :  { %6299 = vmatmul.msk.f32.gmra.mxu2 %vm465_vm1, %v765_v12 }
 0x370   :  { %v746_v19 = vpop.f32.mrf.mxu3 }
 0x371   :  { %v766_v21 = vmul.f32 %v746_v19, %v7947_v17 }
 0x373   :  { %6300 = vmatmul.msk.f32.gmra.mxu2 %vm465_vm1, %v766_v21 }
 0x378   :  { %v749_v29 = vpop.f32.mrf.mxu3 }
 0x379   :  { %v767_v31 = vmul.f32 %v749_v29, %v7959_v28 }
 0x37b   :  { %6301 = vmatmul.msk.f32.gmra.mxu2 %vm465_vm1, %v767_v31 }
 0x386   :  { %v839_v0 = vpop.f32.mrf.mxu2 }
 0x387   :  { %v887_v1 = vmul.f32 0.5, %v839_v0 }
 0x389   :  { %v7929_v5 = vadd.f32 %v887_v1, %v7918_v61  ;;  %v7989_v1 = vpop.f32.mrf.mxu0 }
 0x38b   :  { %v919_v6 = vsel %vm245_vm0, %v7929_v5, -inf }
 0x38c   :  { %920 = vmax.xlane.f32.xlu1 %v919_v6 }
 0x38e   :  { %v842_v7 = vpop.f32.mrf.mxu2 }
 0x38f   :  { %v888_v9 = vmul.f32 0.5, %v842_v7 }
 0x391   :  { %v7941_v13 = vadd.f32 %v888_v9, %v7920_v62  ;;  %v7999_v11 = vpop.f32.mrf.mxu0 }
 0x393   :  { %v922_v14 = vsel %vm245_vm0, %v7941_v13, -inf }
 0x394   :  { %923 = vmax.xlane.f32.xlu1 %v922_v14 }
 0x396   :  { %v845_v15 = vpop.f32.mrf.mxu2 }
 0x397   :  { %v889_v16 = vmul.f32 0.5, %v845_v15 }
 0x399   :  { %v7953_v23 = vadd.f32 %v889_v16, %v7922_v63  ;;  %v8008_v21 = vpop.f32.mrf.mxu0 }
 0x39b   :  { %v925_v24 = vsel %vm245_vm0, %v7953_v23, -inf }
 0x39c   :  { %926 = vmax.xlane.f32.xlu2 %v925_v24 }
 0x39e   :  { %v848_v25 = vpop.f32.mrf.mxu2 }
 0x39f   :  { %v890_v27 = vmul.f32 0.5, %v848_v25 }
 0x3a1   :  { %v7963_v32 = vadd.f32 %v890_v27, %v7934_v8 }
 0x3a3   :  { %v928_v35 = vsel %vm245_vm0, %v7963_v32, -inf }
 0x3a4   :  { %929 = vmax.xlane.f32.xlu2 %v928_v35  ;;  %v8015_v35 = vpop.f32.mrf.mxu0 }
 0x3a6   :  { %v851_v36 = vpop.f32.mrf.mxu2 }
 0x3a7   :  { %v891_v38 = vmul.f32 0.5, %v851_v36 }
 0x3a9   :  { %v7971_v39 = vadd.f32 %v891_v38, %v7949_v20 }
 0x3ab   :  { %v931_v42 = vsel %vm245_vm0, %v7971_v39, -inf }
 0x3ac   :  { %932 = vmax.xlane.f32.xlu0 %v931_v42 }
 0x3ae   :  { %v854_v46 = vpop.f32.mrf.mxu2 }
 0x3af   :  { %v892_v47 = vmul.f32 0.5, %v854_v46 }
 0x3b1   :  { %v7978_v49 = vadd.f32 %v892_v47, %v7965_v33 }
 0x3b3   :  { %v934_v50 = vsel %vm245_vm0, %v7978_v49, -inf }
 0x3b4   :  { %935 = vmax.xlane.f32.xlu1 %v934_v50 }
 0x3b6   :  { %v857_v53 = vpop.f32.mrf.mxu2 }
 0x3b7   :  { %v893_v56 = vmul.f32 0.5, %v857_v53 }
 0x3b9   :  { %v7985_v57 = vadd.f32 %v893_v56, %v7975_v43 }
 0x3bb   :  { %v937_v59 = vsel %vm245_vm0, %v7985_v57, -inf }
 0x3bc   :  { %938 = vmax.xlane.f32.xlu2 %v937_v59 }
 0x3be   :  { %v860_v60 = vpop.f32.mrf.mxu2 }
 0x3bf   :  { %v894_v0 = vmul.f32 0.5, %v860_v60 }
 0x3c1   :  { %v7992_v3 = vadd.f32 %v894_v0, %v7982_v54 }
 0x3c3   :  { %v940_v4 = vsel %vm245_vm0, %v7992_v3, -inf }
 0x3c4   :  { %941 = vmax.xlane.f32.xlu2 %v940_v4 }
 0x3c6   :  { %v863_v6 = vpop.f32.mrf.mxu2 }
 0x3c7   :  { %v895_v7 = vmul.f32 0.5, %v863_v6 }
 0x3c9   :  { %v7997_v9 = vadd.f32 %v895_v7, %v7989_v1 }
 0x3cb   :  { %v943_v12 = vsel %vm245_vm0, %v7997_v9, -inf }
 0x3cc   :  { %944 = vmax.xlane.f32.xlu2 %v943_v12 }
 0x3ce   :  { %v866_v14 = vpop.f32.mrf.mxu2 }
 0x3cf   :  { %v896_v15 = vmul.f32 0.5, %v866_v14 }
 0x3d1   :  { %v8004_v16 = vadd.f32 %v896_v15, %v7999_v11 }
 0x3d3   :  { %v946_v19 = vsel %vm245_vm0, %v8004_v16, -inf }
 0x3d4   :  { %947 = vmax.xlane.f32.xlu2 %v946_v19 }
 0x3d6   :  { %v869_v24 = vpop.f32.mrf.mxu2 }
 0x3d7   :  { %v897_v25 = vmul.f32 0.5, %v869_v24 }
 0x3d9   :  { %v8011_v27 = vadd.f32 %v897_v25, %v8008_v21 }
 0x3db   :  { %v949_v29 = vsel %vm245_vm0, %v8011_v27, -inf }
 0x3dc   :  { %950 = vmax.xlane.f32.xlu2 %v949_v29 }
 0x3de   :  { %v872_v31 = vpop.f32.mrf.mxu2 }
 0x3df   :  { %v898_v36 = vmul.f32 0.5, %v872_v31 }
 0x3e1   :  { %v8018_v38 = vadd.f32 %v898_v36, %v8015_v35 }
 0x3e3   :  { %v952_v42 = vsel %vm245_vm0, %v8018_v38, -inf }
 0x3e4   :  { %953 = vmax.xlane.f32.xlu2 %v952_v42 }
 0x3e6   :  { %v875_v29 = vpop.f32.mrf.mxu2 }
 0x3ff   :  { %v921_v46 = vpop.xlane.xlu1 %920 }
 0x400   :  { %v967_v47 = vsub.f32 %v7929_v5, %v921_v46 }
 0x402   :  { %v983_v50 = vmul.f32 1.442695, %v967_v47 }
 0x404   :  { %7036 = vpow2.f32 %v983_v50  ;;  %v899_v50 = vmul.f32 0.5, %v875_v29 }
 0x407   :  { %v924_v53 = vpop.xlane.xlu1 %923 }
 0x408   :  { %v968_v56 = vsub.f32 %v7941_v13, %v924_v53 }
 0x40a   :  { %v8024_v59 = vpop.eup %7036  ;;  %v985_v60 = vmul.f32 1.442695, %v968_v56 }
 0x40b   :  { %v1015_v0 = vsel %vm245_vm0, %v8024_v59, 0.0 }
 0x40c   :  { %7038 = vpow2.f32 %v985_v60  ;;  %1016 = vadd.xlane.f32.xlu1 %v1015_v0  ;;  %v878_v60 = vpop.f32.mrf.mxu2 }
 0x40f   :  { %v927_v4 = vpop.xlane.xlu2 %926 }
 0x410   :  { %v969_v6 = vsub.f32 %v7953_v23, %v927_v4 }
 0x412   :  { %v8029_v7 = vpop.eup %7038  ;;  %v987_v12 = vmul.f32 1.442695, %v969_v6 }
 0x413   :  { %v1018_v5 = vsel %vm245_vm0, %v8029_v7, 0.0 }
 0x414   :  { %7040 = vpow2.f32 %v987_v12  ;;  %1019 = vadd.xlane.f32.xlu1 %v1018_v5  ;;  %v900_v5 = vmul.f32 0.5, %v878_v60 }
 0x417   :  { %v930_v13 = vpop.xlane.xlu2 %929 }
 0x418   :  { %v970_v14 = vsub.f32 %v7963_v32, %v930_v13  ;;  %v8043_v32 = vpop.f32.mrf.mxu0 }
 0x419   :  { %v8051_v0 = vadd.f32 %v899_v50, %v8043_v32 }
 0x41a   :  { %v8034_v15 = vpop.eup %7040  ;;  %v989_v19 = vmul.f32 1.442695, %v970_v14 }
 0x41b   :  { %v1021_v24 = vsel %vm245_vm0, %v8034_v15, 0.0 }
 0x41c   :  { %7042 = vpow2.f32 %v989_v19  ;;  %1022 = vadd.xlane.f32.xlu1 %v1021_v24  ;;  %v881_v24 = vpop.f32.mrf.mxu2 }
 0x41f   :  { %v933_v23 = vpop.xlane.xlu0 %932 }
 0x420   :  { %v971_v25 = vsub.f32 %v7971_v39, %v933_v23  ;;  %v8053_v4 = vpop.f32.mrf.mxu0 }
 0x421   :  { %10306 = vst [vmem:[#allocation31_spill] sm:$0xff] %v8053_v4  ;;  %v8063_v23 = vadd.f32 %v900_v5, %v8053_v4 }
 0x422   :  { %v8039_v31 = vpop.eup %7042  ;;  %v991_v36 = vmul.f32 1.442695, %v971_v25 }
 0x423   :  { %v1024_v42 = vsel %vm245_vm0, %v8039_v31, 0.0 }
 0x424   :  { %7044 = vpow2.f32 %v991_v36  ;;  %1025 = vadd.xlane.f32.xlu1 %v1024_v42  ;;  %v958_v36 = vsel %vm245_vm0, %v8063_v23, -inf  ;;  %v901_v42 = vmul.f32 0.5, %v881_v24  ;;  %v884_v60 = vpop.f32.mrf.mxu2 }
 0x427   :  { %v936_v46 = vpop.xlane.xlu1 %935 }
 0x428   :  { %v972_v47 = vsub.f32 %v7978_v49, %v936_v46  ;;  %v955_v49 = vsel %vm245_vm0, %v8051_v0, -inf  ;;  %v8066_v29 = vpop.f32.mrf.mxu0 }
 0x429   :  { %10307 = vst [vmem:[#allocation32_spill] sm:$0xff] %v8066_v29 }
 0x42a   :  { %v8046_v53 = vpop.eup %7044  ;;  %v993_v56 = vmul.f32 1.442695, %v972_v47 }
 0x42b   :  { %v1027_v39 = vsel %vm245_vm0, %v8046_v53, 0.0 }
 0x42c   :  { %7046 = vpow2.f32 %v993_v56  ;;  %1028 = vadd.xlane.f32.xlu1 %v1027_v39  ;;  %v8075_v56 = vadd.f32 %v901_v42, %v8066_v29 }
 0x42f   :  { %v939_v6 = vpop.xlane.xlu2 %938 }
 0x430   :  { %v973_v12 = vsub.f32 %v7985_v57, %v939_v6  ;;  %v961_v6 = vsel %vm245_vm0, %v8075_v56, -inf }
 0x432   :  { %v8058_v13 = vpop.eup %7046  ;;  %v995_v14 = vmul.f32 1.442695, %v973_v12  ;;  %v902_v12 = vmul.f32 0.5, %v884_v60 }
 0x433   :  { %v1030_v19 = vsel %vm245_vm0, %v8058_v13, 0.0 }
 0x434   :  { %7048 = vpow2.f32 %v995_v14  ;;  %1031 = vadd.xlane.f32.xlu0 %v1030_v19  ;;  %956 = vmax.xlane.f32.xlu1 %v955_v49  ;;  %v8082_v14 = vpop.f32.mrf.mxu0 }
 0x435   :  { %10308 = vst [vmem:[#allocation33_spill] sm:$0xff] %v8082_v14  ;;  %v8087_v24 = vadd.f32 %v902_v12, %v8082_v14 }
 0x437   :  { %v942_v25 = vpop.xlane.xlu2 %941 }
 0x438   :  { %v974_v57 = vsub.f32 %v7992_v3, %v942_v25 }
 0x43a   :  { %v8070_v46 = vpop.eup %7048  ;;  %v997_v47 = vmul.f32 1.442695, %v974_v57  ;;  %v964_v57 = vsel %vm245_vm0, %v8087_v24, -inf }
 0x43b   :  { %v1033_v50 = vsel %vm245_vm0, %v8070_v46, 0.0 }
 0x43c   :  { %7050 = vpow2.f32 %v997_v47  ;;  %1034 = vadd.xlane.f32.xlu2 %v1033_v50  ;;  %959 = vmax.xlane.f32.xlu0 %v958_v36 }
 0x43f   :  { %v945_v3 = vpop.xlane.xlu2 %944 }
 0x440   :  { %v975_v39 = vsub.f32 %v7997_v9, %v945_v3 }
 0x442   :  { %v8080_v49 = vpop.eup %7050  ;;  %v999_v5 = vmul.f32 1.442695, %v975_v39 }
 0x443   :  { %v1036_v19 = vsel %vm245_vm0, %v8080_v49, 0.0 }
 0x444   :  { %7052 = vpow2.f32 %v999_v5  ;;  %1037 = vadd.xlane.f32.xlu1 %v1036_v19  ;;  %962 = vmax.xlane.f32.xlu2 %v961_v6 }
 0x447   :  { %v948_v25 = vpop.xlane.xlu2 %947 }
 0x448   :  { %v976_v9 = vsub.f32 %v8004_v16, %v948_v25 }
 0x44a   :  { %v8092_v36 = vpop.eup %7052  ;;  %v1001_v42 = vmul.f32 1.442695, %v976_v9 }
 0x44b   :  { %v1039_v47 = vsel %vm245_vm0, %v8092_v36, 0.0 }
 0x44c   :  { %7054 = vpow2.f32 %v1001_v42  ;;  %1040 = vadd.xlane.f32.xlu0 %v1039_v47  ;;  %965 = vmax.xlane.f32.xlu1 %v964_v57 }
 0x44f   :  { %v951_v50 = vpop.xlane.xlu2 %950 }
 0x450   :  { %v977_v60 = vsub.f32 %v8011_v27, %v951_v50 }
 0x452   :  { %v8097_v3 = vpop.eup %7054  ;;  %v1003_v39 = vmul.f32 1.442695, %v977_v60 }
 0x453   :  { %v1042_v16 = vsel %vm245_vm0, %v8097_v3, 0.0 }
 0x454   :  { %7056 = vpow2.f32 %v1003_v39  ;;  %1043 = vadd.xlane.f32.xlu2 %v1042_v16 }
 0x457   :  { %v954_v6 = vpop.xlane.xlu2 %953 }
 0x458   :  { %v978_v12 = vsub.f32 %v8018_v38, %v954_v6 }
 0x45a   :  { %v8102_v5 = vpop.eup %7056  ;;  %v1005_v19 = vmul.f32 1.442695, %v978_v12 }
 0x45b   :  { %v1045_v25 = vsel %vm245_vm0, %v8102_v5, 0.0 }
 0x45c   :  { %7058 = vpow2.f32 %v1005_v19  ;;  %1046 = vadd.xlane.f32.xlu0 %v1045_v25 }
 0x462   :  { %v8106_v27 = vpop.eup %7058 }
 0x463   :  { %v1048_v9 = vsel %vm245_vm0, %v8106_v27, 0.0 }
 0x464   :  { %1049 = vadd.xlane.f32.xlu1 %v1048_v9 }
 0x47f   :  { %v1017_v57 = vpop.xlane.xlu1 %1016 }
 0x480   :  { %7060 = vrcp.f32 %v1017_v57 }
 0x486   :  { %v7061_v42 = vpop.eup %7060 }
 0x487   :  { %v1020_v47 = vpop.xlane.xlu1 %1019  ;;  %v1079_v38 = vmul.f32 %v7061_v42, %v8024_v59 }
 0x488   :  { %7062 = vrcp.f32 %v1020_v47 }
 0x489   :  { %6302 = vmatmul.msk.f32.vlgmr.msrb.gmra.mxu0 %vm245_vm0, %v1079_v38 }
 0x48e   :  { %v7063_v50 = vpop.eup %7062 }
 0x48f   :  { %v1023_v60 = vpop.xlane.xlu1 %1022  ;;  %v1080_v39 = vmul.f32 %v7063_v50, %v8029_v7 }
 0x490   :  { %7064 = vrcp.f32 %v1023_v60 }
 0x491   :  { %6303 = vmatmul.msk.f32.gmra.mxu0 %vm245_vm0, %v1080_v39 }
 0x496   :  { %v7065_v16 = vpop.eup %7064 }
 0x497   :  { %v1026_v6 = vpop.xlane.xlu1 %1025  ;;  %v1081_v12 = vmul.f32 %v7065_v16, %v8034_v15 }
 0x498   :  { %7066 = vrcp.f32 %v1026_v6 }
 0x499   :  { %6304 = vmatmul.msk.f32.gmra.mxu0 %vm245_vm0, %v1081_v12 }
 0x49e   :  { %v7067_v19 = vpop.eup %7066 }
 0x49f   :  { %v1029_v25 = vpop.xlane.xlu1 %1028  ;;  %v1082_v59 = vmul.f32 %v7067_v19, %v8039_v31 }
 0x4a0   :  { %7068 = vrcp.f32 %v1029_v25 }
 0x4a1   :  { %6305 = vmatmul.msk.f32.gmra.mxu0 %vm245_vm0, %v1082_v59 }
 0x4a6   :  { %v7069_v9 = vpop.eup %7068 }
 0x4a7   :  { %v1032_v57 = vpop.xlane.xlu0 %1031  ;;  %v957_v7 = vpop.xlane.xlu1 %956  ;;  %v1083_v42 = vmul.f32 %v7069_v9, %v8046_v53 }
 0x4a8   :  { %7070 = vrcp.f32 %v1032_v57  ;;  %v979_v47 = vsub.f32 %v8051_v0, %v957_v7 }
 0x4a9   :  { %6306 = vmatmul.msk.f32.gmra.mxu0 %vm245_vm0, %v1083_v42 }
 0x4aa   :  { %v1007_v15 = vmul.f32 1.442695, %v979_v47 }
 0x4ac   :  { %7072 = vpow2.f32 %v1007_v15 }
 0x4ae   :  { %v7071_v38 = vpop.eup %7070 }
 0x4af   :  { %v1035_v50 = vpop.xlane.xlu2 %1034  ;;  %v960_v60 = vpop.xlane.xlu0 %959  ;;  %v1084_v31 = vmul.f32 %v7071_v38, %v8058_v13 }
 0x4b0   :  { %7074 = vrcp.f32 %v1035_v50  ;;  %v980_v39 = vsub.f32 %v8063_v23, %v960_v60 }
 0x4b1   :  { %6307 = vmatmul.msk.f32.gmra.mxu0 %vm245_vm0, %v1084_v31 }
 0x4b2   :  { %v7073_v16 = vpop.eup %7072  ;;  %v1009_v6 = vmul.f32 1.442695, %v980_v39 }
 0x4b3   :  { %v1051_v53 = vsel %vm245_vm0, %v7073_v16, 0.0 }
 0x4b4   :  { %7076 = vpow2.f32 %v1009_v6  ;;  %1052 = vadd.xlane.f32.xlu2 %v1051_v53 }
 0x4b6   :  { %v7075_v0 = vpop.eup %7074 }
 0x4b7   :  { %v1038_v12 = vpop.xlane.xlu1 %1037  ;;  %v963_v19 = vpop.xlane.xlu2 %962  ;;  %v1085_v25 = vmul.f32 %v7075_v0, %v8070_v46 }
 0x4b8   :  { %7078 = vrcp.f32 %v1038_v12  ;;  %v981_v59 = vsub.f32 %v8075_v56, %v963_v19 }
 0x4b9   :  { %6308 = vmatmul.msk.f32.gmra.mxu0 %vm245_vm0, %v1085_v25 }
 0x4ba   :  { %v7077_v13 = vpop.eup %7076  ;;  %v1011_v23 = vmul.f32 1.442695, %v981_v59 }
 0x4bb   :  { %v1054_v9 = vsel %vm245_vm0, %v7077_v13, 0.0 }
 0x4bc   :  { %7080 = vpow2.f32 %v1011_v23  ;;  %1055 = vadd.xlane.f32.xlu0 %v1054_v9 }
 0x4be   :  { %v7079_v57 = vpop.eup %7078 }
 0x4bf   :  { %v1041_v7 = vpop.xlane.xlu0 %1040  ;;  %v966_v42 = vpop.xlane.xlu1 %965  ;;  %v1086_v47 = vmul.f32 %v7079_v57, %v8080_v49 }
 0x4c0   :  { %7082 = vrcp.f32 %v1041_v7  ;;  %v982_v15 = vsub.f32 %v8087_v24, %v966_v42 }
 0x4c1   :  { %6309 = vmatmul.msk.f32.gmra.mxu0 %vm245_vm0, %v1086_v47 }
 0x4c2   :  { %v7081_v46 = vpop.eup %7080  ;;  %v1013_v56 = vmul.f32 1.442695, %v982_v15 }
 0x4c3   :  { %v1057_v38 = vsel %vm245_vm0, %v7081_v46, 0.0 }
 0x4c4   :  { %7084 = vpow2.f32 %v1013_v56  ;;  %1058 = vadd.xlane.f32.xlu1 %v1057_v38 }
 0x4c6   :  { %v7083_v50 = vpop.eup %7082 }
 0x4c7   :  { %v1044_v60 = vpop.xlane.xlu2 %1043  ;;  %v1087_v31 = vmul.f32 %v7083_v50, %v8092_v36 }
 0x4c8   :  { %7086 = vrcp.f32 %v1044_v60 }
 0x4c9   :  { %6310 = vmatmul.msk.f32.gmra.mxu0 %vm245_vm0, %v1087_v31 }
 0x4ca   :  { %v7085_v39 = vpop.eup %7084 }
 0x4cb   :  { %v1060_v49 = vsel %vm245_vm0, %v7085_v39, 0.0 }
 0x4cc   :  { %1061 = vadd.xlane.f32.xlu2 %v1060_v49 }
 0x4ce   :  { %v7087_v24 = vpop.eup %7086 }
 0x4cf   :  { %v1047_v6 = vpop.xlane.xlu0 %1046  ;;  %v1088_v53 = vmul.f32 %v7087_v24, %v8097_v3 }
 0x4d0   :  { %7088 = vrcp.f32 %v1047_v6 }
 0x4d1   :  { %6311 = vmatmul.msk.f32.gmra.mxu0 %vm245_vm0, %v1088_v53 }
 0x4d6   :  { %v7089_v0 = vpop.eup %7088 }
 0x4d7   :  { %v1050_v12 = vpop.xlane.xlu1 %1049  ;;  %v1089_v19 = vmul.f32 %v7089_v0, %v8102_v5 }
 0x4d8   :  { %7090 = vrcp.f32 %v1050_v12 }
 0x4d9   :  { %6312 = vmatmul.msk.f32.gmra.mxu0 %vm245_vm0, %v1089_v19 }
 0x4de   :  { %v7091_v36 = vpop.eup %7090 }
 0x4df   :  { %v1090_v25 = vmul.f32 %v7091_v36, %v8106_v27 }
 0x4e1   :  { %6313 = vmatmul.msk.f32.gmra.mxu0 %vm245_vm0, %v1090_v25  ;;  %v8146_v25 = vpop.f32.mrf.mxu1 }
 0x506   :  { %v1160_v5 = vpop.f32.mrf.mxu0 }
 0x50e   :  { %v1163_v56 = vpop.f32.mrf.mxu0 }
 0x527   :  { %v1053_v59 = vpop.xlane.xlu2 %1052 }
 0x528   :  { %7092 = vrcp.f32 %v1053_v59 }
 0x52e   :  { %v7093_v23 = vpop.eup %7092 }
 0x52f   :  { %v1056_v9 = vpop.xlane.xlu0 %1055  ;;  %v1091_v3 = vmul.f32 %v7093_v23, %v7073_v16  ;;  %v1166_v16 = vpop.f32.mrf.mxu0 }
 0x530   :  { %7094 = vrcp.f32 %v1056_v9 }
 0x531   :  { %6314 = vmatmul.msk.f32.gmra.mxu0 %vm245_vm0, %v1091_v3 }
 0x536   :  { %v7095_v57 = vpop.eup %7094 }
 0x537   :  { %v1059_v7 = vpop.xlane.xlu1 %1058  ;;  %v1092_v42 = vmul.f32 %v7095_v57, %v7077_v13  ;;  %v1169_v60 = vpop.f32.mrf.mxu0 }
 0x538   :  { %7096 = vrcp.f32 %v1059_v7  ;;  %v8153_v7 = vpop.f32.mrf.mxu1 }
 0x539   :  { %6315 = vmatmul.msk.f32.gmra.mxu0 %vm245_vm0, %v1092_v42  ;;  %10309 = vst [vmem:[#allocation34_spill] sm:$0xff] %v8153_v7 }
 0x53e   :  { %v7097_v47 = vpop.eup %7096 }
 0x53f   :  { %v1062_v15 = vpop.xlane.xlu2 %1061  ;;  %v1093_v27 = vmul.f32 %v7097_v47, %v7081_v46  ;;  %v1172_v31 = vpop.f32.mrf.mxu0 }
 0x540   :  { %7098 = vrcp.f32 %v1062_v15  ;;  %v8160_v47 = vpop.f32.mrf.mxu1  ;;  %v201_v15 = vld [vmem:[%s10310_s19] sm:$0xff] }
 0x541   :  { %6316 = vmatmul.msk.f32.gmra.mxu0 %vm245_vm0, %v1093_v27  ;;  %10311 = vst [vmem:[#allocation35_spill] sm:$0xff] %v8160_v47 }
 0x546   :  { %v7099_v38 = vpop.eup %7098 }
 0x547   :  { %v1094_v50 = vmul.f32 %v7099_v38, %v7085_v39  ;;  %v1175_v49 = vpop.f32.mrf.mxu0 }
 0x549   :  { %6317 = vmatmul.msk.f32.gmra.mxu0 %vm245_vm0, %v1094_v50  ;;  %v1249_v50 = vld [vmem:[%s10312_s24 + $0x10] sm:$0xff] }
 0x54f   :  { %v1178_v13 = vpop.f32.mrf.mxu0 }
 0x557   :  { %v1181_v24 = vpop.f32.mrf.mxu0 }
 0x55f   :  { %v1184_v6 = vpop.f32.mrf.mxu0 }
 0x567   :  { %v1187_v53 = vpop.f32.mrf.mxu0 }
 0x56f   :  { %v1190_v0 = vpop.f32.mrf.mxu0 }
 0x570   :  { %v1218_v42 = vmul.f32 %v1190_v0, %v7907_v55  ;;  %v1212_v55 = vmul.f32 %v1172_v31, %v7871_v34  ;;  %v202_v34 = vld [vmem:[%s10310_s19 + $0x8] sm:$0xff] }
 0x577   :  { %v1193_v12 = vpop.f32.mrf.mxu0 }
 0x578   :  { %v1219_v57 = vmul.f32 %v1193_v12, %v7913_v58  ;;  %v1213_v58 = vmul.f32 %v1175_v49, %v7877_v37  ;;  %v1208_v37 = vmul.f32 %v1160_v5, %v7835_v18  ;;  %v1248_v18 = vld [vmem:[%s10312_s24 + $0x8] sm:$0xff]  ;;  %v1247_v49 = vld [vmem:[%s10312_s24] sm:$0xff] }
 0x579   :  { %v7019_v12 = vld [vmem:[%s10318_s30] ss:$0 sm:$0xff] }
 0x5ae   :  { %v1196_v19 = vpop.f32.mrf.mxu0 }
 0x5af   :  { %v1220_v3 = vmul.f32 %v1196_v19, %v7925_v2  ;;  %v1214_v2 = vmul.f32 %v1178_v13, %v7883_v40  ;;  %v1209_v40 = vmul.f32 %v1163_v56, %v7844_v22  ;;  %v1250_v56 = vld [vmem:[%s10312_s24 + $0x18] sm:$0xff] }
 0x5b6   :  { %v1199_v46 = vpop.f32.mrf.mxu0 }
 0x5b7   :  { %v1221_v9 = vmul.f32 %v1199_v46, %v7937_v10  ;;  %v1215_v10 = vmul.f32 %v1181_v24, %v7889_v44  ;;  %v8167_v44 = vpop.f32.mrf.mxu1 }
 0x5b8   :  { %10313 = vst [vmem:[#allocation36_spill] sm:$0xff] %v8167_v44 }
 0x5be   :  { %v1202_v36 = vpop.f32.mrf.mxu0 }
 0x5bf   :  { %v1222_v23 = vmul.f32 %v1202_v36, %v7947_v17  ;;  %v1216_v17 = vmul.f32 %v1184_v6, %v7895_v48  ;;  %v1210_v48 = vmul.f32 %v1166_v16, %v7853_v26  ;;  %v8172_v27 = vpop.f32.mrf.mxu1 }
 0x5c0   :  { %10314 = vst [vmem:[#allocation37_spill] sm:$0xff] %v8172_v27 }
 0x5c6   :  { %v1205_v59 = vpop.f32.mrf.mxu0 }
 0x5c7   :  { %v1223_v39 = vmul.f32 %v1205_v59, %v7959_v28  ;;  %v1217_v28 = vmul.f32 %v1187_v53, %v7901_v52  ;;  %v1211_v52 = vmul.f32 %v1169_v60, %v7862_v30  ;;  %v8174_v26 = vpop.f32.mrf.mxu1 }
 0x5c8   :  { %10315 = vst [vmem:[#allocation38_spill] sm:$0xff] %v8174_v26 }
 0x5c9   :  { %1224 = vmatpush.msrb.mxu1 %v1223_v39 }
 0x5cb   :  { %1225 = vmatpush.msrb.mxu1 %v1222_v23 }
 0x5cd   :  { %1226 = vmatpush.msrb.mxu1 %v1221_v9 }
 0x5cf   :  { %1227 = vmatpush.msrb.mxu1 %v1220_v3  ;;  %v8176_v30 = vpop.f32.mrf.mxu1 }
 0x5d1   :  { %1228 = vmatpush.msrb.mxu1 %v1219_v57 }
 0x5d3   :  { %1229 = vmatpush.msrb.mxu1 %v1218_v42 }
 0x5d5   :  { %1230 = vmatpush.msrb.mxu1 %v1217_v28 }
 0x5d7   :  { %1231 = vmatpush.msrb.mxu1 %v1216_v17  ;;  %v8178_v38 = vpop.f32.mrf.mxu1  ;;  %v1343_v17 = vld [vmem:[%s10326_s6 + $0x18] sm:$0xff] }
 0x5d8   :  { %10316 = vst [vmem:[#allocation39_spill] sm:$0xff] %v8178_v38 }
 0x5d9   :  { %1232 = vmatpush.msrb.mxu1 %v1215_v10  ;;  %v1342_v10 = vld [vmem:[%s10326_s6 + $0x10] sm:$0xff] }
 0x5db   :  { %1233 = vmatpush.msrb.mxu1 %v1214_v2  ;;  %v1341_v2 = vld [vmem:[%s10326_s6 + $0x8] sm:$0xff] }
 0x5dd   :  { %1234 = vmatpush.msrb.mxu1 %v1213_v58 }
 0x5df   :  { %1235 = vmatpush.msrb.mxu1 %v1212_v55  ;;  %v8180_v22 = vpop.f32.mrf.mxu1 }
 0x5e0   :  { %10317 = vst [vmem:[#allocation40_spill] sm:$0xff] %v8180_v22 }
 0x5e1   :  { %1236 = vmatpush.msrb.mxu1 %v1211_v52 }
 0x5e3   :  { %1237 = vmatpush.msrb.mxu1 %v1210_v48 }
 0x5e5   :  { %1238 = vmatpush.msrb.mxu1 %v1209_v40 }
 0x5e7   :  { %1239 = vmatpush.msrb.mxu1 %v1208_v37  ;;  %v8185_v5 = vpop.f32.mrf.mxu1 }
 0x5e8   :  { %1240 = vmatmul.f32.vlgmr.msrb.gmra.mxu1 %v201_v15  ;;  %10319 = vst [vmem:[#allocation41_spill] sm:$0xff] %v8185_v5 }
 0x5e9   :  { %1273 = vmatpush.msra.mxu1 %v1250_v56 }
 0x5eb   :  { %1274 = vmatpush.msra.mxu1 %v1249_v50  ;;  %v1380_v50 = vld [vmem:[%s10327_s12 + $0x18] sm:$0xff] }
 0x5ed   :  { %1275 = vmatpush.msra.mxu1 %v1248_v18  ;;  %v1379_v18 = vld [vmem:[%s10327_s12 + $0x10] sm:$0xff] }
 0x5ef   :  { %v8187_v16 = vpop.f32.mrf.mxu1  ;;  %1276 = vmatpush.msra.mxu1 %v1247_v49 }
 0x5f0   :  { %1243 = vmatmul.f32.gmra.mxu1 %v202_v34  ;;  %10320 = vst [vmem:[#allocation42_spill] sm:$0xff] %v8187_v16 }
 0x5f1   :  { %1366 = vmatpush.msrb.mxu1 %v1343_v17 }
 0x5f3   :  { %1367 = vmatpush.msrb.mxu1 %v1342_v10 }
 0x5f5   :  { %1368 = vmatpush.msrb.mxu1 %v1341_v2  ;;  %v587_v2 = vld [vmem:[%s10329_s16] sm:$0x7] }
 0x5f7   :  { %v8189_v60 = vpop.f32.mrf.mxu1 }
 0x5f8   :  { %10321 = vst [vmem:[#allocation43_spill] sm:$0xff] %v8189_v60 }
 0x5ff   :  { %v8191_v31 = vpop.f32.mrf.mxu1 }
 0x600   :  { %10322 = vst [vmem:[#allocation44_spill] sm:$0xff] %v8191_v31 }
 0x607   :  { %v8194_v13 = vpop.f32.mrf.mxu1 }
 0x608   :  { %10323 = vst [vmem:[#allocation45_spill] sm:$0xff] %v8194_v13 }
 0x60f   :  { %v8196_v24 = vpop.f32.mrf.mxu1 }
 0x610   :  { %10324 = vst [vmem:[#allocation46_spill] sm:$0xff] %v8196_v24 }
 0x617   :  { %v8198_v6 = vpop.f32.mrf.mxu1 }
 0x618   :  { %10325 = vst [vmem:[#allocation47_spill] sm:$0xff] %v8198_v6 }
 0x665   :  { %v1241_v53 = vpop.f32.mrf.mxu1 }
 0x666   :  { %6318 = vmatmul.msk.f32.vlgmr.msra.gmra.mxu1 %vm465_vm1, %v1241_v53 }
 0x66d   :  { %v1244_v0 = vpop.f32.mrf.mxu1 }
 0x66e   :  { %6319 = vmatmul.msk.f32.gmra.mxu1 %vm465_vm1, %v1244_v0 }
 0x6e3   :  { %v1278_v19 = vpop.f32.mrf.mxu1 }
 0x6e4   :  { %v1279_v46 = vadd.f32 %v7019_v12, %v1278_v19 }
 0x6e6   :  { %v8204_v36 = vadd.f32 %v1279_v46, %v7749_v41  ;;  %v1377_v46 = vld [vmem:[%s10327_s12] sm:$0xff] }
 0x6e8   :  { %v1288_v59 = vsel %vm465_vm1, %v8204_v36, 0.0  ;;  %v1286_v39 = vmul.f32 %v8204_v36, %v8204_v36 }
 0x6e9   :  { %1289 = vadd.xlane.f32.xlu0 %v1288_v59 }
 0x6ea   :  { %v1294_v23 = vsel %vm465_vm1, %v1286_v39, 0.0 }
 0x6eb   :  { %v1281_v9 = vpop.f32.mrf.mxu1  ;;  %1295 = vadd.xlane.f32.xlu1 %v1294_v23 }
 0x6ec   :  { %v1282_v3 = vadd.f32 %v7019_v12, %v1281_v9  ;;  %v1378_v12 = vld [vmem:[%s10327_s12 + $0x8] sm:$0xff] }
 0x6ee   :  { %v8212_v57 = vadd.f32 %v1282_v3, %v7756_v45  ;;  %v1340_v45 = vld [vmem:[%s10326_s6] sm:$0xff] }
 0x6ef   :  { %1369 = vmatpush.msrb.mxu1 %v1340_v45 }
 0x6f0   :  { %v1291_v41 = vsel %vm465_vm1, %v8212_v57, 0.0  ;;  %v1287_v42 = vmul.f32 %v8212_v57, %v8212_v57 }
 0x6f1   :  { %1292 = vadd.xlane.f32.xlu2 %v1291_v41  ;;  %1409 = vmatpush.msra.mxu1 %v1380_v50  ;;  %v586_v41 = vld [vmem:[%s10328_s15] sm:$0x7] }
 0x6f2   :  { %v1297_v28 = vsel %vm465_vm1, %v1287_v42, 0.0 }
 0x6f3   :  { %1298 = vadd.xlane.f32.xlu0 %v1297_v28  ;;  %1410 = vmatpush.msra.mxu1 %v1379_v18 }
 0x6f5   :  { %1411 = vmatpush.msra.mxu1 %v1378_v12 }
 0x6f7   :  { %1412 = vmatpush.msra.mxu1 %v1377_v46  ;;  %v8255_v46 = vld [vmem:[%s7504_s9 + $0x18] sm:$0xff] }
 0x75c   :  { %v1290_v58 = vpop.xlane.xlu0 %1289 }
 0x75d   :  { %v1300_v55 = vmul.f32 0.03125, %v1290_v58  ;;  %v1334_v58 = vperm.slane %v586_v41, 0  ;;  %v7320_v41 = vld [vmem:[%s10299_s0] sm:$0xff] }
 0x75e   :  { %v1296_v52 = vpop.xlane.xlu1 %1295 }
 0x75f   :  { %v1304_v48 = vmul.f32 %v1300_v55, %v1300_v55  ;;  %v1302_v40 = vmul.f32 0.03125, %v1296_v52  ;;  %v1308_v45 = vsub.f32 %v8204_v36, %v1300_v55 }
 0x761   :  { %v1306_v37 = vsub.f32 %v1302_v40, %v1304_v48 }
 0x763   :  { %v1310_v15 = vadd.f32 1e-05, %v1306_v37  ;;  %v1337_v37 = vperm.slane %v587_v2, 0 }
 0x764   :  { %v1293_v34 = vpop.xlane.xlu2 %1292 }
 0x765   :  { %7100 = vrsqrt.f32 %v1310_v15  ;;  %v1301_v56 = vmul.f32 0.03125, %v1293_v34  ;;  %vm1318_vm3 = vweird.f32 %v1310_v15 }
 0x766   :  { %v1299_v49 = vpop.xlane.xlu0 %1298 }
 0x767   :  { %v1305_v53 = vmul.f32 %v1301_v56, %v1301_v56  ;;  %v1303_v0 = vmul.f32 0.03125, %v1299_v49  ;;  %v1309_v36 = vsub.f32 %v8212_v57, %v1301_v56  ;;  %v8245_v57 = vld [vmem:[%s7504_s9 + $0x8] sm:$0xff]  ;;  %v8250_v56 = vld [vmem:[%s7504_s9 + $0x10] sm:$0xff] }
 0x769   :  { %v1307_v19 = vsub.f32 %v1303_v0, %v1305_v53 }
 0x76b   :  { %v7101_v59 = vpop.eup %7100  ;;  %v1311_v39 = vadd.f32 1e-05, %v1307_v19  ;;  %v8240_v19 = vld [vmem:[%s7504_s9] sm:$0xff] }
 0x76c   :  { %v1313_v23 = vmul.f32 %v7101_v59, %v1310_v15  ;;  %vm1319_vm2 = vweird.f32 %v7101_v59 }
 0x76d   :  { %7102 = vrsqrt.f32 %v1311_v39  ;;  %vm1320_vm4 = vmor %vm1318_vm3, %vm1319_vm2  ;;  %vm1328_vm6 = vweird.f32 %v1311_v39 }
 0x76e   :  { %v1314_v9 = vmul.f32 %v7101_v59, %v1313_v23 }
 0x770   :  { %v1315_v3 = vmul.f32 0.5, %v1314_v9 }
 0x772   :  { %v1316_v42 = vsub.f32 1.5, %v1315_v3 }
 0x773   :  { %v7103_v28 = vpop.eup %7102 }
 0x774   :  { %v1317_v17 = vmul.f32 %v7101_v59, %v1316_v42  ;;  %v1323_v10 = vmul.f32 %v7103_v28, %v1311_v39  ;;  %vm1329_vm5 = vweird.f32 %v7103_v28  ;;  %v7020_v39 = vld [vmem:[%s10330_s18] ss:$0 sm:$0xff]  ;;  %v7321_v42 = vld [vmem:[%s10299_s0 + $0x8] sm:$0xff] }
 0x775   :  { %vm1330_vm7 = vmor %vm1328_vm6, %vm1329_vm5 }
 0x776   :  { %v1321_v52 = vsel %vm1320_vm4, %v7101_v59, %v1317_v17  ;;  %v1324_v48 = vmul.f32 %v7103_v28, %v1323_v10  ;;  %v7323_v10 = vld [vmem:[%s10299_s0 + $0x18] sm:$0xff] }
 0x777   :  { %v1332_v40 = vmul.f32 %v1321_v52, %v1308_v45  ;;  %v7324_v45 = vld [vmem:[%s10299_s0 + $0x20] sm:$0xff] }
 0x778   :  { %v1325_v34 = vmul.f32 0.5, %v1324_v48  ;;  %v7021_v52 = vld [vmem:[%s10331_s22] ss:$0 sm:$0xff]  ;;  %v7325_v48 = vld [vmem:[%s10299_s0 + $0x28] sm:$0xff] }
 0x779   :  { %v1335_v50 = vmul.f32 %v1334_v58, %v1332_v40 }
 0x77a   :  { %v1326_v18 = vsub.f32 1.5, %v1325_v34 }
 0x77b   :  { %v8230_v49 = vadd.f32 %v1337_v37, %v1335_v50 }
 0x77c   :  { %v1327_v15 = vmul.f32 %v7103_v28, %v1326_v18  ;;  %v7326_v18 = vld [vmem:[%s10299_s0 + $0x30] sm:$0xff] }
 0x77d   :  { %6320 = vmatmul.msk.f32.vlgmr.msrb.gmra.mxu1 %vm465_vm1, %v8230_v49 }
 0x77e   :  { %v1331_v55 = vsel %vm1330_vm7, %v7103_v28, %v1327_v15  ;;  %v7322_v28 = vld [vmem:[%s10299_s0 + $0x10] sm:$0xff] }
 0x77f   :  { %v1333_v53 = vmul.f32 %v1331_v55, %v1309_v36  ;;  %v7327_v36 = vld [vmem:[%s10299_s0 + $0x38] sm:$0xff]  ;;  %v7328_v55 = vld [vmem:[%s10299_s0 + $0x40] sm:$0xff] }
 0x781   :  { %v1336_v0 = vmul.f32 %v1334_v58, %v1333_v53  ;;  %v7329_v53 = vld [vmem:[%s10299_s0 + $0x48] sm:$0xff] }
 0x783   :  { %v8235_v12 = vadd.f32 %v1337_v37, %v1336_v0  ;;  %v7330_v0 = vld [vmem:[%s10299_s0 + $0x50] sm:$0xff] }
 0x785   :  { %6321 = vmatmul.msk.f32.gmra.mxu1 %vm465_vm1, %v8235_v12 }
 0x78d   :  { %6322 = vmatmul.msk.f32.vlgmr.msra.gmra.mxu1 %vm465_vm1, %v8240_v19 }
 0x795   :  { %6323 = vmatmul.msk.f32.gmra.mxu1 %vm465_vm1, %v8245_v57 }
 0x79d   :  { %6324 = vmatmul.msk.f32.gmra.mxu1 %vm465_vm1, %v8250_v56 }
 0x7a5   :  { %6325 = vmatmul.msk.f32.gmra.mxu1 %vm465_vm1, %v8255_v46 }
 0x7fa   :  { %v1371_v59 = vpop.f32.mrf.mxu1 }
 0x7fb   :  { %v1372_v3 = vadd.f32 %v7020_v39, %v1371_v59  ;;  %v7331_v59 = vld [vmem:[%s10299_s0 + $0x58] sm:$0xff] }
 0x802   :  { %v1374_v23 = vpop.f32.mrf.mxu1 }
 0x803   :  { %v1375_v9 = vadd.f32 %v7020_v39, %v1374_v23  ;;  %v7332_v39 = vld [vmem:[%s10299_s0 + $0x60] sm:$0xff]  ;;  %v7333_v23 = vld [vmem:[%s10299_s0 + $0x68] sm:$0xff] }
 0x805   :  { %1477 = vmatpush.msrb.mxu2 %v1375_v9  ;;  %v7334_v9 = vld [vmem:[%s10299_s0 + $0x70] sm:$0xff] }
 0x807   :  { %1478 = vmatpush.msrb.mxu2 %v1372_v3  ;;  %v7335_v3 = vld [vmem:[%s10299_s0 + $0x78] sm:$0xff] }
 0x808   :  { %6330 = vmatmul.msk.f32.vlgmr.msrb.gmra.mxu2 %vm245_vm0, %v7320_v41 }
 0x80a   :  { %v1414_v17 = vpop.f32.mrf.mxu1 }
 0x80b   :  { %v1415_v15 = vadd.f32 %v7021_v52, %v1414_v17 }
 0x810   :  { %6331 = vmatmul.msk.f32.gmra.mxu2 %vm245_vm0, %v7321_v42  ;;  %v8298_v42 = vld [vmem:[%s10305_s14] sm:$0xff] }
 0x812   :  { %v1417_v2 = vpop.f32.mrf.mxu1 }
 0x813   :  { %v1418_v50 = vadd.f32 %v7021_v52, %v1417_v2 }
 0x818   :  { %6332 = vmatmul.msk.f32.gmra.mxu2 %vm245_vm0, %v7322_v28 }
 0x81a   :  { %v1420_v58 = vpop.f32.mrf.mxu1 }
 0x81b   :  { %v1421_v34 = vadd.f32 %v7021_v52, %v1420_v58  ;;  %v8308_v58 = vld [vmem:[%s10305_s14 + $0x10] sm:$0xff] }
 0x820   :  { %6333 = vmatmul.msk.f32.gmra.mxu2 %vm245_vm0, %v7323_v10  ;;  %v8303_v10 = vld [vmem:[%s10305_s14 + $0x8] sm:$0xff] }
 0x822   :  { %v1423_v40 = vpop.f32.mrf.mxu1 }
 0x823   :  { %v1424_v37 = vadd.f32 %v7021_v52, %v1423_v40  ;;  %v8313_v40 = vld [vmem:[%s10305_s14 + $0x18] sm:$0xff] }
 0x825   :  { %6346 = vmatpush.xpose.msk.msrb.mxu1 %vm465_vm1, %v1424_v37 }
 0x828   :  { %6334 = vmatmul.msk.f32.gmra.mxu2 %vm245_vm0, %v7324_v45 }
 0x829   :  { %6347 = vmatpush.xpose.msk.msrb.mxu1 %vm465_vm1, %v1421_v34 }
 0x82d   :  { %6348 = vmatpush.xpose.msk.msrb.mxu1 %vm465_vm1, %v1418_v50  ;;  %v8318_v50 = vld [vmem:[%s10305_s14 + $0x20] sm:$0xff] }
 0x830   :  { %6335 = vmatmul.msk.f32.gmra.mxu2 %vm245_vm0, %v7325_v48 }
 0x831   :  { %6349 = vmatpush.xpose.msk.msrb.mxu1 %vm465_vm1, %v1415_v15 }
 0x838   :  { %6336 = vmatmul.msk.f32.gmra.mxu2 %vm245_vm0, %v7326_v18 }
 0x840   :  { %6337 = vmatmul.msk.f32.gmra.mxu2 %vm245_vm0, %v7327_v36  ;;  %v8323_v36 = vld [vmem:[%s10305_s14 + $0x28] sm:$0xff] }
 0x848   :  { %6338 = vmatmul.msk.f32.gmra.mxu2 %vm245_vm0, %v7328_v55 }
 0x850   :  { %6339 = vmatmul.msk.f32.gmra.mxu2 %vm245_vm0, %v7329_v53 }
 0x858   :  { %6340 = vmatmul.msk.f32.gmra.mxu2 %vm245_vm0, %v7330_v0  ;;  %v8328_v0 = vld [vmem:[%s10305_s14 + $0x30] sm:$0xff] }
 0x860   :  { %6341 = vmatmul.msk.f32.gmra.mxu2 %vm245_vm0, %v7331_v59 }
 0x868   :  { %6342 = vmatmul.msk.f32.gmra.mxu2 %vm245_vm0, %v7332_v39 }
 0x870   :  { %6343 = vmatmul.msk.f32.gmra.mxu2 %vm245_vm0, %v7333_v23  ;;  %v8333_v23 = vld [vmem:[%s10305_s14 + $0x38] sm:$0xff] }
 0x878   :  { %6344 = vmatmul.msk.f32.gmra.mxu2 %vm245_vm0, %v7334_v9 }
 0x880   :  { %6345 = vmatmul.msk.f32.gmra.mxu2 %vm245_vm0, %v7335_v3 }
 0x88b   :  { %v1480_v41 = vpop.f32.mrf.mxu2 }
 0x88c   :  { %v1528_v28 = vmul.f32 %v8298_v42, %v1480_v41  ;;  %v8338_v41 = vld [vmem:[%s10305_s14 + $0x40] sm:$0xff] }
 0x88e   :  { %6350 = vmatmul.msk.f32.vlgmr.msrb.gmra.mxu1 %vm465_vm1, %v1528_v28 }
 0x893   :  { %v1483_v17 = vpop.f32.mrf.mxu2 }
 0x894   :  { %v1529_v2 = vmul.f32 %v8303_v10, %v1483_v17 }
 0x896   :  { %6351 = vmatmul.msk.f32.gmra.mxu1 %vm465_vm1, %v1529_v2  ;;  %v8343_v2 = vld [vmem:[%s10305_s14 + $0x48] sm:$0xff] }
 0x89b   :  { %v1486_v45 = vpop.f32.mrf.mxu2 }
 0x89c   :  { %v1530_v52 = vmul.f32 %v8308_v58, %v1486_v45 }
 0x89e   :  { %6352 = vmatmul.msk.f32.gmra.mxu1 %vm465_vm1, %v1530_v52 }
 0x8a3   :  { %v1489_v48 = vpop.f32.mrf.mxu2 }
 0x8a4   :  { %v1531_v37 = vmul.f32 %v8313_v40, %v1489_v48  ;;  %v8348_v48 = vld [vmem:[%s10305_s14 + $0x50] sm:$0xff] }
 0x8a6   :  { %6353 = vmatmul.msk.f32.gmra.mxu1 %vm465_vm1, %v1531_v37 }
 0x8ab   :  { %v1492_v34 = vpop.f32.mrf.mxu2 }
 0x8ac   :  { %v1532_v18 = vmul.f32 %v8318_v50, %v1492_v34 }
 0x8ae   :  { %6354 = vmatmul.msk.f32.gmra.mxu1 %vm465_vm1, %v1532_v18  ;;  %v8353_v18 = vld [vmem:[%s10305_s14 + $0x58] sm:$0xff] }
 0x8b3   :  { %v1495_v15 = vpop.f32.mrf.mxu2 }
 0x8b4   :  { %v1533_v55 = vmul.f32 %v8323_v36, %v1495_v15 }
 0x8b6   :  { %6355 = vmatmul.msk.f32.gmra.mxu1 %vm465_vm1, %v1533_v55 }
 0x8bb   :  { %v1498_v53 = vpop.f32.mrf.mxu2 }
 0x8bc   :  { %v1534_v59 = vmul.f32 %v8328_v0, %v1498_v53  ;;  %v8358_v53 = vld [vmem:[%s10305_s14 + $0x60] sm:$0xff] }
 0x8be   :  { %6356 = vmatmul.msk.f32.gmra.mxu1 %vm465_vm1, %v1534_v59 }
 0x8c3   :  { %v1501_v39 = vpop.f32.mrf.mxu2 }
 0x8c4   :  { %v1535_v9 = vmul.f32 %v8333_v23, %v1501_v39 }
 0x8c6   :  { %6357 = vmatmul.msk.f32.gmra.mxu1 %vm465_vm1, %v1535_v9  ;;  %v8363_v9 = vld [vmem:[%s10305_s14 + $0x68] sm:$0xff] }
 0x8cb   :  { %v1504_v3 = vpop.f32.mrf.mxu2 }
 0x8cc   :  { %v1536_v28 = vmul.f32 %v8338_v41, %v1504_v3 }
 0x8ce   :  { %6358 = vmatmul.msk.f32.gmra.mxu1 %vm465_vm1, %v1536_v28 }
 0x8d3   :  { %v1507_v17 = vpop.f32.mrf.mxu2 }
 0x8d4   :  { %v1537_v45 = vmul.f32 %v8343_v2, %v1507_v17  ;;  %v8368_v17 = vld [vmem:[%s10305_s14 + $0x70] sm:$0xff] }
 0x8d6   :  { %6359 = vmatmul.msk.f32.gmra.mxu1 %vm465_vm1, %v1537_v45 }
 0x8db   :  { %v1510_v52 = vpop.f32.mrf.mxu2 }
 0x8dc   :  { %v1538_v37 = vmul.f32 %v8348_v48, %v1510_v52 }
 0x8de   :  { %6360 = vmatmul.msk.f32.gmra.mxu1 %vm465_vm1, %v1538_v37  ;;  %v8373_v37 = vld [vmem:[%s10305_s14 + $0x78] sm:$0xff] }
 0x8e3   :  { %v1513_v34 = vpop.f32.mrf.mxu2 }
 0x8e4   :  { %v1539_v15 = vmul.f32 %v8353_v18, %v1513_v34 }
 0x8e6   :  { %6361 = vmatmul.msk.f32.gmra.mxu1 %vm465_vm1, %v1539_v15 }
 0x8eb   :  { %v1516_v55 = vpop.f32.mrf.mxu2 }
 0x8ec   :  { %v1540_v59 = vmul.f32 %v8358_v53, %v1516_v55 }
 0x8ee   :  { %6362 = vmatmul.msk.f32.gmra.mxu1 %vm465_vm1, %v1540_v59 }
 0x8f3   :  { %v1519_v39 = vpop.f32.mrf.mxu2 }
 0x8f4   :  { %v1541_v3 = vmul.f32 %v8363_v9, %v1519_v39 }
 0x8f6   :  { %6363 = vmatmul.msk.f32.gmra.mxu1 %vm465_vm1, %v1541_v3 }
 0x8fb   :  { %v1522_v28 = vpop.f32.mrf.mxu2 }
 0x8fc   :  { %v1542_v45 = vmul.f32 %v8368_v17, %v1522_v28 }
 0x8fe   :  { %6364 = vmatmul.msk.f32.gmra.mxu1 %vm465_vm1, %v1542_v45 }
 0x903   :  { %v1525_v52 = vpop.f32.mrf.mxu2 }
 0x904   :  { %v1543_v34 = vmul.f32 %v8373_v37, %v1525_v52 }
 0x906   :  { %6365 = vmatmul.msk.f32.gmra.mxu1 %vm465_vm1, %v1543_v34 }
 0x90b   :  { %v1621_v15 = vpop.f32.mrf.mxu1 }
 0x90c   :  { %v1669_v55 = vmul.f32 0.5, %v1621_v15 }
 0x90e   :  { %v1685_v59 = vadd.f32 %v1669_v55, %v8146_v25 }
 0x910   :  { %v1701_v39 = vsel %vm465_vm1, %v1685_v59, -inf }
 0x911   :  { %1702 = vmax.xlane.f32.xlu1 %v1701_v39 }
 0x913   :  { %v1624_v3 = vpop.f32.mrf.mxu1 }
 0x914   :  { %v1670_v51 = vmul.f32 0.5, %v1624_v3 }
 0x916   :  { %v1686_v28 = vadd.f32 %v1670_v51, %v8153_v7 }
 0x918   :  { %v1704_v45 = vsel %vm465_vm1, %v1686_v28, -inf }
 0x919   :  { %1705 = vmax.xlane.f32.xlu2 %v1704_v45 }
 0x91b   :  { %v1627_v14 = vpop.f32.mrf.mxu1 }
 0x91c   :  { %v1671_v29 = vmul.f32 0.5, %v1627_v14 }
 0x91e   :  { %v1687_v52 = vadd.f32 %v1671_v29, %v8160_v47 }
 0x920   :  { %v1707_v34 = vsel %vm465_vm1, %v1687_v52, -inf }
 0x921   :  { %1708 = vmax.xlane.f32.xlu0 %v1707_v34 }
 0x923   :  { %v1630_v15 = vpop.f32.mrf.mxu1 }
 0x924   :  { %v1672_v4 = vmul.f32 0.5, %v1630_v15 }
 0x926   :  { %v8384_v55 = vadd.f32 %v1672_v4, %v8167_v44  ;;  %v1428_v44 = vld [vmem:[%s10332_s23 + $0x10] sm:$0xff] }
 0x928   :  { %v1710_v39 = vsel %vm465_vm1, %v8384_v55, -inf }
 0x929   :  { %1711 = vmax.xlane.f32.xlu1 %v1710_v39 }
 0x92b   :  { %v1633_v51 = vpop.f32.mrf.mxu1 }
 0x92c   :  { %v1673_v3 = vmul.f32 0.5, %v1633_v51 }
 0x92e   :  { %v8389_v45 = vadd.f32 %v1673_v3, %v8172_v27  ;;  %v1429_v3 = vld [vmem:[%s10332_s23 + $0x18] sm:$0xff] }
 0x92f   :  { %1446 = vmatpush.msrb.mxu3 %v1429_v3 }
 0x930   :  { %v1713_v29 = vsel %vm465_vm1, %v8389_v45, -inf }
 0x931   :  { %1714 = vmax.xlane.f32.xlu2 %v1713_v29  ;;  %1447 = vmatpush.msrb.mxu3 %v1428_v44 }
 0x933   :  { %v1636_v14 = vpop.f32.mrf.mxu1 }
 0x934   :  { %v1674_v34 = vmul.f32 0.5, %v1636_v14 }
 0x936   :  { %v8394_v4 = vadd.f32 %v1674_v34, %v8174_v26  ;;  %v1427_v34 = vld [vmem:[%s10332_s23 + $0x8] sm:$0xff]  ;;  %v1426_v26 = vld [vmem:[%s10332_s23] sm:$0xff] }
 0x937   :  { %1448 = vmatpush.msrb.mxu3 %v1427_v34 }
 0x938   :  { %v1716_v15 = vsel %vm465_vm1, %v8394_v4, -inf }
 0x939   :  { %1717 = vmax.xlane.f32.xlu0 %v1716_v15  ;;  %1449 = vmatpush.msrb.mxu3 %v1426_v26 }
 0x93a   :  { %6326 = vmatmul.msk.f32.vlgmr.msrb.gmra.mxu3 %vm465_vm1, %v8240_v19 }
 0x93b   :  { %v1639_v39 = vpop.f32.mrf.mxu1 }
 0x93c   :  { %v1675_v51 = vmul.f32 0.5, %v1639_v39 }
 0x93e   :  { %v8400_v27 = vadd.f32 %v1675_v51, %v8176_v30 }
 0x940   :  { %v1719_v29 = vsel %vm465_vm1, %v8400_v27, -inf }
 0x941   :  { %1720 = vmax.xlane.f32.xlu1 %v1719_v29 }
 0x942   :  { %6327 = vmatmul.msk.f32.gmra.mxu3 %vm465_vm1, %v8245_v57 }
 0x943   :  { %v1642_v14 = vpop.f32.mrf.mxu1 }
 0x944   :  { %v1676_v47 = vmul.f32 0.5, %v1642_v14 }
 0x946   :  { %v8408_v7 = vadd.f32 %v1676_v47, %v8178_v38 }
 0x948   :  { %v1722_v15 = vsel %vm465_vm1, %v8408_v7, -inf }
 0x949   :  { %1723 = vmax.xlane.f32.xlu0 %v1722_v15 }
 0x94a   :  { %6328 = vmatmul.msk.f32.gmra.mxu3 %vm465_vm1, %v8250_v56 }
 0x94b   :  { %v1645_v47 = vpop.f32.mrf.mxu1 }
 0x94c   :  { %v1677_v34 = vmul.f32 0.5, %v1645_v47 }
 0x952   :  { %6329 = vmatmul.msk.f32.gmra.mxu3 %vm465_vm1, %v8255_v46  ;;  %v8425_v46 = vadd.f32 %v1677_v34, %v8180_v22 }
 0x953   :  { %v1648_v3 = vpop.f32.mrf.mxu1 }
 0x954   :  { %v1725_v47 = vsel %vm465_vm1, %v8425_v46, -inf }
 0x95b   :  { %v1651_v56 = vpop.f32.mrf.mxu1 }
 0x984   :  { %v1703_v44 = vpop.xlane.xlu1 %1702 }
 0x985   :  { %v1749_v39 = vsub.f32 %v1685_v59, %v1703_v44 }
 0x987   :  { %v1765_v51 = vmul.f32 1.442695, %v1749_v39 }
 0x989   :  { %7104 = vpow2.f32 %v1765_v51  ;;  %v1678_v51 = vmul.f32 0.5, %v1648_v3  ;;  %v1679_v3 = vmul.f32 0.5, %v1651_v56 }
 0x98c   :  { %v1706_v26 = vpop.xlane.xlu2 %1705 }
 0x98d   :  { %v1750_v29 = vsub.f32 %v1686_v28, %v1706_v26 }
 0x98f   :  { %v8420_v14 = vpop.eup %7104  ;;  %v1767_v19 = vmul.f32 1.442695, %v1750_v29  ;;  %v8434_v29 = vadd.f32 %v1678_v51, %v8185_v5  ;;  %v8444_v51 = vadd.f32 %v1679_v3, %v8187_v16 }
 0x990   :  { %v1797_v57 = vsel %vm465_vm1, %v8420_v14, 0.0 }
 0x991   :  { %7106 = vpow2.f32 %v1767_v19  ;;  %1798 = vadd.xlane.f32.xlu2 %v1797_v57  ;;  %v1654_v19 = vpop.f32.mrf.mxu1  ;;  %v1731_v5 = vsel %vm465_vm1, %v8444_v51, -inf }
 0x992   :  { %v1680_v56 = vmul.f32 0.5, %v1654_v19 }
 0x994   :  { %v1709_v15 = vpop.xlane.xlu0 %1708  ;;  %v8454_v3 = vadd.f32 %v1680_v56, %v8189_v60 }
 0x995   :  { %v1751_v59 = vsub.f32 %v1687_v52, %v1709_v15 }
 0x997   :  { %v8427_v44 = vpop.eup %7106  ;;  %v1769_v39 = vmul.f32 1.442695, %v1751_v59  ;;  %v1728_v59 = vsel %vm465_vm1, %v8434_v29, -inf }
 0x998   :  { %v1800_v28 = vsel %vm465_vm1, %v8427_v44, 0.0 }
 0x999   :  { %7108 = vpow2.f32 %v1769_v39  ;;  %1801 = vadd.xlane.f32.xlu1 %v1800_v28  ;;  %1726 = vmax.xlane.f32.xlu2 %v1725_v47  ;;  %v1657_v47 = vpop.f32.mrf.mxu1 }
 0x99c   :  { %v1712_v26 = vpop.xlane.xlu1 %1711 }
 0x99d   :  { %v1752_v52 = vsub.f32 %v8384_v55, %v1712_v26 }
 0x99f   :  { %v8437_v34 = vpop.eup %7108  ;;  %v1771_v57 = vmul.f32 1.442695, %v1752_v52 }
 0x9a0   :  { %v1803_v15 = vsel %vm465_vm1, %v8437_v34, 0.0 }
 0x9a1   :  { %7110 = vpow2.f32 %v1771_v57  ;;  %1804 = vadd.xlane.f32.xlu0 %v1803_v15  ;;  %1729 = vmax.xlane.f32.xlu1 %v1728_v59  ;;  %v1660_v16 = vpop.f32.mrf.mxu1 }
 0x9a4   :  { %v1715_v39 = vpop.xlane.xlu2 %1714 }
 0x9a5   :  { %v1753_v28 = vsub.f32 %v8389_v45, %v1715_v39  ;;  %v1681_v39 = vmul.f32 0.5, %v1657_v47  ;;  %v1682_v47 = vmul.f32 0.5, %v1660_v16 }
 0x9a7   :  { %v8447_v55 = vpop.eup %7110  ;;  %v1773_v26 = vmul.f32 1.442695, %v1753_v28  ;;  %v1734_v28 = vsel %vm465_vm1, %v8454_v3, -inf }
 0x9a8   :  { %v1806_v52 = vsel %vm465_vm1, %v8447_v55, 0.0 }
 0x9a9   :  { %7112 = vpow2.f32 %v1773_v26  ;;  %1807 = vadd.xlane.f32.xlu2 %v1806_v52  ;;  %1732 = vmax.xlane.f32.xlu0 %v1731_v5  ;;  %v8464_v26 = vadd.f32 %v1681_v39, %v8191_v31  ;;  %v8474_v39 = vadd.f32 %v1682_v47, %v8194_v13 }
 0x9ab   :  { %v1740_v31 = vsel %vm465_vm1, %v8474_v39, -inf }
 0x9ac   :  { %v1718_v57 = vpop.xlane.xlu0 %1717 }
 0x9ad   :  { %v1754_v45 = vsub.f32 %v8394_v4, %v1718_v57 }
 0x9af   :  { %v8457_v15 = vpop.eup %7112  ;;  %v1775_v59 = vmul.f32 1.442695, %v1754_v45  ;;  %v1737_v45 = vsel %vm465_vm1, %v8464_v26, -inf }
 0x9b0   :  { %v1809_v19 = vsel %vm465_vm1, %v8457_v15, 0.0 }
 0x9b1   :  { %7114 = vpow2.f32 %v1775_v59  ;;  %1810 = vadd.xlane.f32.xlu1 %v1809_v19  ;;  %1735 = vmax.xlane.f32.xlu2 %v1734_v28  ;;  %v1663_v59 = vpop.f32.mrf.mxu1 }
 0x9b2   :  { %v1683_v16 = vmul.f32 0.5, %v1663_v59 }
 0x9b4   :  { %v1721_v5 = vpop.xlane.xlu1 %1720 }
 0x9b5   :  { %v1755_v4 = vsub.f32 %v8400_v27, %v1721_v5 }
 0x9b7   :  { %v8467_v56 = vpop.eup %7114  ;;  %v1777_v52 = vmul.f32 1.442695, %v1755_v4 }
 0x9b8   :  { %v1812_v57 = vsel %vm465_vm1, %v8467_v56, 0.0 }
 0x9b9   :  { %7116 = vpow2.f32 %v1777_v52  ;;  %1813 = vadd.xlane.f32.xlu0 %v1812_v57  ;;  %1738 = vmax.xlane.f32.xlu1 %v1737_v45  ;;  %v8484_v52 = vadd.f32 %v1683_v16, %v8196_v24  ;;  %v1666_v47 = vpop.f32.mrf.mxu1 }
 0x9bb   :  { %v1743_v59 = vsel %vm465_vm1, %v8484_v52, -inf }
 0x9bc   :  { %v1724_v19 = vpop.xlane.xlu0 %1723 }
 0x9bd   :  { %v1756_v27 = vsub.f32 %v8408_v7, %v1724_v19  ;;  %v1684_v7 = vmul.f32 0.5, %v1666_v47 }
 0x9bf   :  { %v8477_v28 = vpop.eup %7116  ;;  %v1779_v5 = vmul.f32 1.442695, %v1756_v27  ;;  %v8493_v19 = vadd.f32 %v1684_v7, %v8198_v6  ;;  %v1451_v27 = vpop.f32.mrf.mxu3 }
 0x9c0   :  { %v1815_v4 = vsel %vm465_vm1, %v8477_v28, 0.0 }
 0x9c1   :  { %7118 = vpow2.f32 %v1779_v5  ;;  %1816 = vadd.xlane.f32.xlu2 %v1815_v4  ;;  %1741 = vmax.xlane.f32.xlu0 %v1740_v31  ;;  %v1746_v31 = vsel %vm465_vm1, %v8493_v19, -inf  ;;  %v7022_v4 = vld [vmem:[%s10333_s26] ss:$0 sm:$0xff] }
 0x9c2   :  { %v1452_v22 = vadd.f32 %v7022_v4, %v1451_v27 }
 0x9c7   :  { %v8486_v57 = vpop.eup %7118  ;;  %v1454_v5 = vpop.f32.mrf.mxu3 }
 0x9c8   :  { %v1818_v45 = vsel %vm465_vm1, %v8486_v57, 0.0  ;;  %v1455_v60 = vadd.f32 %v7022_v4, %v1454_v5 }
 0x9c9   :  { %1819 = vadd.xlane.f32.xlu1 %v1818_v45  ;;  %1744 = vmax.xlane.f32.xlu2 %v1743_v59 }
 0x9cf   :  { %v1457_v16 = vpop.f32.mrf.mxu3 }
 0x9d0   :  { %v1458_v24 = vadd.f32 %v7022_v4, %v1457_v16 }
 0x9d1   :  { %1747 = vmax.xlane.f32.xlu1 %v1746_v31 }
 0x9d7   :  { %v1460_v47 = vpop.f32.mrf.mxu3 }
 0x9d8   :  { %v1461_v13 = vadd.f32 %v7022_v4, %v1460_v47 }
 0x9da   :  { %1937 = vmatpush.msra.mxu3 %v1461_v13 }
 0x9dc   :  { %1938 = vmatpush.msra.mxu3 %v1458_v24 }
 0x9de   :  { %1939 = vmatpush.msra.mxu3 %v1455_v60 }
 0x9e0   :  { %1940 = vmatpush.msra.mxu3 %v1452_v22 }
 0xa04   :  { %v1799_v45 = vpop.xlane.xlu2 %1798 }
 0xa05   :  { %7120 = vrcp.f32 %v1799_v45 }
 0xa0b   :  { %v7121_v7 = vpop.eup %7120 }
 0xa0c   :  { %v1861_v59 = vmul.f32 %v7121_v7, %v8420_v14  ;;  %v1802_v6 = vpop.xlane.xlu1 %1801  ;;  %v1727_v38 = vpop.xlane.xlu2 %1726 }
 0xa0d   :  { %7122 = vrcp.f32 %v1802_v6  ;;  %v1757_v31 = vsub.f32 %v8425_v46, %v1727_v38 }
 0xa0e   :  { %6366 = vmatmul.msk.f32.vlgmr.msra.gmra.mxu3 %vm465_vm1, %v1861_v59 }
 0xa0f   :  { %v1781_v16 = vmul.f32 1.442695, %v1757_v31 }
 0xa11   :  { %7124 = vpow2.f32 %v1781_v16 }
 0xa13   :  { %v7123_v5 = vpop.eup %7122 }
 0xa14   :  { %v1805_v13 = vpop.xlane.xlu0 %1804  ;;  %v1730_v27 = vpop.xlane.xlu1 %1729  ;;  %v1862_v60 = vmul.f32 %v7123_v5, %v8427_v44 }
 0xa15   :  { %7126 = vrcp.f32 %v1805_v13  ;;  %v1758_v22 = vsub.f32 %v8434_v29, %v1730_v27 }
 0xa16   :  { %6367 = vmatmul.msk.f32.gmra.mxu3 %vm465_vm1, %v1862_v60 }
 0xa17   :  { %v8504_v24 = vpop.eup %7124  ;;  %v1783_v14 = vmul.f32 1.442695, %v1758_v22 }
 0xa18   :  { %v1821_v38 = vsel %vm465_vm1, %v8504_v24, 0.0 }
 0xa19   :  { %7128 = vpow2.f32 %v1783_v14  ;;  %1822 = vadd.xlane.f32.xlu0 %v1821_v38 }
 0xa1b   :  { %v7127_v6 = vpop.eup %7126 }
 0xa1c   :  { %v1808_v46 = vpop.xlane.xlu2 %1807  ;;  %v1733_v4 = vpop.xlane.xlu0 %1732  ;;  %v1863_v47 = vmul.f32 %v7127_v6, %v8437_v34 }
 0xa1d   :  { %7130 = vrcp.f32 %v1808_v46  ;;  %v1759_v44 = vsub.f32 %v8444_v51, %v1733_v4 }
 0xa1e   :  { %6368 = vmatmul.msk.f32.gmra.mxu3 %vm465_vm1, %v1863_v47 }
 0xa1f   :  { %v8511_v29 = vpop.eup %7128  ;;  %v1785_v45 = vmul.f32 1.442695, %v1759_v44 }
 0xa20   :  { %v1824_v7 = vsel %vm465_vm1, %v8511_v29, 0.0 }
 0xa21   :  { %7132 = vpow2.f32 %v1785_v45  ;;  %1825 = vadd.xlane.f32.xlu2 %v1824_v7 }
 0xa23   :  { %v7131_v59 = vpop.eup %7130 }
 0xa24   :  { %v1811_v31 = vpop.xlane.xlu1 %1810  ;;  %v1736_v16 = vpop.xlane.xlu2 %1735  ;;  %v1864_v5 = vmul.f32 %v7131_v59, %v8447_v55 }
 0xa25   :  { %7134 = vrcp.f32 %v1811_v31  ;;  %v1760_v34 = vsub.f32 %v8454_v3, %v1736_v16 }
 0xa26   :  { %6369 = vmatmul.msk.f32.gmra.mxu3 %vm465_vm1, %v1864_v5 }
 0xa27   :  { %v8518_v51 = vpop.eup %7132  ;;  %v1787_v13 = vmul.f32 1.442695, %v1760_v34 }
 0xa28   :  { %v1827_v27 = vsel %vm465_vm1, %v8518_v51, 0.0 }
 0xa29   :  { %7136 = vpow2.f32 %v1787_v13  ;;  %1828 = vadd.xlane.f32.xlu0 %v1827_v27 }
 0xa2b   :  { %v7135_v60 = vpop.eup %7134 }
 0xa2c   :  { %v1814_v22 = vpop.xlane.xlu0 %1813  ;;  %v1739_v14 = vpop.xlane.xlu1 %1738  ;;  %v1865_v38 = vmul.f32 %v7135_v60, %v8457_v15 }
 0xa2d   :  { %7138 = vrcp.f32 %v1814_v22  ;;  %v1761_v55 = vsub.f32 %v8464_v26, %v1739_v14 }
 0xa2e   :  { %6370 = vmatmul.msk.f32.gmra.mxu3 %vm465_vm1, %v1865_v38 }
 0xa2f   :  { %v7137_v3 = vpop.eup %7136  ;;  %v1789_v6 = vmul.f32 1.442695, %v1761_v55 }
 0xa30   :  { %v1830_v46 = vsel %vm465_vm1, %v7137_v3, 0.0 }
 0xa31   :  { %7140 = vpow2.f32 %v1789_v6  ;;  %1831 = vadd.xlane.f32.xlu1 %v1830_v46 }
 0xa33   :  { %v7139_v4 = vpop.eup %7138 }
 0xa34   :  { %v1817_v47 = vpop.xlane.xlu2 %1816  ;;  %v1742_v44 = vpop.xlane.xlu0 %1741  ;;  %v1866_v45 = vmul.f32 %v7139_v4, %v8467_v56 }
 0xa35   :  { %7142 = vrcp.f32 %v1817_v47  ;;  %v1762_v7 = vsub.f32 %v8474_v39, %v1742_v44 }
 0xa36   :  { %6371 = vmatmul.msk.f32.gmra.mxu3 %vm465_vm1, %v1866_v45 }
 0xa37   :  { %v7141_v15 = vpop.eup %7140  ;;  %v1791_v26 = vmul.f32 1.442695, %v1762_v7 }
 0xa38   :  { %v1833_v59 = vsel %vm465_vm1, %v7141_v15, 0.0 }
 0xa39   :  { %7144 = vpow2.f32 %v1791_v26  ;;  %1834 = vadd.xlane.f32.xlu2 %v1833_v59 }
 0xa3b   :  { %v7143_v31 = vpop.eup %7142 }
 0xa3c   :  { %v1820_v16 = vpop.xlane.xlu1 %1819  ;;  %v1745_v5 = vpop.xlane.xlu2 %1744  ;;  %v1867_v34 = vmul.f32 %v7143_v31, %v8477_v28 }
 0xa3d   :  { %7146 = vrcp.f32 %v1820_v16  ;;  %v1763_v13 = vsub.f32 %v8484_v52, %v1745_v5 }
 0xa3e   :  { %6372 = vmatmul.msk.f32.gmra.mxu3 %vm465_vm1, %v1867_v34 }
 0xa3f   :  { %v7145_v56 = vpop.eup %7144  ;;  %v1793_v39 = vmul.f32 1.442695, %v1763_v13 }
 0xa40   :  { %v1836_v27 = vsel %vm465_vm1, %v7145_v56, 0.0 }
 0xa41   :  { %7148 = vpow2.f32 %v1793_v39  ;;  %1837 = vadd.xlane.f32.xlu0 %v1836_v27 }
 0xa43   :  { %v7147_v60 = vpop.eup %7146 }
 0xa44   :  { %v1748_v22 = vpop.xlane.xlu1 %1747  ;;  %v1868_v14 = vmul.f32 %v7147_v60, %v8486_v57 }
 0xa45   :  { %v1764_v38 = vsub.f32 %v8493_v19, %v1748_v22 }
 0xa46   :  { %6373 = vmatmul.msk.f32.gmra.mxu3 %vm465_vm1, %v1868_v14 }
 0xa47   :  { %v7149_v28 = vpop.eup %7148  ;;  %v1795_v55 = vmul.f32 1.442695, %v1764_v38 }
 0xa48   :  { %v1839_v52 = vsel %vm465_vm1, %v7149_v28, 0.0 }
 0xa49   :  { %7150 = vpow2.f32 %v1795_v55  ;;  %1840 = vadd.xlane.f32.xlu1 %v1839_v52 }
 0xa4f   :  { %v7151_v6 = vpop.eup %7150 }
 0xa50   :  { %v1842_v46 = vsel %vm465_vm1, %v7151_v6, 0.0 }
 0xa51   :  { %1843 = vadd.xlane.f32.xlu2 %v1842_v46 }
 0xa8c   :  { %v1823_v4 = vpop.xlane.xlu0 %1822 }
 0xa8d   :  { %7152 = vrcp.f32 %v1823_v4 }
 0xa91   :  { %v1942_v38 = vpop.f32.mrf.mxu3 }
 0xa93   :  { %v7153_v47 = vpop.eup %7152 }
 0xa94   :  { %v1826_v44 = vpop.xlane.xlu2 %1825  ;;  %v1869_v57 = vmul.f32 %v7153_v47, %v8504_v24 }
 0xa95   :  { %7154 = vrcp.f32 %v1826_v44 }
 0xa96   :  { %6374 = vmatmul.msk.f32.gmra.mxu3 %vm465_vm1, %v1869_v57 }
 0xa9b   :  { %v7155_v19 = vpop.eup %7154 }
 0xa9c   :  { %v1829_v45 = vpop.xlane.xlu0 %1828  ;;  %v1870_v7 = vmul.f32 %v7155_v19, %v8511_v29 }
 0xa9d   :  { %7156 = vrcp.f32 %v1829_v45 }
 0xa9e   :  { %6375 = vmatmul.msk.f32.gmra.mxu3 %vm465_vm1, %v1870_v7 }
 0xaa3   :  { %v7157_v26 = vpop.eup %7156 }
 0xaa4   :  { %v1832_v59 = vpop.xlane.xlu1 %1831  ;;  %v1871_v31 = vmul.f32 %v7157_v26, %v8518_v51 }
 0xaa5   :  { %7158 = vrcp.f32 %v1832_v59 }
 0xaa6   :  { %6376 = vmatmul.msk.f32.gmra.mxu3 %vm465_vm1, %v1871_v31 }
 0xaab   :  { %v7159_v16 = vpop.eup %7158 }
 0xaac   :  { %v1835_v5 = vpop.xlane.xlu2 %1834  ;;  %v1872_v24 = vmul.f32 %v7159_v16, %v7137_v3 }
 0xaad   :  { %7160 = vrcp.f32 %v1835_v5 }
 0xaae   :  { %6377 = vmatmul.msk.f32.gmra.mxu3 %vm465_vm1, %v1872_v24 }
 0xab3   :  { %v7161_v34 = vpop.eup %7160 }
 0xab4   :  { %v1838_v13 = vpop.xlane.xlu0 %1837  ;;  %v1873_v39 = vmul.f32 %v7161_v34, %v7141_v15  ;;  %v1945_v15 = vpop.f32.mrf.mxu3 }
 0xab5   :  { %7162 = vrcp.f32 %v1838_v13 }
 0xab6   :  { %6378 = vmatmul.msk.f32.gmra.mxu3 %vm465_vm1, %v1873_v39  ;;  %v2030_v39 = vld [vmem:[%s10334_s28 + $0x8] sm:$0xff] }
 0xabb   :  { %v7163_v29 = vpop.eup %7162 }
 0xabc   :  { %v1841_v27 = vpop.xlane.xlu1 %1840  ;;  %v1874_v60 = vmul.f32 %v7163_v29, %v7145_v56  ;;  %v1948_v52 = vpop.f32.mrf.mxu3 }
 0xabd   :  { %7164 = vrcp.f32 %v1841_v27  ;;  %v7023_v27 = vld [vmem:[%s10335_s1] ss:$0 sm:$0xff] }
 0xabe   :  { %6379 = vmatmul.msk.f32.gmra.mxu3 %vm465_vm1, %v1874_v60 }
 0xac3   :  { %v7165_v51 = vpop.eup %7164 }
 0xac4   :  { %v1844_v22 = vpop.xlane.xlu2 %1843  ;;  %v1875_v14 = vmul.f32 %v7165_v51, %v7149_v28  ;;  %v1951_v46 = vpop.f32.mrf.mxu3 }
 0xac5   :  { %7166 = vrcp.f32 %v1844_v22 }
 0xac6   :  { %6380 = vmatmul.msk.f32.gmra.mxu3 %vm465_vm1, %v1875_v14 }
 0xacb   :  { %v7167_v3 = vpop.eup %7166 }
 0xacc   :  { %v1876_v55 = vmul.f32 %v7167_v3, %v7151_v6  ;;  %v1954_v4 = vpop.f32.mrf.mxu3 }
 0xace   :  { %6381 = vmatmul.msk.f32.gmra.mxu3 %vm465_vm1, %v1876_v55 }
 0xad4   :  { %v1957_v47 = vpop.f32.mrf.mxu3 }
 0xadc   :  { %v1960_v56 = vpop.f32.mrf.mxu3 }
 0xae4   :  { %v1963_v44 = vpop.f32.mrf.mxu3 }
 0xb19   :  { %v1966_v57 = vpop.f32.mrf.mxu3 }
 0xb21   :  { %v1969_v19 = vpop.f32.mrf.mxu3 }
 0xb29   :  { %v1972_v45 = vpop.f32.mrf.mxu3 }
 0xb2a   :  { %v2000_v13 = vmul.f32 %v8348_v48, %v1972_v45  ;;  %v1995_v48 = vmul.f32 %v8323_v36, %v1957_v47  ;;  %v1991_v36 = vmul.f32 %v8303_v10, %v1945_v15  ;;  %v2029_v10 = vld [vmem:[%s10334_s28] sm:$0xff]  ;;  %v2159_v45 = vld [vmem:[%s10336_s2 + $0x128] sm:$0xff] }
 0xb2b   :  { %v2170_v47 = vld [vmem:[%s10336_s2 + $0x180] sm:$0xff] }
 0xb31   :  { %v1975_v7 = vpop.f32.mrf.mxu3 }
 0xb32   :  { %v2001_v34 = vmul.f32 %v8353_v18, %v1975_v7  ;;  %v1996_v18 = vmul.f32 %v8328_v0, %v1960_v56  ;;  %v2032_v0 = vld [vmem:[%s10334_s28 + $0x18] sm:$0xff] }
 0xb33   :  { %v2173_v56 = vld [vmem:[%s10336_s2 + $0x198] sm:$0xff] }
 0xb34   :  { %2309 = vmatpush.msra.mxu2 %v2173_v56  ;;  %v2161_v7 = vld [vmem:[%s10336_s2 + $0x138] sm:$0xff] }
 0xb39   :  { %v1978_v28 = vpop.f32.mrf.mxu3 }
 0xb3a   :  { %v2002_v24 = vmul.f32 %v8358_v53, %v1978_v28  ;;  %v1997_v53 = vmul.f32 %v8333_v23, %v1963_v44  ;;  %v1992_v23 = vmul.f32 %v8308_v58, %v1948_v52  ;;  %v7353_v58 = vld [vmem:[%s10310_s19 + $0x8] sm:$0xff]  ;;  %v2138_v28 = vld [vmem:[%s10336_s2 + $0x80] sm:$0xff] }
 0xb3b   :  { %v2175_v44 = vld [vmem:[%s10336_s2 + $0x1a8] sm:$0xff] }
 0xb3c   :  { %2355 = vmatpush.msra.mxu1 %v2175_v44 }
 0xb3e   :  { %2356 = vmatpush.msra.mxu1 %v2159_v45 }
 0xb41   :  { %v1981_v26 = vpop.f32.mrf.mxu3 }
 0xb42   :  { %v2003_v5 = vmul.f32 %v8363_v9, %v1981_v26  ;;  %v1998_v9 = vmul.f32 %v8338_v41, %v1966_v57  ;;  %v1993_v41 = vmul.f32 %v8313_v40, %v1951_v46  ;;  %v7352_v40 = vld [vmem:[%s10310_s19] sm:$0xff]  ;;  %v2141_v26 = vld [vmem:[%s10336_s2 + $0x98] sm:$0xff] }
 0xb43   :  { %v2154_v57 = vld [vmem:[%s10336_s2 + $0x100] sm:$0xff] }
 0xb49   :  { %v1984_v59 = vpop.f32.mrf.mxu3 }
 0xb4a   :  { %v2004_v6 = vmul.f32 %v8368_v17, %v1984_v59  ;;  %v1999_v17 = vmul.f32 %v8343_v2, %v1969_v19  ;;  %v1994_v2 = vmul.f32 %v8318_v50, %v1954_v4  ;;  %v1990_v50 = vmul.f32 %v8298_v42, %v1942_v38  ;;  %v2157_v19 = vld [vmem:[%s10336_s2 + $0x118] sm:$0xff]  ;;  %v2143_v59 = vld [vmem:[%s10336_s2 + $0xa8] sm:$0xff] }
 0xb4b   :  { %2310 = vmatpush.msra.mxu2 %v2157_v19  ;;  %2357 = vmatpush.msra.mxu1 %v2143_v59 }
 0xb4d   :  { %2311 = vmatpush.msra.mxu2 %v2141_v26 }
 0xb51   :  { %v1987_v31 = vpop.f32.mrf.mxu3 }
 0xb52   :  { %v2005_v16 = vmul.f32 %v8373_v37, %v1987_v31  ;;  %v2031_v37 = vld [vmem:[%s10334_s28 + $0x10] sm:$0xff]  ;;  %v2145_v31 = vld [vmem:[%s10336_s2 + $0xb8] sm:$0xff] }
 0xb54   :  { %2006 = vmatpush.msra.mxu0 %v2005_v16  ;;  %6939 = vmatpush.msrb.mxu3 %v2005_v16  ;;  %v2122_v16 = vld [vmem:[%s10336_s2] sm:$0xff] }
 0xb56   :  { %2007 = vmatpush.msra.mxu0 %v2004_v6  ;;  %6940 = vmatpush.msrb.mxu3 %v2004_v6  ;;  %v2125_v6 = vld [vmem:[%s10336_s2 + $0x18] sm:$0xff] }
 0xb57   :  { %2312 = vmatpush.msra.mxu2 %v2125_v6 }
 0xb58   :  { %2008 = vmatpush.msra.mxu0 %v2003_v5  ;;  %6941 = vmatpush.msrb.mxu3 %v2003_v5  ;;  %v2127_v5 = vld [vmem:[%s10336_s2 + $0x28] sm:$0xff] }
 0xb59   :  { %2358 = vmatpush.msra.mxu1 %v2127_v5 }
 0xb5a   :  { %2009 = vmatpush.msra.mxu0 %v2002_v24  ;;  %6942 = vmatpush.msrb.mxu3 %v2002_v24 }
 0xb5c   :  { %2010 = vmatpush.msra.mxu0 %v2001_v34  ;;  %6943 = vmatpush.msrb.mxu3 %v2001_v34  ;;  %v2129_v34 = vld [vmem:[%s10336_s2 + $0x38] sm:$0xff] }
 0xb5e   :  { %2011 = vmatpush.msra.mxu0 %v2000_v13  ;;  %6944 = vmatpush.msrb.mxu3 %v2000_v13 }
 0xb60   :  { %2012 = vmatpush.msra.mxu0 %v1999_v17  ;;  %6945 = vmatpush.msrb.mxu3 %v1999_v17 }
 0xb62   :  { %2013 = vmatpush.msra.mxu0 %v1998_v9  ;;  %6946 = vmatpush.msrb.mxu3 %v1998_v9 }
 0xb64   :  { %2014 = vmatpush.msra.mxu0 %v1997_v53  ;;  %6947 = vmatpush.msrb.mxu3 %v1997_v53 }
 0xb66   :  { %2015 = vmatpush.msra.mxu0 %v1996_v18  ;;  %6948 = vmatpush.msrb.mxu3 %v1996_v18 }
 0xb68   :  { %2016 = vmatpush.msra.mxu0 %v1995_v48  ;;  %6949 = vmatpush.msrb.mxu3 %v1995_v48 }
 0xb6a   :  { %2017 = vmatpush.msra.mxu0 %v1994_v2  ;;  %6950 = vmatpush.msrb.mxu3 %v1994_v2 }
 0xb6c   :  { %2018 = vmatpush.msra.mxu0 %v1993_v41  ;;  %6951 = vmatpush.msrb.mxu3 %v1993_v41 }
 0xb6e   :  { %2019 = vmatpush.msra.mxu0 %v1992_v23  ;;  %6952 = vmatpush.msrb.mxu3 %v1992_v23 }
 0xb70   :  { %2020 = vmatpush.msra.mxu0 %v1991_v36  ;;  %6953 = vmatpush.msrb.mxu3 %v1991_v36  ;;  %v2171_v36 = vld [vmem:[%s10336_s2 + $0x188] sm:$0xff] }
 0xb72   :  { %2021 = vmatpush.msra.mxu0 %v1990_v50  ;;  %6954 = vmatpush.msrb.mxu3 %v1990_v50  ;;  %v2176_v50 = vld [vmem:[%s10336_s2 + $0x1b0] sm:$0xff] }
 0xb73   :  { %2022 = vmatmul.f32.vlgmr.msra.gmra.mxu0 %v7352_v40  ;;  %2025 = vmatmul.f32.vlgmr.msrb.gmra.mxu3 %v7353_v58 }
 0xb74   :  { %2055 = vmatpush.msrb.mxu0 %v2032_v0  ;;  %v2179_v0 = vld [vmem:[%s10336_s2 + $0x1c8] sm:$0xff]  ;;  %2378 = vmatpush.msrb.mxu2 %v2176_v50 }
 0xb75   :  { %2447 = vmatpush.msrb.mxu1 %v2179_v0  ;;  %v2167_v50 = vld [vmem:[%s10336_s2 + $0x168] sm:$0xff]  ;;  %v2169_v0 = vld [vmem:[%s10336_s2 + $0x178] sm:$0xff] }
 0xb76   :  { %2056 = vmatpush.msrb.mxu0 %v2031_v37  ;;  %v2181_v37 = vld [vmem:[%s10336_s2 + $0x1d8] sm:$0xff] }
 0xb78   :  { %2057 = vmatpush.msrb.mxu0 %v2030_v39  ;;  %v2155_v39 = vld [vmem:[%s10336_s2 + $0x108] sm:$0xff] }
 0xb7a   :  { %2058 = vmatpush.msrb.mxu0 %v2029_v10  ;;  %v2160_v10 = vld [vmem:[%s10336_s2 + $0x130] sm:$0xff] }
 0xb7b   :  { %2379 = vmatpush.msrb.mxu2 %v2160_v10  ;;  %v2153_v10 = vld [vmem:[%s10336_s2 + $0xf8] sm:$0xff] }
 0xb7c   :  { %2240 = vmatpush.msra.mxu0 %v2170_v47 }
 0xb7e   :  { %2241 = vmatpush.msra.mxu0 %v2154_v57 }
 0xb80   :  { %2242 = vmatpush.msra.mxu0 %v2138_v28  ;;  %v7354_v28 = vld [vmem:[%s10328_s15] sm:$0x7] }
 0xb81   :  { %v2116_v26 = vperm.slane %v7354_v28, 1  ;;  %v2166_v28 = vld [vmem:[%s10336_s2 + $0x160] sm:$0xff] }
 0xb82   :  { %2243 = vmatpush.msra.mxu0 %v2122_v16  ;;  %v7355_v16 = vld [vmem:[%s10329_s16] sm:$0x7] }
 0xb83   :  { %v2119_v6 = vperm.slane %v7355_v16, 1  ;;  %v2658_v16 = vld [vmem:[%s10337_s7 + $0xf0] sm:$0xff] }
 0xbf0   :  { %v2023_v29 = vpop.f32.mrf.mxu0 }
 0xbf1   :  { %6382 = vmatmul.msk.f32.vlgmr.msrb.gmra.mxu0 %vm465_vm1, %v2023_v29  ;;  %v2163_v29 = vld [vmem:[%s10336_s2 + $0x148] sm:$0xff] }
 0xbf2   :  { %2263 = vmatpush.msrb.mxu0 %v2171_v36  ;;  %2448 = vmatpush.msrb.mxu1 %v2163_v29 }
 0xbf4   :  { %2264 = vmatpush.msrb.mxu0 %v2155_v39  ;;  %v2151_v39 = vld [vmem:[%s10336_s2 + $0xe8] sm:$0xff] }
 0xbf6   :  { %v2026_v42 = vpop.f32.mrf.mxu3 }
 0xbf9   :  { %6383 = vmatmul.msk.f32.gmra.mxu0 %vm465_vm1, %v2026_v42  ;;  %v2165_v42 = vld [vmem:[%s10336_s2 + $0x158] sm:$0xff] }
 0xc6e   :  { %v2060_v60 = vpop.f32.mrf.mxu0 }
 0xc6f   :  { %v2061_v51 = vadd.f32 %v7023_v27, %v2060_v60 }
 0xc71   :  { %v8576_v22 = vadd.f32 %v2061_v51, %v8230_v49  ;;  %v2144_v51 = vld [vmem:[%s10336_s2 + $0xb0] sm:$0xff] }
 0xc72   :  { %2380 = vmatpush.msrb.mxu2 %v2144_v51  ;;  %v2137_v51 = vld [vmem:[%s10336_s2 + $0x78] sm:$0xff] }
 0xc73   :  { %v2070_v14 = vsel %vm465_vm1, %v8576_v22, 0.0  ;;  %v2068_v3 = vmul.f32 %v8576_v22, %v8576_v22 }
 0xc74   :  { %2071 = vadd.xlane.f32.xlu0 %v2070_v14  ;;  %v2147_v14 = vld [vmem:[%s10336_s2 + $0xc8] sm:$0xff] }
 0xc75   :  { %v2076_v38 = vsel %vm465_vm1, %v2068_v3, 0.0  ;;  %v2149_v3 = vld [vmem:[%s10336_s2 + $0xd8] sm:$0xff]  ;;  %2449 = vmatpush.msrb.mxu1 %v2147_v14  ;;  %v2174_v14 = vld [vmem:[%s10336_s2 + $0x1a0] sm:$0xff] }
 0xc76   :  { %v2063_v55 = vpop.f32.mrf.mxu0  ;;  %2077 = vadd.xlane.f32.xlu1 %v2076_v38  ;;  %v2123_v38 = vld [vmem:[%s10336_s2 + $0x8] sm:$0xff] }
 0xc77   :  { %v2064_v15 = vadd.f32 %v7023_v27, %v2063_v55  ;;  %v2139_v27 = vld [vmem:[%s10336_s2 + $0x88] sm:$0xff]  ;;  %v2128_v55 = vld [vmem:[%s10336_s2 + $0x30] sm:$0xff] }
 0xc78   :  { %2265 = vmatpush.msrb.mxu0 %v2139_v27  ;;  %2381 = vmatpush.msrb.mxu2 %v2128_v55  ;;  %v2132_v27 = vld [vmem:[%s10336_s2 + $0x50] sm:$0xff] }
 0xc79   :  { %v8584_v52 = vadd.f32 %v2064_v15, %v8235_v12  ;;  %v2177_v12 = vld [vmem:[%s10336_s2 + $0x1b8] sm:$0xff]  ;;  %v2168_v55 = vld [vmem:[%s10336_s2 + $0x170] sm:$0xff] }
 0xc7a   :  { %2401 = vmatpush.msra.mxu3 %v2177_v12  ;;  %2266 = vmatpush.msrb.mxu0 %v2123_v38  ;;  %v2158_v38 = vld [vmem:[%s10336_s2 + $0x120] sm:$0xff] }
 0xc7b   :  { %v2073_v49 = vsel %vm465_vm1, %v8584_v52, 0.0  ;;  %v2069_v46 = vmul.f32 %v8584_v52, %v8584_v52 }
 0xc7c   :  { %2074 = vadd.xlane.f32.xlu2 %v2073_v49  ;;  %2402 = vmatpush.msra.mxu3 %v2161_v7 }
 0xc7d   :  { %v2079_v4 = vsel %vm465_vm1, %v2069_v46, 0.0  ;;  %v2131_v46 = vld [vmem:[%s10336_s2 + $0x48] sm:$0xff] }
 0xc7e   :  { %2080 = vadd.xlane.f32.xlu0 %v2079_v4  ;;  %2403 = vmatpush.msra.mxu3 %v2145_v31  ;;  %v2133_v4 = vld [vmem:[%s10336_s2 + $0x58] sm:$0xff] }
 0xc7f   :  { %2450 = vmatpush.msrb.mxu1 %v2131_v46  ;;  %v2126_v46 = vld [vmem:[%s10336_s2 + $0x20] sm:$0xff] }
 0xc80   :  { %2404 = vmatpush.msra.mxu3 %v2129_v34 }
 0xc82   :  { %2493 = vmatpush.msrb.mxu3 %v2181_v37 }
 0xc84   :  { %2494 = vmatpush.msrb.mxu3 %v2165_v42  ;;  %v2124_v42 = vld [vmem:[%s10336_s2 + $0x10] sm:$0xff] }
 0xc86   :  { %2495 = vmatpush.msrb.mxu3 %v2149_v3  ;;  %v2184_v3 = vld [vmem:[%s10336_s2 + $0x1f0] sm:$0xff] }
 0xc88   :  { %2496 = vmatpush.msrb.mxu3 %v2133_v4  ;;  %v2136_v4 = vld [vmem:[%s10336_s2 + $0x70] sm:$0xff] }
 0xce7   :  { %v2072_v24 = vpop.xlane.xlu0 %2071 }
 0xce8   :  { %v8607_v13 = vmul.f32 0.03125, %v2072_v24 }
 0xce9   :  { %v2078_v17 = vpop.xlane.xlu1 %2077 }
 0xcea   :  { %v2086_v9 = vmul.f32 %v8607_v13, %v8607_v13  ;;  %v2084_v53 = vmul.f32 0.03125, %v2078_v17  ;;  %v2090_v7 = vsub.f32 %v8576_v22, %v8607_v13  ;;  %v2172_v13 = vld [vmem:[%s10336_s2 + $0x190] sm:$0xff] }
 0xcec   :  { %v2088_v18 = vsub.f32 %v2084_v53, %v2086_v9  ;;  %v2180_v53 = vld [vmem:[%s10336_s2 + $0x1d0] sm:$0xff] }
 0xcee   :  { %v2092_v48 = vadd.f32 1e-05, %v2088_v18 }
 0xcef   :  { %v2075_v2 = vpop.xlane.xlu2 %2074 }
 0xcf0   :  { %7168 = vrsqrt.f32 %v2092_v48  ;;  %v8611_v41 = vmul.f32 0.03125, %v2075_v2  ;;  %vm2100_vm9 = vweird.f32 %v2092_v48  ;;  %v2185_v2 = vld [vmem:[%s10336_s2 + $0x1f8] sm:$0xff] }
 0xcf1   :  { %v2081_v23 = vpop.xlane.xlu0 %2080 }
 0xcf2   :  { %v2087_v40 = vmul.f32 %v8611_v41, %v8611_v41  ;;  %v2085_v58 = vmul.f32 0.03125, %v2081_v23  ;;  %v2091_v18 = vsub.f32 %v8584_v52, %v8611_v41  ;;  %v2156_v52 = vld [vmem:[%s10336_s2 + $0x110] sm:$0xff] }
 0xcf3   :  { %v2164_v41 = vld [vmem:[%s10336_s2 + $0x150] sm:$0xff] }
 0xcf4   :  { %v2089_v60 = vsub.f32 %v2085_v58, %v2087_v40  ;;  %v2140_v40 = vld [vmem:[%s10336_s2 + $0x90] sm:$0xff] }
 0xcf5   :  { %v2148_v58 = vld [vmem:[%s10336_s2 + $0xd0] sm:$0xff] }
 0xcf6   :  { %v7169_v15 = vpop.eup %7168  ;;  %v2093_v49 = vadd.f32 1e-05, %v2089_v60  ;;  %v2135_v60 = vld [vmem:[%s10336_s2 + $0x68] sm:$0xff] }
 0xcf7   :  { %v2095_v47 = vmul.f32 %v7169_v15, %v2092_v48  ;;  %vm2101_vm8 = vweird.f32 %v7169_v15  ;;  %v2183_v48 = vld [vmem:[%s10336_s2 + $0x1e8] sm:$0xff] }
 0xcf8   :  { %7170 = vrsqrt.f32 %v2093_v49  ;;  %vm2102_vm10 = vmor %vm2100_vm9, %vm2101_vm8  ;;  %vm2110_vm12 = vweird.f32 %v2093_v49 }
 0xcf9   :  { %v2096_v56 = vmul.f32 %v7169_v15, %v2095_v47  ;;  %v2178_v47 = vld [vmem:[%s10336_s2 + $0x1c0] sm:$0xff] }
 0xcfb   :  { %v2097_v44 = vmul.f32 0.5, %v2096_v56  ;;  %v2162_v56 = vld [vmem:[%s10336_s2 + $0x140] sm:$0xff] }
 0xcfd   :  { %v2098_v12 = vsub.f32 1.5, %v2097_v44  ;;  %v2146_v44 = vld [vmem:[%s10336_s2 + $0xc0] sm:$0xff] }
 0xcfe   :  { %v7171_v57 = vpop.eup %7170 }
 0xcff   :  { %v2099_v19 = vmul.f32 %v7169_v15, %v2098_v12  ;;  %v2105_v45 = vmul.f32 %v7171_v57, %v2093_v49  ;;  %vm2111_vm11 = vweird.f32 %v7171_v57  ;;  %v2152_v49 = vld [vmem:[%s10336_s2 + $0xf0] sm:$0xff]  ;;  %v2130_v12 = vld [vmem:[%s10336_s2 + $0x40] sm:$0xff] }
 0xd00   :  { %vm2112_vm13 = vmor %vm2110_vm12, %vm2111_vm11 }
 0xd01   :  { %v2103_v59 = vsel %vm2102_vm10, %v7169_v15, %v2099_v19  ;;  %v2106_v31 = vmul.f32 %v7171_v57, %v2105_v45  ;;  %v2142_v15 = vld [vmem:[%s10336_s2 + $0xa0] sm:$0xff]  ;;  %v2690_v19 = vld [vmem:[%s10337_s7 + $0x1f0] sm:$0xff]  ;;  %v2689_v45 = vld [vmem:[%s10337_s7 + $0x1e8] sm:$0xff] }
 0xd02   :  { %v2114_v5 = vmul.f32 %v2103_v59, %v2090_v7  ;;  %v2182_v7 = vld [vmem:[%s10336_s2 + $0x1e0] sm:$0xff]  ;;  %v2687_v59 = vld [vmem:[%s10337_s7 + $0x1d8] sm:$0xff] }
 0xd03   :  { %v2107_v24 = vmul.f32 0.5, %v2106_v31  ;;  %v2659_v31 = vld [vmem:[%s10337_s7 + $0xf8] sm:$0xff] }
 0xd04   :  { %v2117_v34 = vmul.f32 %v2116_v26, %v2114_v5  ;;  %v2686_v5 = vld [vmem:[%s10337_s7 + $0x1d0] sm:$0xff] }
 0xd05   :  { %v2108_v17 = vsub.f32 1.5, %v2107_v24  ;;  %v2134_v24 = vld [vmem:[%s10336_s2 + $0x60] sm:$0xff] }
 0xd06   :  { %v8635_v9 = vadd.f32 %v2119_v6, %v2117_v34  ;;  %v2685_v34 = vld [vmem:[%s10337_s7 + $0x1c8] sm:$0xff] }
 0xd07   :  { %v2109_v22 = vmul.f32 %v7171_v57, %v2108_v17  ;;  %v2657_v17 = vld [vmem:[%s10337_s7 + $0xe8] sm:$0xff] }
 0xd08   :  { %6384 = vmatmul.msk.f32.vlgmr.msra.gmra.mxu0 %vm465_vm1, %v8635_v9  ;;  %6390 = vmatmul.msk.f32.vlgmr.msra.gmra.mxu2 %vm465_vm1, %v8635_v9 }
 0xd09   :  { %v2113_v23 = vsel %vm2112_vm13, %v7171_v57, %v2109_v22  ;;  %6394 = vmatmul.msk.f32.vlgmr.msra.gmra.mxu1 %vm465_vm1, %v8635_v9  ;;  %6398 = vmatmul.msk.f32.vlgmr.msra.gmra.mxu3 %vm465_vm1, %v8635_v9  ;;  %v2691_v57 = vld [vmem:[%s10337_s7 + $0x1f8] sm:$0xff]  ;;  %v2684_v22 = vld [vmem:[%s10337_s7 + $0x1c0] sm:$0xff] }
 0xd0a   :  { %v2115_v36 = vmul.f32 %v2113_v23, %v2091_v18  ;;  %2286 = vmatpush.msra.mxu0 %v2172_v13  ;;  %2470 = vmatpush.msra.mxu2 %v2180_v53  ;;  %v2656_v13 = vld [vmem:[%s10337_s7 + $0xe0] sm:$0xff]  ;;  %v2683_v53 = vld [vmem:[%s10337_s7 + $0x1b8] sm:$0xff]  ;;  %v2681_v23 = vld [vmem:[%s10337_s7 + $0x1a8] sm:$0xff] }
 0xd0b   :  { %2539 = vmatpush.msra.mxu1 %v2183_v48  ;;  %2585 = vmatpush.msra.mxu3 %v2185_v2  ;;  %v2655_v18 = vld [vmem:[%s10337_s7 + $0xd8] sm:$0xff]  ;;  %v2682_v48 = vld [vmem:[%s10337_s7 + $0x1b0] sm:$0xff] }
 0xd0c   :  { %v2118_v37 = vmul.f32 %v2116_v26, %v2115_v36  ;;  %2287 = vmatpush.msra.mxu0 %v2156_v52  ;;  %2471 = vmatpush.msra.mxu2 %v2164_v41  ;;  %v2688_v26 = vld [vmem:[%s10337_s7 + $0x1e0] sm:$0xff]  ;;  %v2654_v2 = vld [vmem:[%s10337_s7 + $0xd0] sm:$0xff]  ;;  %v2643_v52 = vld [vmem:[%s10337_s7 + $0x78] sm:$0xff] }
 0xd0d   :  { %2540 = vmatpush.msra.mxu1 %v2167_v50  ;;  %2586 = vmatpush.msra.mxu3 %v2169_v0  ;;  %v2653_v41 = vld [vmem:[%s10337_s7 + $0xc8] sm:$0xff]  ;;  %v2675_v36 = vld [vmem:[%s10337_s7 + $0x178] sm:$0xff]  ;;  %v2680_v50 = vld [vmem:[%s10337_s7 + $0x1a0] sm:$0xff] }
 0xd0e   :  { %v8659_v29 = vadd.f32 %v2119_v6, %v2118_v37  ;;  %2288 = vmatpush.msra.mxu0 %v2140_v40  ;;  %2472 = vmatpush.msra.mxu2 %v2148_v58  ;;  %v2150_v6 = vld [vmem:[%s10336_s2 + $0xe0] sm:$0xff]  ;;  %v2642_v0 = vld [vmem:[%s10337_s7 + $0x70] sm:$0xff]  ;;  %v2679_v37 = vld [vmem:[%s10337_s7 + $0x198] sm:$0xff] }
 0xd0f   :  { %2541 = vmatpush.msra.mxu1 %v2151_v39  ;;  %2587 = vmatpush.msra.mxu3 %v2153_v10  ;;  %v2652_v40 = vld [vmem:[%s10337_s7 + $0xc0] sm:$0xff]  ;;  %v2674_v58 = vld [vmem:[%s10337_s7 + $0x170] sm:$0xff]  ;;  %v2673_v39 = vld [vmem:[%s10337_s7 + $0x168] sm:$0xff] }
 0xd10   :  { %6385 = vmatmul.msk.f32.gmra.mxu0 %vm465_vm1, %v8659_v29  ;;  %6391 = vmatmul.msk.f32.gmra.mxu2 %vm465_vm1, %v8659_v29  ;;  %v2641_v10 = vld [vmem:[%s10337_s7 + $0x68] sm:$0xff] }
 0xd11   :  { %6395 = vmatmul.msk.f32.gmra.mxu1 %vm465_vm1, %v8659_v29  ;;  %6399 = vmatmul.msk.f32.gmra.mxu3 %vm465_vm1, %v8659_v29 }
 0xd12   :  { %2289 = vmatpush.msra.mxu0 %v2124_v42  ;;  %2473 = vmatpush.msra.mxu2 %v2132_v27  ;;  %v2651_v42 = vld [vmem:[%s10337_s7 + $0xb8] sm:$0xff]  ;;  %v2678_v27 = vld [vmem:[%s10337_s7 + $0x190] sm:$0xff] }
 0xd13   :  { %2542 = vmatpush.msra.mxu1 %v2135_v60  ;;  %2588 = vmatpush.msra.mxu3 %v2137_v51  ;;  %v2672_v60 = vld [vmem:[%s10337_s7 + $0x160] sm:$0xff] }
 0xd14   :  { %v2640_v51 = vld [vmem:[%s10337_s7 + $0x60] sm:$0xff] }
 0xd18   :  { %6386 = vmatmul.msk.f32.vlgmr.msrb.gmra.mxu0 %vm465_vm1, %v8635_v9  ;;  %6396 = vmatmul.msk.f32.vlgmr.msrb.gmra.mxu2 %vm465_vm1, %v8635_v9 }
 0xd19   :  { %6402 = vmatmul.msk.f32.vlgmr.msrb.gmra.mxu1 %vm465_vm1, %v8635_v9  ;;  %6406 = vmatmul.msk.f32.vlgmr.msrb.gmra.mxu3 %vm465_vm1, %v8635_v9 }
 0xd1a   :  { %2332 = vmatpush.msrb.mxu0 %v2174_v14  ;;  %2562 = vmatpush.msrb.mxu2 %v2184_v3  ;;  %v2650_v14 = vld [vmem:[%s10337_s7 + $0xb0] sm:$0xff]  ;;  %v2677_v3 = vld [vmem:[%s10337_s7 + $0x188] sm:$0xff] }
 0xd1b   :  { %2957 = vmatpush.msrb.mxu3 %v2691_v57  ;;  %2911 = vmatpush.msrb.mxu1 %v2659_v31  ;;  %v2647_v57 = vld [vmem:[%s10337_s7 + $0x98] sm:$0xff]  ;;  %v2645_v31 = vld [vmem:[%s10337_s7 + $0x88] sm:$0xff] }
 0xd1c   :  { %2333 = vmatpush.msrb.mxu0 %v2158_v38  ;;  %2563 = vmatpush.msrb.mxu2 %v2168_v55  ;;  %v2639_v38 = vld [vmem:[%s10337_s7 + $0x58] sm:$0xff]  ;;  %v2649_v55 = vld [vmem:[%s10337_s7 + $0xa8] sm:$0xff] }
 0xd1d   :  { %2958 = vmatpush.msrb.mxu3 %v2690_v19  ;;  %2912 = vmatpush.msrb.mxu1 %v2658_v16  ;;  %v2669_v19 = vld [vmem:[%s10337_s7 + $0x148] sm:$0xff]  ;;  %v2668_v16 = vld [vmem:[%s10337_s7 + $0x140] sm:$0xff] }
 0xd1e   :  { %2334 = vmatpush.msrb.mxu0 %v2142_v15  ;;  %2564 = vmatpush.msrb.mxu2 %v2152_v49  ;;  %v2676_v15 = vld [vmem:[%s10337_s7 + $0x180] sm:$0xff]  ;;  %v2671_v49 = vld [vmem:[%s10337_s7 + $0x158] sm:$0xff] }
 0xd1f   :  { %2959 = vmatpush.msrb.mxu3 %v2689_v45  ;;  %2913 = vmatpush.msrb.mxu1 %v2657_v17  ;;  %v2636_v45 = vld [vmem:[%s10337_s7 + $0x40] sm:$0xff]  ;;  %v2633_v17 = vld [vmem:[%s10337_s7 + $0x28] sm:$0xff] }
 0xd20   :  { %6387 = vmatmul.msk.f32.gmra.mxu0 %vm465_vm1, %v8659_v29  ;;  %6397 = vmatmul.msk.f32.gmra.mxu2 %vm465_vm1, %v8659_v29 }
 0xd21   :  { %6403 = vmatmul.msk.f32.gmra.mxu1 %vm465_vm1, %v8659_v29  ;;  %6407 = vmatmul.msk.f32.gmra.mxu3 %vm465_vm1, %v8659_v29 }
 0xd22   :  { %2335 = vmatpush.msrb.mxu0 %v2126_v46  ;;  %2565 = vmatpush.msrb.mxu2 %v2136_v4  ;;  %v2638_v46 = vld [vmem:[%s10337_s7 + $0x50] sm:$0xff]  ;;  %v2755_v4 = vld [vmem:[%s10337_s7 + $0x3f8] sm:$0xff] }
 0xd23   :  { %2960 = vmatpush.msrb.mxu3 %v2688_v26  ;;  %2914 = vmatpush.msrb.mxu1 %v2656_v13  ;;  %v2635_v26 = vld [vmem:[%s10337_s7 + $0x38] sm:$0xff]  ;;  %v2750_v13 = vld [vmem:[%s10337_s7 + $0x3d0] sm:$0xff] }
 0xd25   :  { %2961 = vmatpush.msrb.mxu3 %v2687_v59  ;;  %2915 = vmatpush.msrb.mxu1 %v2655_v18  ;;  %v2752_v59 = vld [vmem:[%s10337_s7 + $0x3e0] sm:$0xff] }
 0xd26   :  { %v2632_v18 = vld [vmem:[%s10337_s7 + $0x20] sm:$0xff] }
 0xd27   :  { %2962 = vmatpush.msrb.mxu3 %v2686_v5  ;;  %2916 = vmatpush.msrb.mxu1 %v2654_v2  ;;  %v2751_v5 = vld [vmem:[%s10337_s7 + $0x3d8] sm:$0xff]  ;;  %v2749_v2 = vld [vmem:[%s10337_s7 + $0x3c8] sm:$0xff] }
 0xd28   :  { %6388 = vmatmul.msk.f32.vlgmr.msra.gmra.mxu0 %vm465_vm1, %v8635_v9  ;;  %6404 = vmatmul.msk.f32.vlgmr.msra.gmra.mxu2 %vm465_vm1, %v8635_v9 }
 0xd29   :  { %6410 = vmatmul.msk.f32.vlgmr.msra.gmra.mxu1 %vm465_vm1, %v8635_v9  ;;  %6414 = vmatmul.msk.f32.vlgmr.msra.gmra.mxu3 %vm465_vm1, %v8635_v9 }
 0xd2a   :  { %2424 = vmatpush.msra.mxu0 %v2178_v47  ;;  %2963 = vmatpush.msrb.mxu3 %v2685_v34  ;;  %v2648_v47 = vld [vmem:[%s10337_s7 + $0xa0] sm:$0xff]  ;;  %v2667_v34 = vld [vmem:[%s10337_s7 + $0x138] sm:$0xff] }
 0xd2b   :  { %2934 = vmatpush.msra.mxu2 %v2675_v36  ;;  %2917 = vmatpush.msrb.mxu1 %v2653_v41  ;;  %v2748_v41 = vld [vmem:[%s10337_s7 + $0x3c0] sm:$0xff]  ;;  %v2665_v36 = vld [vmem:[%s10337_s7 + $0x128] sm:$0xff] }
 0xd2c   :  { %2425 = vmatpush.msra.mxu0 %v2162_v56  ;;  %2964 = vmatpush.msrb.mxu3 %v2684_v22  ;;  %v2670_v56 = vld [vmem:[%s10337_s7 + $0x150] sm:$0xff]  ;;  %v2723_v22 = vld [vmem:[%s10337_s7 + $0x2f8] sm:$0xff] }
 0xd2d   :  { %2935 = vmatpush.msra.mxu2 %v2674_v58  ;;  %2918 = vmatpush.msrb.mxu1 %v2652_v40  ;;  %v2747_v40 = vld [vmem:[%s10337_s7 + $0x3b8] sm:$0xff]  ;;  %v2664_v58 = vld [vmem:[%s10337_s7 + $0x120] sm:$0xff] }
 0xd2e   :  { %2426 = vmatpush.msra.mxu0 %v2146_v44  ;;  %2965 = vmatpush.msrb.mxu3 %v2683_v53  ;;  %v2637_v44 = vld [vmem:[%s10337_s7 + $0x48] sm:$0xff]  ;;  %v2666_v53 = vld [vmem:[%s10337_s7 + $0x130] sm:$0xff] }
 0xd2f   :  { %2936 = vmatpush.msra.mxu2 %v2673_v39  ;;  %2919 = vmatpush.msrb.mxu1 %v2651_v42  ;;  %v2719_v39 = vld [vmem:[%s10337_s7 + $0x2d8] sm:$0xff] }
 0xd30   :  { %6389 = vmatmul.msk.f32.gmra.mxu0 %vm465_vm1, %v8659_v29  ;;  %6405 = vmatmul.msk.f32.gmra.mxu2 %vm465_vm1, %v8659_v29  ;;  %v2663_v42 = vld [vmem:[%s10337_s7 + $0x118] sm:$0xff] }
 0xd31   :  { %6411 = vmatmul.msk.f32.gmra.mxu1 %vm465_vm1, %v8659_v29  ;;  %6415 = vmatmul.msk.f32.gmra.mxu3 %vm465_vm1, %v8659_v29 }
 0xd32   :  { %2427 = vmatpush.msra.mxu0 %v2130_v12  ;;  %2966 = vmatpush.msrb.mxu3 %v2682_v48  ;;  %v2754_v12 = vld [vmem:[%s10337_s7 + $0x3f0] sm:$0xff] }
 0xd33   :  { %2937 = vmatpush.msra.mxu2 %v2672_v60  ;;  %2920 = vmatpush.msrb.mxu1 %v2650_v14  ;;  %v2722_v48 = vld [vmem:[%s10337_s7 + $0x2f0] sm:$0xff]  ;;  %v2707_v60 = vld [vmem:[%s10337_s7 + $0x278] sm:$0xff]  ;;  %v2745_v14 = vld [vmem:[%s10337_s7 + $0x3a8] sm:$0xff] }
 0xd34   :  { %2967 = vmatpush.msrb.mxu3 %v2681_v23  ;;  %v2631_v23 = vld [vmem:[%s10337_s7 + $0x18] sm:$0xff] }
 0xd35   :  { %2921 = vmatpush.msrb.mxu1 %v2649_v55  ;;  %2938 = vmatpush.msra.mxu2 %v2671_v49  ;;  %v2717_v55 = vld [vmem:[%s10337_s7 + $0x2c8] sm:$0xff] }
 0xd36   :  { %2968 = vmatpush.msrb.mxu3 %v2680_v50  ;;  %v2630_v50 = vld [vmem:[%s10337_s7 + $0x10] sm:$0xff]  ;;  %v2661_v49 = vld [vmem:[%s10337_s7 + $0x108] sm:$0xff] }
 0xd37   :  { %2922 = vmatpush.msrb.mxu1 %v2648_v47  ;;  %2939 = vmatpush.msra.mxu2 %v2670_v56  ;;  %v2743_v47 = vld [vmem:[%s10337_s7 + $0x398] sm:$0xff]  ;;  %v2660_v56 = vld [vmem:[%s10337_s7 + $0x100] sm:$0xff] }
 0xd38   :  { %6392 = vmatmul.msk.f32.vlgmr.msrb.gmra.mxu0 %vm465_vm1, %v8635_v9  ;;  %6412 = vmatmul.msk.f32.vlgmr.msrb.gmra.mxu2 %vm465_vm1, %v8635_v9 }
 0xd39   :  { %2516 = vmatpush.msrb.mxu0 %v2182_v7  ;;  %2969 = vmatpush.msrb.mxu3 %v2679_v37  ;;  %v2753_v7 = vld [vmem:[%s10337_s7 + $0x3e8] sm:$0xff] }
 0xd3a   :  { %2923 = vmatpush.msrb.mxu1 %v2647_v57  ;;  %2940 = vmatpush.msra.mxu2 %v2669_v19  ;;  %v2629_v37 = vld [vmem:[%s10337_s7 + $0x8] sm:$0xff]  ;;  %v2739_v57 = vld [vmem:[%s10337_s7 + $0x378] sm:$0xff]  ;;  %v2742_v19 = vld [vmem:[%s10337_s7 + $0x390] sm:$0xff] }
 0xd3b   :  { %2517 = vmatpush.msrb.mxu0 %v2166_v28  ;;  %2970 = vmatpush.msrb.mxu3 %v2678_v27  ;;  %v2646_v28 = vld [vmem:[%s10337_s7 + $0x90] sm:$0xff]  ;;  %v2628_v27 = vld [vmem:[%s10337_s7] sm:$0xff] }
 0xd3c   :  { %2924 = vmatpush.msrb.mxu1 %v2646_v28  ;;  %2941 = vmatpush.msra.mxu2 %v2668_v16  ;;  %v2738_v28 = vld [vmem:[%s10337_s7 + $0x370] sm:$0xff]  ;;  %v2737_v16 = vld [vmem:[%s10337_s7 + $0x368] sm:$0xff] }
 0xd3d   :  { %2518 = vmatpush.msrb.mxu0 %v2150_v6  ;;  %2971 = vmatpush.msrb.mxu3 %v2677_v3  ;;  %v2634_v6 = vld [vmem:[%s10337_s7 + $0x30] sm:$0xff] }
 0xd3e   :  { %2925 = vmatpush.msrb.mxu1 %v2645_v31  ;;  %2942 = vmatpush.msra.mxu2 %v2667_v34  ;;  %v2662_v3 = vld [vmem:[%s10337_s7 + $0x110] sm:$0xff]  ;;  %v2713_v31 = vld [vmem:[%s10337_s7 + $0x2a8] sm:$0xff]  ;;  %v2736_v34 = vld [vmem:[%s10337_s7 + $0x360] sm:$0xff] }
 0xd3f   :  { %2519 = vmatpush.msrb.mxu0 %v2134_v24  ;;  %2972 = vmatpush.msrb.mxu3 %v2676_v15  ;;  %v2644_v24 = vld [vmem:[%s10337_s7 + $0x80] sm:$0xff] }
 0xd40   :  { %6393 = vmatmul.msk.f32.gmra.mxu0 %vm465_vm1, %v8659_v29  ;;  %6413 = vmatmul.msk.f32.gmra.mxu2 %vm465_vm1, %v8659_v29  ;;  %v2744_v15 = vld [vmem:[%s10337_s7 + $0x3a0] sm:$0xff] }
 0xd41   :  { %3049 = vmatpush.msra.mxu3 %v2755_v4  ;;  %2926 = vmatpush.msrb.mxu1 %v2644_v24  ;;  %v2716_v4 = vld [vmem:[%s10337_s7 + $0x2c0] sm:$0xff] }
 0xd42   :  { %2943 = vmatpush.msra.mxu2 %v2666_v53  ;;  %v2712_v24 = vld [vmem:[%s10337_s7 + $0x2a0] sm:$0xff]  ;;  %v2699_v53 = vld [vmem:[%s10337_s7 + $0x238] sm:$0xff] }
 0xd43   :  { %3050 = vmatpush.msra.mxu3 %v2754_v12  ;;  %3003 = vmatpush.msra.mxu1 %v2723_v22  ;;  %v2715_v12 = vld [vmem:[%s10337_s7 + $0x2b8] sm:$0xff] }
 0xd44   :  { %2944 = vmatpush.msra.mxu2 %v2665_v36  ;;  %v2711_v22 = vld [vmem:[%s10337_s7 + $0x298] sm:$0xff]  ;;  %v2708_v36 = vld [vmem:[%s10337_s7 + $0x280] sm:$0xff] }
 0xd45   :  { %3051 = vmatpush.msra.mxu3 %v2753_v7  ;;  %3004 = vmatpush.msra.mxu1 %v2722_v48  ;;  %v2714_v7 = vld [vmem:[%s10337_s7 + $0x2b0] sm:$0xff] }
 0xd46   :  { %2945 = vmatpush.msra.mxu2 %v2664_v58  ;;  %v2734_v48 = vld [vmem:[%s10337_s7 + $0x350] sm:$0xff]  ;;  %v2695_v58 = vld [vmem:[%s10337_s7 + $0x218] sm:$0xff] }
 0xd47   :  { %3052 = vmatpush.msra.mxu3 %v2752_v59  ;;  %v2702_v59 = vld [vmem:[%s10337_s7 + $0x250] sm:$0xff] }
 0xd48   :  { %6400 = vmatmul.msk.f32.vlgmr.msra.gmra.mxu0 %vm465_vm1, %v8635_v9  ;;  %2946 = vmatpush.msra.mxu2 %v2663_v42  ;;  %v2729_v42 = vld [vmem:[%s10337_s7 + $0x328] sm:$0xff] }
 0xd49   :  { %2888 = vmatpush.msra.mxu0 %v2643_v52  ;;  %3053 = vmatpush.msra.mxu3 %v2751_v5  ;;  %v2721_v52 = vld [vmem:[%s10337_s7 + $0x2e8] sm:$0xff] }
 0xd4a   :  { %3005 = vmatpush.msra.mxu1 %v2721_v52  ;;  %2947 = vmatpush.msra.mxu2 %v2662_v3  ;;  %v2701_v5 = vld [vmem:[%s10337_s7 + $0x248] sm:$0xff]  ;;  %v2727_v3 = vld [vmem:[%s10337_s7 + $0x318] sm:$0xff] }
 0xd4b   :  { %2889 = vmatpush.msra.mxu0 %v2642_v0  ;;  %3054 = vmatpush.msra.mxu3 %v2750_v13  ;;  %v2720_v0 = vld [vmem:[%s10337_s7 + $0x2e0] sm:$0xff]  ;;  %v2735_v13 = vld [vmem:[%s10337_s7 + $0x358] sm:$0xff]  ;;  %v2733_v52 = vld [vmem:[%s10337_s7 + $0x348] sm:$0xff] }
 0xd4c   :  { %3006 = vmatpush.msra.mxu1 %v2720_v0  ;;  %2948 = vmatpush.msra.mxu2 %v2661_v49  ;;  %v2696_v0 = vld [vmem:[%s10337_s7 + $0x220] sm:$0xff]  ;;  %v2725_v49 = vld [vmem:[%s10337_s7 + $0x308] sm:$0xff] }
 0xd4d   :  { %2890 = vmatpush.msra.mxu0 %v2641_v10  ;;  %3055 = vmatpush.msra.mxu3 %v2749_v2  ;;  %v2746_v10 = vld [vmem:[%s10337_s7 + $0x3b0] sm:$0xff] }
 0xd4e   :  { %3007 = vmatpush.msra.mxu1 %v2719_v39  ;;  %2949 = vmatpush.msra.mxu2 %v2660_v56  ;;  %v2698_v2 = vld [vmem:[%s10337_s7 + $0x230] sm:$0xff]  ;;  %v8857_v39 = vld [vmem:[%s10338_s10] sm:$0xff] }
 0xd4f   :  { %2891 = vmatpush.msra.mxu0 %v2640_v51  ;;  %3056 = vmatpush.msra.mxu3 %v2748_v41  ;;  %v2718_v51 = vld [vmem:[%s10337_s7 + $0x2d0] sm:$0xff]  ;;  %v2697_v41 = vld [vmem:[%s10337_s7 + $0x228] sm:$0xff]  ;;  %v2724_v56 = vld [vmem:[%s10337_s7 + $0x300] sm:$0xff] }
 0xd50   :  { %6401 = vmatmul.msk.f32.gmra.mxu0 %vm465_vm1, %v8659_v29  ;;  %3008 = vmatpush.msra.mxu1 %v2718_v51  ;;  %v2190_v51 = vperm.slane %v8857_v39, 0 }
 0xd51   :  { %2892 = vmatpush.msra.mxu0 %v2639_v38  ;;  %3057 = vmatpush.msra.mxu3 %v2747_v40  ;;  %v2706_v38 = vld [vmem:[%s10337_s7 + $0x270] sm:$0xff]  ;;  %v2731_v40 = vld [vmem:[%s10337_s7 + $0x338] sm:$0xff] }
 0xd52   :  { %3009 = vmatpush.msra.mxu1 %v2717_v55  ;;  %3026 = vmatpush.msrb.mxu2 %v2739_v57  ;;  %v2726_v55 = vld [vmem:[%s10337_s7 + $0x310] sm:$0xff] }
 0xd53   :  { %2893 = vmatpush.msra.mxu0 %v2638_v46  ;;  %3058 = vmatpush.msra.mxu3 %v2746_v10  ;;  %v2705_v46 = vld [vmem:[%s10337_s7 + $0x268] sm:$0xff]  ;;  %v2694_v10 = vld [vmem:[%s10337_s7 + $0x210] sm:$0xff] }
 0xd54   :  { %3010 = vmatpush.msra.mxu1 %v2716_v4  ;;  %3027 = vmatpush.msrb.mxu2 %v2738_v28  ;;  %v2193_v4 = vperm.slane %v8857_v39, 3 }
 0xd55   :  { %2894 = vmatpush.msra.mxu0 %v2637_v44  ;;  %3059 = vmatpush.msra.mxu3 %v2745_v14  ;;  %v2704_v44 = vld [vmem:[%s10337_s7 + $0x260] sm:$0xff] }
 0xd56   :  { %3011 = vmatpush.msra.mxu1 %v2715_v12  ;;  %3028 = vmatpush.msrb.mxu2 %v2737_v16  ;;  %v2692_v14 = vld [vmem:[%s10337_s7 + $0x200] sm:$0xff]  ;;  %v2818_v16 = vld [vmem:[%s10337_s7 + $0x5f0] sm:$0xff] }
 0xd57   :  { %2895 = vmatpush.msra.mxu0 %v2636_v45  ;;  %3060 = vmatpush.msra.mxu3 %v2744_v15  ;;  %v2703_v45 = vld [vmem:[%s10337_s7 + $0x258] sm:$0xff] }
 0xd58   :  { %6408 = vmatmul.msk.f32.vlgmr.msrb.gmra.mxu0 %vm465_vm1, %v8635_v9  ;;  %3012 = vmatpush.msra.mxu1 %v2714_v7 }
 0xd59   :  { %2896 = vmatpush.msra.mxu0 %v2635_v26  ;;  %3061 = vmatpush.msra.mxu3 %v2743_v47  ;;  %v2741_v26 = vld [vmem:[%s10337_s7 + $0x388] sm:$0xff]  ;;  %v2771_v47 = vld [vmem:[%s10337_s7 + $0x478] sm:$0xff] }
 0xd5a   :  { %3013 = vmatpush.msra.mxu1 %v2713_v31  ;;  %3029 = vmatpush.msrb.mxu2 %v2736_v34  ;;  %v2766_v34 = vld [vmem:[%s10337_s7 + $0x450] sm:$0xff] }
 0xd5b   :  { %2897 = vmatpush.msra.mxu0 %v2634_v6  ;;  %3062 = vmatpush.msra.mxu3 %v2742_v19  ;;  %v2740_v6 = vld [vmem:[%s10337_s7 + $0x380] sm:$0xff]  ;;  %v2769_v19 = vld [vmem:[%s10337_s7 + $0x468] sm:$0xff] }
 0xd5c   :  { %3014 = vmatpush.msra.mxu1 %v2712_v24  ;;  %3030 = vmatpush.msrb.mxu2 %v2735_v13  ;;  %v2191_v24 = vperm.slane %v8857_v39, 1 }
 0xd5d   :  { %2898 = vmatpush.msra.mxu0 %v2633_v17  ;;  %3063 = vmatpush.msra.mxu3 %v2741_v26  ;;  %v2700_v17 = vld [vmem:[%s10337_s7 + $0x240] sm:$0xff]  ;;  %v2819_v26 = vld [vmem:[%s10337_s7 + $0x5f8] sm:$0xff] }
 0xd5e   :  { %3015 = vmatpush.msra.mxu1 %v2711_v22  ;;  %3031 = vmatpush.msrb.mxu2 %v2734_v48 }
 0xd5f   :  { %2899 = vmatpush.msra.mxu0 %v2632_v18  ;;  %3064 = vmatpush.msra.mxu3 %v2740_v6  ;;  %v2710_v18 = vld [vmem:[%s10337_s7 + $0x290] sm:$0xff]  ;;  %v2767_v6 = vld [vmem:[%s10337_s7 + $0x458] sm:$0xff] }
 0xd60   :  { %6409 = vmatmul.msk.f32.gmra.mxu0 %vm465_vm1, %v8659_v29  ;;  %3016 = vmatpush.msra.mxu1 %v2710_v18  ;;  %v2765_v18 = vld [vmem:[%s10337_s7 + $0x448] sm:$0xff] }
 0xd61   :  { %2900 = vmatpush.msra.mxu0 %v2631_v23  ;;  %v2709_v23 = vld [vmem:[%s10337_s7 + $0x288] sm:$0xff]  ;;  %3032 = vmatpush.msrb.mxu2 %v2733_v52 }
 0xd62   :  { %3017 = vmatpush.msra.mxu1 %v2709_v23 }
 0xd63   :  { %2901 = vmatpush.msra.mxu0 %v2630_v50  ;;  %v2732_v50 = vld [vmem:[%s10337_s7 + $0x340] sm:$0xff] }
 0xd64   :  { %3018 = vmatpush.msra.mxu1 %v2708_v36  ;;  %3033 = vmatpush.msrb.mxu2 %v2732_v50  ;;  %v2764_v36 = vld [vmem:[%s10337_s7 + $0x440] sm:$0xff] }
 0xd65   :  { %2902 = vmatpush.msra.mxu0 %v2629_v37  ;;  %v2730_v37 = vld [vmem:[%s10337_s7 + $0x330] sm:$0xff] }
 0xd66   :  { %3034 = vmatpush.msrb.mxu2 %v2731_v40  ;;  %v2814_v40 = vld [vmem:[%s10337_s7 + $0x5d0] sm:$0xff] }
 0xd67   :  { %2903 = vmatpush.msra.mxu0 %v2628_v27  ;;  %v2693_v27 = vld [vmem:[%s10337_s7 + $0x208] sm:$0xff] }
 0xd68   :  { %3035 = vmatpush.msrb.mxu2 %v2730_v37 }
 0xd69   :  { %2980 = vmatpush.msrb.mxu0 %v2707_v60  ;;  %v2728_v60 = vld [vmem:[%s10337_s7 + $0x320] sm:$0xff] }
 0xd6a   :  { %3036 = vmatpush.msrb.mxu2 %v2729_v42  ;;  %v2813_v42 = vld [vmem:[%s10337_s7 + $0x5c8] sm:$0xff] }
 0xd6b   :  { %2981 = vmatpush.msrb.mxu0 %v2706_v38 }
 0xd6c   :  { %3037 = vmatpush.msrb.mxu2 %v2728_v60  ;;  %v2785_v60 = vld [vmem:[%s10337_s7 + $0x4e8] sm:$0xff] }
 0xd6d   :  { %2982 = vmatpush.msrb.mxu0 %v2705_v46 }
 0xd6e   :  { %3038 = vmatpush.msrb.mxu2 %v2727_v3 }
 0xd6f   :  { %2983 = vmatpush.msrb.mxu0 %v2704_v44  ;;  %v2770_v44 = vld [vmem:[%s10337_s7 + $0x470] sm:$0xff] }
 0xd70   :  { %3039 = vmatpush.msrb.mxu2 %v2726_v55 }
 0xd71   :  { %2984 = vmatpush.msrb.mxu0 %v2703_v45 }
 0xd72   :  { %3040 = vmatpush.msrb.mxu2 %v2725_v49  ;;  %v2784_v49 = vld [vmem:[%s10337_s7 + $0x4e0] sm:$0xff] }
 0xd73   :  { %2985 = vmatpush.msrb.mxu0 %v2702_v59  ;;  %v2768_v59 = vld [vmem:[%s10337_s7 + $0x460] sm:$0xff] }
 0xd74   :  { %3041 = vmatpush.msrb.mxu2 %v2724_v56 }
 0xd75   :  { %2986 = vmatpush.msrb.mxu0 %v2701_v5  ;;  %v2817_v5 = vld [vmem:[%s10337_s7 + $0x5e8] sm:$0xff] }
 0xd77   :  { %2987 = vmatpush.msrb.mxu0 %v2700_v17 }
 0xd79   :  { %2988 = vmatpush.msrb.mxu0 %v2699_v53  ;;  %v2816_v53 = vld [vmem:[%s10337_s7 + $0x5e0] sm:$0xff] }
 0xd7b   :  { %2989 = vmatpush.msrb.mxu0 %v2698_v2  ;;  %v2197_v2 = vperm.slane %v8857_v39, 7 }
 0xd7d   :  { %2990 = vmatpush.msrb.mxu0 %v2697_v41  ;;  %v2815_v41 = vld [vmem:[%s10337_s7 + $0x5d8] sm:$0xff] }
 0xd7f   :  { %2991 = vmatpush.msrb.mxu0 %v2696_v0  ;;  %v2787_v0 = vld [vmem:[%s10337_s7 + $0x4f8] sm:$0xff] }
 0xd81   :  { %2992 = vmatpush.msrb.mxu0 %v2695_v58  ;;  %v2763_v58 = vld [vmem:[%s10337_s7 + $0x438] sm:$0xff] }
 0xd83   :  { %2993 = vmatpush.msrb.mxu0 %v2694_v10  ;;  %v2786_v10 = vld [vmem:[%s10337_s7 + $0x4f0] sm:$0xff] }
 0xd85   :  { %2994 = vmatpush.msrb.mxu0 %v2693_v27  ;;  %v2245_v38 = vpop.f32.mrf.mxu0  ;;  %v2762_v27 = vld [vmem:[%s10337_s7 + $0x430] sm:$0xff] }
 0xd86   :  { %v2246_v15 = vadd.f32 %v2245_v38, %v2190_v51  ;;  %v2761_v38 = vld [vmem:[%s10337_s7 + $0x428] sm:$0xff]  ;;  %v2360_v56 = vpop.f32.mrf.mxu1 }
 0xd87   :  { %2995 = vmatpush.msrb.mxu0 %v2692_v14 }
 0xd88   :  { %v2596_v46 = vmax.f32 %v2246_v15, 0.0 }
 0xd8a   :  { %2904 = vmatmul.f32.vlgmr.msra.gmra.mxu0 %v2596_v46  ;;  %v2811_v46 = vld [vmem:[%s10337_s7 + $0x5b8] sm:$0xff] }
 0xd8b   :  { %v2314_v12 = vpop.f32.mrf.mxu2  ;;  %3072 = vmatpush.msra.mxu0 %v2771_v47  ;;  %v2195_v47 = vperm.slane %v8857_v39, 5 }
 0xd8c   :  { %v2315_v57 = vadd.f32 %v2314_v12, %v2193_v4  ;;  %v2406_v17 = vpop.f32.mrf.mxu3  ;;  %v2783_v12 = vld [vmem:[%s10337_s7 + $0x4d8] sm:$0xff] }
 0xd8d   :  { %v2248_v45 = vpop.f32.mrf.mxu0  ;;  %3073 = vmatpush.msra.mxu0 %v2770_v44  ;;  %v2407_v37 = vadd.f32 %v2406_v17, %v2197_v2 }
 0xd8e   :  { %v2599_v7 = vmax.f32 %v2315_v57, 0.0  ;;  %v2249_v28 = vadd.f32 %v2248_v45, %v2190_v51  ;;  %v2812_v51 = vld [vmem:[%s10337_s7 + $0x5c0] sm:$0xff]  ;;  %v2810_v57 = vld [vmem:[%s10337_s7 + $0x5b0] sm:$0xff] }
 0xd8f   :  { %3074 = vmatpush.msra.mxu0 %v2769_v19  ;;  %v2603_v55 = vmax.f32 %v2407_v37, 0.0  ;;  %v2759_v19 = vld [vmem:[%s10337_s7 + $0x418] sm:$0xff]  ;;  %v2805_v37 = vld [vmem:[%s10337_s7 + $0x588] sm:$0xff] }
 0xd90   :  { %v2612_v31 = vmax.f32 %v2249_v28, 0.0  ;;  %2973 = vmatmul.f32.vlgmr.msrb.gmra.mxu3 %v2599_v7  ;;  %v2782_v7 = vld [vmem:[%s10337_s7 + $0x4d0] sm:$0xff]  ;;  %v2809_v28 = vld [vmem:[%s10337_s7 + $0x5a8] sm:$0xff] }
 0xd91   :  { %3141 = vmatpush.msrb.mxu3 %v2819_v26  ;;  %3075 = vmatpush.msra.mxu0 %v2768_v59  ;;  %v2192_v26 = vperm.slane %v8857_v39, 2  ;;  %v2758_v59 = vld [vmem:[%s10337_s7 + $0x410] sm:$0xff] }
 0xd92   :  { %2907 = vmatmul.f32.gmra.mxu0 %v2612_v31  ;;  %v2361_v31 = vadd.f32 %v2360_v56, %v2195_v47 }
 0xd93   :  { %3142 = vmatpush.msrb.mxu3 %v2818_v16  ;;  %v2317_v22 = vpop.f32.mrf.mxu2  ;;  %3076 = vmatpush.msra.mxu0 %v2767_v6  ;;  %v2781_v16 = vld [vmem:[%s10337_s7 + $0x4c8] sm:$0xff]  ;;  %v2808_v6 = vld [vmem:[%s10337_s7 + $0x5a0] sm:$0xff] }
 0xd94   :  { %v2318_v13 = vadd.f32 %v2317_v22, %v2193_v4  ;;  %v2409_v14 = vpop.f32.mrf.mxu3  ;;  %v2760_v4 = vld [vmem:[%s10337_s7 + $0x420] sm:$0xff] }
 0xd95   :  { %3143 = vmatpush.msrb.mxu3 %v2817_v5  ;;  %v2268_v48 = vpop.f32.mrf.mxu0  ;;  %3077 = vmatpush.msra.mxu0 %v2766_v34  ;;  %v2410_v45 = vadd.f32 %v2409_v14, %v2197_v2  ;;  %v2780_v22 = vld [vmem:[%s10337_s7 + $0x4c0] sm:$0xff] }
 0xd96   :  { %v2615_v23 = vmax.f32 %v2318_v13, 0.0  ;;  %v2269_v52 = vadd.f32 %v2268_v48, %v2191_v24  ;;  %v2807_v13 = vld [vmem:[%s10337_s7 + $0x598] sm:$0xff]  ;;  %v2601_v48 = vmax.f32 %v2361_v31, 0.0 }
 0xd97   :  { %3144 = vmatpush.msrb.mxu3 %v2816_v53  ;;  %3078 = vmatpush.msra.mxu0 %v2765_v18  ;;  %v2619_v34 = vmax.f32 %v2410_v45, 0.0  ;;  %v8913_v53 = vld [vmem:[%s10338_s10 + $0x8] sm:$0xff]  ;;  %v2194_v45 = vperm.slane %v8857_v39, 4 }
 0xd98   :  { %v2597_v50 = vmax.f32 %v2269_v52, 0.0  ;;  %2976 = vmatmul.f32.gmra.mxu3 %v2615_v23  ;;  %v2201_v2 = vperm.slane %v8913_v53, 3  ;;  %v2779_v52 = vld [vmem:[%s10337_s7 + $0x4b8] sm:$0xff] }
 0xd99   :  { %3145 = vmatpush.msrb.mxu3 %v2815_v41  ;;  %3079 = vmatpush.msra.mxu0 %v2764_v36  ;;  %v2803_v41 = vld [vmem:[%s10337_s7 + $0x578] sm:$0xff]  ;;  %v2806_v36 = vld [vmem:[%s10337_s7 + $0x590] sm:$0xff] }
 0xd9a   :  { %2927 = vmatmul.f32.vlgmr.msrb.gmra.mxu1 %v2597_v50  ;;  %v2756_v50 = vld [vmem:[%s10337_s7 + $0x400] sm:$0xff] }
 0xd9b   :  { %3095 = vmatpush.msrb.mxu1 %v2787_v0  ;;  %3146 = vmatpush.msrb.mxu3 %v2814_v40  ;;  %v2363_v0 = vpop.f32.mrf.mxu1  ;;  %v2778_v40 = vld [vmem:[%s10337_s7 + $0x4b0] sm:$0xff] }
 0xd9c   :  { %3080 = vmatpush.msra.mxu0 %v2763_v58  ;;  %v2498_v18 = vpop.f32.mrf.mxu3  ;;  %v2802_v58 = vld [vmem:[%s10337_s7 + $0x570] sm:$0xff]  ;;  %v2364_v14 = vadd.f32 %v2363_v0, %v2195_v47  ;;  %v2383_v47 = vpop.f32.mrf.mxu2  ;;  %v2795_v0 = vld [vmem:[%s10337_s7 + $0x538] sm:$0xff] }
 0xd9d   :  { %3096 = vmatpush.msrb.mxu1 %v2786_v10  ;;  %3147 = vmatpush.msrb.mxu3 %v2813_v42  ;;  %v2271_v3 = vpop.f32.mrf.mxu0  ;;  %v2499_v10 = vadd.f32 %v2498_v18, %v2201_v2  ;;  %v2777_v42 = vld [vmem:[%s10337_s7 + $0x4a8] sm:$0xff]  ;;  %v2796_v18 = vld [vmem:[%s10337_s7 + $0x540] sm:$0xff] }
 0xd9e   :  { %v2272_v15 = vadd.f32 %v2271_v3, %v2191_v24  ;;  %3081 = vmatpush.msra.mxu0 %v2762_v27  ;;  %v2757_v24 = vld [vmem:[%s10337_s7 + $0x408] sm:$0xff] }
 0xd9f   :  { %3097 = vmatpush.msrb.mxu1 %v2785_v60  ;;  %3148 = vmatpush.msrb.mxu3 %v2812_v51  ;;  %v2801_v27 = vld [vmem:[%s10337_s7 + $0x568] sm:$0xff]  ;;  %v2804_v51 = vld [vmem:[%s10337_s7 + $0x580] sm:$0xff] }
 0xda0   :  { %v2613_v44 = vmax.f32 %v2272_v15, 0.0  ;;  %3065 = vmatmul.f32.vlgmr.msra.gmra.mxu3 %v2603_v55  ;;  %3082 = vmatpush.msra.mxu0 %v2761_v38  ;;  %v2883_v38 = vld [vmem:[%s10337_s7 + $0x7f8] sm:$0xff]  ;;  %v2776_v55 = vld [vmem:[%s10337_s7 + $0x4a0] sm:$0xff] }
 0xda1   :  { %3098 = vmatpush.msrb.mxu1 %v2784_v49  ;;  %3149 = vmatpush.msrb.mxu3 %v2811_v46  ;;  %v2800_v15 = vld [vmem:[%s10337_s7 + $0x560] sm:$0xff]  ;;  %v2607_v49 = vmax.f32 %v2499_v10, 0.0  ;;  %v2877_v10 = vld [vmem:[%s10337_s7 + $0x7c8] sm:$0xff] }
 0xda2   :  { %2930 = vmatmul.f32.gmra.mxu1 %v2613_v44  ;;  %3083 = vmatpush.msra.mxu0 %v2760_v4  ;;  %v2882_v4 = vld [vmem:[%s10337_s7 + $0x7f0] sm:$0xff]  ;;  %v2799_v44 = vld [vmem:[%s10337_s7 + $0x558] sm:$0xff] }
 0xda3   :  { %3099 = vmatpush.msrb.mxu1 %v2783_v12  ;;  %3150 = vmatpush.msrb.mxu3 %v2810_v57  ;;  %v2617_v12 = vmax.f32 %v2364_v14, 0.0  ;;  %v2775_v57 = vld [vmem:[%s10337_s7 + $0x498] sm:$0xff] }
 0xda4   :  { %3084 = vmatpush.msra.mxu0 %v2759_v19  ;;  %v2501_v56 = vpop.f32.mrf.mxu3  ;;  %v2881_v19 = vld [vmem:[%s10337_s7 + $0x7e8] sm:$0xff] }
 0xda5   :  { %3100 = vmatpush.msrb.mxu1 %v2782_v7  ;;  %3151 = vmatpush.msrb.mxu3 %v2809_v28  ;;  %v2291_v5 = vpop.f32.mrf.mxu0  ;;  %v2199_v7 = vperm.slane %v8913_v53, 1  ;;  %v2196_v28 = vperm.slane %v8857_v39, 6  ;;  %v2502_v31 = vadd.f32 %v2501_v56, %v2201_v2 }
 0xda6   :  { %v2292_v17 = vadd.f32 %v2291_v5, %v2192_v26  ;;  %3085 = vmatpush.msra.mxu0 %v2758_v59  ;;  %v2452_v59 = vpop.f32.mrf.mxu1 }
 0xda7   :  { %3101 = vmatpush.msrb.mxu1 %v2781_v16  ;;  %3152 = vmatpush.msrb.mxu3 %v2808_v6  ;;  %v2774_v16 = vld [vmem:[%s10337_s7 + $0x490] sm:$0xff]  ;;  %v2880_v6 = vld [vmem:[%s10337_s7 + $0x7e0] sm:$0xff] }
 0xda8   :  { %v2598_v23 = vmax.f32 %v2292_v17, 0.0  ;;  %3068 = vmatmul.f32.gmra.mxu3 %v2619_v34  ;;  %3086 = vmatpush.msra.mxu0 %v2757_v24  ;;  %v2797_v24 = vld [vmem:[%s10337_s7 + $0x548] sm:$0xff]  ;;  %v2879_v17 = vld [vmem:[%s10337_s7 + $0x7d8] sm:$0xff] }
 0xda9   :  { %3102 = vmatpush.msrb.mxu1 %v2780_v22  ;;  %3153 = vmatpush.msrb.mxu3 %v2807_v13  ;;  %v2773_v34 = vld [vmem:[%s10337_s7 + $0x488] sm:$0xff]  ;;  %v2453_v22 = vadd.f32 %v2452_v59, %v2199_v7  ;;  %v2384_v13 = vadd.f32 %v2383_v47, %v2196_v28  ;;  %v2831_v59 = vld [vmem:[%s10337_s7 + $0x658] sm:$0xff] }
 0xdaa   :  { %2950 = vmatmul.f32.vlgmr.msra.gmra.mxu2 %v2598_v23  ;;  %3019 = vmatmul.f32.vlgmr.msra.gmra.mxu1 %v2601_v48  ;;  %v2623_v48 = vmax.f32 %v2502_v31, 0.0  ;;  %v2772_v23 = vld [vmem:[%s10337_s7 + $0x480] sm:$0xff]  ;;  %v2846_v31 = vld [vmem:[%s10337_s7 + $0x6d0] sm:$0xff] }
 0xdab   :  { %3103 = vmatpush.msrb.mxu1 %v2779_v52  ;;  %3118 = vmatpush.msra.mxu2 %v2803_v41  ;;  %v2878_v52 = vld [vmem:[%s10337_s7 + $0x7d0] sm:$0xff]  ;;  %v2851_v41 = vld [vmem:[%s10337_s7 + $0x6f8] sm:$0xff] }
 0xdac   :  { %3154 = vmatpush.msrb.mxu3 %v2806_v36  ;;  %3087 = vmatpush.msra.mxu0 %v2756_v50  ;;  %v2605_v36 = vmax.f32 %v2453_v22, 0.0  ;;  %v2602_v50 = vmax.f32 %v2384_v13, 0.0  ;;  %v2872_v13 = vld [vmem:[%s10337_s7 + $0x7a0] sm:$0xff] }
 0xdad   :  { %3104 = vmatpush.msrb.mxu1 %v2778_v40  ;;  %3119 = vmatpush.msra.mxu2 %v2802_v58  ;;  %v2294_v60 = vpop.f32.mrf.mxu0  ;;  %v2835_v40 = vld [vmem:[%s10337_s7 + $0x678] sm:$0xff]  ;;  %v2386_v58 = vpop.f32.mrf.mxu2 }
 0xdae   :  { %3155 = vmatpush.msrb.mxu3 %v2805_v37  ;;  %v2295_v3 = vadd.f32 %v2294_v60, %v2192_v26  ;;  %v2798_v26 = vld [vmem:[%s10337_s7 + $0x550] sm:$0xff] }
 0xdaf   :  { %3105 = vmatpush.msrb.mxu1 %v2777_v42  ;;  %3120 = vmatpush.msra.mxu2 %v2801_v27  ;;  %v2850_v37 = vld [vmem:[%s10337_s7 + $0x6f0] sm:$0xff] }
 0xdb0   :  { %v2614_v46 = vmax.f32 %v2295_v3, 0.0  ;;  %3156 = vmatpush.msrb.mxu3 %v2804_v51  ;;  %v2794_v42 = vld [vmem:[%s10337_s7 + $0x530] sm:$0xff]  ;;  %v2455_v51 = vpop.f32.mrf.mxu1  ;;  %v2849_v3 = vld [vmem:[%s10337_s7 + $0x6e8] sm:$0xff] }
 0xdb1   :  { %3106 = vmatpush.msrb.mxu1 %v2776_v55  ;;  %3121 = vmatpush.msra.mxu2 %v2800_v15  ;;  %v2834_v60 = vld [vmem:[%s10337_s7 + $0x670] sm:$0xff]  ;;  %v2793_v55 = vld [vmem:[%s10337_s7 + $0x528] sm:$0xff]  ;;  %v2456_v56 = vadd.f32 %v2455_v51, %v2199_v7  ;;  %v2198_v7 = vperm.slane %v8913_v53, 0 }
 0xdb2   :  { %3233 = vmatpush.msra.mxu3 %v2883_v38  ;;  %2953 = vmatmul.f32.gmra.mxu2 %v2614_v46  ;;  %v2876_v38 = vld [vmem:[%s10337_s7 + $0x7c0] sm:$0xff]  ;;  %v2833_v15 = vld [vmem:[%s10337_s7 + $0x668] sm:$0xff]  ;;  %v2842_v51 = vld [vmem:[%s10337_s7 + $0x6b0] sm:$0xff] }
 0xdb3   :  { %3157 = vmatmul.f32.vlgmr.msrb.gmra.mxu3 %v2607_v49  ;;  %3022 = vmatmul.f32.gmra.mxu1 %v2617_v12  ;;  %v2387_v49 = vadd.f32 %v2386_v58, %v2196_v28  ;;  %v2848_v46 = vld [vmem:[%s10337_s7 + $0x6e0] sm:$0xff]  ;;  %v2791_v28 = vld [vmem:[%s10337_s7 + $0x518] sm:$0xff] }
 0xdb4   :  { %3234 = vmatpush.msra.mxu3 %v2882_v4  ;;  %3122 = vmatpush.msra.mxu2 %v2799_v44  ;;  %v2875_v4 = vld [vmem:[%s10337_s7 + $0x7b8] sm:$0xff]  ;;  %v2792_v44 = vld [vmem:[%s10337_s7 + $0x520] sm:$0xff] }
 0xdb5   :  { %3107 = vmatpush.msrb.mxu1 %v2775_v57  ;;  %v2337_v5 = vpop.f32.mrf.mxu0  ;;  %v2832_v12 = vld [vmem:[%s10337_s7 + $0x660] sm:$0xff]  ;;  %v2847_v57 = vld [vmem:[%s10337_s7 + $0x6d8] sm:$0xff] }
 0xdb6   :  { %3235 = vmatpush.msra.mxu3 %v2881_v19  ;;  %3123 = vmatpush.msra.mxu2 %v2798_v26  ;;  %v2338_v39 = vadd.f32 %v2337_v5, %v2194_v45  ;;  %v2874_v19 = vld [vmem:[%s10337_s7 + $0x7b0] sm:$0xff]  ;;  %v2621_v26 = vmax.f32 %v2456_v56, 0.0  ;;  %v2475_v5 = vpop.f32.mrf.mxu2  ;;  %v2868_v56 = vld [vmem:[%s10337_s7 + $0x780] sm:$0xff] }
 0xdb7   :  { %3108 = vmatpush.msrb.mxu1 %v2774_v16 }
 0xdb8   :  { %3236 = vmatpush.msra.mxu3 %v2880_v6  ;;  %v2600_v2 = vmax.f32 %v2338_v39, 0.0  ;;  %3124 = vmatpush.msra.mxu2 %v2797_v24  ;;  %v2200_v6 = vperm.slane %v8913_v53, 2  ;;  %v2873_v24 = vld [vmem:[%s10337_s7 + $0x7a8] sm:$0xff]  ;;  %v2790_v39 = vld [vmem:[%s10337_s7 + $0x510] sm:$0xff] }
 0xdb9   :  { %3109 = vmatpush.msrb.mxu1 %v2773_v34  ;;  %v2830_v34 = vld [vmem:[%s10337_s7 + $0x650] sm:$0xff] }
 0xdba   :  { %3237 = vmatpush.msra.mxu3 %v2879_v17  ;;  %3125 = vmatpush.msra.mxu2 %v2796_v18  ;;  %v2845_v17 = vld [vmem:[%s10337_s7 + $0x6c8] sm:$0xff] }
 0xdbb   :  { %3160 = vmatmul.f32.gmra.mxu3 %v2623_v48  ;;  %3110 = vmatpush.msrb.mxu1 %v2772_v23  ;;  %v2789_v18 = vld [vmem:[%s10337_s7 + $0x508] sm:$0xff]  ;;  %v2476_v23 = vadd.f32 %v2475_v5, %v2200_v6 }
 0xdbc   :  { %3238 = vmatpush.msra.mxu3 %v2878_v52  ;;  %2996 = vmatmul.f32.vlgmr.msrb.gmra.mxu0 %v2600_v2  ;;  %v2829_v48 = vld [vmem:[%s10337_s7 + $0x648] sm:$0xff]  ;;  %v2844_v2 = vld [vmem:[%s10337_s7 + $0x6c0] sm:$0xff]  ;;  %v2590_v52 = vpop.f32.mrf.mxu3 }
 0xdbd   :  { %3187 = vmatpush.msra.mxu1 %v2851_v41  ;;  %3042 = vmatmul.f32.vlgmr.msrb.gmra.mxu2 %v2602_v50  ;;  %v2340_v27 = vpop.f32.mrf.mxu0  ;;  %v2871_v41 = vld [vmem:[%s10337_s7 + $0x798] sm:$0xff]  ;;  %v2205_v50 = vperm.slane %v8913_v53, 7 }
 0xdbe   :  { %3111 = vmatmul.f32.vlgmr.msrb.gmra.mxu1 %v2605_v36  ;;  %3126 = vmatpush.msra.mxu2 %v2795_v0  ;;  %v2341_v14 = vadd.f32 %v2340_v27, %v2194_v45  ;;  %v2618_v45 = vmax.f32 %v2387_v49, 0.0  ;;  %v2788_v36 = vld [vmem:[%s10337_s7 + $0x500] sm:$0xff]  ;;  %v2606_v27 = vmax.f32 %v2476_v23, 0.0  ;;  %v2841_v49 = vld [vmem:[%s10337_s7 + $0x6a8] sm:$0xff] }
 0xdbf   :  { %3164 = vmatpush.msrb.mxu0 %v2835_v40  ;;  %3188 = vmatpush.msra.mxu1 %v2850_v37  ;;  %v2828_v0 = vld [vmem:[%s10337_s7 + $0x640] sm:$0xff]  ;;  %v2843_v40 = vld [vmem:[%s10337_s7 + $0x6b8] sm:$0xff]  ;;  %v2861_v23 = vld [vmem:[%s10337_s7 + $0x748] sm:$0xff] }
 0xdc0   :  { %3239 = vmatpush.msra.mxu3 %v2877_v10  ;;  %3127 = vmatpush.msra.mxu2 %v2794_v42  ;;  %v2616_v47 = vmax.f32 %v2341_v14, 0.0  ;;  %v2867_v37 = vld [vmem:[%s10337_s7 + $0x778] sm:$0xff]  ;;  %v2870_v10 = vld [vmem:[%s10337_s7 + $0x790] sm:$0xff]  ;;  %v2591_v14 = vadd.f32 %v2590_v52, %v2205_v50 }
 0xdc1   :  { %3165 = vmatpush.msrb.mxu0 %v2834_v60  ;;  %3189 = vmatpush.msra.mxu1 %v2849_v3  ;;  %v2827_v60 = vld [vmem:[%s10337_s7 + $0x638] sm:$0xff]  ;;  %v2866_v3 = vld [vmem:[%s10337_s7 + $0x770] sm:$0xff] }
 0xdc2   :  { %3240 = vmatpush.msra.mxu3 %v2876_v38  ;;  %3128 = vmatpush.msra.mxu2 %v2793_v55  ;;  %v2869_v38 = vld [vmem:[%s10337_s7 + $0x788] sm:$0xff]  ;;  %v2478_v55 = vpop.f32.mrf.mxu2 }
 0xdc3   :  { %3166 = vmatpush.msrb.mxu0 %v2833_v15  ;;  %3190 = vmatpush.msra.mxu1 %v2848_v46  ;;  %v2826_v15 = vld [vmem:[%s10337_s7 + $0x630] sm:$0xff] }
 0xdc4   :  { %3241 = vmatpush.msra.mxu3 %v2875_v4  ;;  %3129 = vmatpush.msra.mxu2 %v2792_v44  ;;  %v2865_v4 = vld [vmem:[%s10337_s7 + $0x768] sm:$0xff] }
 0xdc5   :  { %3167 = vmatpush.msrb.mxu0 %v2832_v12  ;;  %3191 = vmatpush.msra.mxu1 %v2847_v57  ;;  %v2429_v16 = vpop.f32.mrf.mxu0  ;;  %v2825_v44 = vld [vmem:[%s10337_s7 + $0x628] sm:$0xff]  ;;  %v2611_v12 = vmax.f32 %v2591_v14, 0.0  ;;  %v2840_v57 = vld [vmem:[%s10337_s7 + $0x6a0] sm:$0xff] }
 0xdc6   :  { %3242 = vmatpush.msra.mxu3 %v2874_v19  ;;  %2999 = vmatmul.f32.gmra.mxu0 %v2616_v47  ;;  %v2430_v22 = vadd.f32 %v2429_v16, %v2198_v7  ;;  %v2479_v47 = vadd.f32 %v2478_v55, %v2200_v6  ;;  %v2864_v19 = vld [vmem:[%s10337_s7 + $0x760] sm:$0xff]  ;;  %v2863_v16 = vld [vmem:[%s10337_s7 + $0x758] sm:$0xff]  ;;  %v2202_v6 = vperm.slane %v8913_v53, 4  ;;  %v2857_v14 = vld [vmem:[%s10337_s7 + $0x728] sm:$0xff] }
 0xdc7   :  { %3045 = vmatmul.f32.gmra.mxu2 %v2618_v45  ;;  %3114 = vmatmul.f32.gmra.mxu1 %v2621_v26  ;;  %v2544_v45 = vpop.f32.mrf.mxu1  ;;  %v2203_v26 = vperm.slane %v8913_v53, 5 }
 0xdc8   :  { %3130 = vmatpush.msra.mxu2 %v2791_v28  ;;  %3168 = vmatpush.msrb.mxu0 %v2831_v59  ;;  %v2604_v58 = vmax.f32 %v2430_v22, 0.0  ;;  %v2593_v28 = vpop.f32.mrf.mxu3  ;;  %v2862_v22 = vld [vmem:[%s10337_s7 + $0x750] sm:$0xff] }
 0xdc9   :  { %3192 = vmatpush.msra.mxu1 %v2846_v31  ;;  %3243 = vmatpush.msra.mxu3 %v2873_v24  ;;  %v2839_v31 = vld [vmem:[%s10337_s7 + $0x698] sm:$0xff]  ;;  %v2622_v24 = vmax.f32 %v2479_v47, 0.0 }
 0xdca   :  { %3131 = vmatpush.msra.mxu2 %v2790_v39  ;;  %3169 = vmatpush.msrb.mxu0 %v2830_v34  ;;  %v2594_v39 = vadd.f32 %v2593_v28, %v2205_v50  ;;  %v2823_v34 = vld [vmem:[%s10337_s7 + $0x618] sm:$0xff]  ;;  %v2860_v50 = vld [vmem:[%s10337_s7 + $0x740] sm:$0xff]  ;;  %v2567_v55 = vpop.f32.mrf.mxu2 }
 0xdcb   :  { %3193 = vmatpush.msra.mxu1 %v2845_v17  ;;  %3244 = vmatpush.msra.mxu3 %v2872_v13  ;;  %v2838_v17 = vld [vmem:[%s10337_s7 + $0x690] sm:$0xff]  ;;  %v2545_v13 = vadd.f32 %v2544_v45, %v2203_v26 }
 0xdcc   :  { %3132 = vmatpush.msra.mxu2 %v2789_v18  ;;  %3170 = vmatpush.msrb.mxu0 %v2829_v48  ;;  %v2822_v48 = vld [vmem:[%s10337_s7 + $0x610] sm:$0xff]  ;;  %v2627_v52 = vmax.f32 %v2594_v39, 0.0 }
 0xdcd   :  { %3194 = vmatpush.msra.mxu1 %v2844_v2  ;;  %3245 = vmatpush.msra.mxu3 %v2871_v41  ;;  %v2432_v42 = vpop.f32.mrf.mxu0  ;;  %v2837_v2 = vld [vmem:[%s10337_s7 + $0x688] sm:$0xff] }
 0xdce   :  { %3133 = vmatpush.msra.mxu2 %v2788_v36  ;;  %3171 = vmatpush.msrb.mxu0 %v2828_v0  ;;  %v2433_v46 = vadd.f32 %v2432_v42, %v2198_v7  ;;  %v2824_v7 = vld [vmem:[%s10337_s7 + $0x620] sm:$0xff]  ;;  %v2821_v41 = vld [vmem:[%s10337_s7 + $0x608] sm:$0xff]  ;;  %v2609_v0 = vmax.f32 %v2545_v13, 0.0 }
 0xdcf   :  { %3195 = vmatpush.msra.mxu1 %v2843_v40  ;;  %3246 = vmatpush.msra.mxu3 %v2870_v10  ;;  %v2836_v36 = vld [vmem:[%s10337_s7 + $0x680] sm:$0xff]  ;;  %v2859_v10 = vld [vmem:[%s10337_s7 + $0x738] sm:$0xff] }
 0xdd0   :  { %3210 = vmatpush.msrb.mxu2 %v2867_v37  ;;  %3088 = vmatmul.f32.vlgmr.msra.gmra.mxu0 %v2604_v58  ;;  %v2620_v59 = vmax.f32 %v2433_v46, 0.0  ;;  %v2820_v58 = vld [vmem:[%s10337_s7 + $0x600] sm:$0xff]  ;;  %v2547_v37 = vpop.f32.mrf.mxu1  ;;  %v2855_v46 = vld [vmem:[%s10337_s7 + $0x718] sm:$0xff] }
 0xdd1   :  { %3134 = vmatmul.f32.vlgmr.msra.gmra.mxu2 %v2606_v27  ;;  %3172 = vmatpush.msrb.mxu0 %v2827_v60  ;;  %v2858_v27 = vld [vmem:[%s10337_s7 + $0x730] sm:$0xff]  ;;  %v2548_v60 = vadd.f32 %v2547_v37, %v2203_v26 }
 0xdd2   :  { %3196 = vmatpush.msra.mxu1 %v2842_v51  ;;  %3211 = vmatpush.msrb.mxu2 %v2866_v3  ;;  %v2856_v3 = vld [vmem:[%s10337_s7 + $0x720] sm:$0xff] }
 0xdd3   :  { %3247 = vmatpush.msra.mxu3 %v2869_v38  ;;  %3173 = vmatpush.msrb.mxu0 %v2826_v15  ;;  %v2625_v38 = vmax.f32 %v2548_v60, 0.0 }
 0xdd4   :  { %3197 = vmatpush.msra.mxu1 %v2841_v49  ;;  %3212 = vmatpush.msrb.mxu2 %v2865_v4  ;;  %v2204_v49 = vperm.slane %v8913_v53, 6  ;;  %v2854_v4 = vld [vmem:[%s10337_s7 + $0x710] sm:$0xff] }
 0xdd5   :  { %3248 = vmatpush.msra.mxu3 %v2868_v56  ;;  %3174 = vmatpush.msrb.mxu0 %v2825_v44  ;;  %v2521_v5 = vpop.f32.mrf.mxu0  ;;  %v2853_v44 = vld [vmem:[%s10337_s7 + $0x708] sm:$0xff] }
 0xdd6   :  { %3249 = vmatmul.f32.vlgmr.msra.gmra.mxu3 %v2611_v12  ;;  %3198 = vmatpush.msra.mxu1 %v2840_v57  ;;  %v2522_v18 = vadd.f32 %v2521_v5, %v2202_v6  ;;  %v2568_v56 = vadd.f32 %v2567_v55, %v2204_v49  ;;  %v2852_v12 = vld [vmem:[%s10337_s7 + $0x700] sm:$0xff]  ;;  %v2570_v57 = vpop.f32.mrf.mxu2 }
 0xdd7   :  { %3213 = vmatpush.msrb.mxu2 %v2864_v19  ;;  %3175 = vmatpush.msrb.mxu0 %v2824_v7  ;;  %v2571_v19 = vadd.f32 %v2570_v57, %v2204_v49 }
 0xdd8   :  { %3199 = vmatpush.msra.mxu1 %v2839_v31  ;;  %3091 = vmatmul.f32.gmra.mxu0 %v2620_v59  ;;  %v2608_v40 = vmax.f32 %v2522_v18, 0.0  ;;  %v2610_v47 = vmax.f32 %v2568_v56, 0.0 }
 0xdd9   :  { %3214 = vmatpush.msrb.mxu2 %v2863_v16  ;;  %3176 = vmatpush.msrb.mxu0 %v2823_v34  ;;  %v2626_v45 = vmax.f32 %v2571_v19, 0.0 }
 0xdda   :  { %3137 = vmatmul.f32.gmra.mxu2 %v2622_v24  ;;  %3200 = vmatpush.msra.mxu1 %v2838_v17  ;;  %v7024_v24 = vld [vmem:[%s10339_s11] ss:$0 sm:$0xff] }
 0xddb   :  { %3215 = vmatpush.msrb.mxu2 %v2862_v22  ;;  %3177 = vmatpush.msrb.mxu0 %v2822_v48 }
 0xddc   :  { %3201 = vmatpush.msra.mxu1 %v2837_v2 }
 0xddd   :  { %3216 = vmatpush.msrb.mxu2 %v2861_v23  ;;  %3178 = vmatpush.msrb.mxu0 %v2821_v41  ;;  %v2524_v42 = vpop.f32.mrf.mxu0 }
 0xdde   :  { %3252 = vmatmul.f32.gmra.mxu3 %v2627_v52  ;;  %3202 = vmatpush.msra.mxu1 %v2836_v36  ;;  %v2525_v51 = vadd.f32 %v2524_v42, %v2202_v6 }
 0xddf   :  { %3217 = vmatpush.msrb.mxu2 %v2860_v50  ;;  %3203 = vmatmul.f32.vlgmr.msra.gmra.mxu1 %v2609_v0 }
 0xde0   :  { %3179 = vmatpush.msrb.mxu0 %v2820_v58  ;;  %v2624_v15 = vmax.f32 %v2525_v51, 0.0 }
 0xde1   :  { %3218 = vmatpush.msrb.mxu2 %v2859_v10  ;;  %3180 = vmatmul.f32.vlgmr.msrb.gmra.mxu0 %v2608_v40 }
 0xde3   :  { %3219 = vmatpush.msrb.mxu2 %v2858_v27 }
 0xde5   :  { %3220 = vmatpush.msrb.mxu2 %v2857_v14 }
 0xde7   :  { %3221 = vmatpush.msrb.mxu2 %v2856_v3  ;;  %3206 = vmatmul.f32.gmra.mxu1 %v2625_v38 }
 0xde9   :  { %3222 = vmatpush.msrb.mxu2 %v2855_v46  ;;  %3183 = vmatmul.f32.gmra.mxu0 %v2624_v15 }
 0xdeb   :  { %3223 = vmatpush.msrb.mxu2 %v2854_v4 }
 0xded   :  { %3224 = vmatpush.msrb.mxu2 %v2853_v44 }
 0xdef   :  { %3225 = vmatpush.msrb.mxu2 %v2852_v12 }
 0xdf0   :  { %3226 = vmatmul.f32.vlgmr.msrb.gmra.mxu2 %v2610_v47 }
 0xdf8   :  { %3229 = vmatmul.f32.gmra.mxu2 %v2626_v45 }
 0xe07   :  { %v2905_v53 = vpop.f32.mrf.mxu0 }
 0xe08   :  { %v2906_v17 = vadd.f32 %v7024_v24, %v2905_v53 }
 0xe0f   :  { %v2908_v26 = vpop.f32.mrf.mxu0 }
 0xe10   :  { %v2909_v23 = vadd.f32 %v7024_v24, %v2908_v26 }
 0xe13   :  { %v2974_v7 = vpop.f32.mrf.mxu3 }
 0xe17   :  { %v2928_v28 = vpop.f32.mrf.mxu1 }
 0xe18   :  { %v2929_v18 = vadd.f32 %v2928_v28, %v2906_v17 }
 0xe1b   :  { %v2977_v6 = vpop.f32.mrf.mxu3 }
 0xe1f   :  { %v2931_v31 = vpop.f32.mrf.mxu1 }
 0xe20   :  { %v2932_v36 = vadd.f32 %v2931_v31, %v2909_v23 }
 0xe23   :  { %v3066_v22 = vpop.f32.mrf.mxu3 }
 0xe27   :  { %v3020_v39 = vpop.f32.mrf.mxu1 }
 0xe2b   :  { %v3069_v50 = vpop.f32.mrf.mxu3 }
 0xe2d   :  { %v2951_v59 = vpop.f32.mrf.mxu2 }
 0xe2e   :  { %v2952_v48 = vadd.f32 %v2951_v59, %v2929_v18 }
 0xe30   :  { %v3023_v2 = vpop.f32.mrf.mxu1  ;;  %v2975_v52 = vadd.f32 %v2974_v7, %v2952_v48 }
 0xe35   :  { %v2954_v5 = vpop.f32.mrf.mxu2 }
 0xe36   :  { %v2955_v58 = vadd.f32 %v2954_v5, %v2932_v36  ;;  %v3158_v14 = vpop.f32.mrf.mxu3 }
 0xe38   :  { %v2978_v42 = vadd.f32 %v2977_v6, %v2955_v58  ;;  %v6421_v58 = vld [vmem:[%s7574_s20 + $0x38] sm:$0xff] }
 0xe39   :  { %v2997_v16 = vpop.f32.mrf.mxu0  ;;  %3344 = vmatpush.msra.mxu0 %v6421_v58 }
 0xe3a   :  { %v2998_v0 = vadd.f32 %v2997_v16, %v2975_v52 }
 0xe3b   :  { %v3112_v27 = vpop.f32.mrf.mxu1 }
 0xe3c   :  { %v3021_v37 = vadd.f32 %v3020_v39, %v2998_v0 }
 0xe3e   :  { %v3161_v47 = vpop.f32.mrf.mxu3 }
 0xe40   :  { %v3043_v13 = vpop.f32.mrf.mxu2 }
 0xe41   :  { %v3044_v10 = vadd.f32 %v3043_v13, %v3021_v37  ;;  %v6428_v37 = vld [vmem:[%s7579_s27 + $0x38] sm:$0xff] }
 0xe42   :  { %3377 = vmatpush.msrb.mxu1 %v6428_v37 }
 0xe43   :  { %v3000_v34 = vpop.f32.mrf.mxu0  ;;  %v3067_v3 = vadd.f32 %v3066_v22, %v3044_v10  ;;  %v6435_v10 = vld [vmem:[%s7584_s4 + $0x38] sm:$0xff] }
 0xe44   :  { %v3001_v60 = vadd.f32 %v3000_v34, %v2978_v42  ;;  %v3115_v4 = vpop.f32.mrf.mxu1  ;;  %3410 = vmatpush.msra.mxu2 %v6435_v10  ;;  %v6427_v42 = vld [vmem:[%s7579_s27 + $0x30] sm:$0xff] }
 0xe45   :  { %3378 = vmatpush.msrb.mxu1 %v6427_v42 }
 0xe46   :  { %v3024_v55 = vadd.f32 %v3023_v2, %v3001_v60  ;;  %v6419_v60 = vld [vmem:[%s7574_s20 + $0x28] sm:$0xff] }
 0xe4a   :  { %v3046_v40 = vpop.f32.mrf.mxu2 }
 0xe4b   :  { %v3047_v49 = vadd.f32 %v3046_v40, %v3024_v55  ;;  %v6432_v55 = vld [vmem:[%s7584_s4 + $0x20] sm:$0xff] }
 0xe4d   :  { %v3089_v41 = vpop.f32.mrf.mxu0  ;;  %v3070_v44 = vadd.f32 %v3069_v50, %v3047_v49 }
 0xe4e   :  { %v3090_v15 = vadd.f32 %v3089_v41, %v3067_v3  ;;  %v6418_v3 = vld [vmem:[%s7574_s20 + $0x20] sm:$0xff] }
 0xe50   :  { %v3113_v46 = vadd.f32 %v3112_v27, %v3090_v15  ;;  %v6434_v27 = vld [vmem:[%s7584_s4 + $0x30] sm:$0xff] }
 0xe51   :  { %3411 = vmatpush.msra.mxu2 %v6434_v27  ;;  %v7025_v27 = vld [vmem:[%s10301_s5 + $0x1] ss:$0 sm:$0xff]  ;;  %s7434_s5 = scalar_lea.hbm %s7704_s29, 16 }
 0xe54   :  { %v3135_v38 = vpop.f32.mrf.mxu2 }
 0xe55   :  { %v3092_v51 = vpop.f32.mrf.mxu0  ;;  %v3136_v56 = vadd.f32 %v3135_v38, %v3113_v46  ;;  %v6425_v38 = vld [vmem:[%s7579_s27 + $0x20] sm:$0xff] }
 0xe56   :  { %v3093_v57 = vadd.f32 %v3092_v51, %v3070_v44  ;;  %v6426_v51 = vld [vmem:[%s7579_s27 + $0x28] sm:$0xff]  ;;  %s6155_s27 = sshll.u32 %s7704_s29, 4  ;;  %s6156_s27 = int_to_ptr.hbm [resolvable:$true] %s6155_s27 }
 0xe57   :  { %v3159_v45 = vadd.f32 %v3158_v14, %v3136_v56  ;;  %v6433_v14 = vld [vmem:[%s7584_s4 + $0x28] sm:$0xff]  ;;  %3379 = vmatpush.msrb.mxu1 %v6426_v51  ;;  %s7430_s4 = sshra.s32 %s6156_s27, 4  ;;  %s7431_s4 = int_to_ptr.hbm [resolvable:$true] %s7430_s4 }
 0xe58   :  { %v3116_v53 = vadd.f32 %v3115_v4, %v3093_v57  ;;  %3412 = vmatpush.msra.mxu2 %v6433_v14  ;;  %p7435_p1 = scmp.lt.s32.totalorder %s7431_s4, %s7704_s29 }
 0xe59   :  { %v3250_v59 = vpop.f32.mrf.mxu3  ;;  %3380 = vmatpush.msrb.mxu1 %v6425_v38 }
 0xe5a   :  { %3413 = vmatpush.msra.mxu2 %v6432_v55 }
 0xe5c   :  { %v3204_v7 = vpop.f32.mrf.mxu1 }
 0xe5d   :  { %v3138_v19 = vpop.f32.mrf.mxu2 }
 0xe5e   :  { %v3181_v12 = vpop.f32.mrf.mxu0  ;;  %v3139_v26 = vadd.f32 %v3138_v19, %v3116_v53 }
 0xe5f   :  { %v3182_v28 = vadd.f32 %v3181_v12, %v3159_v45 }
 0xe60   :  { %v3162_v5 = vadd.f32 %v3161_v47, %v3139_v26 }
 0xe61   :  { %v3205_v31 = vadd.f32 %v3204_v7, %v3182_v28  ;;  %v3253_v41 = vpop.f32.mrf.mxu3 }
 0xe64   :  { %v3207_v22 = vpop.f32.mrf.mxu1 }
 0xe66   :  { %v3184_v16 = vpop.f32.mrf.mxu0 }
 0xe67   :  { %v3185_v39 = vadd.f32 %v3184_v16, %v3162_v5 }
 0xe69   :  { %v3208_v13 = vadd.f32 %v3207_v22, %v3185_v39  ;;  %v7356_v22 = vld [vmem:[%s10328_s15] sm:$0x7] }
 0xe73   :  { %v3227_v6 = vpop.f32.mrf.mxu2 }
 0xe74   :  { %v3228_v24 = vadd.f32 %v3227_v6, %v3205_v31 }
 0xe76   :  { %v3251_v34 = vadd.f32 %v3250_v59, %v3228_v24 }
 0xe78   :  { %v9025_v17 = vadd.f32 %v3251_v34, %v8635_v9 }
 0xe7a   :  { %v3260_v18 = vsel %vm465_vm1, %v9025_v17, 0.0  ;;  %v3258_v48 = vmul.f32 %v9025_v17, %v9025_v17 }
 0xe7b   :  { %v3230_v2 = vpop.f32.mrf.mxu2  ;;  %3261 = vadd.xlane.f32.xlu1 %v3260_v18 }
 0xe7c   :  { %v3231_v23 = vadd.f32 %v3230_v2, %v3208_v13  ;;  %v3266_v52 = vsel %vm465_vm1, %v3258_v48, 0.0  ;;  %v3306_v13 = vperm.slane %v7356_v22, 2  ;;  %v7357_v2 = vld [vmem:[%s10329_s16] sm:$0x7] }
 0xe7d   :  { %3267 = vadd.xlane.f32.xlu2 %v3266_v52  ;;  %v9158_v22 = vld [vmem:[%s10305_s14] sm:$0xff] }
 0xe7e   :  { %v3254_v9 = vadd.f32 %v3253_v41, %v3231_v23  ;;  %v3309_v23 = vperm.slane %v7357_v2, 2 }
 0xe80   :  { %v9033_v36 = vadd.f32 %v3254_v9, %v8659_v29  ;;  %v6420_v29 = vld [vmem:[%s7574_s20 + $0x30] sm:$0xff]  ;;  %s10358_s20 = sld [smem:[#allocation29_spill]] }
 0xe81   :  { %3345 = vmatpush.msra.mxu0 %v6420_v29 }
 0xe82   :  { %v3263_v50 = vsel %vm465_vm1, %v9033_v36, 0.0  ;;  %v3259_v0 = vmul.f32 %v9033_v36, %v9033_v36 }
 0xe83   :  { %3264 = vadd.xlane.f32.xlu0 %v3263_v50  ;;  %3346 = vmatpush.msra.mxu0 %v6419_v60  ;;  %v7026_v60 = vld [vmem:[%s10302_s13 + $0x1] ss:$0 sm:$0xff] }
 0xe84   :  { %v3269_v40 = vsel %vm465_vm1, %v3259_v0, 0.0 }
 0xe85   :  { %3270 = vadd.xlane.f32.xlu1 %v3269_v40  ;;  %3347 = vmatpush.msra.mxu0 %v6418_v3 }
 0xeee   :  { %v3262_v15 = vpop.xlane.xlu1 %3261 }
 0xeef   :  { %v3272_v49 = vmul.f32 0.03125, %v3262_v15 }
 0xef0   :  { %v3268_v46 = vpop.xlane.xlu2 %3267 }
 0xef1   :  { %v3276_v4 = vmul.f32 %v3272_v49, %v3272_v49  ;;  %v3274_v56 = vmul.f32 0.03125, %v3268_v46  ;;  %v3280_v34 = vsub.f32 %v9025_v17, %v3272_v49  ;;  %v7027_v46 = vld [vmem:[%s10303_s17 + $0x1] ss:$0 sm:$0xff] }
 0xef3   :  { %v3278_v44 = vsub.f32 %v3274_v56, %v3276_v4  ;;  %v9077_v4 = vld [vmem:[%s10299_s0] sm:$0xff] }
 0xef5   :  { %v3282_v12 = vadd.f32 1e-05, %v3278_v44 }
 0xef6   :  { %v3265_v47 = vpop.xlane.xlu0 %3264 }
 0xef7   :  { %7172 = vrsqrt.f32 %v3282_v12  ;;  %v3273_v57 = vmul.f32 0.03125, %v3265_v47  ;;  %vm3290_vm15 = vweird.f32 %v3282_v12  ;;  %v9083_v47 = vld [vmem:[%s10299_s0 + $0x8] sm:$0xff] }
 0xef8   :  { %v3271_v19 = vpop.xlane.xlu1 %3270 }
 0xef9   :  { %v3277_v45 = vmul.f32 %v3273_v57, %v3273_v57  ;;  %v3275_v53 = vmul.f32 0.03125, %v3271_v19  ;;  %v3281_v17 = vsub.f32 %v9033_v36, %v3273_v57  ;;  %v9088_v57 = vld [vmem:[%s10299_s0 + $0x10] sm:$0xff]  ;;  %v9093_v19 = vld [vmem:[%s10299_s0 + $0x18] sm:$0xff] }
 0xefb   :  { %v3279_v28 = vsub.f32 %v3275_v53, %v3277_v45  ;;  %v9098_v45 = vld [vmem:[%s10299_s0 + $0x20] sm:$0xff]  ;;  %v9103_v53 = vld [vmem:[%s10299_s0 + $0x28] sm:$0xff] }
 0xefd   :  { %v7173_v7 = vpop.eup %7172  ;;  %v3283_v26 = vadd.f32 1e-05, %v3279_v28  ;;  %v9108_v28 = vld [vmem:[%s10299_s0 + $0x30] sm:$0xff] }
 0xefe   :  { %v3285_v59 = vmul.f32 %v7173_v7, %v3282_v12  ;;  %vm3291_vm14 = vweird.f32 %v7173_v7 }
 0xeff   :  { %7174 = vrsqrt.f32 %v3283_v26  ;;  %vm3292_vm2 = vmor %vm3290_vm15, %vm3291_vm14  ;;  %vm3300_vm4 = vweird.f32 %v3283_v26 }
 0xf00   :  { %v3286_v31 = vmul.f32 %v7173_v7, %v3285_v59  ;;  %v9123_v59 = vld [vmem:[%s10299_s0 + $0x48] sm:$0xff] }
 0xf02   :  { %v3287_v16 = vmul.f32 0.5, %v3286_v31  ;;  %v9128_v31 = vld [vmem:[%s10299_s0 + $0x50] sm:$0xff] }
 0xf04   :  { %v3288_v6 = vsub.f32 1.5, %v3287_v16  ;;  %v9133_v16 = vld [vmem:[%s10299_s0 + $0x58] sm:$0xff] }
 0xf05   :  { %v7175_v5 = vpop.eup %7174 }
 0xf06   :  { %v3289_v24 = vmul.f32 %v7173_v7, %v3288_v6  ;;  %v3295_v39 = vmul.f32 %v7175_v5, %v3283_v26  ;;  %vm3301_vm3 = vweird.f32 %v7175_v5  ;;  %v9118_v26 = vld [vmem:[%s10299_s0 + $0x40] sm:$0xff] }
 0xf07   :  { %vm3302_vm5 = vmor %vm3300_vm4, %vm3301_vm3  ;;  %v9138_v6 = vld [vmem:[%s10299_s0 + $0x60] sm:$0xff] }
 0xf08   :  { %v3293_v18 = vsel %vm3292_vm2, %v7173_v7, %v3289_v24  ;;  %v3296_v48 = vmul.f32 %v7175_v5, %v3295_v39  ;;  %v9113_v7 = vld [vmem:[%s10299_s0 + $0x38] sm:$0xff]  ;;  %v9148_v24 = vld [vmem:[%s10299_s0 + $0x70] sm:$0xff] }
 0xf09   :  { %v3304_v52 = vmul.f32 %v3293_v18, %v3280_v34  ;;  %v9153_v39 = vld [vmem:[%s10299_s0 + $0x78] sm:$0xff] }
 0xf0a   :  { %v3297_v41 = vmul.f32 0.5, %v3296_v48  ;;  %v9163_v48 = vld [vmem:[%s10305_s14 + $0x8] sm:$0xff] }
 0xf0b   :  { %v3307_v9 = vmul.f32 %v3306_v13, %v3304_v52  ;;  %v9168_v52 = vld [vmem:[%s10305_s14 + $0x10] sm:$0xff] }
 0xf0c   :  { %v3298_v50 = vsub.f32 1.5, %v3297_v41 }
 0xf0d   :  { %v9055_v0 = vadd.f32 %v3309_v23, %v3307_v9 }
 0xf0e   :  { %v3299_v40 = vmul.f32 %v7175_v5, %v3298_v50  ;;  %v9173_v50 = vld [vmem:[%s10305_s14 + $0x18] sm:$0xff] }
 0xf0f   :  { %6423 = vmatmul.msk.f32.vlgmr.msra.gmra.mxu0 %vm465_vm1, %v9055_v0  ;;  %6430 = vmatmul.msk.f32.vlgmr.msrb.gmra.mxu1 %vm465_vm1, %v9055_v0 }
 0xf10   :  { %v3303_v58 = vsel %vm3302_vm5, %v7175_v5, %v3299_v40  ;;  %6437 = vmatmul.msk.f32.vlgmr.msra.gmra.mxu2 %vm465_vm1, %v9055_v0  ;;  %v9143_v5 = vld [vmem:[%s10299_s0 + $0x68] sm:$0xff]  ;;  %s7432_s0 = scalar_lea.hbm %s7431_s4, 16 }
 0xf11   :  { %v3305_v37 = vmul.f32 %v3303_v58, %v3281_v17  ;;  %v9178_v58 = vld [vmem:[%s10305_s14 + $0x20] sm:$0xff]  ;;  %p7433_p0 = scmp.ne.s32.totalorder %s7431_s4, %s7432_s0  ;;  %p7436_p2 = scmp.lt.s32.totalorder %s7434_s5, %s7432_s0 }
 0xf13   :  { %v3308_v10 = vmul.f32 %v3306_v13, %v3305_v37  ;;  %p7437_p3 = por %p7436_p2, %p7435_p1 }
 0xf15   :  { %v9064_v29 = vadd.f32 %v3309_v23, %v3308_v10  ;;  %p7438_p4 = pnand %p7437_p3, %p7433_p0 }
 0xf17   :  { %6424 = vmatmul.msk.f32.gmra.mxu0 %vm465_vm1, %v9064_v29  ;;  %6431 = vmatmul.msk.f32.gmra.mxu1 %vm465_vm1, %v9064_v29 }
 0xf18   :  { %6438 = vmatmul.msk.f32.gmra.mxu2 %vm465_vm1, %v9064_v29 }
 0xf8c   :  { %v3349_v36 = vpop.f32.mrf.mxu0  ;;  %v3382_v42 = vpop.f32.mrf.mxu1 }
 0xf8d   :  { %v3350_v15 = vadd.f32 %v7025_v27, %v3349_v36  ;;  %v3383_v49 = vadd.f32 %v7026_v60, %v3382_v42  ;;  %v9183_v36 = vld [vmem:[%s10305_s14 + $0x28] sm:$0xff] }
 0xf93   :  { %v3415_v51 = vpop.f32.mrf.mxu2 }
 0xf94   :  { %v3352_v14 = vpop.f32.mrf.mxu0  ;;  %v3385_v3 = vpop.f32.mrf.mxu1  ;;  %v3416_v12 = vadd.f32 %v7027_v46, %v3415_v51 }
 0xf95   :  { %v3353_v38 = vadd.f32 %v7025_v27, %v3352_v14  ;;  %v3386_v55 = vadd.f32 %v7026_v60, %v3385_v3  ;;  %v9188_v60 = vld [vmem:[%s10305_s14 + $0x30] sm:$0xff]  ;;  %v9193_v3 = vld [vmem:[%s10305_s14 + $0x38] sm:$0xff] }
 0xf97   :  { %3435 = vmatpush.msrb.mxu3 %v3353_v38  ;;  %6455 = vmatpush.xpose.msk.msrb.mxu0 %vm465_vm1, %v3386_v55 }
 0xf99   :  { %3436 = vmatpush.msrb.mxu3 %v3350_v15  ;;  %v9198_v15 = vld [vmem:[%s10305_s14 + $0x40] sm:$0xff] }
 0xf9a   :  { %6439 = vmatmul.msk.f32.vlgmr.msrb.gmra.mxu3 %vm245_vm0, %v9077_v4 }
 0xf9b   :  { %v3418_v56 = vpop.f32.mrf.mxu2  ;;  %6456 = vmatpush.xpose.msk.msrb.mxu0 %vm465_vm1, %v3383_v49 }
 0xf9c   :  { %v3419_v44 = vadd.f32 %v7027_v46, %v3418_v56  ;;  %v9203_v56 = vld [vmem:[%s10305_s14 + $0x48] sm:$0xff] }
 0xf9e   :  { %3891 = vmatpush.msra.mxu1 %v3419_v44 }
 0xfa0   :  { %3892 = vmatpush.msra.mxu1 %v3416_v12 }
 0xfa2   :  { %6440 = vmatmul.msk.f32.gmra.mxu3 %vm245_vm0, %v9083_v47 }
 0xfaa   :  { %6441 = vmatmul.msk.f32.gmra.mxu3 %vm245_vm0, %v9088_v57 }
 0xfb2   :  { %6442 = vmatmul.msk.f32.gmra.mxu3 %vm245_vm0, %v9093_v19 }
 0xfba   :  { %6443 = vmatmul.msk.f32.gmra.mxu3 %vm245_vm0, %v9098_v45 }
 0xfc2   :  { %6444 = vmatmul.msk.f32.gmra.mxu3 %vm245_vm0, %v9103_v53 }
 0xfca   :  { %6445 = vmatmul.msk.f32.gmra.mxu3 %vm245_vm0, %v9108_v28 }
 0xfd2   :  { %6446 = vmatmul.msk.f32.gmra.mxu3 %vm245_vm0, %v9113_v7 }
 0xfda   :  { %6447 = vmatmul.msk.f32.gmra.mxu3 %vm245_vm0, %v9118_v26 }
 0xfe2   :  { %6448 = vmatmul.msk.f32.gmra.mxu3 %vm245_vm0, %v9123_v59 }
 0xfea   :  { %6449 = vmatmul.msk.f32.gmra.mxu3 %vm245_vm0, %v9128_v31 }
 0xff2   :  { %6450 = vmatmul.msk.f32.gmra.mxu3 %vm245_vm0, %v9133_v16 }
 0xffa   :  { %6451 = vmatmul.msk.f32.gmra.mxu3 %vm245_vm0, %v9138_v6 }
0x1002   :  { %6452 = vmatmul.msk.f32.gmra.mxu3 %vm245_vm0, %v9143_v5 }
0x100a   :  { %6453 = vmatmul.msk.f32.gmra.mxu3 %vm245_vm0, %v9148_v24 }
0x1012   :  { %6454 = vmatmul.msk.f32.gmra.mxu3 %vm245_vm0, %v9153_v39 }
0x101d   :  { %v3438_v34 = vpop.f32.mrf.mxu3 }
0x101e   :  { %v3486_v13 = vmul.f32 %v9158_v22, %v3438_v34  ;;  %v9208_v34 = vld [vmem:[%s10305_s14 + $0x50] sm:$0xff] }
0x1020   :  { %6457 = vmatmul.msk.f32.vlgmr.msrb.gmra.mxu0 %vm465_vm1, %v3486_v13 }
0x1025   :  { %v3441_v18 = vpop.f32.mrf.mxu3 }
0x1026   :  { %v3487_v2 = vmul.f32 %v9163_v48, %v3441_v18 }
0x1028   :  { %6458 = vmatmul.msk.f32.gmra.mxu0 %vm465_vm1, %v3487_v2  ;;  %v9213_v2 = vld [vmem:[%s10305_s14 + $0x58] sm:$0xff] }
0x102d   :  { %v3444_v23 = vpop.f32.mrf.mxu3 }
0x102e   :  { %v3488_v41 = vmul.f32 %v9168_v52, %v3444_v23 }
0x1030   :  { %6459 = vmatmul.msk.f32.gmra.mxu0 %vm465_vm1, %v3488_v41 }
0x1035   :  { %v3447_v9 = vpop.f32.mrf.mxu3 }
0x1036   :  { %v3489_v40 = vmul.f32 %v9173_v50, %v3447_v9  ;;  %v9218_v9 = vld [vmem:[%s10305_s14 + $0x60] sm:$0xff] }
0x1038   :  { %6460 = vmatmul.msk.f32.gmra.mxu0 %vm465_vm1, %v3489_v40 }
0x103d   :  { %v3450_v17 = vpop.f32.mrf.mxu3 }
0x103e   :  { %v3490_v37 = vmul.f32 %v9178_v58, %v3450_v17 }
0x1040   :  { %6461 = vmatmul.msk.f32.gmra.mxu0 %vm465_vm1, %v3490_v37  ;;  %v9223_v37 = vld [vmem:[%s10305_s14 + $0x68] sm:$0xff] }
0x1045   :  { %v3453_v10 = vpop.f32.mrf.mxu3 }
0x1046   :  { %v3491_v42 = vmul.f32 %v9183_v36, %v3453_v10 }
0x1048   :  { %6462 = vmatmul.msk.f32.gmra.mxu0 %vm465_vm1, %v3491_v42 }
0x104d   :  { %v3456_v27 = vpop.f32.mrf.mxu3 }
0x104e   :  { %v3492_v51 = vmul.f32 %v9188_v60, %v3456_v27  ;;  %v9228_v27 = vld [vmem:[%s10305_s14 + $0x70] sm:$0xff] }
0x1050   :  { %6463 = vmatmul.msk.f32.gmra.mxu0 %vm465_vm1, %v3492_v51 }
0x1055   :  { %v3459_v14 = vpop.f32.mrf.mxu3 }
0x1056   :  { %v3493_v38 = vmul.f32 %v9193_v3, %v3459_v14 }
0x1058   :  { %6464 = vmatmul.msk.f32.gmra.mxu0 %vm465_vm1, %v3493_v38  ;;  %v9233_v38 = vld [vmem:[%s10305_s14 + $0x78] sm:$0xff] }
0x105d   :  { %v3462_v55 = vpop.f32.mrf.mxu3 }
0x105e   :  { %v3494_v49 = vmul.f32 %v9198_v15, %v3462_v55 }
0x1060   :  { %6465 = vmatmul.msk.f32.gmra.mxu0 %vm465_vm1, %v3494_v49 }
0x1065   :  { %v3465_v46 = vpop.f32.mrf.mxu3 }
0x1066   :  { %v3495_v44 = vmul.f32 %v9203_v56, %v3465_v46 }
0x1068   :  { %6466 = vmatmul.msk.f32.gmra.mxu0 %vm465_vm1, %v3495_v44 }
0x106d   :  { %v3468_v12 = vpop.f32.mrf.mxu3 }
0x106e   :  { %v3496_v13 = vmul.f32 %v9208_v34, %v3468_v12 }
0x1070   :  { %6467 = vmatmul.msk.f32.gmra.mxu0 %vm465_vm1, %v3496_v13 }
0x1075   :  { %v3471_v18 = vpop.f32.mrf.mxu3 }
0x1076   :  { %v3497_v23 = vmul.f32 %v9213_v2, %v3471_v18 }
0x1078   :  { %6468 = vmatmul.msk.f32.gmra.mxu0 %vm465_vm1, %v3497_v23 }
0x107d   :  { %v3474_v41 = vpop.f32.mrf.mxu3 }
0x107e   :  { %v3498_v40 = vmul.f32 %v9218_v9, %v3474_v41 }
0x1080   :  { %6469 = vmatmul.msk.f32.gmra.mxu0 %vm465_vm1, %v3498_v40 }
0x1085   :  { %v3477_v17 = vpop.f32.mrf.mxu3 }
0x1086   :  { %v3499_v10 = vmul.f32 %v9223_v37, %v3477_v17 }
0x1088   :  { %6470 = vmatmul.msk.f32.gmra.mxu0 %vm465_vm1, %v3499_v10 }
0x108d   :  { %v3480_v42 = vpop.f32.mrf.mxu3 }
0x108e   :  { %v3500_v51 = vmul.f32 %v9228_v27, %v3480_v42 }
0x1090   :  { %6471 = vmatmul.msk.f32.gmra.mxu0 %vm465_vm1, %v3500_v51 }
0x1095   :  { %v3483_v14 = vpop.f32.mrf.mxu3 }
0x1096   :  { %v3501_v55 = vmul.f32 %v9233_v38, %v3483_v14 }
0x1098   :  { %6472 = vmatmul.msk.f32.gmra.mxu0 %vm465_vm1, %v3501_v55 }
0x109d   :  { %v3573_v49 = vpop.f32.mrf.mxu0 }
0x109e   :  { %v3621_v46 = vmul.f32 0.5, %v3573_v49 }
0x10a0   :  { %v3637_v44 = vadd.f32 %v3621_v46, %v7918_v61 }
0x10a2   :  { %v3653_v12 = vsel %vm245_vm0, %v3637_v44, -inf }
0x10a3   :  { %3654 = vmax.xlane.f32.xlu2 %v3653_v12 }
0x10a5   :  { %v3576_v13 = vpop.f32.mrf.mxu0 }
0x10a6   :  { %v3622_v18 = vmul.f32 0.5, %v3576_v13 }
0x10a8   :  { %v3638_v23 = vadd.f32 %v3622_v18, %v7920_v62 }
0x10aa   :  { %v3656_v41 = vsel %vm245_vm0, %v3638_v23, -inf }
0x10ab   :  { %3657 = vmax.xlane.f32.xlu0 %v3656_v41 }
0x10ad   :  { %v3579_v40 = vpop.f32.mrf.mxu0 }
0x10ae   :  { %v3623_v17 = vmul.f32 0.5, %v3579_v40 }
0x10b0   :  { %v3639_v10 = vadd.f32 %v3623_v17, %v7922_v63 }
0x10b2   :  { %v3659_v42 = vsel %vm245_vm0, %v3639_v10, -inf }
0x10b3   :  { %3660 = vmax.xlane.f32.xlu1 %v3659_v42 }
0x10b5   :  { %v3582_v51 = vpop.f32.mrf.mxu0 }
0x10b6   :  { %v3624_v14 = vmul.f32 0.5, %v3582_v51 }
0x10b8   :  { %v3640_v61 = vadd.f32 %v3624_v14, %v7934_v8 }
0x10ba   :  { %v3662_v55 = vsel %vm245_vm0, %v3640_v61, -inf }
0x10bb   :  { %3663 = vmax.xlane.f32.xlu2 %v3662_v55 }
0x10bd   :  { %v3585_v49 = vpop.f32.mrf.mxu0 }
0x10be   :  { %v3625_v46 = vmul.f32 0.5, %v3585_v49 }
0x10c0   :  { %v3641_v62 = vadd.f32 %v3625_v46, %v7949_v20 }
0x10c2   :  { %v3665_v12 = vsel %vm245_vm0, %v3641_v62, -inf }
0x10c3   :  { %3666 = vmax.xlane.f32.xlu0 %v3665_v12 }
0x10c5   :  { %v3588_v13 = vpop.f32.mrf.mxu0 }
0x10c6   :  { %v3626_v18 = vmul.f32 0.5, %v3588_v13 }
0x10c8   :  { %v9248_v63 = vadd.f32 %v3626_v18, %v7965_v33 }
0x10ca   :  { %v3668_v41 = vsel %vm245_vm0, %v9248_v63, -inf }
0x10cb   :  { %3669 = vmax.xlane.f32.xlu1 %v3668_v41 }
0x10cd   :  { %v3591_v8 = vpop.f32.mrf.mxu0 }
0x10ce   :  { %v3627_v40 = vmul.f32 0.5, %v3591_v8 }
0x10d0   :  { %v9253_v17 = vadd.f32 %v3627_v40, %v7975_v43 }
0x10d2   :  { %v3671_v20 = vsel %vm245_vm0, %v9253_v17, -inf }
0x10d3   :  { %3672 = vmax.xlane.f32.xlu2 %v3671_v20 }
0x10d5   :  { %v3594_v42 = vpop.f32.mrf.mxu0 }
0x10d6   :  { %v3628_v51 = vmul.f32 0.5, %v3594_v42 }
0x10d8   :  { %v9258_v14 = vadd.f32 %v3628_v51, %v7982_v54 }
0x10da   :  { %v3674_v33 = vsel %vm245_vm0, %v9258_v14, -inf }
0x10db   :  { %3675 = vmax.xlane.f32.xlu1 %v3674_v33 }
0x10dd   :  { %v3597_v55 = vpop.f32.mrf.mxu0 }
0x10de   :  { %v3629_v40 = vmul.f32 0.5, %v3597_v55 }
0x10e0   :  { %v9267_v51 = vadd.f32 %v3629_v40, %v7989_v1 }
0x10e2   :  { %v3677_v55 = vsel %vm245_vm0, %v9267_v51, -inf }
0x10e5   :  { %v3600_v13 = vpop.f32.mrf.mxu0 }
0x10ed   :  { %v3603_v20 = vpop.f32.mrf.mxu0 }
0x10ee   :  { %v3631_v40 = vmul.f32 0.5, %v3603_v20 }
0x10f5   :  { %v3606_v1 = vpop.f32.mrf.mxu0 }
0x1116   :  { %v3655_v49 = vpop.xlane.xlu2 %3654 }
0x1117   :  { %v3701_v46 = vsub.f32 %v3637_v44, %v3655_v49 }
0x1119   :  { %v3717_v12 = vmul.f32 1.442695, %v3701_v46  ;;  %v3630_v46 = vmul.f32 0.5, %v3600_v13 }
0x111b   :  { %7176 = vpow2.f32 %v3717_v12 }
0x111e   :  { %v3658_v43 = vpop.xlane.xlu0 %3657 }
0x111f   :  { %v3702_v18 = vsub.f32 %v3638_v23, %v3658_v43  ;;  %v9276_v43 = vadd.f32 %v3630_v46, %v7999_v11 }
0x1121   :  { %v9262_v41 = vpop.eup %7176  ;;  %v3719_v8 = vmul.f32 1.442695, %v3702_v18 }
0x1122   :  { %v3749_v54 = vsel %vm245_vm0, %v9262_v41, 0.0 }
0x1123   :  { %7178 = vpow2.f32 %v3719_v8  ;;  %3750 = vadd.xlane.f32.xlu0 %v3749_v54  ;;  %v3680_v54 = vsel %vm245_vm0, %v9276_v43, -inf }
0x1126   :  { %v3661_v42 = vpop.xlane.xlu1 %3660 }
0x1127   :  { %v3703_v44 = vsub.f32 %v3639_v10, %v3661_v42 }
0x1129   :  { %v9269_v33 = vpop.eup %7178  ;;  %v3721_v49 = vmul.f32 1.442695, %v3703_v44  ;;  %v9285_v44 = vadd.f32 %v3631_v40, %v8008_v21 }
0x112a   :  { %v3752_v23 = vsel %vm245_vm0, %v9269_v33, 0.0 }
0x112b   :  { %7180 = vpow2.f32 %v3721_v49  ;;  %3753 = vadd.xlane.f32.xlu2 %v3752_v23  ;;  %3678 = vmax.xlane.f32.xlu0 %v3677_v55  ;;  %v3632_v23 = vmul.f32 0.5, %v3606_v1  ;;  %v3683_v55 = vsel %vm245_vm0, %v9285_v44, -inf }
0x112e   :  { %v3664_v12 = vpop.xlane.xlu2 %3663 }
0x112f   :  { %v3704_v18 = vsub.f32 %v3640_v61, %v3664_v12  ;;  %v3609_v61 = vpop.f32.mrf.mxu0 }
0x1130   :  { %v3633_v40 = vmul.f32 0.5, %v3609_v61 }
0x1131   :  { %v9278_v10 = vpop.eup %7180  ;;  %v3723_v8 = vmul.f32 1.442695, %v3704_v18  ;;  %v9294_v18 = vadd.f32 %v3632_v23, %v8015_v35 }
0x1132   :  { %v3755_v13 = vsel %vm245_vm0, %v9278_v10, 0.0  ;;  %v9304_v35 = vadd.f32 %v3633_v40, %v8043_v32 }
0x1133   :  { %7182 = vpow2.f32 %v3723_v8  ;;  %3756 = vadd.xlane.f32.xlu1 %v3755_v13  ;;  %3681 = vmax.xlane.f32.xlu2 %v3680_v54  ;;  %v3686_v13 = vsel %vm245_vm0, %v9294_v18, -inf }
0x1136   :  { %v3667_v42 = vpop.xlane.xlu0 %3666 }
0x1137   :  { %v3705_v11 = vsub.f32 %v3641_v62, %v3667_v42  ;;  %v3612_v54 = vpop.f32.mrf.mxu0 }
0x1138   :  { %v3634_v61 = vmul.f32 0.5, %v3612_v54 }
0x1139   :  { %v9287_v49 = vpop.eup %7182  ;;  %v3725_v46 = vmul.f32 1.442695, %v3705_v11 }
0x113a   :  { %v3758_v20 = vsel %vm245_vm0, %v9287_v49, 0.0 }
0x113b   :  { %7184 = vpow2.f32 %v3725_v46  ;;  %3759 = vadd.xlane.f32.xlu0 %v3758_v20  ;;  %3684 = vmax.xlane.f32.xlu1 %v3683_v55  ;;  %v3689_v20 = vsel %vm245_vm0, %v9304_v35, -inf }
0x113e   :  { %v3670_v12 = vpop.xlane.xlu1 %3669 }
0x113f   :  { %v3706_v21 = vsub.f32 %v9248_v63, %v3670_v12  ;;  %v3615_v55 = vpop.f32.mrf.mxu0 }
0x1141   :  { %v9297_v62 = vpop.eup %7184  ;;  %v3727_v8 = vmul.f32 1.442695, %v3706_v21  ;;  %v10340_v21 = vld [vmem:[#allocation31_spill] sm:$0xff] }
0x1142   :  { %v3761_v1 = vsel %vm245_vm0, %v9297_v62, 0.0  ;;  %v9314_v32 = vadd.f32 %v3634_v61, %v10340_v21 }
0x1143   :  { %7186 = vpow2.f32 %v3727_v8  ;;  %3762 = vadd.xlane.f32.xlu2 %v3761_v1  ;;  %3687 = vmax.xlane.f32.xlu0 %v3686_v13  ;;  %v3635_v1 = vmul.f32 0.5, %v3615_v55  ;;  %v10342_v55 = vld [vmem:[#allocation33_spill] sm:$0xff] }
0x1144   :  { %v3692_v54 = vsel %vm245_vm0, %v9314_v32, -inf }
0x1146   :  { %v3673_v42 = vpop.xlane.xlu2 %3672 }
0x1147   :  { %v3707_v63 = vsub.f32 %v9253_v17, %v3673_v42  ;;  %v10341_v42 = vld [vmem:[#allocation32_spill] sm:$0xff] }
0x1149   :  { %v9307_v11 = vpop.eup %7186  ;;  %v3729_v46 = vmul.f32 1.442695, %v3707_v63  ;;  %v9324_v63 = vadd.f32 %v3635_v1, %v10341_v42 }
0x114a   :  { %v3764_v23 = vsel %vm245_vm0, %v9307_v11, 0.0 }
0x114b   :  { %7188 = vpow2.f32 %v3729_v46  ;;  %3765 = vadd.xlane.f32.xlu1 %v3764_v23  ;;  %3690 = vmax.xlane.f32.xlu2 %v3689_v20  ;;  %v3618_v46 = vpop.f32.mrf.mxu0  ;;  %v3695_v20 = vsel %vm245_vm0, %v9324_v63, -inf }
0x114e   :  { %v3676_v12 = vpop.xlane.xlu1 %3675 }
0x114f   :  { %v3708_v17 = vsub.f32 %v9258_v14, %v3676_v12  ;;  %v3636_v14 = vmul.f32 0.5, %v3618_v46 }
0x1151   :  { %v9317_v8 = vpop.eup %7188  ;;  %v3731_v40 = vmul.f32 1.442695, %v3708_v17  ;;  %v9333_v12 = vadd.f32 %v3636_v14, %v10342_v55 }
0x1152   :  { %v3767_v13 = vsel %vm245_vm0, %v9317_v8, 0.0 }
0x1153   :  { %7190 = vpow2.f32 %v3731_v40  ;;  %3768 = vadd.xlane.f32.xlu0 %v3767_v13  ;;  %3693 = vmax.xlane.f32.xlu1 %v3692_v54  ;;  %v3698_v21 = vsel %vm245_vm0, %v9333_v12, -inf }
0x1159   :  { %v9326_v61 = vpop.eup %7190 }
0x115a   :  { %v3770_v23 = vsel %vm245_vm0, %v9326_v61, 0.0 }
0x115b   :  { %3771 = vadd.xlane.f32.xlu2 %v3770_v23  ;;  %3696 = vmax.xlane.f32.xlu0 %v3695_v20 }
0x1163   :  { %3699 = vmax.xlane.f32.xlu2 %v3698_v21 }
0x1196   :  { %v3751_v17 = vpop.xlane.xlu0 %3750 }
0x1197   :  { %7192 = vrcp.f32 %v3751_v17 }
0x119d   :  { %v7193_v40 = vpop.eup %7192 }
0x119e   :  { %v3813_v1 = vmul.f32 %v7193_v40, %v9262_v41  ;;  %v3754_v13 = vpop.xlane.xlu2 %3753  ;;  %v3679_v54 = vpop.xlane.xlu0 %3678 }
0x119f   :  { %7194 = vrcp.f32 %v3754_v13  ;;  %v3709_v42 = vsub.f32 %v9267_v51, %v3679_v54 }
0x11a0   :  { %6473 = vmatmul.msk.f32.vlgmr.msra.gmra.mxu1 %vm245_vm0, %v3813_v1 }
0x11a1   :  { %v3733_v46 = vmul.f32 1.442695, %v3709_v42 }
0x11a3   :  { %7196 = vpow2.f32 %v3733_v46 }
0x11a5   :  { %v7195_v14 = vpop.eup %7194 }
0x11a6   :  { %v3757_v23 = vpop.xlane.xlu1 %3756  ;;  %v3682_v20 = vpop.xlane.xlu2 %3681  ;;  %v3814_v55 = vmul.f32 %v7195_v14, %v9269_v33 }
0x11a7   :  { %7198 = vrcp.f32 %v3757_v23  ;;  %v3710_v21 = vsub.f32 %v9276_v43, %v3682_v20 }
0x11a8   :  { %6474 = vmatmul.msk.f32.gmra.mxu1 %vm245_vm0, %v3814_v55 }
0x11a9   :  { %v9343_v41 = vpop.eup %7196  ;;  %v3735_v17 = vmul.f32 1.442695, %v3710_v21 }
0x11aa   :  { %v3773_v51 = vsel %vm245_vm0, %v9343_v41, 0.0 }
0x11ab   :  { %7200 = vpow2.f32 %v3735_v17  ;;  %3774 = vadd.xlane.f32.xlu1 %v3773_v51 }
0x11ad   :  { %v7199_v40 = vpop.eup %7198 }
0x11ae   :  { %v3760_v1 = vpop.xlane.xlu0 %3759  ;;  %v3685_v13 = vpop.xlane.xlu1 %3684  ;;  %v3815_v54 = vmul.f32 %v7199_v40, %v9278_v10 }
0x11af   :  { %7202 = vrcp.f32 %v3760_v1  ;;  %v3711_v33 = vsub.f32 %v9285_v44, %v3685_v13 }
0x11b0   :  { %6475 = vmatmul.msk.f32.gmra.mxu1 %vm245_vm0, %v3815_v54 }
0x11b1   :  { %v9350_v43 = vpop.eup %7200  ;;  %v3737_v42 = vmul.f32 1.442695, %v3711_v33 }
0x11b2   :  { %v3776_v46 = vsel %vm245_vm0, %v9350_v43, 0.0 }
0x11b3   :  { %7204 = vpow2.f32 %v3737_v42  ;;  %3777 = vadd.xlane.f32.xlu0 %v3776_v46 }
0x11b5   :  { %v7203_v14 = vpop.eup %7202 }
0x11b6   :  { %v3763_v23 = vpop.xlane.xlu2 %3762  ;;  %v3688_v20 = vpop.xlane.xlu0 %3687  ;;  %v3816_v55 = vmul.f32 %v7203_v14, %v9287_v49 }
0x11b7   :  { %7206 = vrcp.f32 %v3763_v23  ;;  %v3712_v10 = vsub.f32 %v9294_v18, %v3688_v20 }
0x11b8   :  { %6476 = vmatmul.msk.f32.gmra.mxu1 %vm245_vm0, %v3816_v55 }
0x11b9   :  { %v9357_v44 = vpop.eup %7204  ;;  %v3739_v21 = vmul.f32 1.442695, %v3712_v10 }
0x11ba   :  { %v3779_v17 = vsel %vm245_vm0, %v9357_v44, 0.0 }
0x11bb   :  { %7208 = vpow2.f32 %v3739_v21  ;;  %3780 = vadd.xlane.f32.xlu1 %v3779_v17 }
0x11bd   :  { %v7207_v51 = vpop.eup %7206 }
0x11be   :  { %v3766_v40 = vpop.xlane.xlu1 %3765  ;;  %v3691_v1 = vpop.xlane.xlu2 %3690  ;;  %v3817_v13 = vmul.f32 %v7207_v51, %v9297_v62 }
0x11bf   :  { %7210 = vrcp.f32 %v3766_v40  ;;  %v3713_v49 = vsub.f32 %v9304_v35, %v3691_v1 }
0x11c0   :  { %6477 = vmatmul.msk.f32.gmra.mxu1 %vm245_vm0, %v3817_v13 }
0x11c1   :  { %v7209_v18 = vpop.eup %7208  ;;  %v3741_v54 = vmul.f32 1.442695, %v3713_v49 }
0x11c2   :  { %v3782_v33 = vsel %vm245_vm0, %v7209_v18, 0.0 }
0x11c3   :  { %7212 = vpow2.f32 %v3741_v54  ;;  %3783 = vadd.xlane.f32.xlu2 %v3782_v33 }
0x11c5   :  { %v7211_v42 = vpop.eup %7210 }
0x11c6   :  { %v3769_v46 = vpop.xlane.xlu0 %3768  ;;  %v3694_v14 = vpop.xlane.xlu1 %3693  ;;  %v3818_v23 = vmul.f32 %v7211_v42, %v9307_v11 }
0x11c7   :  { %7214 = vrcp.f32 %v3769_v46  ;;  %v3714_v20 = vsub.f32 %v9314_v32, %v3694_v14 }
0x11c8   :  { %6478 = vmatmul.msk.f32.gmra.mxu1 %vm245_vm0, %v3818_v23 }
0x11c9   :  { %v7213_v62 = vpop.eup %7212  ;;  %v3743_v35 = vmul.f32 1.442695, %v3714_v20 }
0x11ca   :  { %v3785_v55 = vsel %vm245_vm0, %v7213_v62, 0.0 }
0x11cb   :  { %7216 = vpow2.f32 %v3743_v35  ;;  %3786 = vadd.xlane.f32.xlu0 %v3785_v55 }
0x11cd   :  { %v7215_v10 = vpop.eup %7214 }
0x11ce   :  { %v3772_v21 = vpop.xlane.xlu2 %3771  ;;  %v3697_v17 = vpop.xlane.xlu0 %3696  ;;  %v3819_v51 = vmul.f32 %v7215_v10, %v9317_v8 }
0x11cf   :  { %7218 = vrcp.f32 %v3772_v21  ;;  %v3715_v40 = vsub.f32 %v9324_v63, %v3697_v17 }
0x11d0   :  { %6479 = vmatmul.msk.f32.gmra.mxu1 %vm245_vm0, %v3819_v51 }
0x11d1   :  { %v7217_v11 = vpop.eup %7216  ;;  %v3745_v32 = vmul.f32 1.442695, %v3715_v40 }
0x11d2   :  { %v3788_v1 = vsel %vm245_vm0, %v7217_v11, 0.0 }
0x11d3   :  { %7220 = vpow2.f32 %v3745_v32  ;;  %3789 = vadd.xlane.f32.xlu1 %v3788_v1 }
0x11d5   :  { %v7219_v13 = vpop.eup %7218 }
0x11d6   :  { %v3700_v49 = vpop.xlane.xlu2 %3699  ;;  %v3820_v54 = vmul.f32 %v7219_v13, %v9326_v61 }
0x11d7   :  { %v3716_v33 = vsub.f32 %v9333_v12, %v3700_v49 }
0x11d8   :  { %6480 = vmatmul.msk.f32.gmra.mxu1 %vm245_vm0, %v3820_v54 }
0x11d9   :  { %v7221_v8 = vpop.eup %7220  ;;  %v3747_v42 = vmul.f32 1.442695, %v3716_v33 }
0x11da   :  { %v3791_v63 = vsel %vm245_vm0, %v7221_v8, 0.0 }
0x11db   :  { %7222 = vpow2.f32 %v3747_v42  ;;  %3792 = vadd.xlane.f32.xlu2 %v3791_v63 }
0x11e1   :  { %v7223_v46 = vpop.eup %7222 }
0x11e2   :  { %v3794_v14 = vsel %vm245_vm0, %v7223_v46, 0.0 }
0x11e3   :  { %3795 = vadd.xlane.f32.xlu0 %v3794_v14 }
0x121d   :  { %v3894_v14 = vpop.f32.mrf.mxu1 }
0x121e   :  { %v3775_v23 = vpop.xlane.xlu1 %3774 }
0x121f   :  { %7224 = vrcp.f32 %v3775_v23 }
0x1225   :  { %v7225_v20 = vpop.eup %7224 }
0x1226   :  { %v3778_v35 = vpop.xlane.xlu0 %3777  ;;  %v3821_v61 = vmul.f32 %v7225_v20, %v9343_v41 }
0x1227   :  { %7226 = vrcp.f32 %v3778_v35 }
0x1228   :  { %6481 = vmatmul.msk.f32.gmra.mxu1 %vm245_vm0, %v3821_v61 }
0x122d   :  { %v7227_v12 = vpop.eup %7226 }
0x122e   :  { %v3781_v55 = vpop.xlane.xlu1 %3780  ;;  %v3822_v10 = vmul.f32 %v7227_v12, %v9350_v43 }
0x122f   :  { %7228 = vrcp.f32 %v3781_v55 }
0x1230   :  { %6482 = vmatmul.msk.f32.gmra.mxu1 %vm245_vm0, %v3822_v10 }
0x1235   :  { %v7229_v21 = vpop.eup %7228 }
0x1236   :  { %v3784_v17 = vpop.xlane.xlu2 %3783  ;;  %v3823_v51 = vmul.f32 %v7229_v21, %v9357_v44 }
0x1237   :  { %7230 = vrcp.f32 %v3784_v17 }
0x1238   :  { %6483 = vmatmul.msk.f32.gmra.mxu1 %vm245_vm0, %v3823_v51 }
0x123d   :  { %v7231_v40 = vpop.eup %7230 }
0x123e   :  { %v3787_v32 = vpop.xlane.xlu0 %3786  ;;  %v3824_v41 = vmul.f32 %v7231_v40, %v7209_v18 }
0x123f   :  { %7232 = vrcp.f32 %v3787_v32 }
0x1240   :  { %6484 = vmatmul.msk.f32.gmra.mxu1 %vm245_vm0, %v3824_v41 }
0x1245   :  { %v7233_v1 = vpop.eup %7232 }
0x1246   :  { %v3790_v13 = vpop.xlane.xlu1 %3789  ;;  %v3825_v49 = vmul.f32 %v7233_v1, %v7213_v62  ;;  %v3897_v62 = vpop.f32.mrf.mxu1 }
0x1247   :  { %7234 = vrcp.f32 %v3790_v13 }
0x1248   :  { %6485 = vmatmul.msk.f32.gmra.mxu1 %vm245_vm0, %v3825_v49 }
0x124d   :  { %v7235_v43 = vpop.eup %7234 }
0x124e   :  { %v3793_v54 = vpop.xlane.xlu2 %3792  ;;  %v3826_v33 = vmul.f32 %v7235_v43, %v7217_v11  ;;  %v3900_v20 = vpop.f32.mrf.mxu1 }
0x124f   :  { %7236 = vrcp.f32 %v3793_v54 }
0x1250   :  { %6486 = vmatmul.msk.f32.gmra.mxu1 %vm245_vm0, %v3826_v33 }
0x1255   :  { %v7237_v44 = vpop.eup %7236 }
0x1256   :  { %v3796_v42 = vpop.xlane.xlu0 %3795  ;;  %v3827_v63 = vmul.f32 %v7237_v44, %v7221_v8  ;;  %v3903_v35 = vpop.f32.mrf.mxu1 }
0x1257   :  { %7238 = vrcp.f32 %v3796_v42 }
0x1258   :  { %6487 = vmatmul.msk.f32.gmra.mxu1 %vm245_vm0, %v3827_v63 }
0x125d   :  { %v7239_v18 = vpop.eup %7238 }
0x125e   :  { %v3828_v23 = vmul.f32 %v7239_v18, %v7223_v46  ;;  %v3906_v61 = vpop.f32.mrf.mxu1 }
0x1260   :  { %6488 = vmatmul.msk.f32.gmra.mxu1 %vm245_vm0, %v3828_v23  ;;  %v3946_v23 = vmul.f32 %v9178_v58, %v3906_v61  ;;  %v7390_v61 = vld [vmem:[%s10310_s19] sm:$0xff] }
0x1266   :  { %v3909_v12 = vpop.f32.mrf.mxu1 }
0x1267   :  { %v3947_v18 = vmul.f32 %v9183_v36, %v3909_v12  ;;  %v6492_v12 = vld [vmem:[%s10312_s24 + $0x38] sm:$0xff] }
0x126e   :  { %v3912_v11 = vpop.f32.mrf.mxu1 }
0x126f   :  { %v3948_v63 = vmul.f32 %v9188_v60, %v3912_v11  ;;  %v3943_v11 = vmul.f32 %v9163_v48, %v3897_v62 }
0x1276   :  { %v3915_v55 = vpop.f32.mrf.mxu1 }
0x1277   :  { %v3949_v42 = vmul.f32 %v9193_v3, %v3915_v55  ;;  %v3944_v55 = vmul.f32 %v9168_v52, %v3900_v20  ;;  %v6489_v20 = vld [vmem:[%s10312_s24 + $0x20] sm:$0xff] }
0x12a5   :  { %v3918_v10 = vpop.f32.mrf.mxu1 }
0x12a6   :  { %v3950_v44 = vmul.f32 %v9198_v15, %v3918_v10  ;;  %v3942_v10 = vmul.f32 %v9158_v22, %v3894_v14  ;;  %v7028_v14 = vld [vmem:[%s10318_s30 + $0x1] ss:$0 sm:$0xff] }
0x12ad   :  { %v3921_v21 = vpop.f32.mrf.mxu1 }
0x12ae   :  { %v3951_v33 = vmul.f32 %v9203_v56, %v3921_v21  ;;  %v3945_v21 = vmul.f32 %v9173_v50, %v3903_v35  ;;  %v6490_v35 = vld [vmem:[%s10312_s24 + $0x28] sm:$0xff] }
0x12b5   :  { %v3924_v17 = vpop.f32.mrf.mxu1 }
0x12b6   :  { %v3952_v54 = vmul.f32 %v9208_v34, %v3924_v17  ;;  %v6491_v17 = vld [vmem:[%s10312_s24 + $0x30] sm:$0xff] }
0x12bd   :  { %v3927_v51 = vpop.f32.mrf.mxu1 }
0x12be   :  { %v3953_v43 = vmul.f32 %v9213_v2, %v3927_v51  ;;  %v7391_v51 = vld [vmem:[%s10310_s19 + $0x8] sm:$0xff] }
0x12c5   :  { %v3930_v8 = vpop.f32.mrf.mxu1 }
0x12c6   :  { %v3954_v49 = vmul.f32 %v9218_v9, %v3930_v8 }
0x12cd   :  { %v3933_v40 = vpop.f32.mrf.mxu1 }
0x12ce   :  { %v3955_v13 = vmul.f32 %v9223_v37, %v3933_v40 }
0x12d5   :  { %v3936_v32 = vpop.f32.mrf.mxu1 }
0x12d6   :  { %v3956_v46 = vmul.f32 %v9228_v27, %v3936_v32 }
0x12dd   :  { %v3939_v41 = vpop.f32.mrf.mxu1 }
0x12de   :  { %v3957_v1 = vmul.f32 %v9233_v38, %v3939_v41 }
0x12e0   :  { %3958 = vmatpush.msrb.mxu2 %v3957_v1 }
0x12e2   :  { %3959 = vmatpush.msrb.mxu2 %v3956_v46 }
0x12e4   :  { %3960 = vmatpush.msrb.mxu2 %v3955_v13 }
0x12e6   :  { %3961 = vmatpush.msrb.mxu2 %v3954_v49 }
0x12e8   :  { %3962 = vmatpush.msrb.mxu2 %v3953_v43 }
0x12ea   :  { %3963 = vmatpush.msrb.mxu2 %v3952_v54 }
0x12ec   :  { %3964 = vmatpush.msrb.mxu2 %v3951_v33 }
0x12ee   :  { %3965 = vmatpush.msrb.mxu2 %v3950_v44 }
0x12f0   :  { %3966 = vmatpush.msrb.mxu2 %v3949_v42  ;;  %v6499_v42 = vld [vmem:[%s10326_s6 + $0x38] sm:$0xff] }
0x12f2   :  { %3967 = vmatpush.msrb.mxu2 %v3948_v63  ;;  %v6498_v63 = vld [vmem:[%s10326_s6 + $0x30] sm:$0xff] }
0x12f4   :  { %3968 = vmatpush.msrb.mxu2 %v3947_v18  ;;  %v6497_v18 = vld [vmem:[%s10326_s6 + $0x28] sm:$0xff] }
0x12f6   :  { %3969 = vmatpush.msrb.mxu2 %v3946_v23  ;;  %v6496_v23 = vld [vmem:[%s10326_s6 + $0x20] sm:$0xff] }
0x12f8   :  { %3970 = vmatpush.msrb.mxu2 %v3945_v21 }
0x12fa   :  { %3971 = vmatpush.msrb.mxu2 %v3944_v55 }
0x12fc   :  { %3972 = vmatpush.msrb.mxu2 %v3943_v11 }
0x12fe   :  { %3973 = vmatpush.msrb.mxu2 %v3942_v10 }
0x12ff   :  { %3974 = vmatmul.f32.vlgmr.msrb.gmra.mxu2 %v7390_v61 }
0x1300   :  { %4009 = vmatpush.msra.mxu2 %v6492_v12 }
0x1302   :  { %4010 = vmatpush.msra.mxu2 %v6491_v17 }
0x1304   :  { %4011 = vmatpush.msra.mxu2 %v6490_v35 }
0x1306   :  { %4012 = vmatpush.msra.mxu2 %v6489_v20  ;;  %v6505_v20 = vld [vmem:[%s10327_s12 + $0x30] sm:$0xff] }
0x1307   :  { %3977 = vmatmul.f32.gmra.mxu2 %v7391_v51  ;;  %v6506_v51 = vld [vmem:[%s10327_s12 + $0x38] sm:$0xff] }
0x1308   :  { %4104 = vmatpush.msrb.mxu2 %v6499_v42 }
0x130a   :  { %4105 = vmatpush.msrb.mxu2 %v6498_v63  ;;  %v6417_v63 = vld [vmem:[%s10329_s16 + $0x4] sm:$0x7] }
0x130c   :  { %4106 = vmatpush.msrb.mxu2 %v6497_v18 }
0x130e   :  { %4107 = vmatpush.msrb.mxu2 %v6496_v23 }
0x1382   :  { %v3975_v8 = vpop.f32.mrf.mxu2 }
0x1383   :  { %6494 = vmatmul.msk.f32.vlgmr.msra.gmra.mxu2 %vm465_vm1, %v3975_v8 }
0x1384   :  { %4137 = vmatpush.msra.mxu2 %v6506_v51 }
0x1386   :  { %4138 = vmatpush.msra.mxu2 %v6505_v20 }
0x138a   :  { %v3978_v62 = vpop.f32.mrf.mxu2 }
0x138b   :  { %6495 = vmatmul.msk.f32.gmra.mxu2 %vm465_vm1, %v3978_v62 }
0x1406   :  { %v4014_v40 = vpop.f32.mrf.mxu2 }
0x1407   :  { %v4015_v32 = vadd.f32 %v7028_v14, %v4014_v40  ;;  %v6504_v40 = vld [vmem:[%s10327_s12 + $0x28] sm:$0xff] }
0x1408   :  { %4139 = vmatpush.msra.mxu2 %v6504_v40 }
0x1409   :  { %v9415_v41 = vadd.f32 %v4015_v32, %v9055_v0 }
0x140b   :  { %v4024_v1 = vsel %vm465_vm1, %v9415_v41, 0.0  ;;  %v4022_v46 = vmul.f32 %v9415_v41, %v9415_v41 }
0x140c   :  { %4025 = vadd.xlane.f32.xlu1 %v4024_v1  ;;  %v6503_v1 = vld [vmem:[%s10327_s12 + $0x20] sm:$0xff] }
0x140d   :  { %v4030_v13 = vsel %vm465_vm1, %v4022_v46, 0.0  ;;  %4140 = vmatpush.msra.mxu2 %v6503_v1  ;;  %v9451_v1 = vld [vmem:[%s7504_s9] sm:$0xff] }
0x140e   :  { %v4017_v49 = vpop.f32.mrf.mxu2  ;;  %4031 = vadd.xlane.f32.xlu2 %v4030_v13 }
0x140f   :  { %v4018_v43 = vadd.f32 %v7028_v14, %v4017_v49 }
0x1411   :  { %v9423_v54 = vadd.f32 %v4018_v43, %v9064_v29 }
0x1413   :  { %v4027_v0 = vsel %vm465_vm1, %v9423_v54, 0.0  ;;  %v4023_v33 = vmul.f32 %v9423_v54, %v9423_v54 }
0x1414   :  { %4028 = vadd.xlane.f32.xlu0 %v4027_v0 }
0x1415   :  { %v4033_v44 = vsel %vm465_vm1, %v4023_v33, 0.0  ;;  %v6416_v33 = vld [vmem:[%s10328_s15 + $0x4] sm:$0x7] }
0x1416   :  { %4034 = vadd.xlane.f32.xlu1 %v4033_v44 }
0x147f   :  { %v4026_v29 = vpop.xlane.xlu1 %4025 }
0x1480   :  { %v4036_v21 = vmul.f32 0.03125, %v4026_v29 }
0x1481   :  { %v4032_v55 = vpop.xlane.xlu2 %4031 }
0x1482   :  { %v4040_v11 = vmul.f32 %v4036_v21, %v4036_v21  ;;  %v4038_v10 = vmul.f32 0.03125, %v4032_v55  ;;  %v4044_v23 = vsub.f32 %v9415_v41, %v4036_v21  ;;  %v4070_v55 = vperm.slane %v6416_v33, 0 }
0x1484   :  { %v4042_v12 = vsub.f32 %v4038_v10, %v4040_v11 }
0x1486   :  { %v4046_v61 = vadd.f32 1e-05, %v4042_v12  ;;  %v4073_v12 = vperm.slane %v6417_v63, 0 }
0x1487   :  { %v4029_v17 = vpop.xlane.xlu0 %4028 }
0x1488   :  { %7240 = vrsqrt.f32 %v4046_v61  ;;  %v4037_v35 = vmul.f32 0.03125, %v4029_v17  ;;  %vm4054_vm7 = vweird.f32 %v4046_v61 }
0x1489   :  { %v4035_v8 = vpop.xlane.xlu1 %4034 }
0x148a   :  { %v4041_v62 = vmul.f32 %v4037_v35, %v4037_v35  ;;  %v4039_v14 = vmul.f32 0.03125, %v4035_v8  ;;  %v4045_v41 = vsub.f32 %v9423_v54, %v4037_v35  ;;  %v9461_v54 = vld [vmem:[%s7504_s9 + $0x10] sm:$0xff]  ;;  %v9466_v35 = vld [vmem:[%s7504_s9 + $0x18] sm:$0xff] }
0x148c   :  { %v4043_v32 = vsub.f32 %v4039_v14, %v4041_v62 }
0x148e   :  { %v7241_v46 = vpop.eup %7240  ;;  %v4047_v13 = vadd.f32 1e-05, %v4043_v32 }
0x148f   :  { %v4049_v49 = vmul.f32 %v7241_v46, %v4046_v61  ;;  %vm4055_vm6 = vweird.f32 %v7241_v46 }
0x1490   :  { %7242 = vrsqrt.f32 %v4047_v13  ;;  %vm4056_vm8 = vmor %vm4054_vm7, %vm4055_vm6  ;;  %vm4064_vm10 = vweird.f32 %v4047_v13 }
0x1491   :  { %v4050_v43 = vmul.f32 %v7241_v46, %v4049_v49  ;;  %v7029_v49 = vld [vmem:[%s10330_s18 + $0x1] ss:$0 sm:$0xff] }
0x1493   :  { %v4051_v0 = vmul.f32 0.5, %v4050_v43 }
0x1495   :  { %v4052_v44 = vsub.f32 1.5, %v4051_v0 }
0x1496   :  { %v7243_v42 = vpop.eup %7242 }
0x1497   :  { %v4053_v18 = vmul.f32 %v7241_v46, %v4052_v44  ;;  %v4059_v29 = vmul.f32 %v7243_v42, %v4047_v13  ;;  %vm4065_vm9 = vweird.f32 %v7243_v42 }
0x1498   :  { %vm4066_vm11 = vmor %vm4064_vm10, %vm4065_vm9  ;;  %vm6124_vm9 = vcmask 80896  }
0x1499   :  { %v4057_v11 = vsel %vm4056_vm8, %v7241_v46, %v4053_v18  ;;  %v4060_v10 = vmul.f32 %v7243_v42, %v4059_v29  ;;  %v9456_v46 = vld [vmem:[%s7504_s9 + $0x8] sm:$0xff]  ;;  %v7030_v18 = vld [vmem:[%s10331_s22 + $0x1] ss:$0 sm:$0xff]  ;;  %s10357_s9 = sld [smem:[#allocation28_spill]] }
0x149a   :  { %v4068_v17 = vmul.f32 %v4057_v11, %v4044_v23 }
0x149b   :  { %v4061_v51 = vmul.f32 0.5, %v4060_v10 }
0x149c   :  { %v4071_v20 = vmul.f32 %v4070_v55, %v4068_v17 }
0x149d   :  { %v4062_v8 = vsub.f32 1.5, %v4061_v51 }
0x149e   :  { %v9441_v62 = vadd.f32 %v4073_v12, %v4071_v20 }
0x149f   :  { %v4063_v14 = vmul.f32 %v7243_v42, %v4062_v8 }
0x14a0   :  { %6501 = vmatmul.msk.f32.vlgmr.msrb.gmra.mxu2 %vm465_vm1, %v9441_v62 }
0x14a1   :  { %v4067_v21 = vsel %vm4066_vm11, %v7243_v42, %v4063_v14 }
0x14a2   :  { %v4069_v61 = vmul.f32 %v4067_v21, %v4045_v41 }
0x14a4   :  { %v4072_v40 = vmul.f32 %v4070_v55, %v4069_v61  ;;  %v10343_v61 = vld [vmem:[#allocation34_spill] sm:$0xff] }
0x14a6   :  { %v9446_v32 = vadd.f32 %v4073_v12, %v4072_v40 }
0x14a8   :  { %6502 = vmatmul.msk.f32.gmra.mxu2 %vm465_vm1, %v9446_v32 }
0x14b0   :  { %6508 = vmatmul.msk.f32.vlgmr.msra.gmra.mxu2 %vm465_vm1, %v9451_v1 }
0x14b8   :  { %6509 = vmatmul.msk.f32.gmra.mxu2 %vm465_vm1, %v9456_v46 }
0x14c0   :  { %6510 = vmatmul.msk.f32.gmra.mxu2 %vm465_vm1, %v9461_v54 }
0x14c8   :  { %6511 = vmatmul.msk.f32.gmra.mxu2 %vm465_vm1, %v9466_v35 }
0x1523   :  { %v4109_v13 = vpop.f32.mrf.mxu2 }
0x1524   :  { %v4110_v33 = vadd.f32 %v7029_v49, %v4109_v13 }
0x152b   :  { %v4112_v43 = vpop.f32.mrf.mxu2 }
0x152c   :  { %v4113_v0 = vadd.f32 %v7029_v49, %v4112_v43  ;;  %v10344_v43 = vld [vmem:[#allocation35_spill] sm:$0xff] }
0x152e   :  { %4207 = vmatpush.msra.mxu3 %v4113_v0 }
0x1530   :  { %4208 = vmatpush.msra.mxu3 %v4110_v33 }
0x1531   :  { %6521 = vmatmul.msk.f32.vlgmr.msra.gmra.mxu3 %vm245_vm0, %v9077_v4 }
0x1533   :  { %v4142_v44 = vpop.f32.mrf.mxu2 }
0x1539   :  { %6522 = vmatmul.msk.f32.gmra.mxu3 %vm245_vm0, %v9083_v47 }
0x153b   :  { %v4145_v42 = vpop.f32.mrf.mxu2 }
0x1541   :  { %6523 = vmatmul.msk.f32.gmra.mxu3 %vm245_vm0, %v9088_v57  ;;  %v4146_v57 = vadd.f32 %v7030_v18, %v4145_v42 }
0x1543   :  { %v4148_v63 = vpop.f32.mrf.mxu2 }
0x1544   :  { %v4149_v29 = vadd.f32 %v7030_v18, %v4148_v63 }
0x1549   :  { %6524 = vmatmul.msk.f32.gmra.mxu3 %vm245_vm0, %v9093_v19  ;;  %v4143_v19 = vadd.f32 %v7030_v18, %v4142_v44 }
0x154b   :  { %v4151_v4 = vpop.f32.mrf.mxu2 }
0x154c   :  { %v4152_v47 = vadd.f32 %v7030_v18, %v4151_v4 }
0x154e   :  { %6537 = vmatpush.xpose.msk.msra.mxu0 %vm465_vm1, %v4152_v47  ;;  %v10346_v47 = vld [vmem:[#allocation37_spill] sm:$0xff] }
0x1551   :  { %6525 = vmatmul.msk.f32.gmra.mxu3 %vm245_vm0, %v9098_v45 }
0x1552   :  { %6538 = vmatpush.xpose.msk.msra.mxu0 %vm465_vm1, %v4149_v29 }
0x1556   :  { %6539 = vmatpush.xpose.msk.msra.mxu0 %vm465_vm1, %v4146_v57 }
0x1559   :  { %6526 = vmatmul.msk.f32.gmra.mxu3 %vm245_vm0, %v9103_v53 }
0x155a   :  { %6540 = vmatpush.xpose.msk.msra.mxu0 %vm465_vm1, %v4143_v19 }
0x1561   :  { %6527 = vmatmul.msk.f32.gmra.mxu3 %vm245_vm0, %v9108_v28 }
0x1569   :  { %6528 = vmatmul.msk.f32.gmra.mxu3 %vm245_vm0, %v9113_v7 }
0x1571   :  { %6529 = vmatmul.msk.f32.gmra.mxu3 %vm245_vm0, %v9118_v26 }
0x1579   :  { %6530 = vmatmul.msk.f32.gmra.mxu3 %vm245_vm0, %v9123_v59 }
0x1581   :  { %6531 = vmatmul.msk.f32.gmra.mxu3 %vm245_vm0, %v9128_v31 }
0x1589   :  { %6532 = vmatmul.msk.f32.gmra.mxu3 %vm245_vm0, %v9133_v16 }
0x1591   :  { %6533 = vmatmul.msk.f32.gmra.mxu3 %vm245_vm0, %v9138_v6 }
0x1599   :  { %6534 = vmatmul.msk.f32.gmra.mxu3 %vm245_vm0, %v9143_v5 }
0x15a1   :  { %6535 = vmatmul.msk.f32.gmra.mxu3 %vm245_vm0, %v9148_v24 }
0x15a9   :  { %6536 = vmatmul.msk.f32.gmra.mxu3 %vm245_vm0, %v9153_v39 }
0x15b4   :  { %v4210_v45 = vpop.f32.mrf.mxu3 }
0x15b5   :  { %v4258_v53 = vmul.f32 %v9158_v22, %v4210_v45 }
0x15b7   :  { %6541 = vmatmul.msk.f32.vlgmr.msra.gmra.mxu0 %vm465_vm1, %v4258_v53  ;;  %v10347_v53 = vld [vmem:[#allocation38_spill] sm:$0xff] }
0x15bc   :  { %v4213_v28 = vpop.f32.mrf.mxu3 }
0x15bd   :  { %v4259_v7 = vmul.f32 %v9163_v48, %v4213_v28 }
0x15bf   :  { %6542 = vmatmul.msk.f32.gmra.mxu0 %vm465_vm1, %v4259_v7 }
0x15c4   :  { %v4216_v26 = vpop.f32.mrf.mxu3 }
0x15c5   :  { %v4260_v59 = vmul.f32 %v9168_v52, %v4216_v26 }
0x15c7   :  { %6543 = vmatmul.msk.f32.gmra.mxu0 %vm465_vm1, %v4260_v59 }
0x15cc   :  { %v4219_v31 = vpop.f32.mrf.mxu3 }
0x15cd   :  { %v4261_v16 = vmul.f32 %v9173_v50, %v4219_v31  ;;  %v6515_v31 = vld [vmem:[%s10332_s23 + $0x38] sm:$0xff] }
0x15ce   :  { %4176 = vmatpush.msrb.mxu2 %v6515_v31 }
0x15cf   :  { %6544 = vmatmul.msk.f32.gmra.mxu0 %vm465_vm1, %v4261_v16 }
0x15d4   :  { %v4222_v6 = vpop.f32.mrf.mxu3 }
0x15d5   :  { %v4262_v5 = vmul.f32 %v9178_v58, %v4222_v6 }
0x15d7   :  { %6545 = vmatmul.msk.f32.gmra.mxu0 %vm465_vm1, %v4262_v5 }
0x15dc   :  { %v4225_v24 = vpop.f32.mrf.mxu3 }
0x15dd   :  { %v4263_v39 = vmul.f32 %v9183_v36, %v4225_v24 }
0x15df   :  { %6546 = vmatmul.msk.f32.gmra.mxu0 %vm465_vm1, %v4263_v39  ;;  %v6514_v39 = vld [vmem:[%s10332_s23 + $0x30] sm:$0xff] }
0x15e0   :  { %4177 = vmatpush.msrb.mxu2 %v6514_v39 }
0x15e4   :  { %v4228_v22 = vpop.f32.mrf.mxu3 }
0x15e5   :  { %v4264_v48 = vmul.f32 %v9188_v60, %v4228_v22  ;;  %v6513_v22 = vld [vmem:[%s10332_s23 + $0x28] sm:$0xff] }
0x15e6   :  { %4178 = vmatpush.msrb.mxu2 %v6513_v22 }
0x15e7   :  { %6547 = vmatmul.msk.f32.gmra.mxu0 %vm465_vm1, %v4264_v48  ;;  %v10348_v48 = vld [vmem:[#allocation39_spill] sm:$0xff] }
0x15ec   :  { %v4231_v52 = vpop.f32.mrf.mxu3 }
0x15ed   :  { %v4265_v50 = vmul.f32 %v9193_v3, %v4231_v52 }
0x15ef   :  { %6548 = vmatmul.msk.f32.gmra.mxu0 %vm465_vm1, %v4265_v50  ;;  %v6512_v50 = vld [vmem:[%s10332_s23 + $0x20] sm:$0xff] }
0x15f0   :  { %4179 = vmatpush.msrb.mxu2 %v6512_v50 }
0x15f1   :  { %6517 = vmatmul.msk.f32.vlgmr.msrb.gmra.mxu2 %vm465_vm1, %v9451_v1 }
0x15f4   :  { %v4234_v23 = vpop.f32.mrf.mxu3 }
0x15f5   :  { %v4266_v58 = vmul.f32 %v9198_v15, %v4234_v23 }
0x15f7   :  { %6549 = vmatmul.msk.f32.gmra.mxu0 %vm465_vm1, %v4266_v58 }
0x15f9   :  { %6518 = vmatmul.msk.f32.gmra.mxu2 %vm465_vm1, %v9456_v46 }
0x15fc   :  { %v4237_v55 = vpop.f32.mrf.mxu3 }
0x15fd   :  { %v4267_v36 = vmul.f32 %v9203_v56, %v4237_v55 }
0x15ff   :  { %6550 = vmatmul.msk.f32.gmra.mxu0 %vm465_vm1, %v4267_v36 }
0x1601   :  { %6519 = vmatmul.msk.f32.gmra.mxu2 %vm465_vm1, %v9461_v54 }
0x1604   :  { %v4240_v11 = vpop.f32.mrf.mxu3 }
0x1605   :  { %v4268_v60 = vmul.f32 %v9208_v34, %v4240_v11 }
0x1607   :  { %6551 = vmatmul.msk.f32.gmra.mxu0 %vm465_vm1, %v4268_v60 }
0x1609   :  { %6520 = vmatmul.msk.f32.gmra.mxu2 %vm465_vm1, %v9466_v35  ;;  %v10349_v35 = vld [vmem:[#allocation40_spill] sm:$0xff] }
0x160c   :  { %v4243_v10 = vpop.f32.mrf.mxu3 }
0x160d   :  { %v4269_v3 = vmul.f32 %v9213_v2, %v4243_v10 }
0x160f   :  { %6552 = vmatmul.msk.f32.gmra.mxu0 %vm465_vm1, %v4269_v3 }
0x1614   :  { %v4246_v12 = vpop.f32.mrf.mxu3 }
0x1615   :  { %v4270_v15 = vmul.f32 %v9218_v9, %v4246_v12 }
0x1617   :  { %6553 = vmatmul.msk.f32.gmra.mxu0 %vm465_vm1, %v4270_v15 }
0x161c   :  { %v4249_v17 = vpop.f32.mrf.mxu3 }
0x161d   :  { %v4271_v56 = vmul.f32 %v9223_v37, %v4249_v17 }
0x161f   :  { %6554 = vmatmul.msk.f32.gmra.mxu0 %vm465_vm1, %v4271_v56 }
0x1624   :  { %v4252_v51 = vpop.f32.mrf.mxu3 }
0x1625   :  { %v4272_v34 = vmul.f32 %v9228_v27, %v4252_v51 }
0x1627   :  { %6555 = vmatmul.msk.f32.gmra.mxu0 %vm465_vm1, %v4272_v34 }
0x162c   :  { %v4255_v20 = vpop.f32.mrf.mxu3 }
0x162d   :  { %v4273_v2 = vmul.f32 %v9233_v38, %v4255_v20 }
0x162f   :  { %6556 = vmatmul.msk.f32.gmra.mxu0 %vm465_vm1, %v4273_v2 }
0x1634   :  { %v4351_v8 = vpop.f32.mrf.mxu0 }
0x1635   :  { %v4399_v14 = vmul.f32 0.5, %v4351_v8 }
0x1637   :  { %v4415_v9 = vadd.f32 %v4399_v14, %v8146_v25  ;;  %v10345_v25 = vld [vmem:[#allocation36_spill] sm:$0xff] }
0x1639   :  { %v4431_v41 = vsel %vm465_vm1, %v4415_v9, -inf }
0x163a   :  { %4432 = vmax.xlane.f32.xlu2 %v4431_v41 }
0x163c   :  { %v4354_v37 = vpop.f32.mrf.mxu0 }
0x163d   :  { %v4400_v21 = vmul.f32 0.5, %v4354_v37 }
0x163f   :  { %v4416_v40 = vadd.f32 %v4400_v21, %v10343_v61 }
0x1641   :  { %v4434_v27 = vsel %vm465_vm1, %v4416_v40, -inf }
0x1642   :  { %4435 = vmax.xlane.f32.xlu0 %v4434_v27 }
0x1644   :  { %v4357_v13 = vpop.f32.mrf.mxu0 }
0x1645   :  { %v4401_v49 = vmul.f32 0.5, %v4357_v13 }
0x1647   :  { %v4417_v38 = vadd.f32 %v4401_v49, %v10344_v43 }
0x1649   :  { %v4437_v0 = vsel %vm465_vm1, %v4417_v38, -inf }
0x164a   :  { %4438 = vmax.xlane.f32.xlu1 %v4437_v0 }
0x164c   :  { %v4360_v33 = vpop.f32.mrf.mxu0 }
0x164d   :  { %v4402_v44 = vmul.f32 0.5, %v4360_v33 }
0x164f   :  { %v9547_v42 = vadd.f32 %v4402_v44, %v10345_v25 }
0x1651   :  { %v4440_v63 = vsel %vm465_vm1, %v9547_v42, -inf }
0x1652   :  { %4441 = vmax.xlane.f32.xlu2 %v4440_v63 }
0x1654   :  { %v4363_v18 = vpop.f32.mrf.mxu0 }
0x1655   :  { %v4403_v4 = vmul.f32 0.5, %v4363_v18 }
0x1657   :  { %v9552_v29 = vadd.f32 %v4403_v4, %v10346_v47 }
0x1659   :  { %v4443_v57 = vsel %vm465_vm1, %v9552_v29, -inf }
0x165a   :  { %4444 = vmax.xlane.f32.xlu0 %v4443_v57  ;;  %v10352_v57 = vld [vmem:[#allocation43_spill] sm:$0xff] }
0x165c   :  { %v4366_v19 = vpop.f32.mrf.mxu0 }
0x165d   :  { %v4404_v45 = vmul.f32 0.5, %v4366_v19 }
0x165f   :  { %v9557_v28 = vadd.f32 %v4404_v45, %v10347_v53 }
0x1661   :  { %v4446_v7 = vsel %vm465_vm1, %v9557_v28, -inf }
0x1662   :  { %4447 = vmax.xlane.f32.xlu1 %v4446_v7 }
0x1664   :  { %v4369_v26 = vpop.f32.mrf.mxu0 }
0x1665   :  { %v4405_v59 = vmul.f32 0.5, %v4369_v26 }
0x1667   :  { %v9563_v16 = vadd.f32 %v4405_v59, %v8176_v30 }
0x1669   :  { %v4449_v6 = vsel %vm465_vm1, %v9563_v16, -inf }
0x166a   :  { %4450 = vmax.xlane.f32.xlu2 %v4449_v6 }
0x166c   :  { %v4372_v5 = vpop.f32.mrf.mxu0 }
0x166d   :  { %v4406_v24 = vmul.f32 0.5, %v4372_v5  ;;  %v10353_v5 = vld [vmem:[#allocation44_spill] sm:$0xff] }
0x166f   :  { %v9570_v52 = vadd.f32 %v4406_v24, %v10348_v48 }
0x1671   :  { %v4452_v23 = vsel %vm465_vm1, %v9570_v52, -inf }
0x1672   :  { %4453 = vmax.xlane.f32.xlu1 %v4452_v23 }
0x1674   :  { %v4375_v30 = vpop.f32.mrf.mxu0 }
0x1675   :  { %v4407_v12 = vmul.f32 0.5, %v4375_v30 }
0x1677   :  { %v9588_v17 = vadd.f32 %v4407_v12, %v10349_v35 }
0x1679   :  { %v4455_v8 = vsel %vm465_vm1, %v9588_v17, -inf }
0x167c   :  { %v4378_v11 = vpop.f32.mrf.mxu0 }
0x167d   :  { %v4408_v20 = vmul.f32 0.5, %v4378_v11 }
0x1684   :  { %v4381_v54 = vpop.f32.mrf.mxu0 }
0x1685   :  { %v4409_v27 = vmul.f32 0.5, %v4381_v54 }
0x168c   :  { %v4384_v37 = vpop.f32.mrf.mxu0 }
0x168d   :  { %v4410_v63 = vmul.f32 0.5, %v4384_v37 }
0x168f   :  { %v9617_v19 = vadd.f32 %v4410_v63, %v10352_v57 }
0x1691   :  { %v4464_v59 = vsel %vm465_vm1, %v9617_v19, -inf }
0x1694   :  { %v4387_v25 = vpop.f32.mrf.mxu0 }
0x1695   :  { %v4411_v7 = vmul.f32 0.5, %v4387_v25 }
0x1697   :  { %v9627_v24 = vadd.f32 %v4411_v7, %v10353_v5 }
0x1699   :  { %v4467_v23 = vsel %vm465_vm1, %v9627_v24, -inf }
0x169c   :  { %v4390_v31 = vpop.f32.mrf.mxu0 }
0x169d   :  { %v4412_v48 = vmul.f32 0.5, %v4390_v31 }
0x16a4   :  { %v4393_v30 = vpop.f32.mrf.mxu0 }
0x16ad   :  { %v4433_v58 = vpop.xlane.xlu2 %4432 }
0x16ae   :  { %v4479_v55 = vsub.f32 %v4415_v9, %v4433_v58  ;;  %v10350_v9 = vld [vmem:[#allocation41_spill] sm:$0xff] }
0x16af   :  { %v9597_v41 = vadd.f32 %v4408_v20, %v10350_v9  ;;  %v10356_v20 = vld [vmem:[#allocation47_spill] sm:$0xff] }
0x16b0   :  { %v4495_v36 = vmul.f32 1.442695, %v4479_v55  ;;  %v10354_v55 = vld [vmem:[#allocation45_spill] sm:$0xff] }
0x16b1   :  { %v4458_v49 = vsel %vm465_vm1, %v9597_v41, -inf }
0x16b2   :  { %7244 = vpow2.f32 %v4495_v36  ;;  %v9637_v36 = vadd.f32 %v4412_v48, %v10354_v55 }
0x16b4   :  { %v4470_v12 = vsel %vm465_vm1, %v9637_v36, -inf }
0x16b5   :  { %v4436_v60 = vpop.xlane.xlu0 %4435 }
0x16b6   :  { %v4480_v10 = vsub.f32 %v4416_v40, %v4436_v60 }
0x16b8   :  { %v9583_v3 = vpop.eup %7244  ;;  %v4497_v1 = vmul.f32 1.442695, %v4480_v10  ;;  %v4413_v10 = vmul.f32 0.5, %v4393_v30 }
0x16b9   :  { %v4527_v46 = vsel %vm465_vm1, %v9583_v3, 0.0 }
0x16ba   :  { %7246 = vpow2.f32 %v4497_v1  ;;  %4528 = vadd.xlane.f32.xlu0 %v4527_v46  ;;  %v10355_v46 = vld [vmem:[#allocation46_spill] sm:$0xff] }
0x16bb   :  { %v9647_v54 = vadd.f32 %v4413_v10, %v10355_v46 }
0x16bd   :  { %v4439_v15 = vpop.xlane.xlu1 %4438 }
0x16be   :  { %v4481_v56 = vsub.f32 %v4417_v38, %v4439_v15  ;;  %v10351_v38 = vld [vmem:[#allocation42_spill] sm:$0xff]  ;;  %v4396_v15 = vpop.f32.mrf.mxu0 }
0x16bf   :  { %v9607_v0 = vadd.f32 %v4409_v27, %v10351_v38 }
0x16c0   :  { %v9590_v51 = vpop.eup %7246  ;;  %v4499_v34 = vmul.f32 1.442695, %v4481_v56 }
0x16c1   :  { %v4530_v2 = vsel %vm465_vm1, %v9590_v51, 0.0  ;;  %v4461_v4 = vsel %vm465_vm1, %v9607_v0, -inf }
0x16c2   :  { %7248 = vpow2.f32 %v4499_v34  ;;  %4531 = vadd.xlane.f32.xlu2 %v4530_v2  ;;  %4456 = vmax.xlane.f32.xlu0 %v4455_v8  ;;  %v4473_v34 = vsel %vm465_vm1, %v9647_v54, -inf  ;;  %v4181_v8 = vpop.f32.mrf.mxu2 }
0x16c5   :  { %v4442_v14 = vpop.xlane.xlu2 %4441 }
0x16c6   :  { %v4482_v21 = vsub.f32 %v9547_v42, %v4442_v14 }
0x16c8   :  { %v9600_v61 = vpop.eup %7248  ;;  %v4501_v40 = vmul.f32 1.442695, %v4482_v21  ;;  %v7031_v21 = vld [vmem:[%s10333_s26 + $0x1] ss:$0 sm:$0xff] }
0x16c9   :  { %v4533_v13 = vsel %vm465_vm1, %v9600_v61, 0.0 }
0x16ca   :  { %7250 = vpow2.f32 %v4501_v40  ;;  %4534 = vadd.xlane.f32.xlu1 %v4533_v13  ;;  %4459 = vmax.xlane.f32.xlu2 %v4458_v49  ;;  %v4184_v9 = vpop.f32.mrf.mxu2 }
0x16cb   :  { %v4185_v49 = vadd.f32 %v7031_v21, %v4184_v9 }
0x16cd   :  { %v4445_v43 = vpop.xlane.xlu0 %4444 }
0x16ce   :  { %v4483_v33 = vsub.f32 %v9552_v29, %v4445_v43  ;;  %v4182_v43 = vadd.f32 %v7031_v21, %v4181_v8 }
0x16d0   :  { %v9610_v44 = vpop.eup %7250  ;;  %v4503_v42 = vmul.f32 1.442695, %v4483_v33 }
0x16d1   :  { %v4536_v18 = vsel %vm465_vm1, %v9610_v44, 0.0 }
0x16d2   :  { %7252 = vpow2.f32 %v4503_v42  ;;  %4537 = vadd.xlane.f32.xlu0 %v4536_v18  ;;  %4462 = vmax.xlane.f32.xlu1 %v4461_v4  ;;  %v4187_v37 = vpop.f32.mrf.mxu2 }
0x16d3   :  { %v4188_v27 = vadd.f32 %v7031_v21, %v4187_v37 }
0x16d5   :  { %v4448_v47 = vpop.xlane.xlu1 %4447 }
0x16d6   :  { %v4484_v29 = vsub.f32 %v9557_v28, %v4448_v47 }
0x16d8   :  { %v9620_v45 = vpop.eup %7252  ;;  %v4505_v53 = vmul.f32 1.442695, %v4484_v29 }
0x16d9   :  { %v4539_v26 = vsel %vm465_vm1, %v9620_v45, 0.0 }
0x16da   :  { %7254 = vpow2.f32 %v4505_v53  ;;  %4540 = vadd.xlane.f32.xlu2 %v4539_v26  ;;  %4465 = vmax.xlane.f32.xlu0 %v4464_v59  ;;  %v4190_v40 = vpop.f32.mrf.mxu2 }
0x16db   :  { %v4191_v13 = vadd.f32 %v7031_v21, %v4190_v40 }
0x16dd   :  { %v4451_v6 = vpop.xlane.xlu2 %4450  ;;  %4667 = vmatpush.msrb.mxu1 %v4191_v13 }
0x16de   :  { %v4485_v28 = vsub.f32 %v9563_v16, %v4451_v6 }
0x16df   :  { %4668 = vmatpush.msrb.mxu1 %v4188_v27 }
0x16e0   :  { %v9630_v39 = vpop.eup %7254  ;;  %v4507_v22 = vmul.f32 1.442695, %v4485_v28 }
0x16e1   :  { %v4542_v50 = vsel %vm465_vm1, %v9630_v39, 0.0  ;;  %4669 = vmatpush.msrb.mxu1 %v4185_v49 }
0x16e2   :  { %7256 = vpow2.f32 %v4507_v22  ;;  %4543 = vadd.xlane.f32.xlu1 %v4542_v50  ;;  %4468 = vmax.xlane.f32.xlu2 %v4467_v23 }
0x16e3   :  { %4670 = vmatpush.msrb.mxu1 %v4182_v43 }
0x16e5   :  { %v4454_v58 = vpop.xlane.xlu1 %4453 }
0x16e6   :  { %v4486_v16 = vsub.f32 %v9570_v52, %v4454_v58  ;;  %v4414_v52 = vmul.f32 0.5, %v4396_v15 }
0x16e8   :  { %v9640_v11 = vpop.eup %7256  ;;  %v4509_v60 = vmul.f32 1.442695, %v4486_v16  ;;  %v9656_v2 = vadd.f32 %v4414_v52, %v10356_v20 }
0x16e9   :  { %v4545_v1 = vsel %vm465_vm1, %v9640_v11, 0.0 }
0x16ea   :  { %7258 = vpow2.f32 %v4509_v60  ;;  %4546 = vadd.xlane.f32.xlu0 %v4545_v1  ;;  %4471 = vmax.xlane.f32.xlu1 %v4470_v12  ;;  %v4476_v14 = vsel %vm465_vm1, %v9656_v2, -inf }
0x16f0   :  { %v9649_v35 = vpop.eup %7258 }
0x16f1   :  { %v4548_v56 = vsel %vm465_vm1, %v9649_v35, 0.0 }
0x16f2   :  { %4549 = vadd.xlane.f32.xlu2 %v4548_v56  ;;  %4474 = vmax.xlane.f32.xlu0 %v4473_v34 }
0x16fa   :  { %4477 = vmax.xlane.f32.xlu2 %v4476_v14 }
0x172d   :  { %v4529_v38 = vpop.xlane.xlu0 %4528 }
0x172e   :  { %7260 = vrcp.f32 %v4529_v38 }
0x1734   :  { %v7261_v33 = vpop.eup %7260 }
0x1735   :  { %v4591_v25 = vmul.f32 %v7261_v33, %v9583_v3  ;;  %v4532_v42 = vpop.xlane.xlu2 %4531  ;;  %v4457_v63 = vpop.xlane.xlu0 %4456 }
0x1736   :  { %7262 = vrcp.f32 %v4532_v42  ;;  %v4487_v18 = vsub.f32 %v9588_v17, %v4457_v63 }
0x1737   :  { %6557 = vmatmul.msk.f32.vlgmr.msrb.gmra.mxu1 %vm465_vm1, %v4591_v25 }
0x1738   :  { %v4511_v4 = vmul.f32 1.442695, %v4487_v18 }
0x173a   :  { %7264 = vpow2.f32 %v4511_v4 }
0x173c   :  { %v7263_v47 = vpop.eup %7262 }
0x173d   :  { %v4535_v57 = vpop.xlane.xlu1 %4534  ;;  %v4460_v29 = vpop.xlane.xlu2 %4459  ;;  %v4592_v53 = vmul.f32 %v7263_v47, %v9590_v51 }
0x173e   :  { %7266 = vrcp.f32 %v4535_v57  ;;  %v4488_v7 = vsub.f32 %v9597_v41, %v4460_v29 }
0x173f   :  { %6558 = vmatmul.msk.f32.gmra.mxu1 %vm465_vm1, %v4592_v53 }
0x1740   :  { %v9667_v3 = vpop.eup %7264  ;;  %v4513_v26 = vmul.f32 1.442695, %v4488_v7 }
0x1741   :  { %v4551_v17 = vsel %vm465_vm1, %v9667_v3, 0.0 }
0x1742   :  { %7268 = vpow2.f32 %v4513_v26  ;;  %4552 = vadd.xlane.f32.xlu1 %v4551_v17 }
0x1744   :  { %v7267_v59 = vpop.eup %7266 }
0x1745   :  { %v4538_v31 = vpop.xlane.xlu0 %4537  ;;  %v4463_v6 = vpop.xlane.xlu1 %4462  ;;  %v4593_v5 = vmul.f32 %v7267_v59, %v9600_v61 }
0x1746   :  { %7270 = vrcp.f32 %v4538_v31  ;;  %v4489_v51 = vsub.f32 %v9607_v0, %v4463_v6 }
0x1747   :  { %6559 = vmatmul.msk.f32.gmra.mxu1 %vm465_vm1, %v4593_v5 }
0x1748   :  { %v9674_v41 = vpop.eup %7268  ;;  %v4515_v28 = vmul.f32 1.442695, %v4489_v51 }
0x1749   :  { %v4554_v22 = vsel %vm465_vm1, %v9674_v41, 0.0 }
0x174a   :  { %7272 = vpow2.f32 %v4515_v28  ;;  %4555 = vadd.xlane.f32.xlu0 %v4554_v22 }
0x174c   :  { %v7271_v48 = vpop.eup %7270 }
0x174d   :  { %v4541_v50 = vpop.xlane.xlu2 %4540  ;;  %v4466_v23 = vpop.xlane.xlu0 %4465  ;;  %v4594_v30 = vmul.f32 %v7271_v48, %v9610_v44 }
0x174e   :  { %7274 = vrcp.f32 %v4541_v50  ;;  %v4490_v61 = vsub.f32 %v9617_v19, %v4466_v23 }
0x174f   :  { %6560 = vmatmul.msk.f32.gmra.mxu1 %vm465_vm1, %v4594_v30 }
0x1750   :  { %v9681_v0 = vpop.eup %7272  ;;  %v4517_v58 = vmul.f32 1.442695, %v4490_v61 }
0x1751   :  { %v4557_v55 = vsel %vm465_vm1, %v9681_v0, 0.0 }
0x1752   :  { %7276 = vpow2.f32 %v4517_v58  ;;  %4558 = vadd.xlane.f32.xlu1 %v4557_v55 }
0x1754   :  { %v7275_v16 = vpop.eup %7274 }
0x1755   :  { %v4544_v60 = vpop.xlane.xlu1 %4543  ;;  %v4469_v10 = vpop.xlane.xlu2 %4468  ;;  %v4595_v1 = vmul.f32 %v7275_v16, %v9620_v45 }
0x1756   :  { %7278 = vrcp.f32 %v4544_v60  ;;  %v4491_v44 = vsub.f32 %v9627_v24, %v4469_v10 }
0x1757   :  { %6561 = vmatmul.msk.f32.gmra.mxu1 %vm465_vm1, %v4595_v1 }
0x1758   :  { %v7277_v19 = vpop.eup %7276  ;;  %v4519_v12 = vmul.f32 1.442695, %v4491_v44 }
0x1759   :  { %v4560_v46 = vsel %vm465_vm1, %v7277_v19, 0.0 }
0x175a   :  { %7280 = vpow2.f32 %v4519_v12  ;;  %4561 = vadd.xlane.f32.xlu2 %v4560_v46 }
0x175c   :  { %v7279_v15 = vpop.eup %7278 }
0x175d   :  { %v4547_v52 = vpop.xlane.xlu0 %4546  ;;  %v4472_v56 = vpop.xlane.xlu1 %4471  ;;  %v4596_v34 = vmul.f32 %v7279_v15, %v9630_v39 }
0x175e   :  { %7282 = vrcp.f32 %v4547_v52  ;;  %v4492_v20 = vsub.f32 %v9637_v36, %v4472_v56 }
0x175f   :  { %6562 = vmatmul.msk.f32.gmra.mxu1 %vm465_vm1, %v4596_v34  ;;  %v7396_v34 = vld [vmem:[%s10305_s14 + $0x78] sm:$0xff] }
0x1760   :  { %v7281_v45 = vpop.eup %7280  ;;  %v4521_v24 = vmul.f32 1.442695, %v4492_v20 }
0x1761   :  { %v4563_v8 = vsel %vm465_vm1, %v7281_v45, 0.0 }
0x1762   :  { %7284 = vpow2.f32 %v4521_v24  ;;  %4564 = vadd.xlane.f32.xlu0 %v4563_v8  ;;  %v7398_v8 = vld [vmem:[%s10305_s14 + $0x68] sm:$0xff] }
0x1764   :  { %v7283_v14 = vpop.eup %7282 }
0x1765   :  { %v4550_v9 = vpop.xlane.xlu2 %4549  ;;  %v4475_v37 = vpop.xlane.xlu0 %4474  ;;  %v4597_v21 = vmul.f32 %v7283_v14, %v9640_v11 }
0x1766   :  { %7286 = vrcp.f32 %v4550_v9  ;;  %v4493_v40 = vsub.f32 %v9647_v54, %v4475_v37  ;;  %v7399_v9 = vld [vmem:[%s10305_s14 + $0x60] sm:$0xff] }
0x1767   :  { %6563 = vmatmul.msk.f32.gmra.mxu1 %vm465_vm1, %v4597_v21  ;;  %v7400_v21 = vld [vmem:[%s10305_s14 + $0x58] sm:$0xff] }
0x1768   :  { %v7285_v39 = vpop.eup %7284  ;;  %v4523_v36 = vmul.f32 1.442695, %v4493_v40 }
0x1769   :  { %v4566_v27 = vsel %vm465_vm1, %v7285_v39, 0.0 }
0x176a   :  { %7288 = vpow2.f32 %v4523_v36  ;;  %4567 = vadd.xlane.f32.xlu1 %v4566_v27  ;;  %v7402_v27 = vld [vmem:[%s10305_s14 + $0x48] sm:$0xff] }
0x176c   :  { %v7287_v13 = vpop.eup %7286 }
0x176d   :  { %v4478_v49 = vpop.xlane.xlu2 %4477  ;;  %v4598_v43 = vmul.f32 %v7287_v13, %v9649_v35 }
0x176e   :  { %v4494_v38 = vsub.f32 %v9656_v2, %v4478_v49  ;;  %v7403_v49 = vld [vmem:[%s10305_s14 + $0x40] sm:$0xff] }
0x176f   :  { %6564 = vmatmul.msk.f32.gmra.mxu1 %vm465_vm1, %v4598_v43 }
0x1770   :  { %v7289_v11 = vpop.eup %7288  ;;  %v4525_v33 = vmul.f32 1.442695, %v4494_v38  ;;  %v7404_v38 = vld [vmem:[%s10305_s14 + $0x38] sm:$0xff] }
0x1771   :  { %v4569_v54 = vsel %vm465_vm1, %v7289_v11, 0.0 }
0x1772   :  { %7290 = vpow2.f32 %v4525_v33  ;;  %4570 = vadd.xlane.f32.xlu2 %v4569_v54  ;;  %v7405_v33 = vld [vmem:[%s10305_s14 + $0x30] sm:$0xff] }
0x1778   :  { %v7291_v25 = vpop.eup %7290 }
0x1779   :  { %v4572_v42 = vsel %vm465_vm1, %v7291_v25, 0.0 }
0x177a   :  { %4573 = vadd.xlane.f32.xlu0 %v4572_v42 }
0x17b4   :  { %v9711_v50 = vpop.f32.mrf.mxu1 }
0x17b5   :  { %v4553_v63 = vpop.xlane.xlu1 %4552 }
0x17b6   :  { %7292 = vrcp.f32 %v4553_v63  ;;  %v7407_v63 = vld [vmem:[%s10305_s14 + $0x20] sm:$0xff] }
0x17bc   :  { %v7293_v18 = vpop.eup %7292  ;;  %v4675_v61 = vpop.f32.mrf.mxu1 }
0x17bd   :  { %v4556_v4 = vpop.xlane.xlu0 %4555  ;;  %v4599_v35 = vmul.f32 %v7293_v18, %v9667_v3 }
0x17be   :  { %7294 = vrcp.f32 %v4556_v4  ;;  %v7408_v4 = vld [vmem:[%s10305_s14 + $0x18] sm:$0xff] }
0x17bf   :  { %6565 = vmatmul.msk.f32.gmra.mxu1 %vm465_vm1, %v4599_v35 }
0x17c4   :  { %v7295_v2 = vpop.eup %7294 }
0x17c5   :  { %v4559_v47 = vpop.xlane.xlu1 %4558  ;;  %v4600_v57 = vmul.f32 %v7295_v2, %v9674_v41  ;;  %v7409_v2 = vld [vmem:[%s10305_s14 + $0x10] sm:$0xff] }
0x17c6   :  { %7296 = vrcp.f32 %v4559_v47 }
0x17c7   :  { %6566 = vmatmul.msk.f32.gmra.mxu1 %vm465_vm1, %v4600_v57  ;;  %v7410_v57 = vld [vmem:[%s10305_s14 + $0x8] sm:$0xff] }
0x17cc   :  { %v7297_v29 = vpop.eup %7296 }
0x17cd   :  { %v4562_v53 = vpop.xlane.xlu2 %4561  ;;  %v4601_v7 = vmul.f32 %v7297_v29, %v9681_v0  ;;  %v4678_v0 = vpop.f32.mrf.mxu1  ;;  %v4721_v29 = vmul.f32 %v7410_v57, %v4675_v61  ;;  %v6607_v57 = vld [vmem:[%s10336_s2 + $0x2d8] sm:$0xff] }
0x17ce   :  { %7298 = vrcp.f32 %v4562_v53  ;;  %v4722_v47 = vmul.f32 %v7409_v2, %v4678_v0  ;;  %v7411_v53 = vld [vmem:[%s10305_s14] sm:$0xff] }
0x17cf   :  { %6567 = vmatmul.msk.f32.gmra.mxu1 %vm465_vm1, %v4601_v7  ;;  %v4720_v7 = vmul.f32 %v7411_v53, %v9711_v50  ;;  %v6581_v53 = vld [vmem:[%s10336_s2 + $0x208] sm:$0xff] }
0x17d4   :  { %v7299_v26 = vpop.eup %7298 }
0x17d5   :  { %v4565_v17 = vpop.xlane.xlu0 %4564  ;;  %v4602_v3 = vmul.f32 %v7299_v26, %v7277_v19  ;;  %v4681_v58 = vpop.f32.mrf.mxu1  ;;  %v6576_v26 = vld [vmem:[%s10334_s28 + $0x38] sm:$0xff] }
0x17d6   :  { %7300 = vrcp.f32 %v4565_v17  ;;  %v4723_v35 = vmul.f32 %v7408_v4, %v4681_v58  ;;  %v7412_v17 = vld [vmem:[%s10310_s19] sm:$0xff] }
0x17d7   :  { %6568 = vmatmul.msk.f32.gmra.mxu1 %vm465_vm1, %v4602_v3  ;;  %v6575_v3 = vld [vmem:[%s10334_s28 + $0x30] sm:$0xff]  ;;  %v6624_v4 = vld [vmem:[%s10336_s2 + $0x360] sm:$0xff] }
0x17dc   :  { %v7301_v59 = vpop.eup %7300 }
0x17dd   :  { %v4568_v31 = vpop.xlane.xlu1 %4567  ;;  %v4603_v6 = vmul.f32 %v7301_v59, %v7281_v45  ;;  %v4684_v55 = vpop.f32.mrf.mxu1  ;;  %v7397_v45 = vld [vmem:[%s10305_s14 + $0x70] sm:$0xff]  ;;  %v6574_v59 = vld [vmem:[%s10334_s28 + $0x28] sm:$0xff] }
0x17de   :  { %7302 = vrcp.f32 %v4568_v31  ;;  %v4724_v18 = vmul.f32 %v7407_v63, %v4684_v55  ;;  %v7413_v31 = vld [vmem:[%s10310_s19 + $0x8] sm:$0xff]  ;;  %v6622_v63 = vld [vmem:[%s10336_s2 + $0x350] sm:$0xff] }
0x17df   :  { %6569 = vmatmul.msk.f32.gmra.mxu1 %vm465_vm1, %v4603_v6  ;;  %v6573_v6 = vld [vmem:[%s10334_s28 + $0x20] sm:$0xff] }
0x17e4   :  { %v7303_v5 = vpop.eup %7302 }
0x17e5   :  { %v4571_v51 = vpop.xlane.xlu2 %4570  ;;  %v4604_v41 = vmul.f32 %v7303_v5, %v7285_v39  ;;  %v4687_v16 = vpop.f32.mrf.mxu1  ;;  %v7401_v39 = vld [vmem:[%s10305_s14 + $0x50] sm:$0xff] }
0x17e6   :  { %7304 = vrcp.f32 %v4571_v51 }
0x17e7   :  { %6570 = vmatmul.msk.f32.gmra.mxu1 %vm465_vm1, %v4604_v41  ;;  %v7032_v41 = vld [vmem:[%s10335_s1 + $0x1] ss:$0 sm:$0xff] }
0x17ec   :  { %v7305_v28 = vpop.eup %7304 }
0x17ed   :  { %v4574_v22 = vpop.xlane.xlu0 %4573  ;;  %v4605_v48 = vmul.f32 %v7305_v28, %v7289_v11  ;;  %v4690_v60 = vpop.f32.mrf.mxu1 }
0x17ee   :  { %7306 = vrcp.f32 %v4574_v22  ;;  %v4726_v54 = vmul.f32 %v7405_v33, %v4690_v60  ;;  %v6628_v60 = vld [vmem:[%s10336_s2 + $0x380] sm:$0xff] }
0x17ef   :  { %6571 = vmatmul.msk.f32.gmra.mxu1 %vm465_vm1, %v4605_v48 }
0x17f4   :  { %v7307_v23 = vpop.eup %7306 }
0x17f5   :  { %v4606_v30 = vmul.f32 %v7307_v23, %v7291_v25  ;;  %v4693_v10 = vpop.f32.mrf.mxu1  ;;  %v7406_v25 = vld [vmem:[%s10305_s14 + $0x28] sm:$0xff] }
0x17f6   :  { %v4727_v11 = vmul.f32 %v7404_v38, %v4693_v10  ;;  %v4725_v42 = vmul.f32 %v7406_v25, %v4687_v16  ;;  %v6634_v10 = vld [vmem:[%s10336_s2 + $0x3b0] sm:$0xff]  ;;  %v6640_v25 = vld [vmem:[%s10336_s2 + $0x3e0] sm:$0xff] }
0x17f7   :  { %6572 = vmatmul.msk.f32.gmra.mxu1 %vm465_vm1, %v4606_v30  ;;  %5112 = vmatpush.msrb.mxu3 %v6634_v10  ;;  %v6638_v38 = vld [vmem:[%s10336_s2 + $0x3d0] sm:$0xff] }
0x183c   :  { %v4696_v1 = vpop.f32.mrf.mxu1 }
0x183d   :  { %v4728_v43 = vmul.f32 %v7403_v49, %v4696_v1  ;;  %v6635_v1 = vld [vmem:[%s10336_s2 + $0x3b8] sm:$0xff] }
0x183e   :  { %5135 = vmatpush.msrb.mxu0 %v6635_v1 }
0x1844   :  { %v4699_v44 = vpop.f32.mrf.mxu1 }
0x1845   :  { %v4729_v13 = vmul.f32 %v7402_v27, %v4699_v44  ;;  %v6612_v44 = vld [vmem:[%s10336_s2 + $0x300] sm:$0xff] }
0x184c   :  { %v4702_v19 = vpop.f32.mrf.mxu1 }
0x184d   :  { %v4730_v36 = vmul.f32 %v7401_v39, %v4702_v19  ;;  %v6618_v19 = vld [vmem:[%s10336_s2 + $0x330] sm:$0xff] }
0x184e   :  { %5113 = vmatpush.msrb.mxu3 %v6618_v19  ;;  %v6642_v19 = vld [vmem:[%s10336_s2 + $0x3f0] sm:$0xff] }
0x1854   :  { %v4705_v12 = vpop.f32.mrf.mxu1 }
0x1855   :  { %v4731_v40 = vmul.f32 %v7400_v21, %v4705_v12  ;;  %v6619_v12 = vld [vmem:[%s10336_s2 + $0x338] sm:$0xff] }
0x1856   :  { %5136 = vmatpush.msrb.mxu0 %v6619_v12 }
0x185c   :  { %v4708_v46 = vpop.f32.mrf.mxu1 }
0x185d   :  { %v4732_v37 = vmul.f32 %v7399_v9, %v4708_v46  ;;  %v6620_v46 = vld [vmem:[%s10336_s2 + $0x340] sm:$0xff] }
0x185e   :  { %v6588_v9 = vld [vmem:[%s10336_s2 + $0x240] sm:$0xff] }
0x1864   :  { %v4711_v15 = vpop.f32.mrf.mxu1 }
0x1865   :  { %v4733_v14 = vmul.f32 %v7398_v8, %v4711_v15  ;;  %v6596_v15 = vld [vmem:[%s10336_s2 + $0x280] sm:$0xff]  ;;  %v6587_v8 = vld [vmem:[%s10336_s2 + $0x238] sm:$0xff] }
0x186c   :  { %v4714_v52 = vpop.f32.mrf.mxu1 }
0x186d   :  { %v4734_v24 = vmul.f32 %v7397_v45, %v4714_v52  ;;  %v6602_v52 = vld [vmem:[%s10336_s2 + $0x2b0] sm:$0xff]  ;;  %v6580_v45 = vld [vmem:[%s10336_s2 + $0x200] sm:$0xff] }
0x186e   :  { %5114 = vmatpush.msrb.mxu3 %v6602_v52  ;;  %v6614_v52 = vld [vmem:[%s10336_s2 + $0x310] sm:$0xff] }
0x1874   :  { %v4717_v56 = vpop.f32.mrf.mxu1 }
0x1875   :  { %v4735_v20 = vmul.f32 %v7396_v34, %v4717_v56  ;;  %v6603_v56 = vld [vmem:[%s10336_s2 + $0x2b8] sm:$0xff]  ;;  %v6604_v34 = vld [vmem:[%s10336_s2 + $0x2c0] sm:$0xff] }
0x1876   :  { %5137 = vmatpush.msrb.mxu0 %v6603_v56  ;;  %v6626_v56 = vld [vmem:[%s10336_s2 + $0x370] sm:$0xff] }
0x1877   :  { %4736 = vmatpush.msra.mxu2 %v4735_v20 }
0x1878   :  { %5138 = vmatpush.msrb.mxu0 %v6587_v8  ;;  %v6611_v8 = vld [vmem:[%s10336_s2 + $0x2f8] sm:$0xff] }
0x1879   :  { %4737 = vmatpush.msra.mxu2 %v4734_v24  ;;  %v6586_v24 = vld [vmem:[%s10336_s2 + $0x230] sm:$0xff] }
0x187a   :  { %5115 = vmatpush.msrb.mxu3 %v6586_v24 }
0x187b   :  { %4738 = vmatpush.msra.mxu2 %v4733_v14 }
0x187c   :  { %5204 = vmatpush.msra.mxu3 %v6638_v38  ;;  %v6584_v38 = vld [vmem:[%s10336_s2 + $0x220] sm:$0xff] }
0x187d   :  { %4739 = vmatpush.msra.mxu2 %v4732_v37 }
0x187e   :  { %5205 = vmatpush.msra.mxu3 %v6622_v63  ;;  %v6621_v63 = vld [vmem:[%s10336_s2 + $0x348] sm:$0xff] }
0x187f   :  { %4740 = vmatpush.msra.mxu2 %v4731_v40 }
0x1881   :  { %4741 = vmatpush.msra.mxu2 %v4730_v36 }
0x1883   :  { %4742 = vmatpush.msra.mxu2 %v4729_v13 }
0x1885   :  { %4743 = vmatpush.msra.mxu2 %v4728_v43  ;;  %v6629_v43 = vld [vmem:[%s10336_s2 + $0x388] sm:$0xff] }
0x1887   :  { %4744 = vmatpush.msra.mxu2 %v4727_v11  ;;  %v6639_v11 = vld [vmem:[%s10336_s2 + $0x3d8] sm:$0xff] }
0x1888   :  { %5227 = vmatpush.msra.mxu0 %v6639_v11  ;;  %v6633_v11 = vld [vmem:[%s10336_s2 + $0x3a8] sm:$0xff] }
0x1889   :  { %4745 = vmatpush.msra.mxu2 %v4726_v54 }
0x188b   :  { %4746 = vmatpush.msra.mxu2 %v4725_v42  ;;  %v6613_v42 = vld [vmem:[%s10336_s2 + $0x308] sm:$0xff] }
0x188d   :  { %4747 = vmatpush.msra.mxu2 %v4724_v18  ;;  %v6623_v18 = vld [vmem:[%s10336_s2 + $0x358] sm:$0xff] }
0x188e   :  { %5228 = vmatpush.msra.mxu0 %v6623_v18  ;;  %v6605_v18 = vld [vmem:[%s10336_s2 + $0x2c8] sm:$0xff] }
0x188f   :  { %4748 = vmatpush.msra.mxu2 %v4723_v35  ;;  %v6597_v35 = vld [vmem:[%s10336_s2 + $0x288] sm:$0xff] }
0x1890   :  { %5229 = vmatpush.msra.mxu0 %v6607_v57  ;;  %v6724_v57 = vld [vmem:[%s10337_s7 + $0x970] sm:$0xff] }
0x1891   :  { %4749 = vmatpush.msra.mxu2 %v4722_v47  ;;  %v6606_v47 = vld [vmem:[%s10336_s2 + $0x2d0] sm:$0xff] }
0x1892   :  { %5206 = vmatpush.msra.mxu3 %v6606_v47  ;;  %v6692_v47 = vld [vmem:[%s10337_s7 + $0x870] sm:$0xff] }
0x1893   :  { %4750 = vmatpush.msra.mxu2 %v4721_v29  ;;  %v6608_v29 = vld [vmem:[%s10336_s2 + $0x2e0] sm:$0xff] }
0x1895   :  { %4751 = vmatpush.msra.mxu2 %v4720_v7  ;;  %v6590_v7 = vld [vmem:[%s10336_s2 + $0x250] sm:$0xff] }
0x1896   :  { %4752 = vmatmul.f32.vlgmr.msra.gmra.mxu2 %v7412_v17  ;;  %5207 = vmatpush.msra.mxu3 %v6590_v7  ;;  %v6690_v7 = vld [vmem:[%s10337_s7 + $0x860] sm:$0xff] }
0x1897   :  { %4787 = vmatpush.msrb.mxu2 %v6576_v26 }
0x1899   :  { %4788 = vmatpush.msrb.mxu2 %v6575_v3  ;;  %v6591_v3 = vld [vmem:[%s10336_s2 + $0x258] sm:$0xff] }
0x189a   :  { %5230 = vmatpush.msra.mxu0 %v6591_v3  ;;  %v6722_v3 = vld [vmem:[%s10337_s7 + $0x960] sm:$0xff] }
0x189b   :  { %4789 = vmatpush.msrb.mxu2 %v6574_v59  ;;  %v6592_v59 = vld [vmem:[%s10336_s2 + $0x260] sm:$0xff] }
0x189d   :  { %4790 = vmatpush.msrb.mxu2 %v6573_v6 }
0x189e   :  { %4755 = vmatmul.f32.gmra.mxu2 %v7413_v31 }
0x189f   :  { %4974 = vmatpush.msra.mxu2 %v6628_v60 }
0x18a1   :  { %4975 = vmatpush.msra.mxu2 %v6612_v44  ;;  %v6630_v44 = vld [vmem:[%s10336_s2 + $0x390] sm:$0xff] }
0x18a3   :  { %4976 = vmatpush.msra.mxu2 %v6596_v15 }
0x18a5   :  { %4977 = vmatpush.msra.mxu2 %v6580_v45  ;;  %v6610_v45 = vld [vmem:[%s10336_s2 + $0x2f0] sm:$0xff] }
0x1919   :  { %v4753_v5 = vpop.f32.mrf.mxu2 }
0x191a   :  { %6578 = vmatmul.msk.f32.vlgmr.msrb.gmra.mxu2 %vm465_vm1, %v4753_v5 }
0x191b   :  { %4997 = vmatpush.msrb.mxu2 %v6629_v43  ;;  %v6600_v43 = vld [vmem:[%s10336_s2 + $0x2a0] sm:$0xff] }
0x191d   :  { %4998 = vmatpush.msrb.mxu2 %v6613_v42  ;;  %v6637_v42 = vld [vmem:[%s10336_s2 + $0x3c8] sm:$0xff] }
0x191f   :  { %4999 = vmatpush.msrb.mxu2 %v6597_v35  ;;  %v6693_v35 = vld [vmem:[%s10337_s7 + $0x878] sm:$0xff] }
0x1921   :  { %v4756_v51 = vpop.f32.mrf.mxu2  ;;  %5000 = vmatpush.msrb.mxu2 %v6581_v53  ;;  %v6723_v53 = vld [vmem:[%s10337_s7 + $0x968] sm:$0xff] }
0x1922   :  { %6579 = vmatmul.msk.f32.gmra.mxu2 %vm465_vm1, %v4756_v51 }
0x199d   :  { %v4792_v28 = vpop.f32.mrf.mxu2 }
0x199e   :  { %v4793_v22 = vadd.f32 %v7032_v41, %v4792_v28 }
0x19a0   :  { %v9742_v48 = vadd.f32 %v4793_v22, %v9441_v62 }
0x19a2   :  { %v4802_v50 = vsel %vm465_vm1, %v9742_v48, 0.0  ;;  %v4800_v23 = vmul.f32 %v9742_v48, %v9742_v48 }
0x19a3   :  { %4803 = vadd.xlane.f32.xlu1 %v4802_v50 }
0x19a4   :  { %v4808_v30 = vsel %vm465_vm1, %v4800_v23, 0.0  ;;  %v7414_v23 = vld [vmem:[%s10328_s15 + $0x4] sm:$0x7] }
0x19a5   :  { %v4795_v61 = vpop.f32.mrf.mxu2  ;;  %4809 = vadd.xlane.f32.xlu2 %v4808_v30  ;;  %v4848_v30 = vperm.slane %v7414_v23, 1  ;;  %v6718_v23 = vld [vmem:[%s10337_s7 + $0x940] sm:$0xff] }
0x19a6   :  { %v4796_v0 = vadd.f32 %v7032_v41, %v4795_v61 }
0x19a8   :  { %v9750_v58 = vadd.f32 %v4796_v0, %v9446_v32  ;;  %v6636_v32 = vld [vmem:[%s10336_s2 + $0x3c0] sm:$0xff] }
0x19a9   :  { %5158 = vmatpush.msra.mxu1 %v6636_v32 }
0x19aa   :  { %v4805_v62 = vsel %vm465_vm1, %v9750_v58, 0.0  ;;  %v4801_v55 = vmul.f32 %v9750_v58, %v9750_v58 }
0x19ab   :  { %4806 = vadd.xlane.f32.xlu0 %v4805_v62  ;;  %5159 = vmatpush.msra.mxu1 %v6620_v46  ;;  %v7415_v62 = vld [vmem:[%s10329_s16 + $0x4] sm:$0x7]  ;;  %v6643_v46 = vld [vmem:[%s10336_s2 + $0x3f8] sm:$0xff] }
0x19ac   :  { %v4811_v16 = vsel %vm465_vm1, %v4801_v55, 0.0  ;;  %v4851_v55 = vperm.slane %v7415_v62, 1  ;;  %v6684_v62 = vld [vmem:[%s10337_s7 + $0x830] sm:$0xff] }
0x19ad   :  { %4812 = vadd.xlane.f32.xlu1 %v4811_v16  ;;  %5160 = vmatpush.msra.mxu1 %v6604_v34  ;;  %v6627_v34 = vld [vmem:[%s10336_s2 + $0x378] sm:$0xff] }
0x19af   :  { %5161 = vmatpush.msra.mxu1 %v6588_v9  ;;  %v6582_v9 = vld [vmem:[%s10336_s2 + $0x210] sm:$0xff] }
0x19b1   :  { %5250 = vmatpush.msrb.mxu1 %v6640_v25  ;;  %v6585_v25 = vld [vmem:[%s10336_s2 + $0x228] sm:$0xff] }
0x19b3   :  { %5251 = vmatpush.msrb.mxu1 %v6624_v4  ;;  %v6589_v4 = vld [vmem:[%s10336_s2 + $0x248] sm:$0xff] }
0x19b5   :  { %5252 = vmatpush.msrb.mxu1 %v6608_v29  ;;  %v6691_v29 = vld [vmem:[%s10337_s7 + $0x868] sm:$0xff] }
0x19b7   :  { %5253 = vmatpush.msrb.mxu1 %v6592_v59  ;;  %v6689_v59 = vld [vmem:[%s10337_s7 + $0x858] sm:$0xff] }
0x1a16   :  { %v4804_v20 = vpop.xlane.xlu1 %4803 }
0x1a17   :  { %v9772_v14 = vmul.f32 0.03125, %v4804_v20  ;;  %v6598_v20 = vld [vmem:[%s10336_s2 + $0x290] sm:$0xff] }
0x1a18   :  { %v4810_v37 = vpop.xlane.xlu2 %4809 }
0x1a19   :  { %v4818_v21 = vmul.f32 %v9772_v14, %v9772_v14  ;;  %v4816_v40 = vmul.f32 0.03125, %v4810_v37  ;;  %v4822_v50 = vsub.f32 %v9742_v48, %v9772_v14  ;;  %v6594_v37 = vld [vmem:[%s10336_s2 + $0x270] sm:$0xff] }
0x1a1b   :  { %v4820_v39 = vsub.f32 %v4816_v40, %v4818_v21  ;;  %v6595_v21 = vld [vmem:[%s10336_s2 + $0x278] sm:$0xff] }
0x1a1c   :  { %v6631_v40 = vld [vmem:[%s10336_s2 + $0x398] sm:$0xff] }
0x1a1d   :  { %v4824_v36 = vadd.f32 1e-05, %v4820_v39  ;;  %v6615_v39 = vld [vmem:[%s10336_s2 + $0x318] sm:$0xff] }
0x1a1e   :  { %v4807_v27 = vpop.xlane.xlu0 %4806 }
0x1a1f   :  { %7308 = vrsqrt.f32 %v4824_v36  ;;  %v9777_v13 = vmul.f32 0.03125, %v4807_v27  ;;  %vm4832_vm12 = vweird.f32 %v4824_v36  ;;  %v6583_v27 = vld [vmem:[%s10336_s2 + $0x218] sm:$0xff] }
0x1a20   :  { %v4813_v49 = vpop.xlane.xlu1 %4812 }
0x1a21   :  { %v4819_v33 = vmul.f32 %v9777_v13, %v9777_v13  ;;  %v4817_v54 = vmul.f32 0.03125, %v4813_v49  ;;  %v4823_v12 = vsub.f32 %v9750_v58, %v9777_v13  ;;  %v6632_v13 = vld [vmem:[%s10336_s2 + $0x3a0] sm:$0xff] }
0x1a22   :  { %v6616_v49 = vld [vmem:[%s10336_s2 + $0x320] sm:$0xff] }
0x1a23   :  { %v4821_v2 = vsub.f32 %v4817_v54, %v4819_v33  ;;  %v6617_v33 = vld [vmem:[%s10336_s2 + $0x328] sm:$0xff] }
0x1a24   :  { %v6601_v54 = vld [vmem:[%s10336_s2 + $0x2a8] sm:$0xff] }
0x1a25   :  { %v7309_v26 = vpop.eup %7308  ;;  %v4825_v17 = vadd.f32 1e-05, %v4821_v2  ;;  %v6725_v2 = vld [vmem:[%s10337_s7 + $0x978] sm:$0xff] }
0x1a26   :  { %v4827_v31 = vmul.f32 %v7309_v26, %v4824_v36  ;;  %vm4833_vm0 = vweird.f32 %v7309_v26  ;;  %v6599_v36 = vld [vmem:[%s10336_s2 + $0x298] sm:$0xff] }
0x1a27   :  { %7310 = vrsqrt.f32 %v4825_v17  ;;  %vm4834_vm13 = vmor %vm4832_vm12, %vm4833_vm0  ;;  %vm4842_vm15 = vweird.f32 %v4825_v17 }
0x1a28   :  { %v4828_v6 = vmul.f32 %v7309_v26, %v4827_v31  ;;  %v6721_v31 = vld [vmem:[%s10337_s7 + $0x958] sm:$0xff] }
0x1a2a   :  { %v4829_v5 = vmul.f32 0.5, %v4828_v6  ;;  %v6688_v6 = vld [vmem:[%s10337_s7 + $0x850] sm:$0xff] }
0x1a2c   :  { %v4830_v51 = vsub.f32 1.5, %v4829_v5  ;;  %v6609_v5 = vld [vmem:[%s10336_s2 + $0x2e8] sm:$0xff] }
0x1a2d   :  { %v7311_v41 = vpop.eup %7310 }
0x1a2e   :  { %v4831_v28 = vmul.f32 %v7309_v26, %v4830_v51  ;;  %v4837_v22 = vmul.f32 %v7311_v41, %v4825_v17  ;;  %vm4843_vm14 = vweird.f32 %v7311_v41  ;;  %v6625_v17 = vld [vmem:[%s10336_s2 + $0x368] sm:$0xff]  ;;  %v6720_v51 = vld [vmem:[%s10337_s7 + $0x950] sm:$0xff] }
0x1a2f   :  { %vm4844_vm2 = vmor %vm4842_vm15, %vm4843_vm14 }
0x1a30   :  { %v4835_v61 = vsel %vm4834_vm13, %v7309_v26, %v4831_v28  ;;  %v4838_v0 = vmul.f32 %v7311_v41, %v4837_v22  ;;  %v6641_v26 = vld [vmem:[%s10336_s2 + $0x3e8] sm:$0xff] }
0x1a31   :  { %v4846_v16 = vmul.f32 %v4835_v61, %v4822_v50  ;;  %v6593_v28 = vld [vmem:[%s10336_s2 + $0x268] sm:$0xff]  ;;  %v6686_v50 = vld [vmem:[%s10337_s7 + $0x840] sm:$0xff]  ;;  %v6717_v61 = vld [vmem:[%s10337_s7 + $0x938] sm:$0xff] }
0x1a32   :  { %v4839_v60 = vmul.f32 0.5, %v4838_v0  ;;  %v6719_v22 = vld [vmem:[%s10337_s7 + $0x948] sm:$0xff]  ;;  %v6741_v0 = vld [vmem:[%s10337_s7 + $0x9f8] sm:$0xff] }
0x1a33   :  { %v4849_v10 = vmul.f32 %v4848_v30, %v4846_v16  ;;  %v6740_v16 = vld [vmem:[%s10337_s7 + $0x9f0] sm:$0xff] }
0x1a34   :  { %v4840_v1 = vsub.f32 1.5, %v4839_v60  ;;  %v6683_v60 = vld [vmem:[%s10337_s7 + $0x828] sm:$0xff] }
0x1a35   :  { %v9801_v32 = vadd.f32 %v4851_v55, %v4849_v10  ;;  %v6709_v10 = vld [vmem:[%s10337_s7 + $0x8f8] sm:$0xff] }
0x1a36   :  { %v4841_v48 = vmul.f32 %v7311_v41, %v4840_v1  ;;  %v6715_v1 = vld [vmem:[%s10337_s7 + $0x928] sm:$0xff] }
0x1a37   :  { %6646 = vmatmul.msk.f32.vlgmr.msra.gmra.mxu2 %vm465_vm1, %v9801_v32  ;;  %6658 = vmatmul.msk.f32.vlgmr.msrb.gmra.mxu3 %vm465_vm1, %v9801_v32 }
0x1a38   :  { %v4845_v15 = vsel %vm4844_vm2, %v7311_v41, %v4841_v48  ;;  %6660 = vmatmul.msk.f32.vlgmr.msrb.gmra.mxu0 %vm465_vm1, %v9801_v32  ;;  %6662 = vmatmul.msk.f32.vlgmr.msra.gmra.mxu1 %vm465_vm1, %v9801_v32  ;;  %v6687_v41 = vld [vmem:[%s10337_s7 + $0x848] sm:$0xff] }
0x1a39   :  { %v4847_v58 = vmul.f32 %v4845_v15, %v4823_v12  ;;  %5020 = vmatpush.msra.mxu2 %v6630_v44  ;;  %5296 = vmatpush.msrb.mxu3 %v6642_v19  ;;  %v6739_v48 = vld [vmem:[%s10337_s7 + $0x9e8] sm:$0xff]  ;;  %v6682_v44 = vld [vmem:[%s10337_s7 + $0x820] sm:$0xff]  ;;  %v6708_v19 = vld [vmem:[%s10337_s7 + $0x8f0] sm:$0xff] }
0x1a3a   :  { %5319 = vmatpush.msrb.mxu0 %v6643_v46  ;;  %5624 = vmatpush.msra.mxu1 %v6693_v35  ;;  %v6714_v12 = vld [vmem:[%s10337_s7 + $0x920] sm:$0xff]  ;;  %v6681_v15 = vld [vmem:[%s10337_s7 + $0x818] sm:$0xff] }
0x1a3b   :  { %v4850_v24 = vmul.f32 %v4848_v30, %v4847_v58  ;;  %5021 = vmatpush.msra.mxu2 %v6614_v52  ;;  %5297 = vmatpush.msrb.mxu3 %v6626_v56  ;;  %v6685_v30 = vld [vmem:[%s10337_s7 + $0x838] sm:$0xff]  ;;  %v6738_v46 = vld [vmem:[%s10337_s7 + $0x9e0] sm:$0xff]  ;;  %v6707_v56 = vld [vmem:[%s10337_s7 + $0x8e8] sm:$0xff] }
0x1a3c   :  { %5320 = vmatpush.msrb.mxu0 %v6627_v34  ;;  %5625 = vmatpush.msra.mxu1 %v6692_v47  ;;  %v6713_v52 = vld [vmem:[%s10337_s7 + $0x918] sm:$0xff]  ;;  %v6680_v34 = vld [vmem:[%s10337_s7 + $0x810] sm:$0xff]  ;;  %v6786_v35 = vld [vmem:[%s10337_s7 + $0xb60] sm:$0xff] }
0x1a3d   :  { %v9822_v14 = vadd.f32 %v4851_v55, %v4850_v24  ;;  %5022 = vmatpush.msra.mxu2 %v6598_v20  ;;  %5298 = vmatpush.msrb.mxu3 %v6610_v45  ;;  %v6716_v55 = vld [vmem:[%s10337_s7 + $0x930] sm:$0xff]  ;;  %v6737_v58 = vld [vmem:[%s10337_s7 + $0x9d8] sm:$0xff]  ;;  %v6706_v20 = vld [vmem:[%s10337_s7 + $0x8e0] sm:$0xff] }
0x1a3e   :  { %5321 = vmatpush.msrb.mxu0 %v6611_v8  ;;  %5626 = vmatpush.msra.mxu1 %v6691_v29  ;;  %v6712_v45 = vld [vmem:[%s10337_s7 + $0x910] sm:$0xff]  ;;  %v6679_v8 = vld [vmem:[%s10337_s7 + $0x808] sm:$0xff]  ;;  %v6730_v47 = vld [vmem:[%s10337_s7 + $0x9a0] sm:$0xff] }
0x1a3f   :  { %6647 = vmatmul.msk.f32.gmra.mxu2 %vm465_vm1, %v9822_v14  ;;  %6659 = vmatmul.msk.f32.gmra.mxu3 %vm465_vm1, %v9822_v14  ;;  %v6736_v24 = vld [vmem:[%s10337_s7 + $0x9d0] sm:$0xff]  ;;  %v6785_v29 = vld [vmem:[%s10337_s7 + $0xb58] sm:$0xff] }
0x1a40   :  { %6661 = vmatmul.msk.f32.gmra.mxu0 %vm465_vm1, %v9822_v14  ;;  %6663 = vmatmul.msk.f32.gmra.mxu1 %vm465_vm1, %v9822_v14 }
0x1a41   :  { %5023 = vmatpush.msra.mxu2 %v6582_v9  ;;  %5299 = vmatpush.msrb.mxu3 %v6594_v37  ;;  %v6705_v9 = vld [vmem:[%s10337_s7 + $0x8d8] sm:$0xff]  ;;  %v6711_v37 = vld [vmem:[%s10337_s7 + $0x908] sm:$0xff] }
0x1a42   :  { %5322 = vmatpush.msrb.mxu0 %v6595_v21  ;;  %5627 = vmatpush.msra.mxu1 %v6690_v7  ;;  %v6735_v21 = vld [vmem:[%s10337_s7 + $0x9c8] sm:$0xff]  ;;  %v6729_v7 = vld [vmem:[%s10337_s7 + $0x998] sm:$0xff] }
0x1a44   :  { %5628 = vmatpush.msra.mxu1 %v6689_v59  ;;  %v6728_v59 = vld [vmem:[%s10337_s7 + $0x990] sm:$0xff] }
0x1a46   :  { %5629 = vmatpush.msra.mxu1 %v6688_v6  ;;  %v6783_v6 = vld [vmem:[%s10337_s7 + $0xb48] sm:$0xff] }
0x1a47   :  { %6648 = vmatmul.msk.f32.vlgmr.msrb.gmra.mxu2 %vm465_vm1, %v9801_v32  ;;  %6666 = vmatmul.msk.f32.vlgmr.msra.gmra.mxu3 %vm465_vm1, %v9801_v32 }
0x1a48   :  { %6668 = vmatmul.msk.f32.vlgmr.msra.gmra.mxu0 %vm465_vm1, %v9801_v32  ;;  %6670 = vmatmul.msk.f32.vlgmr.msrb.gmra.mxu1 %vm465_vm1, %v9801_v32 }
0x1a49   :  { %5043 = vmatpush.msrb.mxu2 %v6631_v40  ;;  %5670 = vmatpush.msra.mxu3 %v6725_v2  ;;  %v6678_v40 = vld [vmem:[%s10337_s7 + $0x800] sm:$0xff]  ;;  %v6700_v2 = vld [vmem:[%s10337_s7 + $0x8b0] sm:$0xff] }
0x1a4a   :  { %5630 = vmatpush.msra.mxu1 %v6687_v41  ;;  %5693 = vmatpush.msra.mxu0 %v6741_v0  ;;  %v6751_v41 = vld [vmem:[%s10337_s7 + $0xa48] sm:$0xff]  ;;  %v6805_v0 = vld [vmem:[%s10337_s7 + $0xbf8] sm:$0xff] }
0x1a4b   :  { %5044 = vmatpush.msrb.mxu2 %v6615_v39  ;;  %5671 = vmatpush.msra.mxu3 %v6724_v57  ;;  %v6704_v39 = vld [vmem:[%s10337_s7 + $0x8d0] sm:$0xff]  ;;  %v6754_v57 = vld [vmem:[%s10337_s7 + $0xa60] sm:$0xff] }
0x1a4c   :  { %5631 = vmatpush.msra.mxu1 %v6686_v50  ;;  %5694 = vmatpush.msra.mxu0 %v6740_v16  ;;  %v6726_v50 = vld [vmem:[%s10337_s7 + $0x980] sm:$0xff] }
0x1a4d   :  { %5045 = vmatpush.msrb.mxu2 %v6599_v36  ;;  %5672 = vmatpush.msra.mxu3 %v6723_v53  ;;  %v6710_v36 = vld [vmem:[%s10337_s7 + $0x900] sm:$0xff]  ;;  %v6699_v53 = vld [vmem:[%s10337_s7 + $0x8a8] sm:$0xff] }
0x1a4e   :  { %5632 = vmatpush.msra.mxu1 %v6685_v30  ;;  %5695 = vmatpush.msra.mxu0 %v6739_v48  ;;  %v6781_v30 = vld [vmem:[%s10337_s7 + $0xb38] sm:$0xff]  ;;  %v6694_v16 = vld [vmem:[%s10337_s7 + $0x880] sm:$0xff]  ;;  %v6779_v48 = vld [vmem:[%s10337_s7 + $0xb28] sm:$0xff] }
0x1a4f   :  { %6649 = vmatmul.msk.f32.gmra.mxu2 %vm465_vm1, %v9822_v14  ;;  %6667 = vmatmul.msk.f32.gmra.mxu3 %vm465_vm1, %v9822_v14 }
0x1a50   :  { %6669 = vmatmul.msk.f32.gmra.mxu0 %vm465_vm1, %v9822_v14  ;;  %6671 = vmatmul.msk.f32.gmra.mxu1 %vm465_vm1, %v9822_v14 }
0x1a51   :  { %5046 = vmatpush.msrb.mxu2 %v6583_v27  ;;  %5673 = vmatpush.msra.mxu3 %v6722_v3  ;;  %v6734_v27 = vld [vmem:[%s10337_s7 + $0x9c0] sm:$0xff] }
0x1a52   :  { %5633 = vmatpush.msra.mxu1 %v6684_v62  ;;  %5696 = vmatpush.msra.mxu0 %v6738_v46  ;;  %v6698_v3 = vld [vmem:[%s10337_s7 + $0x8a0] sm:$0xff]  ;;  %v6749_v62 = vld [vmem:[%s10337_s7 + $0xa38] sm:$0xff]  ;;  %v6747_v46 = vld [vmem:[%s10337_s7 + $0xa28] sm:$0xff] }
0x1a53   :  { %5674 = vmatpush.msra.mxu3 %v6721_v31  ;;  %v6752_v31 = vld [vmem:[%s10337_s7 + $0xa50] sm:$0xff] }
0x1a54   :  { %5634 = vmatpush.msra.mxu1 %v6683_v60  ;;  %5697 = vmatpush.msra.mxu0 %v6737_v58  ;;  %v6804_v60 = vld [vmem:[%s10337_s7 + $0xbf0] sm:$0xff]  ;;  %v6771_v58 = vld [vmem:[%s10337_s7 + $0xae8] sm:$0xff] }
0x1a55   :  { %5675 = vmatpush.msra.mxu3 %v6720_v51  ;;  %v6727_v51 = vld [vmem:[%s10337_s7 + $0x988] sm:$0xff] }
0x1a56   :  { %5635 = vmatpush.msra.mxu1 %v6682_v44  ;;  %5698 = vmatpush.msra.mxu0 %v6736_v24  ;;  %v6803_v44 = vld [vmem:[%s10337_s7 + $0xbe8] sm:$0xff] }
0x1a57   :  { %6650 = vmatmul.msk.f32.vlgmr.msra.gmra.mxu2 %vm465_vm1, %v9801_v32  ;;  %6674 = vmatmul.msk.f32.vlgmr.msrb.gmra.mxu3 %vm465_vm1, %v9801_v32 }
0x1a58   :  { %6676 = vmatmul.msk.f32.vlgmr.msrb.gmra.mxu0 %vm465_vm1, %v9801_v32  ;;  %5066 = vmatpush.msra.mxu2 %v6632_v13  ;;  %v6789_v13 = vld [vmem:[%s10337_s7 + $0xb78] sm:$0xff] }
0x1a59   :  { %5676 = vmatpush.msra.mxu3 %v6719_v22  ;;  %5636 = vmatpush.msra.mxu1 %v6681_v15  ;;  %v6696_v22 = vld [vmem:[%s10337_s7 + $0x890] sm:$0xff] }
0x1a5a   :  { %5067 = vmatpush.msra.mxu2 %v6616_v49  ;;  %5699 = vmatpush.msra.mxu0 %v6735_v21  ;;  %v6733_v49 = vld [vmem:[%s10337_s7 + $0x9b8] sm:$0xff]  ;;  %v6776_v21 = vld [vmem:[%s10337_s7 + $0xb10] sm:$0xff] }
0x1a5b   :  { %5677 = vmatpush.msra.mxu3 %v6718_v23  ;;  %5637 = vmatpush.msra.mxu1 %v6680_v34  ;;  %v6750_v23 = vld [vmem:[%s10337_s7 + $0xa40] sm:$0xff] }
0x1a5c   :  { %5068 = vmatpush.msra.mxu2 %v6600_v43  ;;  %v6703_v43 = vld [vmem:[%s10337_s7 + $0x8c8] sm:$0xff]  ;;  %5700 = vmatpush.msra.mxu0 %v6734_v27  ;;  %v6746_v34 = vld [vmem:[%s10337_s7 + $0xa20] sm:$0xff]  ;;  %v6744_v27 = vld [vmem:[%s10337_s7 + $0xa10] sm:$0xff] }
0x1a5d   :  { %5678 = vmatpush.msra.mxu3 %v6717_v61  ;;  %5638 = vmatpush.msra.mxu1 %v6679_v8  ;;  %v6695_v61 = vld [vmem:[%s10337_s7 + $0x888] sm:$0xff]  ;;  %v6770_v8 = vld [vmem:[%s10337_s7 + $0xae0] sm:$0xff] }
0x1a5e   :  { %5069 = vmatpush.msra.mxu2 %v6584_v38  ;;  %v6757_v38 = vld [vmem:[%s10337_s7 + $0xa78] sm:$0xff]  ;;  %5701 = vmatpush.msra.mxu0 %v6733_v49  ;;  %v6768_v49 = vld [vmem:[%s10337_s7 + $0xad0] sm:$0xff] }
0x1a5f   :  { %6651 = vmatmul.msk.f32.gmra.mxu2 %vm465_vm1, %v9822_v14  ;;  %6675 = vmatmul.msk.f32.gmra.mxu3 %vm465_vm1, %v9822_v14 }
0x1a60   :  { %6677 = vmatmul.msk.f32.gmra.mxu0 %vm465_vm1, %v9822_v14  ;;  %5679 = vmatpush.msra.mxu3 %v6716_v55  ;;  %v6780_v55 = vld [vmem:[%s10337_s7 + $0xb30] sm:$0xff] }
0x1a61   :  { %5639 = vmatpush.msra.mxu1 %v6678_v40  ;;  %v6800_v40 = vld [vmem:[%s10337_s7 + $0xbd0] sm:$0xff] }
0x1a62   :  { %5680 = vmatpush.msra.mxu3 %v6715_v1  ;;  %v6748_v1 = vld [vmem:[%s10337_s7 + $0xa30] sm:$0xff] }
0x1a63   :  { %5716 = vmatpush.msrb.mxu1 %v6757_v38  ;;  %v6743_v38 = vld [vmem:[%s10337_s7 + $0xa08] sm:$0xff] }
0x1a64   :  { %5681 = vmatpush.msra.mxu3 %v6714_v12  ;;  %v6772_v12 = vld [vmem:[%s10337_s7 + $0xaf0] sm:$0xff] }
0x1a66   :  { %5682 = vmatpush.msra.mxu3 %v6713_v52  ;;  %v6778_v52 = vld [vmem:[%s10337_s7 + $0xb20] sm:$0xff] }
0x1a67   :  { %6652 = vmatmul.msk.f32.vlgmr.msrb.gmra.mxu2 %vm465_vm1, %v9801_v32 }
0x1a68   :  { %5089 = vmatpush.msrb.mxu2 %v6633_v11  ;;  %5683 = vmatpush.msra.mxu3 %v6712_v45  ;;  %v6788_v11 = vld [vmem:[%s10337_s7 + $0xb70] sm:$0xff]  ;;  %v6801_v45 = vld [vmem:[%s10337_s7 + $0xbd8] sm:$0xff] }
0x1a6a   :  { %5090 = vmatpush.msrb.mxu2 %v6617_v33  ;;  %5684 = vmatpush.msra.mxu3 %v6711_v37  ;;  %v6702_v33 = vld [vmem:[%s10337_s7 + $0x8c0] sm:$0xff] }
0x1a6c   :  { %5091 = vmatpush.msrb.mxu2 %v6601_v54  ;;  %5685 = vmatpush.msra.mxu3 %v6710_v36  ;;  %v6732_v54 = vld [vmem:[%s10337_s7 + $0x9b0] sm:$0xff] }
0x1a6d   :  { %5702 = vmatpush.msra.mxu0 %v6732_v54  ;;  %v6798_v54 = vld [vmem:[%s10337_s7 + $0xbc0] sm:$0xff] }
0x1a6e   :  { %5092 = vmatpush.msrb.mxu2 %v6585_v25  ;;  %5762 = vmatpush.msrb.mxu3 %v6789_v13  ;;  %v6756_v25 = vld [vmem:[%s10337_s7 + $0xa70] sm:$0xff]  ;;  %v6775_v13 = vld [vmem:[%s10337_s7 + $0xb08] sm:$0xff] }
0x1a6f   :  { %6653 = vmatmul.msk.f32.gmra.mxu2 %vm465_vm1, %v9822_v14  ;;  %5717 = vmatpush.msrb.mxu1 %v6756_v25  ;;  %v6742_v25 = vld [vmem:[%s10337_s7 + $0xa00] sm:$0xff] }
0x1a70   :  { %5763 = vmatpush.msrb.mxu3 %v6788_v11  ;;  %v6774_v11 = vld [vmem:[%s10337_s7 + $0xb00] sm:$0xff] }
0x1a77   :  { %6654 = vmatmul.msk.f32.vlgmr.msra.gmra.mxu2 %vm465_vm1, %v9801_v32 }
0x1a78   :  { %5181 = vmatpush.msra.mxu2 %v6637_v42  ;;  %v6787_v42 = vld [vmem:[%s10337_s7 + $0xb68] sm:$0xff] }
0x1a79   :  { %5764 = vmatpush.msrb.mxu3 %v6787_v42 }
0x1a7a   :  { %5182 = vmatpush.msra.mxu2 %v6621_v63  ;;  %v6701_v63 = vld [vmem:[%s10337_s7 + $0x8b8] sm:$0xff] }
0x1a7b   :  { %5765 = vmatpush.msrb.mxu3 %v6786_v35  ;;  %v6821_v35 = vld [vmem:[%s10337_s7 + $0xc78] sm:$0xff] }
0x1a7c   :  { %5183 = vmatpush.msra.mxu2 %v6605_v18  ;;  %v6731_v18 = vld [vmem:[%s10337_s7 + $0x9a8] sm:$0xff] }
0x1a7d   :  { %5703 = vmatpush.msra.mxu0 %v6731_v18  ;;  %5766 = vmatpush.msrb.mxu3 %v6785_v29  ;;  %v6797_v18 = vld [vmem:[%s10337_s7 + $0xbb8] sm:$0xff]  ;;  %v6820_v29 = vld [vmem:[%s10337_s7 + $0xc70] sm:$0xff] }
0x1a7e   :  { %5184 = vmatpush.msra.mxu2 %v6589_v4  ;;  %v6755_v4 = vld [vmem:[%s10337_s7 + $0xa68] sm:$0xff] }
0x1a7f   :  { %6655 = vmatmul.msk.f32.gmra.mxu2 %vm465_vm1, %v9822_v14  ;;  %5718 = vmatpush.msrb.mxu1 %v6755_v4 }
0x1a80   :  { %5704 = vmatpush.msra.mxu0 %v6730_v47 }
0x1a81   :  { %5719 = vmatpush.msrb.mxu1 %v6754_v57  ;;  %v6796_v57 = vld [vmem:[%s10337_s7 + $0xbb0] sm:$0xff] }
0x1a82   :  { %5705 = vmatpush.msra.mxu0 %v6729_v7 }
0x1a84   :  { %5706 = vmatpush.msra.mxu0 %v6728_v59  ;;  %v6794_v59 = vld [vmem:[%s10337_s7 + $0xba0] sm:$0xff] }
0x1a86   :  { %5707 = vmatpush.msra.mxu0 %v6727_v51 }
0x1a87   :  { %6656 = vmatmul.msk.f32.vlgmr.msrb.gmra.mxu2 %vm465_vm1, %v9801_v32 }
0x1a88   :  { %5273 = vmatpush.msrb.mxu2 %v6641_v26  ;;  %v6753_v26 = vld [vmem:[%s10337_s7 + $0xa58] sm:$0xff]  ;;  %5708 = vmatpush.msra.mxu0 %v6726_v50 }
0x1a89   :  { %5720 = vmatpush.msrb.mxu1 %v6753_v26  ;;  %v6795_v26 = vld [vmem:[%s10337_s7 + $0xba8] sm:$0xff]  ;;  %v6761_v50 = vld [vmem:[%s10337_s7 + $0xa98] sm:$0xff] }
0x1a8a   :  { %5274 = vmatpush.msrb.mxu2 %v6625_v17  ;;  %v6784_v17 = vld [vmem:[%s10337_s7 + $0xb50] sm:$0xff]  ;;  %5785 = vmatpush.msrb.mxu0 %v6805_v0  ;;  %v6791_v0 = vld [vmem:[%s10337_s7 + $0xb88] sm:$0xff] }
0x1a8b   :  { %5767 = vmatpush.msrb.mxu3 %v6784_v17  ;;  %5721 = vmatpush.msrb.mxu1 %v6752_v31  ;;  %v6819_v17 = vld [vmem:[%s10337_s7 + $0xc68] sm:$0xff]  ;;  %v6818_v31 = vld [vmem:[%s10337_s7 + $0xc60] sm:$0xff] }
0x1a8c   :  { %5275 = vmatpush.msrb.mxu2 %v6609_v5  ;;  %v6697_v5 = vld [vmem:[%s10337_s7 + $0x898] sm:$0xff]  ;;  %5786 = vmatpush.msrb.mxu0 %v6804_v60 }
0x1a8d   :  { %5768 = vmatpush.msrb.mxu3 %v6783_v6  ;;  %5722 = vmatpush.msrb.mxu1 %v6751_v41  ;;  %v6793_v41 = vld [vmem:[%s10337_s7 + $0xb98] sm:$0xff] }
0x1a8e   :  { %5276 = vmatpush.msrb.mxu2 %v6593_v28  ;;  %v6782_v28 = vld [vmem:[%s10337_s7 + $0xb40] sm:$0xff]  ;;  %5787 = vmatpush.msrb.mxu0 %v6803_v44  ;;  %v6813_v44 = vld [vmem:[%s10337_s7 + $0xc38] sm:$0xff] }
0x1a8f   :  { %6657 = vmatmul.msk.f32.gmra.mxu2 %vm465_vm1, %v9822_v14  ;;  %5769 = vmatpush.msrb.mxu3 %v6782_v28  ;;  %v6817_v28 = vld [vmem:[%s10337_s7 + $0xc58] sm:$0xff] }
0x1a90   :  { %5723 = vmatpush.msrb.mxu1 %v6750_v23  ;;  %v6792_v23 = vld [vmem:[%s10337_s7 + $0xb90] sm:$0xff] }
0x1a91   :  { %5770 = vmatpush.msrb.mxu3 %v6781_v30  ;;  %v6816_v30 = vld [vmem:[%s10337_s7 + $0xc50] sm:$0xff] }
0x1a92   :  { %5724 = vmatpush.msrb.mxu1 %v6749_v62  ;;  %v6815_v62 = vld [vmem:[%s10337_s7 + $0xc48] sm:$0xff] }
0x1a93   :  { %5771 = vmatpush.msrb.mxu3 %v6780_v55  ;;  %v6759_v55 = vld [vmem:[%s10337_s7 + $0xa88] sm:$0xff] }
0x1a94   :  { %5725 = vmatpush.msrb.mxu1 %v6748_v1 }
0x1a95   :  { %5772 = vmatpush.msrb.mxu3 %v6779_v48  ;;  %v6758_v48 = vld [vmem:[%s10337_s7 + $0xa80] sm:$0xff] }
0x1a96   :  { %5726 = vmatpush.msrb.mxu1 %v6747_v46  ;;  %v6837_v46 = vld [vmem:[%s10337_s7 + $0xcf8] sm:$0xff] }
0x1a97   :  { %6664 = vmatmul.msk.f32.vlgmr.msra.gmra.mxu2 %vm465_vm1, %v9801_v32  ;;  %5773 = vmatpush.msrb.mxu3 %v6778_v52 }
0x1a98   :  { %5647 = vmatpush.msra.mxu2 %v6709_v10  ;;  %v6773_v10 = vld [vmem:[%s10337_s7 + $0xaf8] sm:$0xff]  ;;  %5727 = vmatpush.msrb.mxu1 %v6746_v34  ;;  %v6835_v34 = vld [vmem:[%s10337_s7 + $0xce8] sm:$0xff] }
0x1a9a   :  { %5648 = vmatpush.msra.mxu2 %v6708_v19  ;;  %v9993_v19 = vld [vmem:[%s10338_s10 + $0x10] sm:$0xff] }
0x1a9b   :  { %v4924_v15 = vperm.slane %v9993_v19, 0  ;;  %v4925_v7 = vperm.slane %v9993_v19, 1  ;;  %v4926_v52 = vperm.slane %v9993_v19, 2 }
0x1a9c   :  { %5649 = vmatpush.msra.mxu2 %v6707_v56  ;;  %v6802_v56 = vld [vmem:[%s10337_s7 + $0xbe0] sm:$0xff] }
0x1a9d   :  { %5788 = vmatpush.msrb.mxu0 %v6802_v56  ;;  %v6836_v56 = vld [vmem:[%s10337_s7 + $0xcf0] sm:$0xff] }
0x1a9e   :  { %5650 = vmatpush.msra.mxu2 %v6706_v20  ;;  %v6777_v20 = vld [vmem:[%s10337_s7 + $0xb18] sm:$0xff] }
0x1a9f   :  { %6665 = vmatmul.msk.f32.gmra.mxu2 %vm465_vm1, %v9822_v14  ;;  %5774 = vmatpush.msrb.mxu3 %v6777_v20 }
0x1aa0   :  { %5651 = vmatpush.msra.mxu2 %v6705_v9  ;;  %v6745_v9 = vld [vmem:[%s10337_s7 + $0xa18] sm:$0xff]  ;;  %5789 = vmatpush.msrb.mxu0 %v6801_v45  ;;  %v6810_v45 = vld [vmem:[%s10337_s7 + $0xc20] sm:$0xff] }
0x1aa1   :  { %5728 = vmatpush.msrb.mxu1 %v6745_v9  ;;  %5775 = vmatpush.msrb.mxu3 %v6776_v21  ;;  %v6809_v9 = vld [vmem:[%s10337_s7 + $0xc18] sm:$0xff] }
0x1aa2   :  { %5652 = vmatpush.msra.mxu2 %v6704_v39  ;;  %v6769_v39 = vld [vmem:[%s10337_s7 + $0xad8] sm:$0xff]  ;;  %5790 = vmatpush.msrb.mxu0 %v6800_v40 }
0x1aa3   :  { %5729 = vmatpush.msrb.mxu1 %v6744_v27  ;;  %5776 = vmatpush.msrb.mxu3 %v6775_v13  ;;  %v6853_v21 = vld [vmem:[%s10337_s7 + $0xd78] sm:$0xff]  ;;  %v6832_v27 = vld [vmem:[%s10337_s7 + $0xcd0] sm:$0xff]  ;;  %v6807_v13 = vld [vmem:[%s10337_s7 + $0xc08] sm:$0xff] }
0x1aa4   :  { %5653 = vmatpush.msra.mxu2 %v6703_v43  ;;  %v6799_v43 = vld [vmem:[%s10337_s7 + $0xbc8] sm:$0xff]  ;;  %v6833_v40 = vld [vmem:[%s10337_s7 + $0xcd8] sm:$0xff] }
0x1aa5   :  { %5791 = vmatpush.msrb.mxu0 %v6799_v43  ;;  %5730 = vmatpush.msrb.mxu1 %v6743_v38  ;;  %v6831_v43 = vld [vmem:[%s10337_s7 + $0xcc8] sm:$0xff] }
0x1aa6   :  { %5654 = vmatpush.msra.mxu2 %v6702_v33  ;;  %v6767_v33 = vld [vmem:[%s10337_s7 + $0xac8] sm:$0xff]  ;;  %5777 = vmatpush.msrb.mxu3 %v6774_v11 }
0x1aa7   :  { %6672 = vmatmul.msk.f32.vlgmr.msrb.gmra.mxu2 %vm465_vm1, %v9801_v32  ;;  %5792 = vmatpush.msrb.mxu0 %v6798_v54 }
0x1aa8   :  { %5655 = vmatpush.msra.mxu2 %v6701_v63  ;;  %v6766_v63 = vld [vmem:[%s10337_s7 + $0xac0] sm:$0xff]  ;;  %5731 = vmatpush.msrb.mxu1 %v6742_v25 }
0x1aa9   :  { %5793 = vmatpush.msrb.mxu0 %v6797_v18  ;;  %v6850_v25 = vld [vmem:[%s10337_s7 + $0xd60] sm:$0xff] }
0x1aaa   :  { %5656 = vmatpush.msra.mxu2 %v6700_v2  ;;  %v6765_v2 = vld [vmem:[%s10337_s7 + $0xab8] sm:$0xff] }
0x1aab   :  { %5794 = vmatpush.msrb.mxu0 %v6796_v57  ;;  %v6828_v57 = vld [vmem:[%s10337_s7 + $0xcb0] sm:$0xff] }
0x1aac   :  { %5657 = vmatpush.msra.mxu2 %v6699_v53  ;;  %v6764_v53 = vld [vmem:[%s10337_s7 + $0xab0] sm:$0xff] }
0x1aad   :  { %5795 = vmatpush.msrb.mxu0 %v6795_v26 }
0x1aae   :  { %5658 = vmatpush.msra.mxu2 %v6698_v3  ;;  %v6763_v3 = vld [vmem:[%s10337_s7 + $0xaa8] sm:$0xff] }
0x1aaf   :  { %6673 = vmatmul.msk.f32.gmra.mxu2 %vm465_vm1, %v9822_v14  ;;  %5796 = vmatpush.msrb.mxu0 %v6794_v59  ;;  %v6826_v59 = vld [vmem:[%s10337_s7 + $0xca0] sm:$0xff] }
0x1ab0   :  { %5659 = vmatpush.msra.mxu2 %v6697_v5  ;;  %v6762_v5 = vld [vmem:[%s10337_s7 + $0xaa0] sm:$0xff] }
0x1ab1   :  { %5797 = vmatpush.msrb.mxu0 %v6793_v41  ;;  %v6869_v41 = vld [vmem:[%s10337_s7 + $0xdf8] sm:$0xff] }
0x1ab2   :  { %5660 = vmatpush.msra.mxu2 %v6696_v22 }
0x1ab3   :  { %5798 = vmatpush.msrb.mxu0 %v6792_v23  ;;  %v6824_v23 = vld [vmem:[%s10337_s7 + $0xc90] sm:$0xff] }
0x1ab4   :  { %5661 = vmatpush.msra.mxu2 %v6695_v61  ;;  %v6760_v61 = vld [vmem:[%s10337_s7 + $0xa90] sm:$0xff] }
0x1ab5   :  { %5799 = vmatpush.msrb.mxu0 %v6791_v0  ;;  %v6867_v0 = vld [vmem:[%s10337_s7 + $0xde8] sm:$0xff] }
0x1ab6   :  { %5662 = vmatpush.msra.mxu2 %v6694_v16  ;;  %v6790_v16 = vld [vmem:[%s10337_s7 + $0xb80] sm:$0xff] }
0x1ab7   :  { %5800 = vmatpush.msrb.mxu0 %v6790_v16 }
0x1ab8   :  { %5739 = vmatpush.msrb.mxu2 %v6773_v10  ;;  %v6814_v10 = vld [vmem:[%s10337_s7 + $0xc40] sm:$0xff] }
0x1aba   :  { %5740 = vmatpush.msrb.mxu2 %v6772_v12  ;;  %v4979_v24 = vpop.f32.mrf.mxu2  ;;  %v5117_v38 = vpop.f32.mrf.mxu3 }
0x1abb   :  { %v4980_v37 = vadd.f32 %v4979_v24, %v4924_v15 }
0x1abc   :  { %5741 = vmatpush.msrb.mxu2 %v6771_v58  ;;  %v6811_v58 = vld [vmem:[%s10337_s7 + $0xc28] sm:$0xff] }
0x1abd   :  { %v5330_v36 = vmax.f32 %v4980_v37, 0.0 }
0x1abe   :  { %5742 = vmatpush.msrb.mxu2 %v6770_v8  ;;  %v6834_v8 = vld [vmem:[%s10337_s7 + $0xce0] sm:$0xff] }
0x1abf   :  { %5640 = vmatmul.f32.vlgmr.msra.gmra.mxu1 %v5330_v36  ;;  %v6852_v36 = vld [vmem:[%s10337_s7 + $0xd70] sm:$0xff] }
0x1ac0   :  { %5743 = vmatpush.msrb.mxu2 %v6769_v39  ;;  %5808 = vmatpush.msra.mxu1 %v6821_v35  ;;  %v6808_v39 = vld [vmem:[%s10337_s7 + $0xc10] sm:$0xff]  ;;  %v6829_v35 = vld [vmem:[%s10337_s7 + $0xcb8] sm:$0xff] }
0x1ac2   :  { %5744 = vmatpush.msrb.mxu2 %v6768_v49  ;;  %v4982_v42 = vpop.f32.mrf.mxu2  ;;  %5809 = vmatpush.msra.mxu1 %v6820_v29  ;;  %v6851_v49 = vld [vmem:[%s10337_s7 + $0xd68] sm:$0xff] }
0x1ac3   :  { %v4983_v4 = vadd.f32 %v4982_v42, %v4924_v15  ;;  %v6812_v15 = vld [vmem:[%s10337_s7 + $0xc30] sm:$0xff]  ;;  %v6830_v42 = vld [vmem:[%s10337_s7 + $0xcc0] sm:$0xff] }
0x1ac4   :  { %5745 = vmatpush.msrb.mxu2 %v6767_v33  ;;  %5810 = vmatpush.msra.mxu1 %v6819_v17  ;;  %v6806_v33 = vld [vmem:[%s10337_s7 + $0xc00] sm:$0xff] }
0x1ac5   :  { %v5346_v47 = vmax.f32 %v4983_v4, 0.0  ;;  %v6849_v4 = vld [vmem:[%s10337_s7 + $0xd58] sm:$0xff] }
0x1ac6   :  { %5746 = vmatpush.msrb.mxu2 %v6766_v63  ;;  %5811 = vmatpush.msra.mxu1 %v6818_v31  ;;  %v4930_v63 = vperm.slane %v9993_v19, 6  ;;  %v5120_v31 = vpop.f32.mrf.mxu3 }
0x1ac7   :  { %5643 = vmatmul.f32.gmra.mxu1 %v5346_v47  ;;  %v4927_v47 = vperm.slane %v9993_v19, 3 }
0x1ac8   :  { %5747 = vmatpush.msrb.mxu2 %v6765_v2  ;;  %5812 = vmatpush.msra.mxu1 %v6817_v28  ;;  %v6848_v2 = vld [vmem:[%s10337_s7 + $0xd50] sm:$0xff]  ;;  %v5118_v29 = vadd.f32 %v5117_v38, %v4930_v63  ;;  %v6825_v28 = vld [vmem:[%s10337_s7 + $0xc98] sm:$0xff] }
0x1aca   :  { %5748 = vmatpush.msrb.mxu2 %v6764_v53  ;;  %v5002_v6 = vpop.f32.mrf.mxu2  ;;  %5813 = vmatpush.msra.mxu1 %v6816_v30  ;;  %v6847_v53 = vld [vmem:[%s10337_s7 + $0xd48] sm:$0xff]  ;;  %v5121_v30 = vadd.f32 %v5120_v31, %v4930_v63  ;;  %v6860_v63 = vld [vmem:[%s10337_s7 + $0xdb0] sm:$0xff]  ;;  %v5163_v31 = vpop.f32.mrf.mxu1 }
0x1acb   :  { %v5003_v51 = vadd.f32 %v5002_v6, %v4925_v7  ;;  %v5336_v6 = vmax.f32 %v5118_v29, 0.0 }
0x1acc   :  { %5749 = vmatpush.msrb.mxu2 %v6763_v3  ;;  %5814 = vmatpush.msra.mxu1 %v6815_v62  ;;  %v6846_v3 = vld [vmem:[%s10337_s7 + $0xd40] sm:$0xff] }
0x1acd   :  { %v5331_v22 = vmax.f32 %v5003_v51, 0.0  ;;  %v6845_v51 = vld [vmem:[%s10337_s7 + $0xd38] sm:$0xff] }
0x1ace   :  { %5750 = vmatpush.msrb.mxu2 %v6762_v5  ;;  %5815 = vmatpush.msra.mxu1 %v6814_v10  ;;  %v6866_v10 = vld [vmem:[%s10337_s7 + $0xde0] sm:$0xff] }
0x1acf   :  { %5663 = vmatmul.f32.vlgmr.msra.gmra.mxu2 %v5331_v22  ;;  %v6844_v22 = vld [vmem:[%s10337_s7 + $0xd30] sm:$0xff] }
0x1ad0   :  { %5751 = vmatpush.msrb.mxu2 %v6761_v50  ;;  %5816 = vmatpush.msra.mxu1 %v6813_v44  ;;  %v6868_v50 = vld [vmem:[%s10337_s7 + $0xdf0] sm:$0xff]  ;;  %v5352_v44 = vmax.f32 %v5121_v30, 0.0 }
0x1ad2   :  { %v5005_v60 = vpop.f32.mrf.mxu2  ;;  %5752 = vmatpush.msrb.mxu2 %v6760_v61  ;;  %5817 = vmatpush.msra.mxu1 %v6812_v15  ;;  %v6843_v61 = vld [vmem:[%s10337_s7 + $0xd28] sm:$0xff]  ;;  %v6865_v15 = vld [vmem:[%s10337_s7 + $0xdd8] sm:$0xff] }
0x1ad3   :  { %v5006_v1 = vadd.f32 %v5005_v60, %v4925_v7  ;;  %v6827_v7 = vld [vmem:[%s10337_s7 + $0xca8] sm:$0xff]  ;;  %v6842_v60 = vld [vmem:[%s10337_s7 + $0xd20] sm:$0xff] }
0x1ad4   :  { %5753 = vmatpush.msrb.mxu2 %v6759_v55  ;;  %5818 = vmatpush.msra.mxu1 %v6811_v58  ;;  %v6823_v55 = vld [vmem:[%s10337_s7 + $0xc88] sm:$0xff]  ;;  %v5209_v58 = vpop.f32.mrf.mxu3 }
0x1ad5   :  { %v5347_v12 = vmax.f32 %v5006_v1, 0.0  ;;  %v5140_v1 = vpop.f32.mrf.mxu0 }
0x1ad6   :  { %5754 = vmatpush.msrb.mxu2 %v6758_v48  ;;  %5819 = vmatpush.msra.mxu1 %v6810_v45  ;;  %v10087_v48 = vld [vmem:[%s10338_s10 + $0x18] sm:$0xff]  ;;  %v6864_v45 = vld [vmem:[%s10337_s7 + $0xdd0] sm:$0xff] }
0x1ad7   :  { %5666 = vmatmul.f32.gmra.mxu2 %v5347_v12 }
0x1ad8   :  { %5831 = vmatpush.msra.mxu2 %v6837_v46  ;;  %5820 = vmatpush.msra.mxu1 %v6809_v9  ;;  %v6841_v46 = vld [vmem:[%s10337_s7 + $0xd18] sm:$0xff]  ;;  %v6863_v9 = vld [vmem:[%s10337_s7 + $0xdc8] sm:$0xff] }
0x1ada   :  { %v5025_v20 = vpop.f32.mrf.mxu2  ;;  %5832 = vmatpush.msra.mxu2 %v6836_v56  ;;  %5821 = vmatpush.msra.mxu1 %v6808_v39  ;;  %v4934_v56 = vperm.slane %v10087_v48, 2 }
0x1adb   :  { %v5026_v24 = vadd.f32 %v5025_v20, %v4926_v52  ;;  %v6840_v20 = vld [vmem:[%s10337_s7 + $0xd10] sm:$0xff] }
0x1adc   :  { %5833 = vmatpush.msra.mxu2 %v6835_v34  ;;  %5822 = vmatpush.msra.mxu1 %v6807_v13  ;;  %v6822_v34 = vld [vmem:[%s10337_s7 + $0xc80] sm:$0xff]  ;;  %v6917_v13 = vld [vmem:[%s10337_s7 + $0xf78] sm:$0xff] }
0x1add   :  { %v5332_v37 = vmax.f32 %v5026_v24, 0.0  ;;  %v4928_v24 = vperm.slane %v9993_v19, 4 }
0x1ade   :  { %5834 = vmatpush.msra.mxu2 %v6834_v8  ;;  %5823 = vmatpush.msra.mxu1 %v6806_v33  ;;  %v6839_v8 = vld [vmem:[%s10337_s7 + $0xd08] sm:$0xff]  ;;  %v6885_v33 = vld [vmem:[%s10337_s7 + $0xe78] sm:$0xff] }
0x1adf   :  { %5686 = vmatmul.f32.vlgmr.msra.gmra.mxu3 %v5332_v37 }
0x1ae0   :  { %5854 = vmatpush.msra.mxu3 %v6853_v21  ;;  %5835 = vmatpush.msra.mxu2 %v6833_v40  ;;  %v5210_v21 = vadd.f32 %v5209_v58, %v4934_v56 }
0x1ae2   :  { %5855 = vmatpush.msra.mxu3 %v6852_v36  ;;  %v5028_v11 = vpop.f32.mrf.mxu2  ;;  %5836 = vmatpush.msra.mxu2 %v6832_v27  ;;  %v6838_v36 = vld [vmem:[%s10337_s7 + $0xd00] sm:$0xff]  ;;  %v5340_v38 = vmax.f32 %v5210_v21, 0.0  ;;  %v6876_v21 = vld [vmem:[%s10337_s7 + $0xe30] sm:$0xff] }
0x1ae3   :  { %v5029_v54 = vadd.f32 %v5028_v11, %v4926_v52  ;;  %v4931_v52 = vperm.slane %v9993_v19, 7  ;;  %v6862_v27 = vld [vmem:[%s10337_s7 + $0xdc0] sm:$0xff]  ;;  %v6861_v11 = vld [vmem:[%s10337_s7 + $0xdb8] sm:$0xff] }
0x1ae4   :  { %5856 = vmatpush.msra.mxu3 %v6851_v49  ;;  %5837 = vmatpush.msra.mxu2 %v6831_v43 }
0x1ae5   :  { %v5348_v18 = vmax.f32 %v5029_v54, 0.0  ;;  %v5141_v37 = vadd.f32 %v5140_v1, %v4931_v52  ;;  %v5143_v54 = vpop.f32.mrf.mxu0 }
0x1ae6   :  { %5857 = vmatpush.msra.mxu3 %v6850_v25  ;;  %5838 = vmatpush.msra.mxu2 %v6830_v42  ;;  %v6916_v25 = vld [vmem:[%s10337_s7 + $0xf70] sm:$0xff]  ;;  %v5212_v42 = vpop.f32.mrf.mxu3 }
0x1ae7   :  { %5689 = vmatmul.f32.gmra.mxu3 %v5348_v18  ;;  %v5337_v43 = vmax.f32 %v5141_v37, 0.0  ;;  %v6884_v18 = vld [vmem:[%s10337_s7 + $0xe70] sm:$0xff]  ;;  %v5213_v29 = vadd.f32 %v5212_v42, %v4934_v56  ;;  %v6933_v56 = vld [vmem:[%s10337_s7 + $0xff8] sm:$0xff]  ;;  %v6898_v42 = vld [vmem:[%s10337_s7 + $0xee0] sm:$0xff] }
0x1ae8   :  { %5858 = vmatpush.msra.mxu3 %v6849_v4  ;;  %5839 = vmatpush.msra.mxu2 %v6829_v35  ;;  %v6915_v4 = vld [vmem:[%s10337_s7 + $0xf68] sm:$0xff] }
0x1aea   :  { %5859 = vmatpush.msra.mxu3 %v6848_v2  ;;  %v5048_v26 = vpop.f32.mrf.mxu2  ;;  %5840 = vmatpush.msra.mxu2 %v6828_v57  ;;  %v6859_v2 = vld [vmem:[%s10337_s7 + $0xda8] sm:$0xff]  ;;  %v5144_v57 = vadd.f32 %v5143_v54, %v4931_v52  ;;  %v6909_v52 = vld [vmem:[%s10337_s7 + $0xf38] sm:$0xff] }
0x1aeb   :  { %v5049_v17 = vadd.f32 %v5048_v26, %v4927_v47  ;;  %v6858_v26 = vld [vmem:[%s10337_s7 + $0xda0] sm:$0xff] }
0x1aec   :  { %5860 = vmatpush.msra.mxu3 %v6847_v53  ;;  %5841 = vmatpush.msra.mxu2 %v6827_v7  ;;  %v6914_v7 = vld [vmem:[%s10337_s7 + $0xf60] sm:$0xff] }
0x1aed   :  { %v5333_v5 = vmax.f32 %v5049_v17, 0.0  ;;  %v6882_v17 = vld [vmem:[%s10337_s7 + $0xe60] sm:$0xff]  ;;  %v5232_v30 = vpop.f32.mrf.mxu0 }
0x1aee   :  { %5861 = vmatpush.msra.mxu3 %v6846_v3  ;;  %5842 = vmatpush.msra.mxu2 %v6826_v59  ;;  %v6913_v59 = vld [vmem:[%s10337_s7 + $0xf58] sm:$0xff] }
0x1aef   :  { %5709 = vmatmul.f32.vlgmr.msra.gmra.mxu0 %v5333_v5  ;;  %5778 = vmatmul.f32.vlgmr.msrb.gmra.mxu3 %v5336_v6  ;;  %v5353_v6 = vmax.f32 %v5144_v57, 0.0  ;;  %v5356_v5 = vmax.f32 %v5213_v29, 0.0  ;;  %v6873_v29 = vld [vmem:[%s10337_s7 + $0xe18] sm:$0xff] }
0x1af0   :  { %5862 = vmatpush.msra.mxu3 %v6845_v51  ;;  %5877 = vmatpush.msra.mxu0 %v6869_v41  ;;  %v6857_v51 = vld [vmem:[%s10337_s7 + $0xd98] sm:$0xff] }
0x1af1   :  { %5843 = vmatpush.msra.mxu2 %v6825_v28  ;;  %v6881_v41 = vld [vmem:[%s10337_s7 + $0xe58] sm:$0xff]  ;;  %v4929_v28 = vperm.slane %v9993_v19, 5 }
0x1af2   :  { %5863 = vmatpush.msra.mxu3 %v6844_v22  ;;  %5878 = vmatpush.msra.mxu0 %v6868_v50  ;;  %v5051_v62 = vpop.f32.mrf.mxu2  ;;  %v4932_v22 = vperm.slane %v10087_v48, 0  ;;  %v4935_v50 = vperm.slane %v10087_v48, 3 }
0x1af3   :  { %v5052_v16 = vadd.f32 %v5051_v62, %v4927_v47  ;;  %5844 = vmatpush.msra.mxu2 %v6824_v23  ;;  %v6883_v47 = vld [vmem:[%s10337_s7 + $0xe68] sm:$0xff]  ;;  %v6912_v23 = vld [vmem:[%s10337_s7 + $0xf50] sm:$0xff] }
0x1af4   :  { %5864 = vmatpush.msra.mxu3 %v6843_v61  ;;  %5879 = vmatpush.msra.mxu0 %v6867_v0  ;;  %v6856_v61 = vld [vmem:[%s10337_s7 + $0xd90] sm:$0xff]  ;;  %v6911_v62 = vld [vmem:[%s10337_s7 + $0xf48] sm:$0xff]  ;;  %v5233_v1 = vadd.f32 %v5232_v30, %v4935_v50  ;;  %v6902_v30 = vld [vmem:[%s10337_s7 + $0xf00] sm:$0xff] }
0x1af5   :  { %v5349_v12 = vmax.f32 %v5052_v16, 0.0  ;;  %5845 = vmatpush.msra.mxu2 %v6823_v55  ;;  %v6880_v0 = vld [vmem:[%s10337_s7 + $0xe50] sm:$0xff]  ;;  %v6855_v16 = vld [vmem:[%s10337_s7 + $0xd88] sm:$0xff] }
0x1af6   :  { %5865 = vmatpush.msra.mxu3 %v6842_v60  ;;  %5880 = vmatpush.msra.mxu0 %v6866_v10  ;;  %v6879_v60 = vld [vmem:[%s10337_s7 + $0xe48] sm:$0xff]  ;;  %v5164_v10 = vadd.f32 %v5163_v31, %v4932_v22  ;;  %v6928_v31 = vld [vmem:[%s10337_s7 + $0xfd0] sm:$0xff] }
0x1af7   :  { %5712 = vmatmul.f32.gmra.mxu0 %v5349_v12  ;;  %5781 = vmatmul.f32.gmra.mxu3 %v5352_v44  ;;  %v6910_v44 = vld [vmem:[%s10337_s7 + $0xf40] sm:$0xff] }
0x1af8   :  { %5866 = vmatpush.msra.mxu3 %v6841_v46  ;;  %5881 = vmatpush.msra.mxu0 %v6865_v15  ;;  %v6854_v46 = vld [vmem:[%s10337_s7 + $0xd80] sm:$0xff]  ;;  %v5338_v58 = vmax.f32 %v5164_v10, 0.0  ;;  %v6925_v10 = vld [vmem:[%s10337_s7 + $0xfb8] sm:$0xff] }
0x1af9   :  { %5846 = vmatpush.msra.mxu2 %v6822_v34  ;;  %v6878_v15 = vld [vmem:[%s10337_s7 + $0xe40] sm:$0xff]  ;;  %v5166_v34 = vpop.f32.mrf.mxu1 }
0x1afa   :  { %5867 = vmatpush.msra.mxu3 %v6840_v20  ;;  %5882 = vmatpush.msra.mxu0 %v6864_v45  ;;  %v5071_v40 = vpop.f32.mrf.mxu2  ;;  %v5341_v20 = vmax.f32 %v5233_v1, 0.0  ;;  %v6877_v45 = vld [vmem:[%s10337_s7 + $0xe38] sm:$0xff] }
0x1afb   :  { %v5072_v39 = vadd.f32 %v5071_v40, %v4928_v24  ;;  %v6900_v40 = vld [vmem:[%s10337_s7 + $0xef0] sm:$0xff]  ;;  %v6893_v1 = vld [vmem:[%s10337_s7 + $0xeb8] sm:$0xff] }
0x1afc   :  { %5868 = vmatpush.msra.mxu3 %v6839_v8  ;;  %5883 = vmatpush.msra.mxu0 %v6863_v9  ;;  %v6908_v8 = vld [vmem:[%s10337_s7 + $0xf30] sm:$0xff] }
0x1afd   :  { %v5334_v49 = vmax.f32 %v5072_v39, 0.0  ;;  %v6932_v9 = vld [vmem:[%s10337_s7 + $0xff0] sm:$0xff]  ;;  %v5235_v39 = vpop.f32.mrf.mxu0 }
0x1afe   :  { %5869 = vmatpush.msra.mxu3 %v6838_v36  ;;  %5884 = vmatpush.msra.mxu0 %v6862_v27  ;;  %v6907_v27 = vld [vmem:[%s10337_s7 + $0xf28] sm:$0xff]  ;;  %v5236_v54 = vadd.f32 %v5235_v39, %v4935_v50  ;;  %v4939_v39 = vperm.slane %v10087_v48, 7 }
0x1aff   :  { %5732 = vmatmul.f32.vlgmr.msrb.gmra.mxu1 %v5334_v49  ;;  %5801 = vmatmul.f32.vlgmr.msrb.gmra.mxu0 %v5337_v43  ;;  %v6875_v49 = vld [vmem:[%s10337_s7 + $0xe28] sm:$0xff] }
0x1b00   :  { %5946 = vmatpush.msrb.mxu3 %v6917_v13  ;;  %5885 = vmatpush.msra.mxu0 %v6861_v11  ;;  %v6931_v13 = vld [vmem:[%s10337_s7 + $0xfe8] sm:$0xff]  ;;  %v6906_v11 = vld [vmem:[%s10337_s7 + $0xf20] sm:$0xff] }
0x1b01   :  { %5870 = vmatmul.f32.vlgmr.msra.gmra.mxu3 %v5340_v38  ;;  %5900 = vmatpush.msrb.mxu1 %v6885_v33  ;;  %v6899_v43 = vld [vmem:[%s10337_s7 + $0xee8] sm:$0xff]  ;;  %v5167_v38 = vadd.f32 %v5166_v34, %v4932_v22  ;;  %v6930_v33 = vld [vmem:[%s10337_s7 + $0xfe0] sm:$0xff] }
0x1b02   :  { %5947 = vmatpush.msrb.mxu3 %v6916_v25  ;;  %v5074_v35 = vpop.f32.mrf.mxu2  ;;  %5886 = vmatpush.msra.mxu0 %v6860_v63  ;;  %v6874_v25 = vld [vmem:[%s10337_s7 + $0xe20] sm:$0xff]  ;;  %v5301_v63 = vpop.f32.mrf.mxu3  ;;  %v6927_v22 = vld [vmem:[%s10337_s7 + $0xfc8] sm:$0xff] }
0x1b03   :  { %v5075_v53 = vadd.f32 %v5074_v35, %v4928_v24  ;;  %5901 = vmatpush.msrb.mxu1 %v6884_v18  ;;  %v6901_v24 = vld [vmem:[%s10337_s7 + $0xef8] sm:$0xff]  ;;  %v5354_v57 = vmax.f32 %v5167_v38, 0.0  ;;  %v6871_v50 = vld [vmem:[%s10337_s7 + $0xe08] sm:$0xff] }
0x1b04   :  { %5948 = vmatpush.msrb.mxu3 %v6915_v4  ;;  %5887 = vmatpush.msra.mxu0 %v6859_v2  ;;  %v6905_v4 = vld [vmem:[%s10337_s7 + $0xf18] sm:$0xff]  ;;  %v4938_v2 = vperm.slane %v10087_v48, 6  ;;  %v6923_v34 = vld [vmem:[%s10337_s7 + $0xfa8] sm:$0xff] }
0x1b05   :  { %v5350_v3 = vmax.f32 %v5075_v53, 0.0  ;;  %5902 = vmatpush.msrb.mxu1 %v6883_v47  ;;  %v6929_v35 = vld [vmem:[%s10337_s7 + $0xfd8] sm:$0xff]  ;;  %v4933_v47 = vperm.slane %v10087_v48, 1  ;;  %v5255_v53 = vpop.f32.mrf.mxu1 }
0x1b06   :  { %5949 = vmatpush.msrb.mxu3 %v6914_v7  ;;  %5888 = vmatpush.msra.mxu0 %v6858_v26  ;;  %v5357_v7 = vmax.f32 %v5236_v54, 0.0  ;;  %v6897_v26 = vld [vmem:[%s10337_s7 + $0xed8] sm:$0xff]  ;;  %v6887_v54 = vld [vmem:[%s10337_s7 + $0xe88] sm:$0xff] }
0x1b07   :  { %5903 = vmatpush.msrb.mxu1 %v6882_v17  ;;  %5804 = vmatmul.f32.gmra.mxu0 %v5353_v6  ;;  %v6904_v17 = vld [vmem:[%s10337_s7 + $0xf10] sm:$0xff] }
0x1b08   :  { %5950 = vmatpush.msrb.mxu3 %v6913_v59  ;;  %5735 = vmatmul.f32.gmra.mxu1 %v5350_v3  ;;  %v4936_v59 = vperm.slane %v10087_v48, 4  ;;  %v6872_v6 = vld [vmem:[%s10337_s7 + $0xe10] sm:$0xff] }
0x1b09   :  { %5873 = vmatmul.f32.gmra.mxu3 %v5356_v5  ;;  %5889 = vmatpush.msra.mxu0 %v6857_v51  ;;  %v5302_v5 = vadd.f32 %v5301_v63, %v4938_v2  ;;  %v6886_v63 = vld [vmem:[%s10337_s7 + $0xe80] sm:$0xff] }
0x1b0a   :  { %5904 = vmatpush.msrb.mxu1 %v6881_v41  ;;  %v5094_v19 = vpop.f32.mrf.mxu2  ;;  %5951 = vmatpush.msrb.mxu3 %v6912_v23  ;;  %v6896_v41 = vld [vmem:[%s10337_s7 + $0xed0] sm:$0xff]  ;;  %v6895_v23 = vld [vmem:[%s10337_s7 + $0xec8] sm:$0xff] }
0x1b0b   :  { %v5095_v55 = vadd.f32 %v5094_v19, %v4929_v28  ;;  %5890 = vmatpush.msra.mxu0 %v6856_v61  ;;  %v5256_v61 = vadd.f32 %v5255_v53, %v4936_v59  ;;  %v5344_v19 = vmax.f32 %v5302_v5, 0.0 }
0x1b0c   :  { %5905 = vmatpush.msrb.mxu1 %v6880_v0  ;;  %5952 = vmatpush.msrb.mxu3 %v6911_v62  ;;  %v6926_v0 = vld [vmem:[%s10337_s7 + $0xfc0] sm:$0xff] }
0x1b0d   :  { %v5335_v12 = vmax.f32 %v5095_v55, 0.0  ;;  %5891 = vmatpush.msra.mxu0 %v6855_v16  ;;  %v6870_v55 = vld [vmem:[%s10337_s7 + $0xe00] sm:$0xff] }
0x1b0e   :  { %5906 = vmatpush.msrb.mxu1 %v6879_v60  ;;  %5953 = vmatpush.msrb.mxu3 %v6910_v44  ;;  %v6894_v16 = vld [vmem:[%s10337_s7 + $0xec0] sm:$0xff]  ;;  %v5304_v60 = vpop.f32.mrf.mxu3 }
0x1b0f   :  { %5755 = vmatmul.f32.vlgmr.msrb.gmra.mxu2 %v5335_v12  ;;  %5892 = vmatpush.msra.mxu0 %v6854_v46  ;;  %v5342_v12 = vmax.f32 %v5256_v61, 0.0  ;;  %v6924_v46 = vld [vmem:[%s10337_s7 + $0xfb0] sm:$0xff] }
0x1b10   :  { %5907 = vmatpush.msrb.mxu1 %v6878_v15  ;;  %5954 = vmatpush.msrb.mxu3 %v6909_v52  ;;  %v5258_v15 = vpop.f32.mrf.mxu1  ;;  %v5305_v52 = vadd.f32 %v5304_v60, %v4938_v2 }
0x1b11   :  { %5969 = vmatpush.msrb.mxu0 %v6933_v56  ;;  %5824 = vmatmul.f32.vlgmr.msra.gmra.mxu1 %v5338_v58  ;;  %v6892_v58 = vld [vmem:[%s10337_s7 + $0xeb0] sm:$0xff] }
0x1b12   :  { %5893 = vmatmul.f32.vlgmr.msra.gmra.mxu0 %v5341_v20  ;;  %v5097_v37 = vpop.f32.mrf.mxu2  ;;  %5908 = vmatpush.msrb.mxu1 %v6877_v45  ;;  %v6891_v20 = vld [vmem:[%s10337_s7 + $0xea8] sm:$0xff]  ;;  %v5259_v45 = vadd.f32 %v5258_v15, %v4936_v59 }
0x1b13   :  { %5923 = vmatpush.msrb.mxu2 %v6901_v24  ;;  %v5098_v36 = vadd.f32 %v5097_v37, %v4929_v28  ;;  %5955 = vmatpush.msrb.mxu3 %v6908_v8  ;;  %v6903_v28 = vld [vmem:[%s10337_s7 + $0xf08] sm:$0xff]  ;;  %v6922_v24 = vld [vmem:[%s10337_s7 + $0xfa0] sm:$0xff]  ;;  %v5324_v8 = vpop.f32.mrf.mxu0 }
0x1b14   :  { %5970 = vmatpush.msrb.mxu0 %v6932_v9  ;;  %5909 = vmatpush.msrb.mxu1 %v6876_v21  ;;  %v5360_v9 = vmax.f32 %v5305_v52, 0.0  ;;  %v6890_v21 = vld [vmem:[%s10337_s7 + $0xea0] sm:$0xff] }
0x1b15   :  { %5924 = vmatpush.msrb.mxu2 %v6900_v40  ;;  %5956 = vmatpush.msrb.mxu3 %v6907_v27  ;;  %v5351_v18 = vmax.f32 %v5098_v36, 0.0  ;;  %v4937_v40 = vperm.slane %v10087_v48, 5  ;;  %v6921_v36 = vld [vmem:[%s10337_s7 + $0xf98] sm:$0xff]  ;;  %v6919_v48 = vld [vmem:[%s10337_s7 + $0xf88] sm:$0xff] }
0x1b16   :  { %5971 = vmatpush.msrb.mxu0 %v6931_v13  ;;  %5910 = vmatpush.msrb.mxu1 %v6875_v49  ;;  %v6889_v27 = vld [vmem:[%s10337_s7 + $0xe98] sm:$0xff]  ;;  %v5358_v49 = vmax.f32 %v5259_v45, 0.0 }
0x1b17   :  { %5925 = vmatpush.msrb.mxu2 %v6899_v43  ;;  %5957 = vmatpush.msrb.mxu3 %v6906_v11  ;;  %v6920_v43 = vld [vmem:[%s10337_s7 + $0xf90] sm:$0xff] }
0x1b18   :  { %5972 = vmatpush.msrb.mxu0 %v6930_v33  ;;  %5911 = vmatpush.msrb.mxu1 %v6874_v25  ;;  %v6888_v11 = vld [vmem:[%s10337_s7 + $0xe90] sm:$0xff]  ;;  %v5325_v33 = vadd.f32 %v5324_v8, %v4939_v39  ;;  %v6918_v25 = vld [vmem:[%s10337_s7 + $0xf80] sm:$0xff] }
0x1b19   :  { %5926 = vmatpush.msrb.mxu2 %v6898_v42  ;;  %5958 = vmatpush.msrb.mxu3 %v6905_v4 }
0x1b1a   :  { %5973 = vmatpush.msrb.mxu0 %v6929_v35  ;;  %v5186_v3 = vpop.f32.mrf.mxu2  ;;  %5758 = vmatmul.f32.gmra.mxu2 %v5351_v18  ;;  %v5345_v18 = vmax.f32 %v5325_v33, 0.0 }
0x1b1b   :  { %5827 = vmatmul.f32.gmra.mxu1 %v5354_v57  ;;  %5896 = vmatmul.f32.gmra.mxu0 %v5357_v7  ;;  %v5187_v51 = vadd.f32 %v5186_v3, %v4933_v47  ;;  %v5327_v4 = vpop.f32.mrf.mxu0 }
0x1b1c   :  { %5912 = vmatpush.msrb.mxu1 %v6873_v29  ;;  %5927 = vmatpush.msrb.mxu2 %v6897_v26 }
0x1b1d   :  { %5959 = vmatpush.msrb.mxu3 %v6904_v17  ;;  %5974 = vmatpush.msrb.mxu0 %v6928_v31  ;;  %v5339_v62 = vmax.f32 %v5187_v51, 0.0  ;;  %v7033_v51 = vld [vmem:[%s10339_s11 + $0x1] ss:$0 sm:$0xff] }
0x1b1e   :  { %5913 = vmatpush.msrb.mxu1 %v6872_v6  ;;  %5928 = vmatpush.msrb.mxu2 %v6896_v41 }
0x1b1f   :  { %5960 = vmatpush.msrb.mxu3 %v6903_v28  ;;  %5975 = vmatpush.msrb.mxu0 %v6927_v22 }
0x1b20   :  { %5914 = vmatpush.msrb.mxu1 %v6871_v50  ;;  %5929 = vmatpush.msrb.mxu2 %v6895_v23 }
0x1b21   :  { %5961 = vmatpush.msrb.mxu3 %v6902_v30  ;;  %5976 = vmatpush.msrb.mxu0 %v6926_v0 }
0x1b22   :  { %5962 = vmatmul.f32.vlgmr.msrb.gmra.mxu3 %v5344_v19  ;;  %v5189_v44 = vpop.f32.mrf.mxu2  ;;  %5915 = vmatpush.msrb.mxu1 %v6870_v55 }
0x1b23   :  { %5930 = vmatpush.msrb.mxu2 %v6894_v16  ;;  %5977 = vmatpush.msrb.mxu0 %v6925_v10  ;;  %v5190_v56 = vadd.f32 %v5189_v44, %v4933_v47  ;;  %v5328_v47 = vadd.f32 %v5327_v4, %v4939_v39 }
0x1b24   :  { %5847 = vmatmul.f32.vlgmr.msra.gmra.mxu2 %v5339_v62  ;;  %5916 = vmatmul.f32.vlgmr.msrb.gmra.mxu1 %v5342_v12 }
0x1b25   :  { %5931 = vmatpush.msrb.mxu2 %v6893_v1  ;;  %5978 = vmatpush.msrb.mxu0 %v6924_v46  ;;  %v5355_v37 = vmax.f32 %v5190_v56, 0.0  ;;  %v5361_v29 = vmax.f32 %v5328_v47, 0.0 }
0x1b27   :  { %5932 = vmatpush.msrb.mxu2 %v6892_v58  ;;  %5979 = vmatpush.msrb.mxu0 %v6923_v34 }
0x1b29   :  { %5933 = vmatpush.msrb.mxu2 %v6891_v20  ;;  %5980 = vmatpush.msrb.mxu0 %v6922_v24 }
0x1b2a   :  { %5965 = vmatmul.f32.gmra.mxu3 %v5360_v9  ;;  %v5278_v13 = vpop.f32.mrf.mxu2 }
0x1b2b   :  { %5934 = vmatpush.msrb.mxu2 %v6890_v21  ;;  %5981 = vmatpush.msrb.mxu0 %v6921_v36  ;;  %v5279_v38 = vadd.f32 %v5278_v13, %v4937_v40 }
0x1b2c   :  { %5850 = vmatmul.f32.gmra.mxu2 %v5355_v37  ;;  %5919 = vmatmul.f32.gmra.mxu1 %v5358_v49 }
0x1b2d   :  { %5935 = vmatpush.msrb.mxu2 %v6889_v27  ;;  %5982 = vmatpush.msrb.mxu0 %v6920_v43  ;;  %v5343_v42 = vmax.f32 %v5279_v38, 0.0 }
0x1b2f   :  { %5936 = vmatpush.msrb.mxu2 %v6888_v11  ;;  %5983 = vmatpush.msrb.mxu0 %v6919_v48 }
0x1b31   :  { %5937 = vmatpush.msrb.mxu2 %v6887_v54  ;;  %5984 = vmatpush.msrb.mxu0 %v6918_v25 }
0x1b32   :  { %v5281_v35 = vpop.f32.mrf.mxu2  ;;  %5985 = vmatmul.f32.vlgmr.msrb.gmra.mxu0 %v5345_v18 }
0x1b33   :  { %5938 = vmatpush.msrb.mxu2 %v6886_v63  ;;  %v5282_v2 = vadd.f32 %v5281_v35, %v4937_v40 }
0x1b34   :  { %5939 = vmatmul.f32.vlgmr.msrb.gmra.mxu2 %v5343_v42 }
0x1b35   :  { %v5359_v57 = vmax.f32 %v5282_v2, 0.0 }
0x1b3a   :  { %5988 = vmatmul.f32.gmra.mxu0 %v5361_v29 }
0x1b3c   :  { %5942 = vmatmul.f32.gmra.mxu2 %v5359_v57  ;;  %v5641_v53 = vpop.f32.mrf.mxu1 }
0x1b3d   :  { %v5642_v28 = vadd.f32 %v7033_v51, %v5641_v53 }
0x1b44   :  { %v5644_v3 = vpop.f32.mrf.mxu1 }
0x1b45   :  { %v5645_v19 = vadd.f32 %v7033_v51, %v5644_v3 }
0x1b52   :  { %v5664_v17 = vpop.f32.mrf.mxu2 }
0x1b53   :  { %v5665_v50 = vadd.f32 %v5664_v17, %v5642_v28  ;;  %v6050_v28 = vld [vmem:[%s10357_s9 + $0x10] sm:$0xff] }
0x1b5a   :  { %v5667_v5 = vpop.f32.mrf.mxu2 }
0x1b5b   :  { %v5668_v16 = vadd.f32 %v5667_v5, %v5645_v19 }
0x1b62   :  { %v5687_v7 = vpop.f32.mrf.mxu3 }
0x1b63   :  { %v5688_v61 = vadd.f32 %v5687_v7, %v5665_v50 }
0x1b6a   :  { %v5690_v59 = vpop.f32.mrf.mxu3 }
0x1b6b   :  { %v5691_v1 = vadd.f32 %v5690_v59, %v5668_v16 }
0x1b6c   :  { %v5710_v26 = vpop.f32.mrf.mxu0 }
0x1b6d   :  { %v5711_v0 = vadd.f32 %v5710_v26, %v5688_v61 }
0x1b72   :  { %v5779_v41 = vpop.f32.mrf.mxu3 }
0x1b74   :  { %v5713_v31 = vpop.f32.mrf.mxu0 }
0x1b75   :  { %v5714_v46 = vadd.f32 %v5713_v31, %v5691_v1 }
0x1b7a   :  { %v5782_v55 = vpop.f32.mrf.mxu3 }
0x1b7c   :  { %v5733_v6 = vpop.f32.mrf.mxu1  ;;  %v5802_v22 = vpop.f32.mrf.mxu0 }
0x1b7d   :  { %v5734_v62 = vadd.f32 %v5733_v6, %v5711_v0 }
0x1b84   :  { %v5805_v10 = vpop.f32.mrf.mxu0  ;;  %v5871_v34 = vpop.f32.mrf.mxu3 }
0x1b85   :  { %v5736_v30 = vpop.f32.mrf.mxu1 }
0x1b86   :  { %v5737_v52 = vadd.f32 %v5736_v30, %v5714_v46 }
0x1b8c   :  { %v5874_v39 = vpop.f32.mrf.mxu3 }
0x1b8e   :  { %v5825_v12 = vpop.f32.mrf.mxu1 }
0x1b8f   :  { %v5894_v20 = vpop.f32.mrf.mxu0 }
0x1b92   :  { %v5756_v23 = vpop.f32.mrf.mxu2 }
0x1b93   :  { %v5757_v60 = vadd.f32 %v5756_v23, %v5734_v62 }
0x1b95   :  { %v5780_v15 = vadd.f32 %v5779_v41, %v5757_v60  ;;  %v6051_v41 = vld [vmem:[%s10357_s9 + $0x18] sm:$0xff] }
0x1b96   :  { %6074 = vmatpush.msra.mxu1 %v6051_v41  ;;  %v6090_v60 = vld [vmem:[%s7694_s8 + $0x18] sm:$0xff] }
0x1b97   :  { %v5803_v58 = vadd.f32 %v5802_v22, %v5780_v15  ;;  %v6049_v22 = vld [vmem:[%s10357_s9 + $0x8] sm:$0xff]  ;;  %6113 = vmatpush.msra.mxu2 %v6090_v60 }
0x1b98   :  { %v5828_v9 = vpop.f32.mrf.mxu1  ;;  %v5897_v13 = vpop.f32.mrf.mxu0  ;;  %6075 = vmatpush.msra.mxu1 %v6050_v28 }
0x1b99   :  { %v5826_v8 = vadd.f32 %v5825_v12, %v5803_v58 }
0x1b9a   :  { %6076 = vmatpush.msra.mxu1 %v6049_v22 }
0x1b9d   :  { %v5759_v44 = vpop.f32.mrf.mxu2 }
0x1b9e   :  { %v5760_v56 = vadd.f32 %v5759_v44, %v5737_v52 }
0x1ba0   :  { %v5783_v24 = vadd.f32 %v5782_v55, %v5760_v56 }
0x1ba1   :  { %v5917_v38 = vpop.f32.mrf.mxu1 }
0x1ba2   :  { %v5806_v21 = vadd.f32 %v5805_v10, %v5783_v24 }
0x1ba4   :  { %v5829_v27 = vadd.f32 %v5828_v9, %v5806_v21  ;;  %v7416_v9 = vld [vmem:[%s10328_s15 + $0x4] sm:$0x7] }
0x1ba5   :  { %v5963_v48 = vpop.f32.mrf.mxu3 }
0x1ba7   :  { %v5848_v45 = vpop.f32.mrf.mxu2 }
0x1ba8   :  { %v5849_v37 = vadd.f32 %v5848_v45, %v5826_v8 }
0x1ba9   :  { %v5920_v35 = vpop.f32.mrf.mxu1 }
0x1baa   :  { %v5872_v40 = vadd.f32 %v5871_v34, %v5849_v37  ;;  %v6042_v37 = vperm.slane %v7416_v9, 2 }
0x1bac   :  { %v5895_v43 = vadd.f32 %v5894_v20, %v5872_v40 }
0x1bad   :  { %v5966_v26 = vpop.f32.mrf.mxu3 }
0x1bae   :  { %v5918_v33 = vadd.f32 %v5917_v38, %v5895_v43 }
0x1baf   :  { %v5851_v36 = vpop.f32.mrf.mxu2  ;;  %v5986_v42 = vpop.f32.mrf.mxu0 }
0x1bb0   :  { %v5852_v49 = vadd.f32 %v5851_v36, %v5829_v27 }
0x1bb2   :  { %v5875_v11 = vadd.f32 %v5874_v39, %v5852_v49  ;;  %v7417_v39 = vld [vmem:[%s10329_s16 + $0x4] sm:$0x7] }
0x1bb3   :  { %v6045_v36 = vperm.slane %v7417_v39, 2 }
0x1bb4   :  { %v5898_v18 = vadd.f32 %v5897_v13, %v5875_v11 }
0x1bb6   :  { %v5921_v2 = vadd.f32 %v5920_v35, %v5898_v18  ;;  %v6088_v18 = vld [vmem:[%s7694_s8 + $0x8] sm:$0xff]  ;;  %v7034_v35 = vld [vmem:[%s10358_s20] ss:$0 sm:$0xff] }
0x1bb7   :  { %v5940_v54 = vpop.f32.mrf.mxu2  ;;  %v5989_v59 = vpop.f32.mrf.mxu0 }
0x1bb8   :  { %v5941_v25 = vadd.f32 %v5940_v54, %v5918_v33 }
0x1bba   :  { %v5964_v63 = vadd.f32 %v5963_v48, %v5941_v25 }
0x1bbc   :  { %v5987_v4 = vadd.f32 %v5986_v42, %v5964_v63  ;;  %v6089_v63 = vld [vmem:[%s7694_s8 + $0x10] sm:$0xff] }
0x1bbd   :  { %6114 = vmatpush.msra.mxu2 %v6089_v63 }
0x1bbe   :  { %v10187_v47 = vadd.f32 %v5987_v4, %v9801_v32  ;;  %v6087_v4 = vld [vmem:[%s7694_s8] sm:$0xff] }
0x1bbf   :  { %v5943_v57 = vpop.f32.mrf.mxu2  ;;  %6115 = vmatpush.msra.mxu2 %v6088_v18 }
0x1bc0   :  { %v5944_v29 = vadd.f32 %v5943_v57, %v5921_v2  ;;  %v5996_v53 = vsel %vm465_vm1, %v10187_v47, 0.0  ;;  %v5994_v7 = vmul.f32 %v10187_v47, %v10187_v47 }
0x1bc1   :  { %5997 = vadd.xlane.f32.xlu2 %v5996_v53  ;;  %6116 = vmatpush.msra.mxu2 %v6087_v4 }
0x1bc2   :  { %v5967_v17 = vadd.f32 %v5966_v26, %v5944_v29  ;;  %v6002_v3 = vsel %vm465_vm1, %v5994_v7, 0.0  ;;  %v7035_v26 = vld [vmem:[%s7699_s21] ss:$0 sm:$0xff]  ;;  %s7488_s21 = smov [#allocation2]  }
0x1bc3   :  { %6003 = vadd.xlane.f32.xlu0 %v6002_v3  ;;  %s6153_s8 = sshll.u32 %s7488_s21, 4  ;;  %s6154_s8 = int_to_ptr.vmem [resolvable:$true] %s6153_s8 }
0x1bc4   :  { %v5990_v32 = vadd.f32 %v5989_v59, %v5967_v17 }
0x1bc6   :  { %v10195_v31 = vadd.f32 %v5990_v32, %v9822_v14  ;;  %v6048_v14 = vld [vmem:[%s10357_s9] sm:$0xff] }
0x1bc7   :  { %6077 = vmatpush.msra.mxu1 %v6048_v14 }
0x1bc8   :  { %v5999_v6 = vsel %vm465_vm1, %v10195_v31, 0.0  ;;  %v5995_v5 = vmul.f32 %v10195_v31, %v10195_v31 }
0x1bc9   :  { %6000 = vadd.xlane.f32.xlu1 %v5999_v6 }
0x1bca   :  { %v6005_v51 = vsel %vm465_vm1, %v5995_v5, 0.0  ;;  %v10359_v5 = vld [vmem:[#allocation30_spill] sm:$0xff] }
0x1bcb   :  { %6006 = vadd.xlane.f32.xlu2 %v6005_v51  ;;  %v6127_v51 = vcvt.s32.f32 %v10359_v5 }
0x1c34   :  { %v5998_v50 = vpop.xlane.xlu2 %5997 }
0x1c35   :  { %v6008_v23 = vmul.f32 0.03125, %v5998_v50 }
0x1c36   :  { %v6004_v30 = vpop.xlane.xlu0 %6003 }
0x1c37   :  { %v6012_v61 = vmul.f32 %v6008_v23, %v6008_v23  ;;  %v6010_v0 = vmul.f32 0.03125, %v6004_v30  ;;  %v6016_v8 = vsub.f32 %v10187_v47, %v6008_v23 }
0x1c39   :  { %v6014_v19 = vsub.f32 %v6010_v0, %v6012_v61 }
0x1c3b   :  { %v6018_v62 = vadd.f32 1e-05, %v6014_v19 }
0x1c3c   :  { %v6001_v55 = vpop.xlane.xlu1 %6000 }
0x1c3d   :  { %7312 = vrsqrt.f32 %v6018_v62  ;;  %v6009_v16 = vmul.f32 0.03125, %v6001_v55  ;;  %vm6026_vm4 = vweird.f32 %v6018_v62 }
0x1c3e   :  { %v6007_v10 = vpop.xlane.xlu2 %6006 }
0x1c3f   :  { %v6013_v1 = vmul.f32 %v6009_v16, %v6009_v16  ;;  %v6011_v44 = vmul.f32 0.03125, %v6007_v10  ;;  %v6017_v33 = vsub.f32 %v10195_v31, %v6009_v16 }
0x1c41   :  { %v6015_v12 = vsub.f32 %v6011_v44, %v6013_v1 }
0x1c43   :  { %v7313_v46 = vpop.eup %7312  ;;  %v6019_v15 = vadd.f32 1e-05, %v6015_v12 }
0x1c44   :  { %v6021_v52 = vmul.f32 %v7313_v46, %v6018_v62  ;;  %vm6027_vm3 = vweird.f32 %v7313_v46 }
0x1c45   :  { %7314 = vrsqrt.f32 %v6019_v15  ;;  %vm6028_vm5 = vmor %vm6026_vm4, %vm6027_vm3  ;;  %vm6036_vm7 = vweird.f32 %v6019_v15 }
0x1c46   :  { %v6022_v56 = vmul.f32 %v7313_v46, %v6021_v52 }
0x1c48   :  { %v6023_v58 = vmul.f32 0.5, %v6022_v56 }
0x1c4a   :  { %v6024_v34 = vsub.f32 1.5, %v6023_v58 }
0x1c4b   :  { %v7315_v20 = vpop.eup %7314 }
0x1c4c   :  { %v6025_v45 = vmul.f32 %v7313_v46, %v6024_v34  ;;  %v6031_v24 = vmul.f32 %v7315_v20, %v6019_v15  ;;  %vm6037_vm6 = vweird.f32 %v7315_v20 }
0x1c4d   :  { %vm6038_vm8 = vmor %vm6036_vm7, %vm6037_vm6 }
0x1c4e   :  { %v6029_v21 = vsel %vm6028_vm5, %v7313_v46, %v6025_v45  ;;  %v6032_v40 = vmul.f32 %v7315_v20, %v6031_v24 }
0x1c4f   :  { %v6040_v27 = vmul.f32 %v6029_v21, %v6016_v8 }
0x1c50   :  { %v6033_v13 = vmul.f32 0.5, %v6032_v40 }
0x1c51   :  { %v6043_v49 = vmul.f32 %v6042_v37, %v6040_v27 }
0x1c52   :  { %v6034_v43 = vsub.f32 1.5, %v6033_v13 }
0x1c53   :  { %v6046_v38 = vadd.f32 %v6045_v36, %v6043_v49 }
0x1c54   :  { %v6035_v11 = vmul.f32 %v7315_v20, %v6034_v43 }
0x1c55   :  { %6935 = vmatmul.msk.f32.vlgmr.msra.gmra.mxu1 %vm465_vm1, %v6046_v38 }
0x1c56   :  { %v6039_v48 = vsel %vm6038_vm8, %v7315_v20, %v6035_v11 }
0x1c57   :  { %v6041_v54 = vmul.f32 %v6039_v48, %v6017_v33 }
0x1c59   :  { %v6044_v25 = vmul.f32 %v6042_v37, %v6041_v54 }
0x1c5b   :  { %v6047_v42 = vadd.f32 %v6045_v36, %v6044_v25 }
0x1c5d   :  { %6936 = vmatmul.msk.f32.gmra.mxu1 %vm465_vm1, %v6047_v42 }
0x1cd2   :  { %v6079_v2 = vpop.f32.mrf.mxu1 }
0x1cd3   :  { %v6080_v47 = vadd.f32 %v7034_v35, %v6079_v2 }
0x1cd5   :  { %v6085_v57 = vmax.f32 %v6080_v47, 0.0 }
0x1cd7   :  { %6937 = vmatmul.msk.f32.vlgmr.msra.gmra.mxu2 %vm465_vm1, %v6085_v57 }
0x1cda   :  { %v6082_v29 = vpop.f32.mrf.mxu1 }
0x1cdb   :  { %v6083_v53 = vadd.f32 %v7034_v35, %v6082_v29 }
0x1cdd   :  { %v6086_v7 = vmax.f32 %v6083_v53, 0.0 }
0x1cdf   :  { %6938 = vmatmul.msk.f32.gmra.mxu2 %vm465_vm1, %v6086_v7 }
0x1d5a   :  { %v6118_v17 = vpop.f32.mrf.mxu2 }
0x1d5b   :  { %v6119_v3 = vadd.f32 %v7035_v26, %v6118_v17 }
0x1d5d   :  { %6125 = vst.msk [vmem:[#allocation2] sm:$0xff] %vm6124_vm9, %v6119_v3  ;;  %v6128_v59 = vsel %vm6124_vm9, %v6119_v3, -inf }
0x1d5e   :  { %6129 = vmax.xlane.f32.xlu0 %v6128_v59 }
0x1d62   :  { %v6121_v32 = vpop.f32.mrf.mxu2 }
0x1d63   :  { %v6122_v31 = vadd.f32 %v7035_v26, %v6121_v32 }
0x1d65   :  { %6126 = vst.msk [vmem:[#allocation2 + $0x8] sm:$0xff] %vm6124_vm9, %v6122_v31  ;;  %v6131_v6 = vsel %vm6124_vm9, %v6122_v31, -inf }
0x1d66   :  { %6132 = vmax.xlane.f32.xlu1 %v6131_v6 }
0x1dd1   :  { %v6130_v41 = vpop.xlane.xlu0 %6129 }
0x1dd2   :  { %vm6134_vm1 = vcmp.eq.f32.partialorder %v6119_v3, %v6130_v41 }
0x1dd3   :  { %v6136_v28 = vsel %vm6134_vm1, %v6127_v51, 10.0 }
0x1dd4   :  { %v6138_v22 = vsel %vm6124_vm9, %v6136_v28, inf }
0x1dd5   :  { %6139 = vmin.xlane.f32.xlu2 %v6138_v22 }
0x1dd6   :  { %7441 = shalt.err (!%p7438_p4)
}
0x1dd7   :  { %s7489_s13 = smov 128   ;;  %s7490_s17 = smov 8   ;;  %vm6146_vm0 = vcmask 7168  }
0x1dd8   :  { %6161 = dma.vmem_to_hbm [thread:$0]  %s6154_s8, 256, %s6156_s27, [#allocation3], %s7489_s13, %s7489_s13, %s7490_s17  }
0x1dd9   :  { %v6133_v50 = vpop.xlane.xlu1 %6132 }
0x1dda   :  { %vm6135_vm10 = vcmp.eq.f32.partialorder %v6122_v31, %v6133_v50 }
0x1ddb   :  { %v6137_v14 = vsel %vm6135_vm10, %v6127_v51, 10.0 }
0x1ddc   :  { %v6141_v23 = vsel %vm6124_vm9, %v6137_v14, inf }
0x1ddd   :  { %6142 = vmin.xlane.f32.xlu0 %v6141_v23 }
0x1e48   :  { %v6140_v30 = vpop.xlane.xlu2 %6139 }
0x1e49   :  { %vm6955_vm11 = vcmp.lt.s32.totalorder %v6140_v30, 0  ;;  %v6956_v61 = vceil.f32 %v6140_v30  ;;  %v6957_v0 = vfloor.f32 %v6140_v30 }
0x1e4b   :  { %v6958_v19 = vsel %vm6955_vm11, %v6956_v61, %v6957_v0 }
0x1e4c   :  { %v6959_v62 = vcvt.f32.s32 %v6958_v19 }
0x1e4e   :  { %6147 = vst.msk [vmem:[%s7709_s3] sm:$0xff] %vm6146_vm0, %v6959_v62 }
0x1e50   :  { %v6143_v55 = vpop.xlane.xlu0 %6142 }
0x1e51   :  { %vm6960_vm12 = vcmp.lt.s32.totalorder %v6143_v55, 0  ;;  %v6961_v16 = vceil.f32 %v6143_v55  ;;  %v6962_v60 = vfloor.f32 %v6143_v55 }
0x1e53   :  { %v6963_v10 = vsel %vm6960_vm12, %v6961_v16, %v6962_v60 }
0x1e54   :  { %v6964_v1 = vcvt.f32.s32 %v6963_v10 }
0x1e56   :  { %6148 = vst.msk [vmem:[%s7709_s3 + $0x8] sm:$0xff] %vm6146_vm0, %v6964_v1 }
0x1e57   :  { %7442 = dma.done.wait [#allocation3], 256  }
0x1e58   :  { %7443 = vsyncadd [#allocation3], 4294967040 }
0x1e59   :  { %6170 = vsyncpa [#allocation3], 1 }

</bundles_post_ra>
